<compile_context>
chip_gen: v6e
topology: v6e:2x2x1
jax: 0.10.0
libtpu: 0.0.40
codegen_flags: <defaults>
</compile_context>

<pallas_src>
import jax
import jax.numpy as jnp
from jax.experimental import pallas as pl
from jax.experimental.pallas import tpu as pltpu

# ----------------------------- configuration --------------------------------
# packing order of the heads inside the fused kernel (semantics are unchanged)
HEADS = {"hm": 1, "hm_kpts": 1, "wh": 10, "reg": 2, "reg_kpts": 2}
HEAD_OFFSETS = {}
_off = 0
for _h, _c in HEADS.items():
    HEAD_OFFSETS[_h] = _off
    _off += _c
TOTAL_CLASSES = _off            # 16
DOWN_RATIO = 4                  # stand-in backbone downsample
C_FEAT = 32                     # channels of the decoder feature map (stand-in)
HEAD_CONV = 32
MAX_BBOX = 20
MAX_KPTS = 40
BN_EPS = 1e-5


# ----------------------------- Pallas kernels -------------------------------
def fused_forward_kernel(x_ref, wbb_ref, bbb_ref, w1_ref, b1_ref, w2_ref, b2_ref,
                         heads_ref, nms_ref, flat_ref,
                         xpad, fmpad, hpad, hmpad):
    """Per-batch fused: backbone conv -> all head conv1 -> all head conv2
    (+sigmoid) -> 3x3 NMS+threshold, plus coordinate-augmented flat features."""
    _, H, W, Cin = x_ref.shape
    HW = H * W
    CF = fmpad.shape[-1]                       # feature-map channels (32)
    CH = hpad.shape[-1]                        # concatenated head hidden (160)
    NH = heads_ref.shape[1]                    # total head output channels (16)

    def im2col(pad_ref, c):
        # builds the (HW, 9*c) patch matrix for a 3x3 'same' conv
        padv = pad_ref[...]                    # (H+2, W+2, c)
        taps = []
        for dh in range(3):
            for dw in range(3):
                taps.append(padv[dh:dh + H, dw:dw + W, :].reshape(HW, c))
        return jnp.concatenate(taps, axis=1)   # (HW, 9*c)

    # ---- stand-in backbone 3x3 conv (eval-BN + ReLU folded), K = 9*Cin ------
    xpad[...] = jnp.zeros_like(xpad)
    xpad[1:1 + H, 1:1 + W, :] = x_ref[0]
    fm = jnp.maximum(
        jnp.dot(im2col(xpad, Cin), wbb_ref[...],
                preferred_element_type=jnp.float32) + bbb_ref[...], 0.0)   # (HW, CF)

    # ---- flat features with normalized row/col coords (row-gatherable) ------
    pidx = jax.lax.broadcasted_iota(jnp.int32, (HW, 1), 0).astype(jnp.float32)
    hidx = jnp.floor((pidx + 0.5) * (1.0 / W))
    widx = pidx - hidx * W
    flat_ref[0, :, 0:CF] = fm
    flat_ref[0, :, CF:CF + 1] = hidx / (H - 1)
    flat_ref[0, :, CF + 1:CF + 2] = widx / (W - 1)

    # ---- all heads conv1 (Cout = 5*HEAD_CONV), single im2col matmul K=288 ---
    fmpad[...] = jnp.zeros_like(fmpad)
    fmpad[1:1 + H, 1:1 + W, :] = fm.reshape(H, W, CF)
    h_all = jnp.maximum(
        jnp.dot(im2col(fmpad, CF), w1_ref[...],
                preferred_element_type=jnp.float32) + b1_ref[...], 0.0)    # (HW, CH)

    # ---- all heads conv2 via block-diagonal weights, K = 9*CH = 1440 --------
    hpad[...] = jnp.zeros_like(hpad)
    hpad[1:1 + H, 1:1 + W, :] = h_all.reshape(H, W, CH)
    out_all = (jnp.dot(im2col(hpad, CH), w2_ref[...],
                       preferred_element_type=jnp.float32) + b2_ref[...])  # (HW, NH)

    # sigmoid only on the two heatmap channels (packed columns 0: hm, 1: hm_kpts)
    col = jax.lax.broadcasted_iota(jnp.int32, (HW, NH), 1)
    out_fin = jnp.where(col < 2, jax.nn.sigmoid(out_all), out_all)
    heads_ref[0] = out_fin.T                   # lane-dense (NH, HW) store

    # ---- fused 3x3 max-pool NMS + 0.5 threshold for hm / hm_kpts ------------
    hmpad[...] = jnp.full_like(hmpad, -1.0)    # halo < min(sigmoid), like -inf pad
    hmpad[1:1 + H, 1:1 + W, :] = out_fin[:, 0:2].reshape(H, W, 2)
    padv = hmpad[...]
    center = padv[1:1 + H, 1:1 + W, :]
    hmax = center
    for dh in range(3):
        for dw in range(3):
            hmax = jnp.maximum(hmax, padv[dh:dh + H, dw:dw + W, :])
    keep = hmax == center
    nmsed = jnp.where(keep, center, 0.0)
    nms_ref[0] = (nmsed > 0.5).astype(jnp.float32).reshape(HW, 2)


def fused_backbone_and_heads(xd, p):
    """xd: (B, H, W, 3) NHWC downsampled input.  Returns
    heads (B, 16, H*W), nms masks (B, H*W, 2), flat features (B, H*W, C+2)."""
    B, H, W, Cin = xd.shape
    HW = H * W
    CF = C_FEAT
    CH = len(HEADS) * HEAD_CONV
    NH = TOTAL_CLASSES
    return pl.pallas_call(
        fused_forward_kernel,
        out_shape=(
            jax.ShapeDtypeStruct((B, NH, HW), jnp.float32),
            jax.ShapeDtypeStruct((B, HW, 2), jnp.float32),
            jax.ShapeDtypeStruct((B, HW, CF + 2), jnp.float32),
        ),
        grid=(B,),
        in_specs=[
            pl.BlockSpec((1, H, W, Cin), lambda i: (i, 0, 0, 0)),
            pl.BlockSpec((9 * Cin, CF), lambda i: (0, 0)),
            pl.BlockSpec((1, CF), lambda i: (0, 0)),
            pl.BlockSpec((9 * CF, CH), lambda i: (0, 0)),
            pl.BlockSpec((1, CH), lambda i: (0, 0)),
            pl.BlockSpec((9 * CH, NH), lambda i: (0, 0)),
            pl.BlockSpec((1, NH), lambda i: (0, 0)),
        ],
        out_specs=(
            pl.BlockSpec((1, NH, HW), lambda i: (i, 0, 0)),
            pl.BlockSpec((1, HW, 2), lambda i: (i, 0, 0)),
            pl.BlockSpec((1, HW, CF + 2), lambda i: (i, 0, 0)),
        ),
        scratch_shapes=[
            pltpu.VMEM((H + 2, W + 2, Cin), jnp.float32),
            pltpu.VMEM((H + 2, W + 2, CF), jnp.float32),
            pltpu.VMEM((H + 2, W + 2, CH), jnp.float32),
            pltpu.VMEM((H + 2, W + 2, 2), jnp.float32),
        ],
        compiler_params=pltpu.CompilerParams(dimension_semantics=("parallel",)),
    )(xd, p["wbb"], p["bbb"], p["w1"], p["b1"], p["w2"], p["b2"])


def pair_classifier_kernel(bf_ref, kf_ref, w1b_ref, w1k_ref, wxyd_ref, b1_ref,
                           w2_ref, b2_ref, w3_ref, b3_ref, eb_ref, ek_ref, o_ref):
    """All-batch pair classifier in one step; pure 2D math (pair expansion via
    constant selection-matrix matmuls), lane-dense (B, NB*NK) output."""
    B, NB, FC = bf_ref.shape
    NK = kf_ref.shape[1]
    H1 = b1_ref.shape[0]
    wxyd = wxyd_ref[...]                                   # (H1, 3)
    for b in range(B):
        bT = bf_ref[b]                                     # (NB, FC)
        kT = kf_ref[b]                                     # (NK, FC)
        # first-layer partial projections; last 2 rows are the raw coords
        pb = jnp.dot(w1b_ref[...], bT.T, preferred_element_type=jnp.float32)  # (H1+2, NB)
        pk = jnp.dot(w1k_ref[...], kT.T, preferred_element_type=jnp.float32)  # (H1+2, NK)
        # expand to all NB*NK pairs (column p = ib*NK + ik)
        pbe = jnp.dot(pb, eb_ref[...], preferred_element_type=jnp.float32)    # (H1+2, P)
        pke = jnp.dot(pk, ek_ref[...], preferred_element_type=jnp.float32)    # (H1+2, P)
        relx = pke[H1:H1 + 1, :] - pbe[H1:H1 + 1, :]       # (1, P) kpt - center
        rely = pke[H1 + 1:H1 + 2, :] - pbe[H1 + 1:H1 + 2, :]
        dist = jnp.sqrt(relx * relx + rely * rely)
        h = (pbe[0:H1, :] + pke[0:H1, :]
             + wxyd[:, 0:1] * relx + wxyd[:, 1:2] * rely + wxyd[:, 2:3] * dist
             + b1_ref[...])
        h = jnp.maximum(h, 0.0)
        h = jnp.maximum(jnp.dot(w2_ref[...], h, preferred_element_type=jnp.float32)
                        + b2_ref[...], 0.0)
        logit = (jnp.dot(w3_ref[...], h, preferred_element_type=jnp.float32)
                 + b3_ref[...])                            # (1, P)
        o_ref[b:b + 1, :] = jax.nn.sigmoid(logit)


def pair_classifier(bfeat, kfeat, clf, eb, ek):
    B, NB, FC = bfeat.shape
    NK = kfeat.shape[1]
    P = NB * NK
    H1 = clf["b1"].shape[0]
    H2 = clf["b2"].shape[0]

    def full(shape):
        return pl.BlockSpec(shape, lambda i: (0,) * len(shape))

    return pl.pallas_call(
        pair_classifier_kernel,
        out_shape=jax.ShapeDtypeStruct((B, P), jnp.float32),
        grid=(1,),
        in_specs=[
            full((B, NB, FC)), full((B, NK, FC)),
            full((H1 + 2, FC)), full((H1 + 2, FC)),
            full((H1, 3)), full((H1, 1)),
            full((H2, H1)), full((H2, 1)),
            full((1, H2)), full((1, 1)),
            full((NB, P)), full((NK, P)),
        ],
        out_specs=pl.BlockSpec((B, P), lambda i: (0, 0)),
        compiler_params=pltpu.CompilerParams(dimension_semantics=("arbitrary",)),
    )(bfeat, kfeat, clf["w1b"], clf["w1k"], clf["wxyd"], clf["b1"],
      clf["w2"], clf["b2"], clf["w3"], clf["b3"], eb, ek)


# --------------------------- parameter construction -------------------------
def _init(key, shape, scale=0.1):
    return scale * jax.random.normal(key, shape, jnp.float32)


def _bn_fold(keys, c):
    gamma = 1.0 + _init(keys[0], (c,))
    beta = _init(keys[1], (c,))
    mean = _init(keys[2], (c,))
    var = 1.0 + jnp.abs(_init(keys[3], (c,)))
    s = gamma / jnp.sqrt(var + BN_EPS)
    return s, beta - mean * s


def init_all_params(key):
    keys = jax.random.split(key, 3)
    p = {}

    # stand-in backbone conv (3 -> C_FEAT), BN folded
    bk = jax.random.split(keys[0], 6)
    wbb = _init(bk[0], (9, 3, C_FEAT)).reshape(9 * 3, C_FEAT)
    bbb = _init(bk[1], (C_FEAT,))
    s, t = _bn_fold(bk[2:6], C_FEAT)
    p["wbb"] = wbb * s[None, :]
    p["bbb"] = (bbb * s + t)[None, :]

    # heads: conv1 packed along Cout (BN folded); conv2 packed block-diagonally
    n_heads = len(HEADS)
    ncls = TOTAL_CLASSES
    w1_list, b1_list = [], []
    w2_block = jnp.zeros((9, n_heads * HEAD_CONV, ncls), jnp.float32)
    b2_all = jnp.zeros((ncls,), jnp.float32)
    hkeys = jax.random.split(keys[1], n_heads)
    for hi, (head, classes) in enumerate(HEADS.items()):
        ks = jax.random.split(hkeys[hi], 8)
        w1 = _init(ks[0], (9, C_FEAT, HEAD_CONV)).reshape(9 * C_FEAT, HEAD_CONV)
        b1 = _init(ks[1], (HEAD_CONV,))
        s, t = _bn_fold(ks[2:6], HEAD_CONV)
        w1_list.append(w1 * s[None, :])
        b1_list.append(b1 * s + t)
        w2 = _init(ks[6], (9, HEAD_CONV, classes))
        b2 = (jnp.full((classes,), -2.19, jnp.float32) if "hm" in head
              else _init(ks[7], (classes,)))
        off = HEAD_OFFSETS[head]
        w2_block = w2_block.at[:, hi * HEAD_CONV:(hi + 1) * HEAD_CONV,
                               off:off + classes].set(w2)
        b2_all = b2_all.at[off:off + classes].set(b2)
    p["w1"] = jnp.concatenate(w1_list, axis=1)                      # (288, 160)
    p["b1"] = jnp.concatenate(b1_list)[None, :]                     # (1, 160)
    p["w2"] = w2_block.reshape(9 * n_heads * HEAD_CONV, ncls)       # (1440, 16)
    p["b2"] = b2_all[None, :]                                       # (1, 16)

    # classifier (eval BN1d folded, dropout = identity), pre-transposed
    feat_dim = (C_FEAT + 2) * 2 + 2 + 1                             # 71
    h1, h2 = feat_dim // 2, feat_dim // 4                           # 35, 17
    ck = jax.random.split(keys[2], 14)
    w1 = _init(ck[0], (feat_dim, h1)); b1 = _init(ck[1], (h1,))
    s1, t1 = _bn_fold(ck[2:6], h1)
    w1f, b1f = w1 * s1[None, :], b1 * s1 + t1
    w2 = _init(ck[6], (h1, h2)); b2 = _init(ck[7], (h2,))
    s2, t2 = _bn_fold(ck[8:12], h2)
    w2f, b2f = w2 * s2[None, :], b2 * s2 + t2
    w3 = _init(ck[12], (h2, 1)); b3 = _init(ck[13], (1,))
    FC = C_FEAT + 2
    w1T = w1f.T                                                     # (35, 71)
    sel = (jnp.zeros((2, FC), jnp.float32)
           .at[0, FC - 2].set(1.0).at[1, FC - 1].set(1.0))
    p["clf"] = {
        "w1b": jnp.concatenate([w1T[:, :FC], sel], axis=0),         # (37, 34)
        "w1k": jnp.concatenate([w1T[:, FC:2 * FC], sel], axis=0),   # (37, 34)
        "wxyd": w1T[:, 2 * FC:],                                    # (35, 3)
        "b1": b1f[:, None],                                         # (35, 1)
        "w2": w2f.T, "b2": b2f[:, None],                            # (17,35),(17,1)
        "w3": w3.T, "b3": b3[:, None],                              # (1,17),(1,1)
    }

    # constant 0/1 pair-expansion selection matrices (column p = ib*NK + ik)
    P = MAX_BBOX * MAX_KPTS
    cols = jnp.arange(P)
    p["expand_b"] = (cols[None, :] // MAX_KPTS
                     == jnp.arange(MAX_BBOX)[:, None]).astype(jnp.float32)
    p["expand_k"] = (cols[None, :] % MAX_KPTS
                     == jnp.arange(MAX_KPTS)[:, None]).astype(jnp.float32)
    return p


# ------------------------------- forward pass --------------------------------
def _gather_feats(flat, mask, max_pc):
    """Row-gather detected points from the (HW, C+2) flat map (torch semantics:
    entries whose gathered flat index is 0 are zeroed, like masked_fill)."""
    feats, counts = [], []
    for i in range(flat.shape[0]):
        m = mask[i]
        idx = jnp.nonzero(m, size=max_pc, fill_value=0)[0]
        counts.append(jnp.minimum(jnp.sum(m), max_pc).astype(jnp.int32))
        f = jnp.take(flat[i], idx, axis=0)                 # (max_pc, C+2)
        f = jnp.where((idx == 0)[:, None], 0.0, f)
        feats.append(f)
    return jnp.stack(feats), jnp.stack(counts)


@jax.jit
def ctrbox_forward(x_nchw, params):
    B = x_nchw.shape[0]
    # stand-in backbone + decoder (see TODO at top of file)
    xd = x_nchw[:, :, ::DOWN_RATIO, ::DOWN_RATIO]
    xd = jnp.transpose(xd, (0, 2, 3, 1)).astype(jnp.float32)       # tiny NHWC copy
    Hs, Ws = xd.shape[1], xd.shape[2]

    heads_out, nms_out, flat_out = fused_backbone_and_heads(xd, params)

    dec = {}
    for head, classes in HEADS.items():
        off = HEAD_OFFSETS[head]
        dec[head] = heads_out[:, off:off + classes, :].reshape(B, classes, Hs, Ws)

    # inference-phase targets (already NMS'ed + thresholded in-kernel)
    tb = nms_out[:, :, 0]
    tk = nms_out[:, :, 1]
    bfeat, nb = _gather_feats(flat_out, tb, MAX_BBOX)              # (B, 20, 34)
    kfeat, nk = _gather_feats(flat_out, tk, MAX_KPTS)              # (B, 40, 34)

    probs = pair_classifier(bfeat, kfeat, params["clf"],
                            params["expand_b"], params["expand_k"])
    probs = probs.reshape(B, MAX_BBOX, MAX_KPTS)
    valid = ((jnp.arange(MAX_BBOX)[None, :, None] < nb[:, None, None])
             & (jnp.arange(MAX_KPTS)[None, None, :] < nk[:, None, None]))

    dec["edges"] = probs
    dec["edges_valid_mask"] = valid
    return dec


# ----------------------------------- main ------------------------------------
if __name__ == "__main__":
    B, H_IN, W_IN = 2, 3, 32
    key = jax.random.PRNGKey(0)
    k_x, k_p = jax.random.split(key)
    x = jax.random.normal(k_x, (B, 3, 32, 32), jnp.float32)
    params = init_all_params(k_p)
    out = ctrbox_forward(x, params)
    jax.block_until_ready(out)
    print("KERNEL_OK")
</pallas_src>

<mosaic_0001>
module attributes {stable_mosaic.version = 11 : i64} {
  func.func private @main(%arg0: i32) attributes {dimension_semantics = [#tpu.dimension_semantics<core_parallel>], iteration_bounds = array<i64: 2>, tpu.core_type = #tpu.core_type<sc_scalar_subcore>, window_params = []} {
    return
  }
}

module attributes {stable_mosaic.version = 11 : i64} {
  func.func private @main(%arg0: i32) attributes {dimension_semantics = [#tpu.dimension_semantics<core_parallel>], iteration_bounds = array<i64: 2>, tpu.core_type = #tpu.core_type<sc_scalar_subcore>, window_params = []} {
    return
  }
}

module attributes {stable_mosaic.version = 11 : i64} {
  func.func @fused_forward_kernel(%arg0: i32, %arg1: memref<1x8x8x3xf32, #tpu.memory_space<vmem>>, %arg2: memref<27x32xf32, #tpu.memory_space<vmem>>, %arg3: memref<1x32xf32, #tpu.memory_space<vmem>>, %arg4: memref<288x160xf32, #tpu.memory_space<vmem>>, %arg5: memref<1x160xf32, #tpu.memory_space<vmem>>, %arg6: memref<1440x16xf32, #tpu.memory_space<vmem>>, %arg7: memref<1x16xf32, #tpu.memory_space<vmem>>, %arg8: memref<1x16x64xf32, #tpu.memory_space<vmem>>, %arg9: memref<1x64x2xf32, #tpu.memory_space<vmem>>, %arg10: memref<1x64x34xf32, #tpu.memory_space<vmem>>, %arg11: memref<10x10x3xf32, #tpu.memory_space<vmem>>, %arg12: memref<10x10x32xf32, #tpu.memory_space<vmem>>, %arg13: memref<10x10x160xf32, #tpu.memory_space<vmem>>, %arg14: memref<10x10x2xf32, #tpu.memory_space<vmem>>) attributes {dimension_semantics = [#tpu.dimension_semantics<parallel>], iteration_bounds = array<i64: 2>, scalar_prefetch = 0 : i64, scratch_operands = 4 : i64, tpu.core_type = #tpu.core_type<tc>, window_params = [{transform_indices = @transform_0, window_bounds = array<i64: 1, 8, 8, 3>}, {pipeline_mode = #tpu.pipeline_mode<synchronous>, transform_indices = @transform_1, window_bounds = array<i64: 27, 32>}, {pipeline_mode = #tpu.pipeline_mode<synchronous>, transform_indices = @transform_2, window_bounds = array<i64: 1, 32>}, {pipeline_mode = #tpu.pipeline_mode<synchronous>, transform_indices = @transform_3, window_bounds = array<i64: 288, 160>}, {pipeline_mode = #tpu.pipeline_mode<synchronous>, transform_indices = @transform_4, window_bounds = array<i64: 1, 160>}, {pipeline_mode = #tpu.pipeline_mode<synchronous>, transform_indices = @transform_5, window_bounds = array<i64: 1440, 16>}, {pipeline_mode = #tpu.pipeline_mode<synchronous>, transform_indices = @transform_6, window_bounds = array<i64: 1, 16>}, {transform_indices = @transform_7, window_bounds = array<i64: 1, 16, 64>}, {transform_indices = @transform_8, window_bounds = array<i64: 1, 64, 2>}, {transform_indices = @transform_9, window_bounds = array<i64: 1, 64, 34>}]} {
    %cst = arith.constant 0.000000e+00 : f32
    %0 = vector.broadcast %cst : f32 to vector<10x10x3xf32>
    %c0 = arith.constant 0 : index
    %c0_0 = arith.constant 0 : index
    %c0_1 = arith.constant 0 : index
    %1 = vector.load %arg11[%c0, %c0_0, %c0_1] : memref<10x10x3xf32, #tpu.memory_space<vmem>>, vector<10x10x3xf32>
    tpu.vector_store %arg11[%c0, %c0_0, %c0_1], %0 {strides = array<i32>} : memref<10x10x3xf32, #tpu.memory_space<vmem>>, vector<10x10x3xf32>,
    %c0_2 = arith.constant 0 : index
    %c0_3 = arith.constant 0 : index
    %c0_4 = arith.constant 0 : index
    %c0_5 = arith.constant 0 : index
    %2 = vector.load %arg1[%c0_2, %c0_3, %c0_4, %c0_5] : memref<1x8x8x3xf32, #tpu.memory_space<vmem>>, vector<1x8x8x3xf32>
    %3 = vector.shape_cast %2 : vector<1x8x8x3xf32> to vector<8x8x3xf32>
    %c1 = arith.constant 1 : index
    %c1_6 = arith.constant 1 : index
    %c0_7 = arith.constant 0 : index
    %4 = vector.load %arg11[%c1, %c1_6, %c0_7] : memref<10x10x3xf32, #tpu.memory_space<vmem>>, vector<8x8x3xf32>
    tpu.vector_store %arg11[%c1, %c1_6, %c0_7], %3 {strides = array<i32>} : memref<10x10x3xf32, #tpu.memory_space<vmem>>, vector<8x8x3xf32>,
    %c0_8 = arith.constant 0 : index
    %c0_9 = arith.constant 0 : index
    %c0_10 = arith.constant 0 : index
    %5 = vector.load %arg11[%c0_8, %c0_9, %c0_10] : memref<10x10x3xf32, #tpu.memory_space<vmem>>, vector<10x10x3xf32>
    %6 = vector.extract_strided_slice %5 {offsets = [0, 0, 0], sizes = [8, 8, 3], strides = [1, 1, 1]} : vector<10x10x3xf32> to vector<8x8x3xf32>
    %7 = vector.shape_cast %6 : vector<8x8x3xf32> to vector<64x3xf32>
    %8 = vector.extract_strided_slice %5 {offsets = [0, 1, 0], sizes = [8, 8, 3], strides = [1, 1, 1]} : vector<10x10x3xf32> to vector<8x8x3xf32>
    %9 = vector.shape_cast %8 : vector<8x8x3xf32> to vector<64x3xf32>
    %10 = vector.extract_strided_slice %5 {offsets = [0, 2, 0], sizes = [8, 8, 3], strides = [1, 1, 1]} : vector<10x10x3xf32> to vector<8x8x3xf32>
    %11 = vector.shape_cast %10 : vector<8x8x3xf32> to vector<64x3xf32>
    %12 = vector.extract_strided_slice %5 {offsets = [1, 0, 0], sizes = [8, 8, 3], strides = [1, 1, 1]} : vector<10x10x3xf32> to vector<8x8x3xf32>
    %13 = vector.shape_cast %12 : vector<8x8x3xf32> to vector<64x3xf32>
    %14 = vector.extract_strided_slice %5 {offsets = [1, 1, 0], sizes = [8, 8, 3], strides = [1, 1, 1]} : vector<10x10x3xf32> to vector<8x8x3xf32>
    %15 = vector.shape_cast %14 : vector<8x8x3xf32> to vector<64x3xf32>
    %16 = vector.extract_strided_slice %5 {offsets = [1, 2, 0], sizes = [8, 8, 3], strides = [1, 1, 1]} : vector<10x10x3xf32> to vector<8x8x3xf32>
    %17 = vector.shape_cast %16 : vector<8x8x3xf32> to vector<64x3xf32>
    %18 = vector.extract_strided_slice %5 {offsets = [2, 0, 0], sizes = [8, 8, 3], strides = [1, 1, 1]} : vector<10x10x3xf32> to vector<8x8x3xf32>
    %19 = vector.shape_cast %18 : vector<8x8x3xf32> to vector<64x3xf32>
    %20 = vector.extract_strided_slice %5 {offsets = [2, 1, 0], sizes = [8, 8, 3], strides = [1, 1, 1]} : vector<10x10x3xf32> to vector<8x8x3xf32>
    %21 = vector.shape_cast %20 : vector<8x8x3xf32> to vector<64x3xf32>
    %22 = vector.extract_strided_slice %5 {offsets = [2, 2, 0], sizes = [8, 8, 3], strides = [1, 1, 1]} : vector<10x10x3xf32> to vector<8x8x3xf32>
    %23 = vector.shape_cast %22 : vector<8x8x3xf32> to vector<64x3xf32>
    %24 = tpu.concatenate %7, %9, %11, %13, %15, %17, %19, %21, %23 in 1 : vector<64x3xf32>, vector<64x3xf32>, vector<64x3xf32>, vector<64x3xf32>, vector<64x3xf32>, vector<64x3xf32>, vector<64x3xf32>, vector<64x3xf32>, vector<64x3xf32> -> vector<64x27xf32>
    %c0_11 = arith.constant 0 : index
    %c0_12 = arith.constant 0 : index
    %25 = vector.load %arg2[%c0_11, %c0_12] : memref<27x32xf32, #tpu.memory_space<vmem>>, vector<27x32xf32>
    %cst_13 = arith.constant dense<0.000000e+00> : vector<64x32xf32>
    %26 = tpu.matmul %24, %25, %cst_13 {dimension_numbers = #tpu.dot_dimension_numbers<[1], [0], [0], [1], [0, 0, 1, 1], [], []>} : vector<64x27xf32>, vector<27x32xf32>, vector<64x32xf32> -> vector<64x32xf32>
    %c0_14 = arith.constant 0 : index
    %c0_15 = arith.constant 0 : index
    %27 = vector.load %arg3[%c0_14, %c0_15] : memref<1x32xf32, #tpu.memory_space<vmem>>, vector<1x32xf32>
    %28 = vector.broadcast %27 : vector<1x32xf32> to vector<64x32xf32>
    %29 = arith.addf %26, %28 : vector<64x32xf32>
    %cst_16 = arith.constant 0.000000e+00 : f32
    %30 = vector.broadcast %cst_16 : f32 to vector<64x32xf32>
    %31 = arith.maximumf %29, %30 : vector<64x32xf32>
    %32 = tpu.iota {dimensions = array<i32: 0>} : vector<64x1xi32>
    %33 = arith.sitofp %32 : vector<64x1xi32> to vector<64x1xf32>
    %cst_17 = arith.constant 5.000000e-01 : f32
    %34 = vector.broadcast %cst_17 : f32 to vector<64x1xf32>
    %35 = arith.addf %33, %34 : vector<64x1xf32>
    %cst_18 = arith.constant 1.250000e-01 : f32
    %36 = vector.broadcast %cst_18 : f32 to vector<64x1xf32>
    %37 = arith.mulf %35, %36 : vector<64x1xf32>
    %38 = math.floor %37 : vector<64x1xf32>
    %cst_19 = arith.constant 8.000000e+00 : f32
    %39 = vector.broadcast %cst_19 : f32 to vector<64x1xf32>
    %40 = arith.mulf %38, %39 : vector<64x1xf32>
    %41 = arith.subf %33, %40 : vector<64x1xf32>
    %c0_20 = arith.constant 0 : index
    %c0_21 = arith.constant 0 : index
    %c0_22 = arith.constant 0 : index
    %42 = vector.load %arg10[%c0_20, %c0_21, %c0_22] : memref<1x64x34xf32, #tpu.memory_space<vmem>>, vector<1x64x32xf32>
    %43 = vector.shape_cast %42 : vector<1x64x32xf32> to vector<64x32xf32>
    %44 = vector.shape_cast %31 : vector<64x32xf32> to vector<1x64x32xf32>
    tpu.vector_store %arg10[%c0_20, %c0_21, %c0_22], %44 {strides = array<i32>} : memref<1x64x34xf32, #tpu.memory_space<vmem>>, vector<1x64x32xf32>,
    %cst_23 = arith.constant 7.000000e+00 : f32
    %45 = vector.broadcast %cst_23 : f32 to vector<64x1xf32>
    %46 = arith.divf %38, %45 : vector<64x1xf32>
    %c0_24 = arith.constant 0 : index
    %c0_25 = arith.constant 0 : index
    %c32 = arith.constant 32 : index
    %47 = vector.load %arg10[%c0_24, %c0_25, %c32] : memref<1x64x34xf32, #tpu.memory_space<vmem>>, vector<1x64x1xf32>
    %48 = vector.shape_cast %47 : vector<1x64x1xf32> to vector<64x1xf32>
    %49 = vector.shape_cast %46 : vector<64x1xf32> to vector<1x64x1xf32>
    tpu.vector_store %arg10[%c0_24, %c0_25, %c32], %49 {strides = array<i32>} : memref<1x64x34xf32, #tpu.memory_space<vmem>>, vector<1x64x1xf32>,
    %cst_26 = arith.constant 7.000000e+00 : f32
    %50 = vector.broadcast %cst_26 : f32 to vector<64x1xf32>
    %51 = arith.divf %41, %50 : vector<64x1xf32>
    %c0_27 = arith.constant 0 : index
    %c0_28 = arith.constant 0 : index
    %c33 = arith.constant 33 : index
    %52 = vector.load %arg10[%c0_27, %c0_28, %c33] : memref<1x64x34xf32, #tpu.memory_space<vmem>>, vector<1x64x1xf32>
    %53 = vector.shape_cast %52 : vector<1x64x1xf32> to vector<64x1xf32>
    %54 = vector.shape_cast %51 : vector<64x1xf32> to vector<1x64x1xf32>
    tpu.vector_store %arg10[%c0_27, %c0_28, %c33], %54 {strides = array<i32>} : memref<1x64x34xf32, #tpu.memory_space<vmem>>, vector<1x64x1xf32>,
    %cst_29 = arith.constant 0.000000e+00 : f32
    %55 = vector.broadcast %cst_29 : f32 to vector<10x10x32xf32>
    %c0_30 = arith.constant 0 : index
    %c0_31 = arith.constant 0 : index
    %c0_32 = arith.constant 0 : index
    %56 = vector.load %arg12[%c0_30, %c0_31, %c0_32] : memref<10x10x32xf32, #tpu.memory_space<vmem>>, vector<10x10x32xf32>
    tpu.vector_store %arg12[%c0_30, %c0_31, %c0_32], %55 {strides = array<i32>} : memref<10x10x32xf32, #tpu.memory_space<vmem>>, vector<10x10x32xf32>,
    %57 = vector.shape_cast %31 : vector<64x32xf32> to vector<8x8x32xf32>
    %c1_33 = arith.constant 1 : index
    %c1_34 = arith.constant 1 : index
    %c0_35 = arith.constant 0 : index
    %58 = vector.load %arg12[%c1_33, %c1_34, %c0_35] : memref<10x10x32xf32, #tpu.memory_space<vmem>>, vector<8x8x32xf32>
    tpu.vector_store %arg12[%c1_33, %c1_34, %c0_35], %57 {strides = array<i32>} : memref<10x10x32xf32, #tpu.memory_space<vmem>>, vector<8x8x32xf32>,
    %c0_36 = arith.constant 0 : index
    %c0_37 = arith.constant 0 : index
    %c0_38 = arith.constant 0 : index
    %59 = vector.load %arg12[%c0_36, %c0_37, %c0_38] : memref<10x10x32xf32, #tpu.memory_space<vmem>>, vector<10x10x32xf32>
    %60 = vector.extract_strided_slice %59 {offsets = [0, 0, 0], sizes = [8, 8, 32], strides = [1, 1, 1]} : vector<10x10x32xf32> to vector<8x8x32xf32>
    %61 = vector.shape_cast %60 : vector<8x8x32xf32> to vector<64x32xf32>
    %62 = vector.extract_strided_slice %59 {offsets = [0, 1, 0], sizes = [8, 8, 32], strides = [1, 1, 1]} : vector<10x10x32xf32> to vector<8x8x32xf32>
    %63 = vector.shape_cast %62 : vector<8x8x32xf32> to vector<64x32xf32>
    %64 = vector.extract_strided_slice %59 {offsets = [0, 2, 0], sizes = [8, 8, 32], strides = [1, 1, 1]} : vector<10x10x32xf32> to vector<8x8x32xf32>
    %65 = vector.shape_cast %64 : vector<8x8x32xf32> to vector<64x32xf32>
    %66 = vector.extract_strided_slice %59 {offsets = [1, 0, 0], sizes = [8, 8, 32], strides = [1, 1, 1]} : vector<10x10x32xf32> to vector<8x8x32xf32>
    %67 = vector.shape_cast %66 : vector<8x8x32xf32> to vector<64x32xf32>
    %68 = vector.extract_strided_slice %59 {offsets = [1, 1, 0], sizes = [8, 8, 32], strides = [1, 1, 1]} : vector<10x10x32xf32> to vector<8x8x32xf32>
    %69 = vector.shape_cast %68 : vector<8x8x32xf32> to vector<64x32xf32>
    %70 = vector.extract_strided_slice %59 {offsets = [1, 2, 0], sizes = [8, 8, 32], strides = [1, 1, 1]} : vector<10x10x32xf32> to vector<8x8x32xf32>
    %71 = vector.shape_cast %70 : vector<8x8x32xf32> to vector<64x32xf32>
    %72 = vector.extract_strided_slice %59 {offsets = [2, 0, 0], sizes = [8, 8, 32], strides = [1, 1, 1]} : vector<10x10x32xf32> to vector<8x8x32xf32>
    %73 = vector.shape_cast %72 : vector<8x8x32xf32> to vector<64x32xf32>
    %74 = vector.extract_strided_slice %59 {offsets = [2, 1, 0], sizes = [8, 8, 32], strides = [1, 1, 1]} : vector<10x10x32xf32> to vector<8x8x32xf32>
    %75 = vector.shape_cast %74 : vector<8x8x32xf32> to vector<64x32xf32>
    %76 = vector.extract_strided_slice %59 {offsets = [2, 2, 0], sizes = [8, 8, 32], strides = [1, 1, 1]} : vector<10x10x32xf32> to vector<8x8x32xf32>
    %77 = vector.shape_cast %76 : vector<8x8x32xf32> to vector<64x32xf32>
    %78 = tpu.concatenate %61, %63, %65, %67, %69, %71, %73, %75, %77 in 1 : vector<64x32xf32>, vector<64x32xf32>, vector<64x32xf32>, vector<64x32xf32>, vector<64x32xf32>, vector<64x32xf32>, vector<64x32xf32>, vector<64x32xf32>, vector<64x32xf32> -> vector<64x288xf32>
    %c0_39 = arith.constant 0 : index
    %c0_40 = arith.constant 0 : index
    %79 = vector.load %arg4[%c0_39, %c0_40] : memref<288x160xf32, #tpu.memory_space<vmem>>, vector<288x160xf32>
    %cst_41 = arith.constant dense<0.000000e+00> : vector<64x160xf32>
    %80 = tpu.matmul %78, %79, %cst_41 {dimension_numbers = #tpu.dot_dimension_numbers<[1], [0], [0], [1], [0, 0, 1, 1], [], []>} : vector<64x288xf32>, vector<288x160xf32>, vector<64x160xf32> -> vector<64x160xf32>
    %c0_42 = arith.constant 0 : index
    %c0_43 = arith.constant 0 : index
    %81 = vector.load %arg5[%c0_42, %c0_43] : memref<1x160xf32, #tpu.memory_space<vmem>>, vector<1x160xf32>
    %82 = vector.broadcast %81 : vector<1x160xf32> to vector<64x160xf32>
    %83 = arith.addf %80, %82 : vector<64x160xf32>
    %cst_44 = arith.constant 0.000000e+00 : f32
    %84 = vector.broadcast %cst_44 : f32 to vector<64x160xf32>
    %85 = arith.maximumf %83, %84 : vector<64x160xf32>
    %cst_45 = arith.constant 0.000000e+00 : f32
    %86 = vector.broadcast %cst_45 : f32 to vector<10x10x160xf32>
    %c0_46 = arith.constant 0 : index
    %c0_47 = arith.constant 0 : index
    %c0_48 = arith.constant 0 : index
    %87 = vector.load %arg13[%c0_46, %c0_47, %c0_48] : memref<10x10x160xf32, #tpu.memory_space<vmem>>, vector<10x10x160xf32>
    tpu.vector_store %arg13[%c0_46, %c0_47, %c0_48], %86 {strides = array<i32>} : memref<10x10x160xf32, #tpu.memory_space<vmem>>, vector<10x10x160xf32>,
    %88 = vector.shape_cast %85 : vector<64x160xf32> to vector<8x8x160xf32>
    %c1_49 = arith.constant 1 : index
    %c1_50 = arith.constant 1 : index
    %c0_51 = arith.constant 0 : index
    %89 = vector.load %arg13[%c1_49, %c1_50, %c0_51] : memref<10x10x160xf32, #tpu.memory_space<vmem>>, vector<8x8x160xf32>
    tpu.vector_store %arg13[%c1_49, %c1_50, %c0_51], %88 {strides = array<i32>} : memref<10x10x160xf32, #tpu.memory_space<vmem>>, vector<8x8x160xf32>,
    %c0_52 = arith.constant 0 : index
    %c0_53 = arith.constant 0 : index
    %c0_54 = arith.constant 0 : index
    %90 = vector.load %arg13[%c0_52, %c0_53, %c0_54] : memref<10x10x160xf32, #tpu.memory_space<vmem>>, vector<10x10x160xf32>
    %91 = vector.extract_strided_slice %90 {offsets = [0, 0, 0], sizes = [8, 8, 160], strides = [1, 1, 1]} : vector<10x10x160xf32> to vector<8x8x160xf32>
    %92 = vector.shape_cast %91 : vector<8x8x160xf32> to vector<64x160xf32>
    %93 = vector.extract_strided_slice %90 {offsets = [0, 1, 0], sizes = [8, 8, 160], strides = [1, 1, 1]} : vector<10x10x160xf32> to vector<8x8x160xf32>
    %94 = vector.shape_cast %93 : vector<8x8x160xf32> to vector<64x160xf32>
    %95 = vector.extract_strided_slice %90 {offsets = [0, 2, 0], sizes = [8, 8, 160], strides = [1, 1, 1]} : vector<10x10x160xf32> to vector<8x8x160xf32>
    %96 = vector.shape_cast %95 : vector<8x8x160xf32> to vector<64x160xf32>
    %97 = vector.extract_strided_slice %90 {offsets = [1, 0, 0], sizes = [8, 8, 160], strides = [1, 1, 1]} : vector<10x10x160xf32> to vector<8x8x160xf32>
    %98 = vector.shape_cast %97 : vector<8x8x160xf32> to vector<64x160xf32>
    %99 = vector.extract_strided_slice %90 {offsets = [1, 1, 0], sizes = [8, 8, 160], strides = [1, 1, 1]} : vector<10x10x160xf32> to vector<8x8x160xf32>
    %100 = vector.shape_cast %99 : vector<8x8x160xf32> to vector<64x160xf32>
    %101 = vector.extract_strided_slice %90 {offsets = [1, 2, 0], sizes = [8, 8, 160], strides = [1, 1, 1]} : vector<10x10x160xf32> to vector<8x8x160xf32>
    %102 = vector.shape_cast %101 : vector<8x8x160xf32> to vector<64x160xf32>
    %103 = vector.extract_strided_slice %90 {offsets = [2, 0, 0], sizes = [8, 8, 160], strides = [1, 1, 1]} : vector<10x10x160xf32> to vector<8x8x160xf32>
    %104 = vector.shape_cast %103 : vector<8x8x160xf32> to vector<64x160xf32>
    %105 = vector.extract_strided_slice %90 {offsets = [2, 1, 0], sizes = [8, 8, 160], strides = [1, 1, 1]} : vector<10x10x160xf32> to vector<8x8x160xf32>
    %106 = vector.shape_cast %105 : vector<8x8x160xf32> to vector<64x160xf32>
    %107 = vector.extract_strided_slice %90 {offsets = [2, 2, 0], sizes = [8, 8, 160], strides = [1, 1, 1]} : vector<10x10x160xf32> to vector<8x8x160xf32>
    %108 = vector.shape_cast %107 : vector<8x8x160xf32> to vector<64x160xf32>
    %109 = tpu.concatenate %92, %94, %96, %98, %100, %102, %104, %106, %108 in 1 : vector<64x160xf32>, vector<64x160xf32>, vector<64x160xf32>, vector<64x160xf32>, vector<64x160xf32>, vector<64x160xf32>, vector<64x160xf32>, vector<64x160xf32>, vector<64x160xf32> -> vector<64x1440xf32>
    %c0_55 = arith.constant 0 : index
    %c0_56 = arith.constant 0 : index
    %110 = vector.load %arg6[%c0_55, %c0_56] : memref<1440x16xf32, #tpu.memory_space<vmem>>, vector<1440x16xf32>
    %cst_57 = arith.constant dense<0.000000e+00> : vector<64x16xf32>
    %111 = tpu.matmul %109, %110, %cst_57 {dimension_numbers = #tpu.dot_dimension_numbers<[1], [0], [0], [1], [0, 0, 1, 1], [], []>} : vector<64x1440xf32>, vector<1440x16xf32>, vector<64x16xf32> -> vector<64x16xf32>
    %c0_58 = arith.constant 0 : index
    %c0_59 = arith.constant 0 : index
    %112 = vector.load %arg7[%c0_58, %c0_59] : memref<1x16xf32, #tpu.memory_space<vmem>>, vector<1x16xf32>
    %113 = vector.broadcast %112 : vector<1x16xf32> to vector<64x16xf32>
    %114 = arith.addf %111, %113 : vector<64x16xf32>
    %115 = tpu.iota {dimensions = array<i32: 1>} : vector<64x16xi32>
    %c2_i32 = arith.constant 2 : i32
    %116 = vector.broadcast %c2_i32 : i32 to vector<64x16xi32>
    %117 = arith.cmpi slt, %115, %116 : vector<64x16xi32>
    %118 = arith.negf %114 : vector<64x16xf32>
    %119 = math.exp %118 : vector<64x16xf32>
    %cst_60 = arith.constant 1.000000e+00 : f32
    %120 = vector.broadcast %cst_60 : f32 to vector<64x16xf32>
    %121 = arith.addf %120, %119 : vector<64x16xf32>
    %122 = arith.divf %120, %121 : vector<64x16xf32>
    %123 = arith.select %117, %122, %114 : vector<64x16xi1>, vector<64x16xf32>
    %124 = tpu.transpose %123, [1, 0] : vector<64x16xf32> -> vector<16x64xf32>
    %c0_61 = arith.constant 0 : index
    %c0_62 = arith.constant 0 : index
    %c0_63 = arith.constant 0 : index
    %125 = vector.load %arg8[%c0_61, %c0_62, %c0_63] : memref<1x16x64xf32, #tpu.memory_space<vmem>>, vector<1x16x64xf32>
    %126 = vector.shape_cast %125 : vector<1x16x64xf32> to vector<16x64xf32>
    %127 = vector.shape_cast %124 : vector<16x64xf32> to vector<1x16x64xf32>
    tpu.vector_store %arg8[%c0_61, %c0_62, %c0_63], %127 {strides = array<i32>} : memref<1x16x64xf32, #tpu.memory_space<vmem>>, vector<1x16x64xf32>,
    %cst_64 = arith.constant -1.000000e+00 : f32
    %128 = vector.broadcast %cst_64 : f32 to vector<10x10x2xf32>
    %c0_65 = arith.constant 0 : index
    %c0_66 = arith.constant 0 : index
    %c0_67 = arith.constant 0 : index
    %129 = vector.load %arg14[%c0_65, %c0_66, %c0_67] : memref<10x10x2xf32, #tpu.memory_space<vmem>>, vector<10x10x2xf32>
    tpu.vector_store %arg14[%c0_65, %c0_66, %c0_67], %128 {strides = array<i32>} : memref<10x10x2xf32, #tpu.memory_space<vmem>>, vector<10x10x2xf32>,
    %130 = vector.extract_strided_slice %123 {offsets = [0, 0], sizes = [64, 2], strides = [1, 1]} : vector<64x16xf32> to vector<64x2xf32>
    %131 = vector.shape_cast %130 : vector<64x2xf32> to vector<8x8x2xf32>
    %c1_68 = arith.constant 1 : index
    %c1_69 = arith.constant 1 : index
    %c0_70 = arith.constant 0 : index
    %132 = vector.load %arg14[%c1_68, %c1_69, %c0_70] : memref<10x10x2xf32, #tpu.memory_space<vmem>>, vector<8x8x2xf32>
    tpu.vector_store %arg14[%c1_68, %c1_69, %c0_70], %131 {strides = array<i32>} : memref<10x10x2xf32, #tpu.memory_space<vmem>>, vector<8x8x2xf32>,
    %c0_71 = arith.constant 0 : index
    %c0_72 = arith.constant 0 : index
    %c0_73 = arith.constant 0 : index
    %133 = vector.load %arg14[%c0_71, %c0_72, %c0_73] : memref<10x10x2xf32, #tpu.memory_space<vmem>>, vector<10x10x2xf32>
    %134 = vector.extract_strided_slice %133 {offsets = [1, 1, 0], sizes = [8, 8, 2], strides = [1, 1, 1]} : vector<10x10x2xf32> to vector<8x8x2xf32>
    %135 = vector.extract_strided_slice %133 {offsets = [0, 0, 0], sizes = [8, 8, 2], strides = [1, 1, 1]} : vector<10x10x2xf32> to vector<8x8x2xf32>
    %136 = arith.maximumf %134, %135 : vector<8x8x2xf32>
    %137 = vector.extract_strided_slice %133 {offsets = [0, 1, 0], sizes = [8, 8, 2], strides = [1, 1, 1]} : vector<10x10x2xf32> to vector<8x8x2xf32>
    %138 = arith.maximumf %136, %137 : vector<8x8x2xf32>
    %139 = vector.extract_strided_slice %133 {offsets = [0, 2, 0], sizes = [8, 8, 2], strides = [1, 1, 1]} : vector<10x10x2xf32> to vector<8x8x2xf32>
    %140 = arith.maximumf %138, %139 : vector<8x8x2xf32>
    %141 = vector.extract_strided_slice %133 {offsets = [1, 0, 0], sizes = [8, 8, 2], strides = [1, 1, 1]} : vector<10x10x2xf32> to vector<8x8x2xf32>
    %142 = arith.maximumf %140, %141 : vector<8x8x2xf32>
    %143 = vector.extract_strided_slice %133 {offsets = [1, 1, 0], sizes = [8, 8, 2], strides = [1, 1, 1]} : vector<10x10x2xf32> to vector<8x8x2xf32>
    %144 = arith.maximumf %142, %143 : vector<8x8x2xf32>
    %145 = vector.extract_strided_slice %133 {offsets = [1, 2, 0], sizes = [8, 8, 2], strides = [1, 1, 1]} : vector<10x10x2xf32> to vector<8x8x2xf32>
    %146 = arith.maximumf %144, %145 : vector<8x8x2xf32>
    %147 = vector.extract_strided_slice %133 {offsets = [2, 0, 0], sizes = [8, 8, 2], strides = [1, 1, 1]} : vector<10x10x2xf32> to vector<8x8x2xf32>
    %148 = arith.maximumf %146, %147 : vector<8x8x2xf32>
    %149 = vector.extract_strided_slice %133 {offsets = [2, 1, 0], sizes = [8, 8, 2], strides = [1, 1, 1]} : vector<10x10x2xf32> to vector<8x8x2xf32>
    %150 = arith.maximumf %148, %149 : vector<8x8x2xf32>
    %151 = vector.extract_strided_slice %133 {offsets = [2, 2, 0], sizes = [8, 8, 2], strides = [1, 1, 1]} : vector<10x10x2xf32> to vector<8x8x2xf32>
    %152 = arith.maximumf %150, %151 : vector<8x8x2xf32>
    %153 = arith.cmpf oeq, %152, %134 : vector<8x8x2xf32>
    %cst_74 = arith.constant 0.000000e+00 : f32
    %154 = vector.broadcast %cst_74 : f32 to vector<8x8x2xf32>
    %155 = arith.select %153, %134, %154 : vector<8x8x2xi1>, vector<8x8x2xf32>
    %cst_75 = arith.constant 5.000000e-01 : f32
    %156 = vector.broadcast %cst_75 : f32 to vector<8x8x2xf32>
    %157 = arith.cmpf ogt, %155, %156 : vector<8x8x2xf32>
    %158 = arith.extui %157 : vector<8x8x2xi1> to vector<8x8x2xi32>
    %159 = arith.sitofp %158 : vector<8x8x2xi32> to vector<8x8x2xf32>
    %160 = vector.shape_cast %159 : vector<8x8x2xf32> to vector<64x2xf32>
    %c0_76 = arith.constant 0 : index
    %c0_77 = arith.constant 0 : index
    %c0_78 = arith.constant 0 : index
    %161 = vector.load %arg9[%c0_76, %c0_77, %c0_78] : memref<1x64x2xf32, #tpu.memory_space<vmem>>, vector<1x64x2xf32>
    %162 = vector.shape_cast %161 : vector<1x64x2xf32> to vector<64x2xf32>
    %163 = vector.shape_cast %160 : vector<64x2xf32> to vector<1x64x2xf32>
    tpu.vector_store %arg9[%c0_76, %c0_77, %c0_78], %163 {strides = array<i32>} : memref<1x64x2xf32, #tpu.memory_space<vmem>>, vector<1x64x2xf32>,
    return
  }
  func.func @transform_0(%arg0: i32) -> (i32, i32, i32, i32) {
    %c0_i32 = arith.constant 0 : i32
    %c0_i32_0 = arith.constant 0 : i32
    %c0_i32_1 = arith.constant 0 : i32
    %c0_i32_2 = arith.constant 0 : i32
    return %arg0, %c0_i32, %c0_i32_0, %c0_i32_1 : i32, i32, i32, i32
  }
  func.func @transform_1(%arg0: i32) -> (i32, i32) {
    %c0_i32 = arith.constant 0 : i32
    %c0_i32_0 = arith.constant 0 : i32
    %c0_i32_1 = arith.constant 0 : i32
    return %c0_i32, %c0_i32_0 : i32, i32
  }
  func.func @transform_2(%arg0: i32) -> (i32, i32) {
    %c0_i32 = arith.constant 0 : i32
    %c0_i32_0 = arith.constant 0 : i32
    %c0_i32_1 = arith.constant 0 : i32
    return %c0_i32, %c0_i32_0 : i32, i32
  }
  func.func @transform_3(%arg0: i32) -> (i32, i32) {
    %c0_i32 = arith.constant 0 : i32
    %c0_i32_0 = arith.constant 0 : i32
    %c0_i32_1 = arith.constant 0 : i32
    return %c0_i32, %c0_i32_0 : i32, i32
  }
  func.func @transform_4(%arg0: i32) -> (i32, i32) {
    %c0_i32 = arith.constant 0 : i32
    %c0_i32_0 = arith.constant 0 : i32
    %c0_i32_1 = arith.constant 0 : i32
    return %c0_i32, %c0_i32_0 : i32, i32
  }
  func.func @transform_5(%arg0: i32) -> (i32, i32) {
    %c0_i32 = arith.constant 0 : i32
    %c0_i32_0 = arith.constant 0 : i32
    %c0_i32_1 = arith.constant 0 : i32
    return %c0_i32, %c0_i32_0 : i32, i32
  }
  func.func @transform_6(%arg0: i32) -> (i32, i32) {
    %c0_i32 = arith.constant 0 : i32
    %c0_i32_0 = arith.constant 0 : i32
    %c0_i32_1 = arith.constant 0 : i32
    return %c0_i32, %c0_i32_0 : i32, i32
  }
  func.func @transform_7(%arg0: i32) -> (i32, i32, i32) {
    %c0_i32 = arith.constant 0 : i32
    %c0_i32_0 = arith.constant 0 : i32
    %c0_i32_1 = arith.constant 0 : i32
    return %arg0, %c0_i32, %c0_i32_0 : i32, i32, i32
  }
  func.func @transform_8(%arg0: i32) -> (i32, i32, i32) {
    %c0_i32 = arith.constant 0 : i32
    %c0_i32_0 = arith.constant 0 : i32
    %c0_i32_1 = arith.constant 0 : i32
    return %arg0, %c0_i32, %c0_i32_0 : i32, i32, i32
  }
  func.func @transform_9(%arg0: i32) -> (i32, i32, i32) {
    %c0_i32 = arith.constant 0 : i32
    %c0_i32_0 = arith.constant 0 : i32
    %c0_i32_1 = arith.constant 0 : i32
    return %arg0, %c0_i32, %c0_i32_0 : i32, i32, i32
  }
}

module attributes {stable_mosaic.version = 11 : i64} {
  func.func @pair_classifier_kernel(%arg0: i32, %arg1: memref<2x20x34xf32, #tpu.memory_space<vmem>>, %arg2: memref<2x40x34xf32, #tpu.memory_space<vmem>>, %arg3: memref<37x34xf32, #tpu.memory_space<vmem>>, %arg4: memref<37x34xf32, #tpu.memory_space<vmem>>, %arg5: memref<35x3xf32, #tpu.memory_space<vmem>>, %arg6: memref<35x1xf32, #tpu.memory_space<vmem>>, %arg7: memref<17x35xf32, #tpu.memory_space<vmem>>, %arg8: memref<17x1xf32, #tpu.memory_space<vmem>>, %arg9: memref<1x17xf32, #tpu.memory_space<vmem>>, %arg10: memref<1x1xf32, #tpu.memory_space<vmem>>, %arg11: memref<20x800xf32, #tpu.memory_space<vmem>>, %arg12: memref<40x800xf32, #tpu.memory_space<vmem>>, %arg13: memref<2x800xf32, #tpu.memory_space<vmem>>) attributes {dimension_semantics = [#tpu.dimension_semantics<arbitrary>], iteration_bounds = array<i64: 1>, scalar_prefetch = 0 : i64, scratch_operands = 0 : i64, tpu.core_type = #tpu.core_type<tc>, window_params = [{pipeline_mode = #tpu.pipeline_mode<synchronous>, transform_indices = @transform_0, window_bounds = array<i64: 2, 20, 34>}, {pipeline_mode = #tpu.pipeline_mode<synchronous>, transform_indices = @transform_1, window_bounds = array<i64: 2, 40, 34>}, {pipeline_mode = #tpu.pipeline_mode<synchronous>, transform_indices = @transform_2, window_bounds = array<i64: 37, 34>}, {pipeline_mode = #tpu.pipeline_mode<synchronous>, transform_indices = @transform_3, window_bounds = array<i64: 37, 34>}, {pipeline_mode = #tpu.pipeline_mode<synchronous>, transform_indices = @transform_4, window_bounds = array<i64: 35, 3>}, {pipeline_mode = #tpu.pipeline_mode<synchronous>, transform_indices = @transform_5, window_bounds = array<i64: 35, 1>}, {pipeline_mode = #tpu.pipeline_mode<synchronous>, transform_indices = @transform_6, window_bounds = array<i64: 17, 35>}, {pipeline_mode = #tpu.pipeline_mode<synchronous>, transform_indices = @transform_7, window_bounds = array<i64: 17, 1>}, {pipeline_mode = #tpu.pipeline_mode<synchronous>, transform_indices = @transform_8, window_bounds = array<i64: 1, 17>}, {pipeline_mode = #tpu.pipeline_mode<synchronous>, transform_indices = @transform_9, window_bounds = array<i64: 1, 1>}, {pipeline_mode = #tpu.pipeline_mode<synchronous>, transform_indices = @transform_10, window_bounds = array<i64: 20, 800>}, {pipeline_mode = #tpu.pipeline_mode<synchronous>, transform_indices = @transform_11, window_bounds = array<i64: 40, 800>}, {pipeline_mode = #tpu.pipeline_mode<synchronous>, transform_indices = @transform_12, window_bounds = array<i64: 2, 800>}]} {
    %c0 = arith.constant 0 : index
    %c0_0 = arith.constant 0 : index
    %0 = vector.load %arg5[%c0, %c0_0] : memref<35x3xf32, #tpu.memory_space<vmem>>, vector<35x3xf32>
    %c0_1 = arith.constant 0 : index
    %c0_2 = arith.constant 0 : index
    %c0_3 = arith.constant 0 : index
    %1 = vector.load %arg1[%c0_1, %c0_2, %c0_3] : memref<2x20x34xf32, #tpu.memory_space<vmem>>, vector<1x20x34xf32>
    %2 = vector.shape_cast %1 : vector<1x20x34xf32> to vector<20x34xf32>
    %c0_4 = arith.constant 0 : index
    %c0_5 = arith.constant 0 : index
    %c0_6 = arith.constant 0 : index
    %3 = vector.load %arg2[%c0_4, %c0_5, %c0_6] : memref<2x40x34xf32, #tpu.memory_space<vmem>>, vector<1x40x34xf32>
    %4 = vector.shape_cast %3 : vector<1x40x34xf32> to vector<40x34xf32>
    %c0_7 = arith.constant 0 : index
    %c0_8 = arith.constant 0 : index
    %5 = vector.load %arg3[%c0_7, %c0_8] : memref<37x34xf32, #tpu.memory_space<vmem>>, vector<37x34xf32>
    %6 = tpu.transpose %2, [1, 0] : vector<20x34xf32> -> vector<34x20xf32>
    %cst = arith.constant dense<0.000000e+00> : vector<37x20xf32>
    %7 = tpu.matmul %5, %6, %cst {dimension_numbers = #tpu.dot_dimension_numbers<[1], [0], [0], [1], [0, 0, 1, 1], [], []>} : vector<37x34xf32>, vector<34x20xf32>, vector<37x20xf32> -> vector<37x20xf32>
    %c0_9 = arith.constant 0 : index
    %c0_10 = arith.constant 0 : index
    %8 = vector.load %arg4[%c0_9, %c0_10] : memref<37x34xf32, #tpu.memory_space<vmem>>, vector<37x34xf32>
    %9 = tpu.transpose %4, [1, 0] : vector<40x34xf32> -> vector<34x40xf32>
    %cst_11 = arith.constant dense<0.000000e+00> : vector<37x40xf32>
    %10 = tpu.matmul %8, %9, %cst_11 {dimension_numbers = #tpu.dot_dimension_numbers<[1], [0], [0], [1], [0, 0, 1, 1], [], []>} : vector<37x34xf32>, vector<34x40xf32>, vector<37x40xf32> -> vector<37x40xf32>
    %c0_12 = arith.constant 0 : index
    %c0_13 = arith.constant 0 : index
    %11 = vector.load %arg11[%c0_12, %c0_13] : memref<20x800xf32, #tpu.memory_space<vmem>>, vector<20x800xf32>
    %cst_14 = arith.constant dense<0.000000e+00> : vector<37x800xf32>
    %12 = tpu.matmul %7, %11, %cst_14 {dimension_numbers = #tpu.dot_dimension_numbers<[1], [0], [0], [1], [0, 0, 1, 1], [], []>} : vector<37x20xf32>, vector<20x800xf32>, vector<37x800xf32> -> vector<37x800xf32>
    %c0_15 = arith.constant 0 : index
    %c0_16 = arith.constant 0 : index
    %13 = vector.load %arg12[%c0_15, %c0_16] : memref<40x800xf32, #tpu.memory_space<vmem>>, vector<40x800xf32>
    %cst_17 = arith.constant dense<0.000000e+00> : vector<37x800xf32>
    %14 = tpu.matmul %10, %13, %cst_17 {dimension_numbers = #tpu.dot_dimension_numbers<[1], [0], [0], [1], [0, 0, 1, 1], [], []>} : vector<37x40xf32>, vector<40x800xf32>, vector<37x800xf32> -> vector<37x800xf32>
    %15 = vector.extract_strided_slice %14 {offsets = [35, 0], sizes = [1, 800], strides = [1, 1]} : vector<37x800xf32> to vector<1x800xf32>
    %16 = vector.extract_strided_slice %12 {offsets = [35, 0], sizes = [1, 800], strides = [1, 1]} : vector<37x800xf32> to vector<1x800xf32>
    %17 = arith.subf %15, %16 : vector<1x800xf32>
    %18 = vector.extract_strided_slice %14 {offsets = [36, 0], sizes = [1, 800], strides = [1, 1]} : vector<37x800xf32> to vector<1x800xf32>
    %19 = vector.extract_strided_slice %12 {offsets = [36, 0], sizes = [1, 800], strides = [1, 1]} : vector<37x800xf32> to vector<1x800xf32>
    %20 = arith.subf %18, %19 : vector<1x800xf32>
    %21 = arith.mulf %17, %17 : vector<1x800xf32>
    %22 = arith.mulf %20, %20 : vector<1x800xf32>
    %23 = arith.addf %21, %22 : vector<1x800xf32>
    %24 = math.sqrt %23 : vector<1x800xf32>
    %25 = vector.extract_strided_slice %12 {offsets = [0, 0], sizes = [35, 800], strides = [1, 1]} : vector<37x800xf32> to vector<35x800xf32>
    %26 = vector.extract_strided_slice %14 {offsets = [0, 0], sizes = [35, 800], strides = [1, 1]} : vector<37x800xf32> to vector<35x800xf32>
    %27 = arith.addf %25, %26 : vector<35x800xf32>
    %28 = vector.extract_strided_slice %0 {offsets = [0, 0], sizes = [35, 1], strides = [1, 1]} : vector<35x3xf32> to vector<35x1xf32>
    %29 = vector.broadcast %28 : vector<35x1xf32> to vector<35x800xf32>
    %30 = vector.broadcast %17 : vector<1x800xf32> to vector<35x800xf32>
    %31 = arith.mulf %29, %30 : vector<35x800xf32>
    %32 = arith.addf %27, %31 : vector<35x800xf32>
    %33 = vector.extract_strided_slice %0 {offsets = [0, 1], sizes = [35, 1], strides = [1, 1]} : vector<35x3xf32> to vector<35x1xf32>
    %34 = vector.broadcast %33 : vector<35x1xf32> to vector<35x800xf32>
    %35 = vector.broadcast %20 : vector<1x800xf32> to vector<35x800xf32>
    %36 = arith.mulf %34, %35 : vector<35x800xf32>
    %37 = arith.addf %32, %36 : vector<35x800xf32>
    %38 = vector.extract_strided_slice %0 {offsets = [0, 2], sizes = [35, 1], strides = [1, 1]} : vector<35x3xf32> to vector<35x1xf32>
    %39 = vector.broadcast %38 : vector<35x1xf32> to vector<35x800xf32>
    %40 = vector.broadcast %24 : vector<1x800xf32> to vector<35x800xf32>
    %41 = arith.mulf %39, %40 : vector<35x800xf32>
    %42 = arith.addf %37, %41 : vector<35x800xf32>
    %c0_18 = arith.constant 0 : index
    %c0_19 = arith.constant 0 : index
    %43 = vector.load %arg6[%c0_18, %c0_19] : memref<35x1xf32, #tpu.memory_space<vmem>>, vector<35x1xf32>
    %44 = vector.broadcast %43 : vector<35x1xf32> to vector<35x800xf32>
    %45 = arith.addf %42, %44 : vector<35x800xf32>
    %cst_20 = arith.constant 0.000000e+00 : f32
    %46 = vector.broadcast %cst_20 : f32 to vector<35x800xf32>
    %47 = arith.maximumf %45, %46 : vector<35x800xf32>
    %c0_21 = arith.constant 0 : index
    %c0_22 = arith.constant 0 : index
    %48 = vector.load %arg7[%c0_21, %c0_22] : memref<17x35xf32, #tpu.memory_space<vmem>>, vector<17x35xf32>
    %cst_23 = arith.constant dense<0.000000e+00> : vector<17x800xf32>
    %49 = tpu.matmul %48, %47, %cst_23 {dimension_numbers = #tpu.dot_dimension_numbers<[1], [0], [0], [1], [0, 0, 1, 1], [], []>} : vector<17x35xf32>, vector<35x800xf32>, vector<17x800xf32> -> vector<17x800xf32>
    %c0_24 = arith.constant 0 : index
    %c0_25 = arith.constant 0 : index
    %50 = vector.load %arg8[%c0_24, %c0_25] : memref<17x1xf32, #tpu.memory_space<vmem>>, vector<17x1xf32>
    %51 = vector.broadcast %50 : vector<17x1xf32> to vector<17x800xf32>
    %52 = arith.addf %49, %51 : vector<17x800xf32>
    %cst_26 = arith.constant 0.000000e+00 : f32
    %53 = vector.broadcast %cst_26 : f32 to vector<17x800xf32>
    %54 = arith.maximumf %52, %53 : vector<17x800xf32>
    %c0_27 = arith.constant 0 : index
    %c0_28 = arith.constant 0 : index
    %55 = vector.load %arg9[%c0_27, %c0_28] : memref<1x17xf32, #tpu.memory_space<vmem>>, vector<1x17xf32>
    %cst_29 = arith.constant dense<0.000000e+00> : vector<1x800xf32>
    %56 = tpu.matmul %55, %54, %cst_29 {dimension_numbers = #tpu.dot_dimension_numbers<[1], [0], [0], [1], [0, 0, 1, 1], [], []>} : vector<1x17xf32>, vector<17x800xf32>, vector<1x800xf32> -> vector<1x800xf32>
    %c0_30 = arith.constant 0 : index
    %c0_31 = arith.constant 0 : index
    %57 = vector.load %arg10[%c0_30, %c0_31] : memref<1x1xf32, #tpu.memory_space<vmem>>, vector<1x1xf32>
    %58 = vector.broadcast %57 : vector<1x1xf32> to vector<1x800xf32>
    %59 = arith.addf %56, %58 : vector<1x800xf32>
    %60 = arith.negf %59 : vector<1x800xf32>
    %61 = math.exp %60 : vector<1x800xf32>
    %cst_32 = arith.constant 1.000000e+00 : f32
    %62 = vector.broadcast %cst_32 : f32 to vector<1x800xf32>
    %63 = arith.addf %62, %61 : vector<1x800xf32>
    %64 = arith.divf %62, %63 : vector<1x800xf32>
    %c0_33 = arith.constant 0 : index
    %c0_34 = arith.constant 0 : index
    %65 = vector.load %arg13[%c0_33, %c0_34] : memref<2x800xf32, #tpu.memory_space<vmem>>, vector<1x800xf32>
    tpu.vector_store %arg13[%c0_33, %c0_34], %64 {strides = array<i32>} : memref<2x800xf32, #tpu.memory_space<vmem>>, vector<1x800xf32>,
    %c1 = arith.constant 1 : index
    %c0_35 = arith.constant 0 : index
    %c0_36 = arith.constant 0 : index
    %66 = vector.load %arg1[%c1, %c0_35, %c0_36] : memref<2x20x34xf32, #tpu.memory_space<vmem>>, vector<1x20x34xf32>
    %67 = vector.shape_cast %66 : vector<1x20x34xf32> to vector<20x34xf32>
    %c1_37 = arith.constant 1 : index
    %c0_38 = arith.constant 0 : index
    %c0_39 = arith.constant 0 : index
    %68 = vector.load %arg2[%c1_37, %c0_38, %c0_39] : memref<2x40x34xf32, #tpu.memory_space<vmem>>, vector<1x40x34xf32>
    %69 = vector.shape_cast %68 : vector<1x40x34xf32> to vector<40x34xf32>
    %c0_40 = arith.constant 0 : index
    %c0_41 = arith.constant 0 : index
    %70 = vector.load %arg3[%c0_40, %c0_41] : memref<37x34xf32, #tpu.memory_space<vmem>>, vector<37x34xf32>
    %71 = tpu.transpose %67, [1, 0] : vector<20x34xf32> -> vector<34x20xf32>
    %cst_42 = arith.constant dense<0.000000e+00> : vector<37x20xf32>
    %72 = tpu.matmul %70, %71, %cst_42 {dimension_numbers = #tpu.dot_dimension_numbers<[1], [0], [0], [1], [0, 0, 1, 1], [], []>} : vector<37x34xf32>, vector<34x20xf32>, vector<37x20xf32> -> vector<37x20xf32>
    %c0_43 = arith.constant 0 : index
    %c0_44 = arith.constant 0 : index
    %73 = vector.load %arg4[%c0_43, %c0_44] : memref<37x34xf32, #tpu.memory_space<vmem>>, vector<37x34xf32>
    %74 = tpu.transpose %69, [1, 0] : vector<40x34xf32> -> vector<34x40xf32>
    %cst_45 = arith.constant dense<0.000000e+00> : vector<37x40xf32>
    %75 = tpu.matmul %73, %74, %cst_45 {dimension_numbers = #tpu.dot_dimension_numbers<[1], [0], [0], [1], [0, 0, 1, 1], [], []>} : vector<37x34xf32>, vector<34x40xf32>, vector<37x40xf32> -> vector<37x40xf32>
    %c0_46 = arith.constant 0 : index
    %c0_47 = arith.constant 0 : index
    %76 = vector.load %arg11[%c0_46, %c0_47] : memref<20x800xf32, #tpu.memory_space<vmem>>, vector<20x800xf32>
    %cst_48 = arith.constant dense<0.000000e+00> : vector<37x800xf32>
    %77 = tpu.matmul %72, %76, %cst_48 {dimension_numbers = #tpu.dot_dimension_numbers<[1], [0], [0], [1], [0, 0, 1, 1], [], []>} : vector<37x20xf32>, vector<20x800xf32>, vector<37x800xf32> -> vector<37x800xf32>
    %c0_49 = arith.constant 0 : index
    %c0_50 = arith.constant 0 : index
    %78 = vector.load %arg12[%c0_49, %c0_50] : memref<40x800xf32, #tpu.memory_space<vmem>>, vector<40x800xf32>
    %cst_51 = arith.constant dense<0.000000e+00> : vector<37x800xf32>
    %79 = tpu.matmul %75, %78, %cst_51 {dimension_numbers = #tpu.dot_dimension_numbers<[1], [0], [0], [1], [0, 0, 1, 1], [], []>} : vector<37x40xf32>, vector<40x800xf32>, vector<37x800xf32> -> vector<37x800xf32>
    %80 = vector.extract_strided_slice %79 {offsets = [35, 0], sizes = [1, 800], strides = [1, 1]} : vector<37x800xf32> to vector<1x800xf32>
    %81 = vector.extract_strided_slice %77 {offsets = [35, 0], sizes = [1, 800], strides = [1, 1]} : vector<37x800xf32> to vector<1x800xf32>
    %82 = arith.subf %80, %81 : vector<1x800xf32>
    %83 = vector.extract_strided_slice %79 {offsets = [36, 0], sizes = [1, 800], strides = [1, 1]} : vector<37x800xf32> to vector<1x800xf32>
    %84 = vector.extract_strided_slice %77 {offsets = [36, 0], sizes = [1, 800], strides = [1, 1]} : vector<37x800xf32> to vector<1x800xf32>
    %85 = arith.subf %83, %84 : vector<1x800xf32>
    %86 = arith.mulf %82, %82 : vector<1x800xf32>
    %87 = arith.mulf %85, %85 : vector<1x800xf32>
    %88 = arith.addf %86, %87 : vector<1x800xf32>
    %89 = math.sqrt %88 : vector<1x800xf32>
    %90 = vector.extract_strided_slice %77 {offsets = [0, 0], sizes = [35, 800], strides = [1, 1]} : vector<37x800xf32> to vector<35x800xf32>
    %91 = vector.extract_strided_slice %79 {offsets = [0, 0], sizes = [35, 800], strides = [1, 1]} : vector<37x800xf32> to vector<35x800xf32>
    %92 = arith.addf %90, %91 : vector<35x800xf32>
    %93 = vector.extract_strided_slice %0 {offsets = [0, 0], sizes = [35, 1], strides = [1, 1]} : vector<35x3xf32> to vector<35x1xf32>
    %94 = vector.broadcast %93 : vector<35x1xf32> to vector<35x800xf32>
    %95 = vector.broadcast %82 : vector<1x800xf32> to vector<35x800xf32>
    %96 = arith.mulf %94, %95 : vector<35x800xf32>
    %97 = arith.addf %92, %96 : vector<35x800xf32>
    %98 = vector.extract_strided_slice %0 {offsets = [0, 1], sizes = [35, 1], strides = [1, 1]} : vector<35x3xf32> to vector<35x1xf32>
    %99 = vector.broadcast %98 : vector<35x1xf32> to vector<35x800xf32>
    %100 = vector.broadcast %85 : vector<1x800xf32> to vector<35x800xf32>
    %101 = arith.mulf %99, %100 : vector<35x800xf32>
    %102 = arith.addf %97, %101 : vector<35x800xf32>
    %103 = vector.extract_strided_slice %0 {offsets = [0, 2], sizes = [35, 1], strides = [1, 1]} : vector<35x3xf32> to vector<35x1xf32>
    %104 = vector.broadcast %103 : vector<35x1xf32> to vector<35x800xf32>
    %105 = vector.broadcast %89 : vector<1x800xf32> to vector<35x800xf32>
    %106 = arith.mulf %104, %105 : vector<35x800xf32>
    %107 = arith.addf %102, %106 : vector<35x800xf32>
    %c0_52 = arith.constant 0 : index
    %c0_53 = arith.constant 0 : index
    %108 = vector.load %arg6[%c0_52, %c0_53] : memref<35x1xf32, #tpu.memory_space<vmem>>, vector<35x1xf32>
    %109 = vector.broadcast %108 : vector<35x1xf32> to vector<35x800xf32>
    %110 = arith.addf %107, %109 : vector<35x800xf32>
    %cst_54 = arith.constant 0.000000e+00 : f32
    %111 = vector.broadcast %cst_54 : f32 to vector<35x800xf32>
    %112 = arith.maximumf %110, %111 : vector<35x800xf32>
    %c0_55 = arith.constant 0 : index
    %c0_56 = arith.constant 0 : index
    %113 = vector.load %arg7[%c0_55, %c0_56] : memref<17x35xf32, #tpu.memory_space<vmem>>, vector<17x35xf32>
    %cst_57 = arith.constant dense<0.000000e+00> : vector<17x800xf32>
    %114 = tpu.matmul %113, %112, %cst_57 {dimension_numbers = #tpu.dot_dimension_numbers<[1], [0], [0], [1], [0, 0, 1, 1], [], []>} : vector<17x35xf32>, vector<35x800xf32>, vector<17x800xf32> -> vector<17x800xf32>
    %c0_58 = arith.constant 0 : index
    %c0_59 = arith.constant 0 : index
    %115 = vector.load %arg8[%c0_58, %c0_59] : memref<17x1xf32, #tpu.memory_space<vmem>>, vector<17x1xf32>
    %116 = vector.broadcast %115 : vector<17x1xf32> to vector<17x800xf32>
    %117 = arith.addf %114, %116 : vector<17x800xf32>
    %cst_60 = arith.constant 0.000000e+00 : f32
    %118 = vector.broadcast %cst_60 : f32 to vector<17x800xf32>
    %119 = arith.maximumf %117, %118 : vector<17x800xf32>
    %c0_61 = arith.constant 0 : index
    %c0_62 = arith.constant 0 : index
    %120 = vector.load %arg9[%c0_61, %c0_62] : memref<1x17xf32, #tpu.memory_space<vmem>>, vector<1x17xf32>
    %cst_63 = arith.constant dense<0.000000e+00> : vector<1x800xf32>
    %121 = tpu.matmul %120, %119, %cst_63 {dimension_numbers = #tpu.dot_dimension_numbers<[1], [0], [0], [1], [0, 0, 1, 1], [], []>} : vector<1x17xf32>, vector<17x800xf32>, vector<1x800xf32> -> vector<1x800xf32>
    %c0_64 = arith.constant 0 : index
    %c0_65 = arith.constant 0 : index
    %122 = vector.load %arg10[%c0_64, %c0_65] : memref<1x1xf32, #tpu.memory_space<vmem>>, vector<1x1xf32>
    %123 = vector.broadcast %122 : vector<1x1xf32> to vector<1x800xf32>
    %124 = arith.addf %121, %123 : vector<1x800xf32>
    %125 = arith.negf %124 : vector<1x800xf32>
    %126 = math.exp %125 : vector<1x800xf32>
    %cst_66 = arith.constant 1.000000e+00 : f32
    %127 = vector.broadcast %cst_66 : f32 to vector<1x800xf32>
    %128 = arith.addf %127, %126 : vector<1x800xf32>
    %129 = arith.divf %127, %128 : vector<1x800xf32>
    %c1_67 = arith.constant 1 : index
    %c0_68 = arith.constant 0 : index
    %130 = vector.load %arg13[%c1_67, %c0_68] : memref<2x800xf32, #tpu.memory_space<vmem>>, vector<1x800xf32>
    tpu.vector_store %arg13[%c1_67, %c0_68], %129 {strides = array<i32>} : memref<2x800xf32, #tpu.memory_space<vmem>>, vector<1x800xf32>,
    return
  }
  func.func @transform_0(%arg0: i32) -> (i32, i32, i32) {
    %c0_i32 = arith.constant 0 : i32
    %c0_i32_0 = arith.constant 0 : i32
    %c0_i32_1 = arith.constant 0 : i32
    %c0_i32_2 = arith.constant 0 : i32
    return %c0_i32, %c0_i32_0, %c0_i32_1 : i32, i32, i32
  }
  func.func @transform_1(%arg0: i32) -> (i32, i32, i32) {
    %c0_i32 = arith.constant 0 : i32
    %c0_i32_0 = arith.constant 0 : i32
    %c0_i32_1 = arith.constant 0 : i32
    %c0_i32_2 = arith.constant 0 : i32
    return %c0_i32, %c0_i32_0, %c0_i32_1 : i32, i32, i32
  }
  func.func @transform_2(%arg0: i32) -> (i32, i32) {
    %c0_i32 = arith.constant 0 : i32
    %c0_i32_0 = arith.constant 0 : i32
    %c0_i32_1 = arith.constant 0 : i32
    return %c0_i32, %c0_i32_0 : i32, i32
  }
  func.func @transform_3(%arg0: i32) -> (i32, i32) {
    %c0_i32 = arith.constant 0 : i32
    %c0_i32_0 = arith.constant 0 : i32
    %c0_i32_1 = arith.constant 0 : i32
    return %c0_i32, %c0_i32_0 : i32, i32
  }
  func.func @transform_4(%arg0: i32) -> (i32, i32) {
    %c0_i32 = arith.constant 0 : i32
    %c0_i32_0 = arith.constant 0 : i32
    %c0_i32_1 = arith.constant 0 : i32
    return %c0_i32, %c0_i32_0 : i32, i32
  }
  func.func @transform_5(%arg0: i32) -> (i32, i32) {
    %c0_i32 = arith.constant 0 : i32
    %c0_i32_0 = arith.constant 0 : i32
    %c0_i32_1 = arith.constant 0 : i32
    return %c0_i32, %c0_i32_0 : i32, i32
  }
  func.func @transform_6(%arg0: i32) -> (i32, i32) {
    %c0_i32 = arith.constant 0 : i32
    %c0_i32_0 = arith.constant 0 : i32
    %c0_i32_1 = arith.constant 0 : i32
    return %c0_i32, %c0_i32_0 : i32, i32
  }
  func.func @transform_7(%arg0: i32) -> (i32, i32) {
    %c0_i32 = arith.constant 0 : i32
    %c0_i32_0 = arith.constant 0 : i32
    %c0_i32_1 = arith.constant 0 : i32
    return %c0_i32, %c0_i32_0 : i32, i32
  }
  func.func @transform_8(%arg0: i32) -> (i32, i32) {
    %c0_i32 = arith.constant 0 : i32
    %c0_i32_0 = arith.constant 0 : i32
    %c0_i32_1 = arith.constant 0 : i32
    return %c0_i32, %c0_i32_0 : i32, i32
  }
  func.func @transform_9(%arg0: i32) -> (i32, i32) {
    %c0_i32 = arith.constant 0 : i32
    %c0_i32_0 = arith.constant 0 : i32
    %c0_i32_1 = arith.constant 0 : i32
    return %c0_i32, %c0_i32_0 : i32, i32
  }
  func.func @transform_10(%arg0: i32) -> (i32, i32) {
    %c0_i32 = arith.constant 0 : i32
    %c0_i32_0 = arith.constant 0 : i32
    %c0_i32_1 = arith.constant 0 : i32
    return %c0_i32, %c0_i32_0 : i32, i32
  }
  func.func @transform_11(%arg0: i32) -> (i32, i32) {
    %c0_i32 = arith.constant 0 : i32
    %c0_i32_0 = arith.constant 0 : i32
    %c0_i32_1 = arith.constant 0 : i32
    return %c0_i32, %c0_i32_0 : i32, i32
  }
  func.func @transform_12(%arg0: i32) -> (i32, i32) {
    %c0_i32 = arith.constant 0 : i32
    %c0_i32_0 = arith.constant 0 : i32
    %c0_i32_1 = arith.constant 0 : i32
    return %c0_i32, %c0_i32_0 : i32, i32
  }
}

</mosaic_0001>

<bundles_post_ra>
// kernel: ctrbox_forward.2
= control target key start
LH: loop header
LB: loop body
LE: loop exit
PB: predicated region body
PF: predicated region fallthrough
CT: control target
= control target key end

     0   :  { %s4762_s30 = smov 0   ;;  %s7531_s0 = inlined_call_operand.vmem [shape: f32[2,8,8,3], index: 0, kind: input, shape index: {}]   ;;  %s7532_s1 = inlined_call_operand.vmem [shape: f32[27,32], index: 1, kind: input, shape index: {}]   ;;  %s7533_s2 = inlined_call_operand.vmem [shape: f32[1,32], index: 2, kind: input, shape index: {}]   ;;  %s7534_s3 = inlined_call_operand.vmem [shape: f32[288,160], index: 3, kind: input, shape index: {}]   ;;  %s7535_s4 = inlined_call_operand.vmem [shape: f32[1,160], index: 4, kind: input, shape index: {}]   ;;  %s7536_s5 = inlined_call_operand.vmem [shape: f32[1440,16], index: 5, kind: input, shape index: {}]   ;;  %s7537_s6 = inlined_call_operand.vmem [shape: f32[1,16], index: 6, kind: input, shape index: {}]   ;;  %s7538_s7 = inlined_call_operand.vmem [shape: f32[2,16,64], index: 7, kind: output, shape index: {0}]   ;;  %s7539_s8 = inlined_call_operand.vmem [shape: f32[2,64,2], index: 8, kind: output, shape index: {1}]   ;;  %s7540_s9 = inlined_call_operand.vmem [shape: f32[2,64,34], index: 9, kind: output, shape index: {2}]  }
   0x1 LB: > { %s3889_s10 = sadd.s32 4294967295, %s4697_s30   ;;  %p3893_p0 = scmp.ge.s32.totalorder %s4697_s30, 1  ;;  %s4697_s30 = sphi %s4762_s30, %s20_s30  }
   0x2   : > { %p292_p1 = scmp.lt.s32.totalorder %s4697_s30, 3 }
   0x4   : > { %p293_p2 = pnand %p3893_p0, %p292_p1 }
   0x6   : > { %296 = sbr.rel (%p293_p2) target bundleno = 1422 (0x58e), region = 48 }
   0xb   : > { %vm358_vm0 = vcmask 23552   ;;  %vm360_vm1 = vcmask 17408   ;;  %v4699_v0 = vmov 0.0   ;;  %p338_p3 = scmp.lt.s32.totalorder %s3889_s10, 1  ;;  %vm458_vm2 = vcmask 1045504   ;;  %s4700_s15 = smov 6  }
   0xc   : > { %359 = vst.msk [vmem:[#allocation2] sm:$0xff] %vm358_vm0, %v4699_v0  ;;  %362 = vst.msk [vmem:[#allocation2 + $0x10] sm:$0xff] %vm358_vm0, %v4699_v0  ;;  %1625 = vmatprep.mubr.f32.mxu0 %v4699_v0  ;;  %vm433_vm3 = vcmask 1046528   ;;  %s4701_s16 = smov 3   ;;  %s4702_s17 = smov 9   ;;  %vm798_vm4 = vcmask 1042432  }
   0xd   : > { %361 = vst.msk [vmem:[#allocation2 + $0x8] sm:$0x3] %vm360_vm1, %v4699_v0  ;;  %363 = vst.msk [vmem:[#allocation2 + $0x18] sm:$0x3] %vm360_vm1, %v4699_v0  ;;  %s7554_s10 = smov (!%p338_p3, %s3889_s10), 1  ;;  %s4703_s18 = smov 12  }
   0xe   : > { %364 = vst.msk [vmem:[#allocation2 + $0x20] sm:$0xff] %vm358_vm0, %v4699_v0  ;;  %366 = vst.msk [vmem:[#allocation2 + $0x30] sm:$0xff] %vm358_vm0, %v4699_v0  ;;  %s4837_s11 = sshll.u32 %s7554_s10, 6  ;;  %s4704_s19 = smov 15   ;;  %v765_v35 = vld [vmem:[%s7532_s1 + $0x18] sm:$0x7] }
   0xf   : > { %365 = vst.msk [vmem:[#allocation2 + $0x28] sm:$0x3] %vm360_vm1, %v4699_v0  ;;  %367 = vst.msk [vmem:[#allocation2 + $0x38] sm:$0x3] %vm360_vm1, %v4699_v0  ;;  %s342_s14 = scalar_lea.vmem %s7531_s0, %s4837_s11  ;;  %s4705_s22 = smov 18   ;;  %v764_v36 = vld [vmem:[%s7532_s1 + $0x10] sm:$0xff]  ;;  %4251 = vmatprep.subr.msk.mxu1 %vm798_vm4, %v765_v35 }
  0x10   : > { %368 = vst.msk [vmem:[#allocation2 + $0x40] sm:$0xff] %vm358_vm0, %v4699_v0  ;;  %370 = vst.msk [vmem:[#allocation2 + $0x50] sm:$0xff] %vm358_vm0, %v4699_v0  ;;  %v381_v1 = vld [vmem:[%s342_s14 + $0x8] sm:$0xff]  ;;  %v380_v2 = vld [vmem:[%s342_s14] sm:$0xff]  ;;  %4252 = vmatpush3.msk.msra.mxu1 %vm798_vm4, %v765_v35  ;;  %s4706_s27 = smov 21   ;;  %s4707_s12 = smov 24  }
  0x11   : > { %369 = vst.msk [vmem:[#allocation2 + $0x48] sm:$0x3] %vm360_vm1, %v4699_v0  ;;  %371 = vst.msk [vmem:[#allocation2 + $0x58] sm:$0x3] %vm360_vm1, %v4699_v0  ;;  %v382_v3 = vld [vmem:[%s342_s14 + $0x10] sm:$0xff]  ;;  %v383_v6 = vld [vmem:[%s342_s14 + $0x18] sm:$0xff]  ;;  %4253 = vmatprep.subr.mxu1 %v764_v36  ;;  %s7323_s28 = scalar_lea.vmem %s7539_s8, %s4837_s11 }
  0x12   : > { %372 = vst.msk [vmem:[#allocation2 + $0x60] sm:$0xff] %vm358_vm0, %v4699_v0  ;;  %374 = vst.msk [vmem:[#allocation2 + $0x70] sm:$0xff] %vm358_vm0, %v4699_v0  ;;  %v384_v11 = vld [vmem:[%s342_s14 + $0x20] sm:$0xff]  ;;  %v385_v12 = vld [vmem:[%s342_s14 + $0x28] sm:$0xff]  ;;  %4254 = vmatpush3.msra.mxu1 %v764_v36  ;;  %vm699_vm5 = vcmask 48128   ;;  %vm708_vm6 = vcmask 72704  }
  0x13   : > { %373 = vst.msk [vmem:[#allocation2 + $0x68] sm:$0x3] %vm360_vm1, %v4699_v0  ;;  %375 = vst.msk [vmem:[#allocation2 + $0x78] sm:$0x3] %vm360_vm1, %v4699_v0  ;;  %v4843_v4 = vld [vmem:[#allocation2] sm:$0xff]  ;;  %v386_v13 = vld [vmem:[%s342_s14 + $0x30] sm:$0xff] }
  0x14   : > { %376 = vst.msk [vmem:[#allocation2 + $0x80] sm:$0xff] %vm358_vm0, %v4699_v0  ;;  %378 = vst.msk [vmem:[#allocation2 + $0x90] sm:$0xff] %vm358_vm0, %v4699_v0  ;;  %v398_v5 = vld [vmem:[#allocation2 + $0x8] sm:$0x3]  ;;  %v459_v7 = vrot.slane %v4843_v4, 2  ;;  %v434_v9 = vrot.slane %v4843_v4, 1 }
  0x15   : > { %377 = vst.msk [vmem:[#allocation2 + $0x88] sm:$0x3] %vm360_vm1, %v4699_v0  ;;  %379 = vst.msk [vmem:[#allocation2 + $0x98] sm:$0x3] %vm360_vm1, %v4699_v0  ;;  %v460_v8 = vrot.slane %v398_v5, 2  ;;  %v435_v10 = vrot.slane %v398_v5, 1 }
  0x16   : > { %1690 = vst [vmem:[#allocation4] sm:$0xff] %v4699_v0  ;;  %1692 = vst [vmem:[#allocation4 + $0x10] sm:$0x3] %v4699_v0  ;;  %v387_v14 = vld [vmem:[%s342_s14 + $0x38] sm:$0xff]  ;;  %v763_v39 = vld [vmem:[%s7532_s1 + $0x8] sm:$0xff]  ;;  %vm717_vm7 = vcmask 97280  }
  0x17   : > { %1694 = vst [vmem:[#allocation4 + $0x20] sm:$0xff] %v4699_v0  ;;  %1696 = vst [vmem:[#allocation4 + $0x30] sm:$0x3] %v4699_v0  ;;  %v461_v15 = vsel %vm458_vm2, %v459_v7, %v460_v8  ;;  %v436_v16 = vsel %vm433_vm3, %v434_v9, %v435_v10  ;;  %4255 = vmatprep.subr.mxu1 %v763_v39  ;;  %v762_v41 = vld [vmem:[%s7532_s1] sm:$0xff]  ;;  %vm726_vm8 = vcmask 121856   ;;  %vm735_vm9 = vcmask 146432  }
  0x18   : > { %1698 = vst [vmem:[#allocation4 + $0x40] sm:$0xff] %v4699_v0  ;;  %1700 = vst [vmem:[#allocation4 + $0x50] sm:$0x3] %v4699_v0  ;;  %523 = vrot.lane.b32.xlu1 %v461_v15, %s4700_s15  ;;  %499 = vrot.lane.b32.xlu0 %v436_v16, %s4701_s16  ;;  %vm744_vm10 = vcmask 171008   ;;  %vm753_vm11 = vcmask 195584   ;;  %vm773_vm12 = vcmask 220160  }
  0x19   : > { %1702 = vst [vmem:[#allocation4 + $0x60] sm:$0xff] %v4699_v0  ;;  %1704 = vst [vmem:[#allocation4 + $0x70] sm:$0x3] %v4699_v0  ;;  %4256 = vmatpush3.msra.mxu1 %v763_v39  ;;  %vm972_vm13 = vcmask 261120   ;;  %vm1017_vm14 = vcmask 254976   ;;  %vm990_vm15 = vcmask 269568  }
  0x1a   : > { %1706 = vst [vmem:[#allocation4 + $0x80] sm:$0xff] %v4699_v0  ;;  %1708 = vst [vmem:[#allocation4 + $0x90] sm:$0x3] %v4699_v0  ;;  %4257 = vmatprep.subr.mxu1 %v762_v41  ;;  %s4709_s20 = smov 96   ;;  %s4710_s21 = smov 32   ;;  %vm1306_vm1 = vcmask 523264  }
  0x1b   : > { %1710 = vst [vmem:[#allocation4 + $0xa0] sm:$0xff] %v4699_v0  ;;  %1712 = vst [vmem:[#allocation4 + $0xb0] sm:$0x3] %v4699_v0  ;;  %4258 = vmatpush3.msra.mxu1 %v762_v41  ;;  %vm1315_vm4 = vcmask 785408  }
  0x1c   : > { %1714 = vst [vmem:[#allocation4 + $0xc0] sm:$0xff] %v4699_v0  ;;  %1716 = vst [vmem:[#allocation4 + $0xd0] sm:$0x3] %v4699_v0 }
  0x1d   : > { %1718 = vst [vmem:[#allocation4 + $0xe0] sm:$0xff] %v4699_v0  ;;  %1720 = vst [vmem:[#allocation4 + $0xf0] sm:$0x3] %v4699_v0 }
  0x1e   : > { %1722 = vst [vmem:[#allocation4 + $0x100] sm:$0xff] %v4699_v0  ;;  %1724 = vst [vmem:[#allocation4 + $0x110] sm:$0x3] %v4699_v0 }
  0x1f   : > { %1728 = vst [vmem:[#allocation4 + $0x130] sm:$0x3] %v4699_v0  ;;  %390 = vst.msk [vmem:[#allocation2 + $0x21] sm:$0xff] %vm358_vm0, %v381_v1 }
  0x20   : > { %389 = vst.msk [vmem:[#allocation2 + $0x11] sm:$0xff] %vm358_vm0, %v380_v2  ;;  %391 = vst.msk [vmem:[#allocation2 + $0x31] sm:$0xff] %vm358_vm0, %v382_v3 }
  0x21   : > { %392 = vst.msk [vmem:[#allocation2 + $0x41] sm:$0xff] %vm358_vm0, %v383_v6  ;;  %393 = vst.msk [vmem:[#allocation2 + $0x51] sm:$0xff] %vm358_vm0, %v384_v11 }
  0x22   : > { %394 = vst.msk [vmem:[#allocation2 + $0x61] sm:$0xff] %vm358_vm0, %v385_v12  ;;  %395 = vst.msk [vmem:[#allocation2 + $0x71] sm:$0xff] %vm358_vm0, %v386_v13 }
  0x23   : > { %396 = vst.msk [vmem:[#allocation2 + $0x81] sm:$0xff] %vm358_vm0, %v387_v14 }
  0x24   : > { %1021 = vst.msk [vmem:[#allocation3 + $0x20] sm:$0xff] %vm972_vm13, %v4699_v0  ;;  %1016 = vst.msk [vmem:[#allocation3] sm:$0xff] %vm972_vm13, %v4699_v0 }
  0x25   : > { %1022 = vst.msk [vmem:[#allocation3 + $0x28] sm:$0x3] %vm1017_vm14, %v4699_v0  ;;  %1018 = vst.msk [vmem:[#allocation3 + $0x8] sm:$0x3] %vm1017_vm14, %v4699_v0 }
  0x26   : > { %v4859_v17 = vld [vmem:[#allocation2 + $0x20] sm:$0xff]  ;;  %v402_v24 = vld [vmem:[#allocation2 + $0x28] sm:$0x3]  ;;  %1019 = vst.msk [vmem:[#allocation3 + $0x10] sm:$0xff] %vm972_vm13, %v4699_v0  ;;  %1023 = vst.msk [vmem:[#allocation3 + $0x30] sm:$0xff] %vm972_vm13, %v4699_v0 }
  0x27   : > { %v4861_v18 = vld [vmem:[#allocation2 + $0x10] sm:$0xff]  ;;  %v400_v19 = vld [vmem:[#allocation2 + $0x18] sm:$0x3]  ;;  %549 = vrot.lane.b32.xlu1 %v4859_v17, %s4702_s17  ;;  %v440_v25 = vrot.slane %v4859_v17, 1  ;;  %v441_v26 = vrot.slane %v402_v24, 1  ;;  %v465_v30 = vrot.slane %v4859_v17, 2 }
  0x28   : > { %547 = vrot.lane.b32.xlu0 %v4861_v18, %s4702_s17  ;;  %v462_v20 = vrot.slane %v4861_v18, 2  ;;  %v463_v21 = vrot.slane %v400_v19, 2  ;;  %v437_v22 = vrot.slane %v4861_v18, 1  ;;  %v438_v23 = vrot.slane %v400_v19, 1  ;;  %v4881_v33 = vld [vmem:[#allocation2 + $0x30] sm:$0xff]  ;;  %v4909_v45 = vld [vmem:[#allocation2 + $0x40] sm:$0xff] }
  0x29   : > { %v442_v29 = vsel %vm433_vm3, %v440_v25, %v441_v26  ;;  %v466_v31 = vrot.slane %v402_v24, 2  ;;  %v404_v34 = vld [vmem:[#allocation2 + $0x38] sm:$0x3]  ;;  %v443_v37 = vrot.slane %v4881_v33, 1  ;;  %v468_v42 = vrot.slane %v4881_v33, 2  ;;  %v4923_v53 = vld [vmem:[#allocation2 + $0x50] sm:$0xff] }
  0x2a   : > { %v464_v27 = vsel %vm458_vm2, %v462_v20, %v463_v21  ;;  %v439_v28 = vsel %vm433_vm3, %v437_v22, %v438_v23  ;;  %v444_v38 = vrot.slane %v404_v34, 1  ;;  %v469_v43 = vrot.slane %v404_v34, 2  ;;  %v406_v46 = vld [vmem:[#allocation2 + $0x48] sm:$0x3]  ;;  %v408_v54 = vld [vmem:[#allocation2 + $0x58] sm:$0x3] }
  0x2b   : > { %525 = vrot.lane.b32.xlu1 %v464_v27, %s4700_s15  ;;  %v467_v32 = vsel %vm458_vm2, %v465_v30, %v466_v31  ;;  %v446_v47 = vrot.slane %v4909_v45, 1  ;;  %v447_v48 = vrot.slane %v406_v46, 1  ;;  %v471_v50 = vrot.slane %v4909_v45, 2  ;;  %v4941_v61 = vld [vmem:[#allocation2 + $0x60] sm:$0xff]  ;;  %v410_v62 = vld [vmem:[#allocation2 + $0x68] sm:$0x3] }
  0x2c   : > { %501 = vrot.lane.b32.xlu0 %v439_v28, %s4701_s16  ;;  %v445_v40 = vsel %vm433_vm3, %v443_v37, %v444_v38  ;;  %v470_v44 = vsel %vm458_vm2, %v468_v42, %v469_v43  ;;  %v472_v51 = vrot.slane %v406_v46, 2  ;;  %v449_v55 = vrot.slane %v4923_v53, 1  ;;  %v4955_v7 = vld [vmem:[#allocation2 + $0x70] sm:$0xff]  ;;  %v412_v8 = vld [vmem:[#allocation2 + $0x78] sm:$0x3]  ;;  %v413_v15 = vld [vmem:[#allocation2 + $0x80] sm:$0xff] }
  0x2d   : > { %v448_v49 = vsel %vm433_vm3, %v446_v47, %v447_v48  ;;  %v450_v56 = vrot.slane %v408_v54, 1  ;;  %v474_v58 = vrot.slane %v4923_v53, 2  ;;  %v475_v59 = vrot.slane %v408_v54, 2  ;;  %v414_v16 = vld [vmem:[#allocation2 + $0x88] sm:$0x3]  ;;  %v415_v25 = vld [vmem:[#allocation2 + $0x90] sm:$0xff] }
  0x2e   : > { %v473_v52 = vsel %vm458_vm2, %v471_v50, %v472_v51  ;;  %v452_v63 = vrot.slane %v4941_v61, 1  ;;  %v453_v1 = vrot.slane %v410_v62, 1  ;;  %v477_v3 = vrot.slane %v4941_v61, 2  ;;  %v416_v26 = vld [vmem:[#allocation2 + $0x98] sm:$0x3]  ;;  %1025 = vst.msk [vmem:[#allocation3 + $0x40] sm:$0xff] %vm972_vm13, %v4699_v0 }
  0x2f   : > { %573 = vrot.lane.b32.xlu1 %v442_v29, %s4703_s18  ;;  %v451_v57 = vsel %vm433_vm3, %v449_v55, %v450_v56  ;;  %v476_v60 = vsel %vm458_vm2, %v474_v58, %v475_v59  ;;  %v478_v5 = vrot.slane %v410_v62, 2  ;;  %v455_v9 = vrot.slane %v4955_v7, 1  ;;  %1020 = vst.msk [vmem:[#allocation3 + $0x18] sm:$0x3] %vm1017_vm14, %v4699_v0  ;;  %1024 = vst.msk [vmem:[#allocation3 + $0x38] sm:$0x3] %vm1017_vm14, %v4699_v0 }
  0x30   : > { %571 = vrot.lane.b32.xlu0 %v439_v28, %s4703_s18  ;;  %v454_v2 = vsel %vm433_vm3, %v452_v63, %v453_v1  ;;  %v456_v10 = vrot.slane %v412_v8, 1  ;;  %v480_v12 = vrot.slane %v4955_v7, 2  ;;  %v481_v13 = vrot.slane %v412_v8, 2  ;;  %1026 = vst.msk [vmem:[#allocation3 + $0x48] sm:$0x3] %vm1017_vm14, %v4699_v0 }
  0x31   : > { %v479_v6 = vsel %vm458_vm2, %v477_v3, %v478_v5  ;;  %v485_v19 = vrot.slane %v413_v15, 1  ;;  %v486_v20 = vrot.slane %v414_v16, 1  ;;  %v488_v22 = vrot.slane %v413_v15, 2  ;;  %1027 = vst.msk [vmem:[#allocation3 + $0x50] sm:$0xff] %vm972_vm13, %v4699_v0  ;;  %1029 = vst.msk [vmem:[#allocation3 + $0x60] sm:$0xff] %vm972_vm13, %v4699_v0 }
  0x32   : > { %v457_v11 = vsel %vm433_vm3, %v455_v9, %v456_v10  ;;  %v482_v14 = vsel %vm458_vm2, %v480_v12, %v481_v13  ;;  %v489_v23 = vrot.slane %v414_v16, 2  ;;  %v494_v28 = vrot.slane %v416_v26, 1  ;;  %1028 = vst.msk [vmem:[#allocation3 + $0x58] sm:$0x3] %vm1017_vm14, %v4699_v0  ;;  %1030 = vst.msk [vmem:[#allocation3 + $0x68] sm:$0x3] %vm1017_vm14, %v4699_v0 }
  0x33   : > { %597 = vrot.lane.b32.xlu1 %v467_v32, %s4704_s19  ;;  %v487_v21 = vsel %vm433_vm3, %v485_v19, %v486_v20  ;;  %v496_v31 = vrot.slane %v415_v25, 2  ;;  %v497_v34 = vrot.slane %v416_v26, 2  ;;  %1031 = vst.msk [vmem:[#allocation3 + $0x70] sm:$0xff] %vm972_vm13, %v4699_v0  ;;  %1033 = vst.msk [vmem:[#allocation3 + $0x80] sm:$0xff] %vm972_vm13, %v4699_v0 }
  0x34   : > { %595 = vrot.lane.b32.xlu0 %v464_v27, %s4704_s19  ;;  %v490_v24 = vsel %vm458_vm2, %v488_v22, %v489_v23  ;;  %v493_v27 = vrot.slane %v415_v25, 1  ;;  %1032 = vst.msk [vmem:[#allocation3 + $0x78] sm:$0x3] %vm1017_vm14, %v4699_v0  ;;  %1034 = vst.msk [vmem:[#allocation3 + $0x88] sm:$0x3] %vm1017_vm14, %v4699_v0 }
  0x35   : > { %v498_v37 = vsel %vm458_vm2, %v496_v31, %v497_v34  ;;  %1035 = vst.msk [vmem:[#allocation3 + $0x90] sm:$0xff] %vm972_vm13, %v4699_v0  ;;  %1691 = vst.msk [vmem:[#allocation4 + $0x8] sm:$0xff] %vm972_vm13, %v4699_v0 }
  0x36   : > { %1036 = vst.msk [vmem:[#allocation3 + $0x98] sm:$0x3] %vm1017_vm14, %v4699_v0  ;;  %1693 = vst.msk [vmem:[#allocation4 + $0x18] sm:$0x3] %vm1017_vm14, %v4699_v0 }
  0x37   : > { %503 = vrot.lane.b32.xlu1 %v442_v29, %s4701_s16  ;;  %1695 = vst.msk [vmem:[#allocation4 + $0x28] sm:$0xff] %vm972_vm13, %v4699_v0  ;;  %1699 = vst.msk [vmem:[#allocation4 + $0x48] sm:$0xff] %vm972_vm13, %v4699_v0 }
  0x38   : > { %619 = vrot.lane.b32.xlu0 %v4859_v17, %s4705_s22  ;;  %1697 = vst.msk [vmem:[#allocation4 + $0x38] sm:$0x3] %vm1017_vm14, %v4699_v0  ;;  %1701 = vst.msk [vmem:[#allocation4 + $0x58] sm:$0x3] %vm1017_vm14, %v4699_v0 }
  0x39   : > { %1703 = vst.msk [vmem:[#allocation4 + $0x68] sm:$0xff] %vm972_vm13, %v4699_v0  ;;  %1707 = vst.msk [vmem:[#allocation4 + $0x88] sm:$0xff] %vm972_vm13, %v4699_v0 }
  0x3a   : > { %1705 = vst.msk [vmem:[#allocation4 + $0x78] sm:$0x3] %vm1017_vm14, %v4699_v0  ;;  %1709 = vst.msk [vmem:[#allocation4 + $0x98] sm:$0x3] %vm1017_vm14, %v4699_v0 }
  0x3b   : > { %643 = vrot.lane.b32.xlu1 %v442_v29, %s4706_s27  ;;  %1711 = vst.msk [vmem:[#allocation4 + $0xa8] sm:$0xff] %vm972_vm13, %v4699_v0  ;;  %1715 = vst.msk [vmem:[#allocation4 + $0xc8] sm:$0xff] %vm972_vm13, %v4699_v0 }
  0x3c   : > { %621 = vrot.lane.b32.xlu0 %v4881_v33, %s4705_s22  ;;  %1713 = vst.msk [vmem:[#allocation4 + $0xb8] sm:$0x3] %vm1017_vm14, %v4699_v0  ;;  %1717 = vst.msk [vmem:[#allocation4 + $0xd8] sm:$0x3] %vm1017_vm14, %v4699_v0 }
  0x3d   : > { %1719 = vst.msk [vmem:[#allocation4 + $0xe8] sm:$0xff] %vm972_vm13, %v4699_v0  ;;  %1723 = vst.msk [vmem:[#allocation4 + $0x108] sm:$0xff] %vm972_vm13, %v4699_v0 }
  0x3e   : > { %1721 = vst.msk [vmem:[#allocation4 + $0xf8] sm:$0x3] %vm1017_vm14, %v4699_v0  ;;  %1725 = vst.msk [vmem:[#allocation4 + $0x118] sm:$0x3] %vm1017_vm14, %v4699_v0 }
  0x3f   : > { %527 = vrot.lane.b32.xlu1 %v467_v32, %s4700_s15  ;;  %1727 = vst.msk [vmem:[#allocation4 + $0x128] sm:$0xff] %vm972_vm13, %v4699_v0 }
  0x40   : > { %505 = vrot.lane.b32.xlu0 %v445_v40, %s4701_s16  ;;  %1729 = vst.msk [vmem:[#allocation4 + $0x138] sm:$0x3] %vm1017_vm14, %v4699_v0  ;;  %v1416_v0 = vld [vmem:[%s7534_s3 + $0x220] sm:$0xff] }
  0x43   : > { %667 = vrot.lane.b32.xlu1 %v467_v32, %s4707_s12  ;;  %v495_v32 = vsel %vm433_vm3, %v493_v27, %v494_v28 }
  0x44   : > { %645 = vrot.lane.b32.xlu0 %v445_v40, %s4706_s27 }
  0x47   : > { %551 = vrot.lane.b32.xlu1 %v4881_v33, %s4702_s17 }
  0x48   : > { %529 = vrot.lane.b32.xlu0 %v470_v44, %s4700_s15 }
  0x4b   : > { %553 = vrot.lane.b32.xlu1 %v4909_v45, %s4702_s17 }
  0x4c   : > { %669 = vrot.lane.b32.xlu0 %v470_v44, %s4707_s12 }
  0x4f   : > { %577 = vrot.lane.b32.xlu1 %v448_v49, %s4703_s18 }
  0x50   : > { %575 = vrot.lane.b32.xlu0 %v445_v40, %s4703_s18 }
  0x53   : > { %601 = vrot.lane.b32.xlu1 %v473_v52, %s4704_s19 }
  0x54   : > { %599 = vrot.lane.b32.xlu0 %v470_v44, %s4704_s19 }
  0x57   : > { %625 = vrot.lane.b32.xlu1 %v4923_v53, %s4705_s22 }
  0x58   : > { %623 = vrot.lane.b32.xlu0 %v4909_v45, %s4705_s22 }
  0x5b   : > { %649 = vrot.lane.b32.xlu1 %v451_v57, %s4706_s27 }
  0x5c   : > { %647 = vrot.lane.b32.xlu0 %v448_v49, %s4706_s27 }
  0x5f   : > { %507 = vrot.lane.b32.xlu1 %v448_v49, %s4701_s16 }
  0x60   : > { %671 = vrot.lane.b32.xlu0 %v473_v52, %s4707_s12 }
  0x63   : > { %509 = vrot.lane.b32.xlu1 %v451_v57, %s4701_s16 }
  0x64   : > { %673 = vrot.lane.b32.xlu0 %v476_v60, %s4707_s12 }
  0x67   : > { %533 = vrot.lane.b32.xlu1 %v476_v60, %s4700_s15 }
  0x68   : > { %531 = vrot.lane.b32.xlu0 %v473_v52, %s4700_s15 }
  0x6b   : > { %557 = vrot.lane.b32.xlu1 %v4941_v61, %s4702_s17 }
  0x6c   : > { %555 = vrot.lane.b32.xlu0 %v4923_v53, %s4702_s17 }
  0x6f   : > { %581 = vrot.lane.b32.xlu1 %v454_v2, %s4703_s18 }
  0x70   : > { %579 = vrot.lane.b32.xlu0 %v451_v57, %s4703_s18 }
  0x73   : > { %605 = vrot.lane.b32.xlu1 %v479_v6, %s4704_s19 }
  0x74   : > { %603 = vrot.lane.b32.xlu0 %v476_v60, %s4704_s19 }
  0x77   : > { %629 = vrot.lane.b32.xlu1 %v4955_v7, %s4705_s22 }
  0x78   : > { %627 = vrot.lane.b32.xlu0 %v4941_v61, %s4705_s22 }
  0x7b   : > { %653 = vrot.lane.b32.xlu1 %v457_v11, %s4706_s27 }
  0x7c   : > { %651 = vrot.lane.b32.xlu0 %v454_v2, %s4706_s27 }
  0x7f   : > { %511 = vrot.lane.b32.xlu1 %v454_v2, %s4701_s16 }
  0x80   : > { %675 = vrot.lane.b32.xlu0 %v479_v6, %s4707_s12 }
  0x83   : > { %513 = vrot.lane.b32.xlu1 %v457_v11, %s4701_s16 }
  0x84   : > { %677 = vrot.lane.b32.xlu0 %v482_v14, %s4707_s12 }
  0x87   : > { %537 = vrot.lane.b32.xlu1 %v482_v14, %s4700_s15 }
  0x88   : > { %535 = vrot.lane.b32.xlu0 %v479_v6, %s4700_s15 }
  0x8a   : > { %v524_v29 = vpop.permute.xlu1 %523  ;;  %v500_v30 = vpop.permute.xlu0 %499 }
  0x8b   : > { %561 = vrot.lane.b32.xlu1 %v413_v15, %s4702_s17  ;;  %v691_v47 = vsel %vm358_vm0, %v4843_v4, %v500_v30 }
  0x8c   : > { %559 = vrot.lane.b32.xlu0 %v4955_v7, %s4702_s17  ;;  %v700_v50 = vsel %vm699_vm5, %v691_v47, %v524_v29 }
  0x8f   : > { %585 = vrot.lane.b32.xlu1 %v487_v21, %s4703_s18 }
  0x90   : > { %583 = vrot.lane.b32.xlu0 %v457_v11, %s4703_s18 }
  0x93   : > { %609 = vrot.lane.b32.xlu1 %v490_v24, %s4704_s19 }
  0x94   : > { %607 = vrot.lane.b32.xlu0 %v482_v14, %s4704_s19  ;;  %s4708_s19 = smov 64  }
  0x97   : > { %633 = vrot.lane.b32.xlu1 %v415_v25, %s4705_s22 }
  0x98   : > { %631 = vrot.lane.b32.xlu0 %v413_v15, %s4705_s22 }
  0x99   : > { %v550_v35 = vpop.permute.xlu1 %549 }
  0x9a   : > { %v548_v36 = vpop.permute.xlu0 %547 }
  0x9b   : > { %657 = vrot.lane.b32.xlu1 %v495_v32, %s4706_s27  ;;  %v709_v51 = vsel %vm708_vm6, %v700_v50, %v548_v36 }
  0x9c   : > { %655 = vrot.lane.b32.xlu0 %v487_v21, %s4706_s27  ;;  %s5374_s27 = scalar_lea.vmem %s7540_s9, %s4837_s11  ;;  %s3956_s11 = sshll.u32 %s7554_s10, 4 }
  0x9d   : > { %v526_v38 = vpop.permute.xlu1 %525  ;;  %s347_s13 = scalar_lea.vmem %s7538_s7, %s3956_s11 }
  0x9e   : > { %v502_v39 = vpop.permute.xlu0 %501 }
  0x9f   : > { %681 = vrot.lane.b32.xlu1 %v498_v37, %s4707_s12  ;;  %v692_v52 = vsel %vm358_vm0, %v4861_v18, %v502_v39 }
  0xa0   : > { %679 = vrot.lane.b32.xlu0 %v490_v24, %s4707_s12  ;;  %v701_v57 = vsel %vm699_vm5, %v692_v52, %v526_v38 }
  0xa1   : > { %v574_v40 = vpop.permute.xlu1 %573  ;;  %v710_v63 = vsel %vm708_vm6, %v701_v57, %v550_v35 }
  0xa2   : > { %v572_v41 = vpop.permute.xlu0 %571  ;;  %v719_v3 = vsel %vm717_vm7, %v710_v63, %v574_v40 }
  0xa3   : > { %v718_v56 = vsel %vm717_vm7, %v709_v51, %v572_v41 }
  0xa5   : > { %v598_v42 = vpop.permute.xlu1 %597 }
  0xa6   : > { %v596_v43 = vpop.permute.xlu0 %595  ;;  %v728_v5 = vsel %vm726_vm8, %v719_v3, %v598_v42 }
  0xa7   : > { %v727_v4 = vsel %vm726_vm8, %v718_v56, %v596_v43 }
  0xa9   : > { %v504_v44 = vpop.permute.xlu1 %503 }
  0xaa   : > { %v620_v46 = vpop.permute.xlu0 %619  ;;  %v693_v20 = vsel %vm358_vm0, %v4859_v17, %v504_v44 }
  0xab   : > { %v736_v58 = vsel %vm735_vm9, %v727_v4, %v620_v46 }
  0xad   : > { %v644_v48 = vpop.permute.xlu1 %643 }
  0xae   : > { %v622_v49 = vpop.permute.xlu0 %621  ;;  %v745_v59 = vsel %vm744_vm10, %v736_v58, %v644_v48 }
  0xaf   : > { %v737_v6 = vsel %vm735_vm9, %v728_v5, %v622_v49 }
  0xb1   : > { %v528_v54 = vpop.permute.xlu1 %527 }
  0xb2   : > { %v506_v55 = vpop.permute.xlu0 %505  ;;  %v702_v21 = vsel %vm699_vm5, %v693_v20, %v528_v54 }
  0xb3   : > { %v694_v26 = vsel %vm358_vm0, %v4881_v33, %v506_v55 }
  0xb5   : > { %v668_v60 = vpop.permute.xlu1 %667 }
  0xb6   : > { %v646_v62 = vpop.permute.xlu0 %645  ;;  %v754_v18 = vsel %vm753_vm11, %v745_v59, %v668_v60 }
  0xb7   : > { %4259 = vmatprep.mubr.msk.f32.mxu1 %vm773_vm12, %v754_v18  ;;  %v746_v8 = vsel %vm744_vm10, %v737_v6, %v646_v62 }
  0xb9   : > { %v552_v1 = vpop.permute.xlu1 %551 }
  0xba   : > { %v530_v2 = vpop.permute.xlu0 %529  ;;  %v711_v22 = vsel %vm708_vm6, %v702_v21, %v552_v1  ;;  %v1419_v21 = vld [vmem:[%s7534_s3 + $0x238] sm:$0xff] }
  0xbb   : > { %v703_v28 = vsel %vm699_vm5, %v694_v26, %v530_v2  ;;  %1585 = vmatprep.subr.mxu0 %v1419_v21  ;;  %v1349_v21 = vld [vmem:[%s7534_s3 + $0x8] sm:$0xff] }
  0xbd   : > { %v554_v9 = vpop.permute.xlu1 %553 }
  0xbe   : > { %v670_v10 = vpop.permute.xlu0 %669  ;;  %v712_v30 = vsel %vm708_vm6, %v703_v28, %v554_v9  ;;  %v1413_v28 = vld [vmem:[%s7534_s3 + $0x208] sm:$0xff] }
  0xbf   : > { %v755_v11 = vsel %vm753_vm11, %v746_v8, %v670_v10 }
  0xc0   : > { %4260 = vmatmul.mubr.msk.f32.vlgmr.msra.gmra.mxu1 %vm773_vm12, %v755_v11 }
  0xc1   : > { %v578_v12 = vpop.permute.xlu1 %577 }
  0xc2   : > { %v576_v13 = vpop.permute.xlu0 %575  ;;  %v721_v34 = vsel %vm717_vm7, %v712_v30, %v578_v12 }
  0xc3   : > { %v720_v25 = vsel %vm717_vm7, %v711_v22, %v576_v13  ;;  %v1418_v22 = vld [vmem:[%s7534_s3 + $0x230] sm:$0xff] }
  0xc4   : > { %1586 = vmatpush1.msra.mxu0 %v1418_v22 }
  0xc5   : > { %v602_v14 = vpop.permute.xlu1 %601 }
  0xc6   : > { %v600_v15 = vpop.permute.xlu0 %599  ;;  %v730_v36 = vsel %vm726_vm8, %v721_v34, %v602_v14 }
  0xc7   : > { %v729_v27 = vsel %vm726_vm8, %v720_v25, %v600_v15 }
  0xc9   : > { %v626_v16 = vpop.permute.xlu1 %625 }
  0xca   : > { %v624_v19 = vpop.permute.xlu0 %623  ;;  %v739_v33 = vsel %vm735_vm9, %v730_v36, %v626_v16 }
  0xcb   : > { %v738_v29 = vsel %vm735_vm9, %v729_v27, %v624_v19  ;;  %v1414_v27 = vld [vmem:[%s7534_s3 + $0x210] sm:$0xff] }
  0xcd   : > { %v650_v23 = vpop.permute.xlu1 %649 }
  0xce   : > { %v648_v24 = vpop.permute.xlu0 %647  ;;  %v748_v37 = vsel %vm744_vm10, %v739_v33, %v650_v23  ;;  %v1417_v23 = vld [vmem:[%s7534_s3 + $0x228] sm:$0xff] }
  0xcf   : > { %v747_v17 = vsel %vm744_vm10, %v738_v29, %v648_v24  ;;  %v1415_v24 = vld [vmem:[%s7534_s3 + $0x218] sm:$0xff]  ;;  %1587 = vmatprep.subr.mxu0 %v1417_v23  ;;  %v1348_v23 = vld [vmem:[%s7534_s3] sm:$0xff] }
  0xd0   : > { %1588 = vmatpush1.msra.mxu0 %v1416_v0  ;;  %v1411_v0 = vld [vmem:[%s7534_s3 + $0x1f8] sm:$0xff] }
  0xd1   : > { %v508_v31 = vpop.permute.xlu1 %507  ;;  %1589 = vmatprep.subr.mxu0 %v1415_v24  ;;  %v1410_v24 = vld [vmem:[%s7534_s3 + $0x1f0] sm:$0xff] }
  0xd2   : > { %v672_v32 = vpop.permute.xlu0 %671  ;;  %v695_v52 = vsel %vm358_vm0, %v4909_v45, %v508_v31  ;;  %1590 = vmatpush1.msra.mxu0 %v1414_v27 }
  0xd3   : > { %v756_v35 = vsel %vm753_vm11, %v747_v17, %v672_v32  ;;  %v1412_v17 = vld [vmem:[%s7534_s3 + $0x200] sm:$0xff]  ;;  %1591 = vmatprep.subr.mxu0 %v1413_v28 }
  0xd4   : > { %4262 = vmatprep.mubr.msk.f32.mxu1 %vm773_vm12, %v756_v35  ;;  %1592 = vmatpush1.msra.mxu0 %v1412_v17  ;;  %v1408_v28 = vld [vmem:[%s7534_s3 + $0x1e0] sm:$0xff] }
  0xd5   : > { %v510_v38 = vpop.permute.xlu1 %509 }
  0xd6   : > { %v674_v39 = vpop.permute.xlu0 %673  ;;  %v696_v58 = vsel %vm358_vm0, %v4923_v53, %v510_v38 }
  0xd7   : > { %v757_v40 = vsel %vm753_vm11, %v748_v37, %v674_v39 }
  0xd8   : > { %4263 = vmatmul.mubr.msk.f32.gmra.mxu1 %vm773_vm12, %v757_v40 }
  0xd9   : > { %v534_v41 = vpop.permute.xlu1 %533 }
  0xda   : > { %v532_v42 = vpop.permute.xlu0 %531  ;;  %v705_v60 = vsel %vm699_vm5, %v696_v58, %v534_v41  ;;  %v1369_v58 = vld [vmem:[%s7534_s3 + $0xa8] sm:$0xff] }
  0xdb   : > { %v704_v54 = vsel %vm699_vm5, %v695_v52, %v532_v42  ;;  %v1375_v52 = vld [vmem:[%s7534_s3 + $0xd8] sm:$0xff] }
  0xdd   : > { %v558_v43 = vpop.permute.xlu1 %557 }
  0xde   : > { %v556_v44 = vpop.permute.xlu0 %555  ;;  %v714_v18 = vsel %vm708_vm6, %v705_v60, %v558_v43  ;;  %v1367_v60 = vld [vmem:[%s7534_s3 + $0x98] sm:$0xff] }
  0xdf   : > { %v713_v55 = vsel %vm708_vm6, %v704_v54, %v556_v44  ;;  %v1374_v54 = vld [vmem:[%s7534_s3 + $0xd0] sm:$0xff] }
  0xe1   : > { %v582_v46 = vpop.permute.xlu1 %581 }
  0xe2   : > { %v580_v47 = vpop.permute.xlu0 %579  ;;  %v723_v2 = vsel %vm717_vm7, %v714_v18, %v582_v46  ;;  %v1365_v18 = vld [vmem:[%s7534_s3 + $0x88] sm:$0xff] }
  0xe3   : > { %v722_v57 = vsel %vm717_vm7, %v713_v55, %v580_v47  ;;  %v1373_v55 = vld [vmem:[%s7534_s3 + $0xc8] sm:$0xff] }
  0xe5   : > { %v606_v48 = vpop.permute.xlu1 %605 }
  0xe6   : > { %v604_v49 = vpop.permute.xlu0 %603  ;;  %v732_v5 = vsel %vm726_vm8, %v723_v2, %v606_v48  ;;  %v1379_v48 = vld [vmem:[%s7534_s3 + $0xf8] sm:$0xff]  ;;  %v1361_v2 = vld [vmem:[%s7534_s3 + $0x68] sm:$0xff] }
  0xe7   : > { %v731_v59 = vsel %vm726_vm8, %v722_v57, %v604_v49  ;;  %1448 = vmatprep.subr.mxu1 %v1379_v48  ;;  %v1378_v49 = vld [vmem:[%s7534_s3 + $0xf0] sm:$0xff] }
  0xe8   : > { %1449 = vmatpush1.msra.mxu1 %v1378_v49  ;;  %v1370_v57 = vld [vmem:[%s7534_s3 + $0xb0] sm:$0xff] }
  0xe9   : > { %v630_v50 = vpop.permute.xlu1 %629 }
  0xea   : > { %v628_v51 = vpop.permute.xlu0 %627  ;;  %v741_v53 = vsel %vm735_vm9, %v732_v5, %v630_v50  ;;  %v1377_v50 = vld [vmem:[%s7534_s3 + $0xe8] sm:$0xff]  ;;  %v7541_v5 = vlaneseq }
  0xeb   : > { %v740_v62 = vsel %vm735_vm9, %v731_v59, %v628_v51  ;;  %1450 = vmatprep.subr.mxu1 %v1377_v50  ;;  %v1376_v51 = vld [vmem:[%s7534_s3 + $0xe0] sm:$0xff]  ;;  %v1393_v50 = vld [vmem:[%s7534_s3 + $0x168] sm:$0xff] }
  0xec   : > { %1451 = vmatpush1.msra.mxu1 %v1376_v51  ;;  %v1368_v59 = vld [vmem:[%s7534_s3 + $0xa0] sm:$0xff] }
  0xed   : > { %v654_v56 = vpop.permute.xlu1 %653  ;;  %1452 = vmatprep.subr.mxu1 %v1375_v52 }
  0xee   : > { %v652_v4 = vpop.permute.xlu0 %651  ;;  %v750_v6 = vsel %vm744_vm10, %v741_v53, %v654_v56  ;;  %1453 = vmatpush1.msra.mxu1 %v1374_v54  ;;  %v1372_v56 = vld [vmem:[%s7534_s3 + $0xc0] sm:$0xff]  ;;  %v1359_v53 = vld [vmem:[%s7534_s3 + $0x58] sm:$0xff] }
  0xef   : > { %v749_v45 = vsel %vm744_vm10, %v740_v62, %v652_v4  ;;  %1454 = vmatprep.subr.mxu1 %v1373_v55  ;;  %v1371_v4 = vld [vmem:[%s7534_s3 + $0xb8] sm:$0xff]  ;;  %v1366_v62 = vld [vmem:[%s7534_s3 + $0x90] sm:$0xff] }
  0xf0   : > { %1455 = vmatpush1.msra.mxu1 %v1372_v56 }
  0xf1   : > { %v5044_v63 = vpop.permute.xlu1 %511  ;;  %1456 = vmatprep.subr.mxu1 %v1371_v4 }
  0xf2   : > { %v676_v1 = vpop.permute.xlu0 %675  ;;  %v697_v29 = vsel %vm358_vm0, %v4941_v61, %v5044_v63  ;;  %1457 = vmatpush1.msra.mxu1 %v1370_v57  ;;  %v1363_v63 = vld [vmem:[%s7534_s3 + $0x78] sm:$0xff]  ;;  %v1392_v57 = vld [vmem:[%s7534_s3 + $0x160] sm:$0xff] }
  0xf3   : > { %v758_v3 = vsel %vm753_vm11, %v749_v45, %v676_v1  ;;  %1458 = vmatprep.subr.mxu1 %v1369_v58  ;;  %v1364_v45 = vld [vmem:[%s7534_s3 + $0x80] sm:$0xff]  ;;  %v1362_v1 = vld [vmem:[%s7534_s3 + $0x70] sm:$0xff]  ;;  %v1391_v58 = vld [vmem:[%s7534_s3 + $0x158] sm:$0xff] }
  0xf4   : > { %4265 = vmatprep.mubr.msk.f32.mxu1 %vm773_vm12, %v758_v3  ;;  %1459 = vmatpush1.msra.mxu1 %v1368_v59  ;;  %v1360_v3 = vld [vmem:[%s7534_s3 + $0x60] sm:$0xff]  ;;  %v1390_v59 = vld [vmem:[%s7534_s3 + $0x150] sm:$0xff] }
  0xf5   : > { %v5052_v8 = vpop.permute.xlu1 %513  ;;  %1460 = vmatprep.subr.mxu1 %v1367_v60 }
  0xf6   : > { %v678_v9 = vpop.permute.xlu0 %677  ;;  %v698_v30 = vsel %vm358_vm0, %v4955_v7, %v5052_v8  ;;  %1461 = vmatpush1.msra.mxu1 %v1366_v62  ;;  %v1357_v8 = vld [vmem:[%s7534_s3 + $0x48] sm:$0xff]  ;;  %vm1007_vm0 = vcmask 277768  }
  0xf7   : > { %v759_v10 = vsel %vm753_vm11, %v750_v6, %v678_v9  ;;  %1462 = vmatprep.subr.mxu1 %v1365_v18  ;;  %v1358_v6 = vld [vmem:[%s7534_s3 + $0x50] sm:$0xff]  ;;  %v1356_v9 = vld [vmem:[%s7534_s3 + $0x40] sm:$0xff] }
  0xf8   : > { %4266 = vmatmul.mubr.msk.f32.gmra.mxu1 %vm773_vm12, %v759_v10  ;;  %v5273_v10 = vshrl.u32 %v7541_v5, 7  ;;  %v2532_v5 = vld [vmem:[%s7536_s5 + $0x378] sm:$0xff] }
  0xf9   : > { %v5056_v11 = vpop.permute.xlu1 %537  ;;  %1463 = vmatpush1.msra.mxu1 %v1364_v45  ;;  %v5386_v45 = vld [vmem:[#allocation3] sm:$0xff] }
  0xfa   : > { %v5058_v12 = vpop.permute.xlu0 %535  ;;  %v707_v31 = vsel %vm699_vm5, %v698_v30, %v5056_v11  ;;  %1464 = vmatprep.subr.mxu1 %v1363_v63  ;;  %v1355_v11 = vld [vmem:[%s7534_s3 + $0x38] sm:$0xff]  ;;  %v924_v22 = vcvt.s32.f32 %v5273_v10  ;;  %v1406_v30 = vld [vmem:[%s7534_s3 + $0x1d0] sm:$0xff]  ;;  %v5361_v49 = vadd.s32 24, %v5273_v10  ;;  %v5367_v52 = vadd.s32 16, %v5273_v10  ;;  %v5388_v63 = vld [vmem:[#allocation3 + $0x8] sm:$0x3] }
  0xfb   : > { %v706_v32 = vsel %vm699_vm5, %v697_v29, %v5058_v12  ;;  %1465 = vmatpush1.msra.mxu1 %v1362_v1  ;;  %v917_v12 = vadd.s32 8, %v5273_v10  ;;  %v1407_v29 = vld [vmem:[%s7534_s3 + $0x1d8] sm:$0xff]  ;;  %vm1780_vm5 = vcmask 261121  }
  0xfc   : > { %1466 = vmatprep.subr.mxu1 %v1361_v2  ;;  %v932_v27 = vadd.f32 0.5, %v924_v22  ;;  %v927_v1 = vcvt.s32.f32 %v5361_v49 }
  0xfd   : > { %v5060_v13 = vpop.permute.xlu1 %561  ;;  %1467 = vmatpush1.msra.mxu1 %v1360_v3  ;;  %v926_v3 = vcvt.s32.f32 %v5367_v52  ;;  %v921_v52 = vadd.s32 40, %v5273_v10 }
  0xfe   : > { %v5062_v14 = vpop.permute.xlu0 %559  ;;  %v716_v34 = vsel %vm708_vm6, %v707_v31, %v5060_v13  ;;  %1468 = vmatprep.subr.mxu1 %v1359_v53  ;;  %v1354_v13 = vld [vmem:[%s7534_s3 + $0x30] sm:$0xff]  ;;  %v1405_v31 = vld [vmem:[%s7534_s3 + $0x1c8] sm:$0xff] }
  0xff   : > { %v715_v61 = vsel %vm708_vm6, %v706_v32, %v5062_v14  ;;  %1469 = vmatpush1.msra.mxu1 %v1358_v6  ;;  %v1353_v14 = vld [vmem:[%s7534_s3 + $0x28] sm:$0xff]  ;;  %v940_v32 = vmul.f32 0.125, %v932_v27  ;;  %vm1783_vm6 = vcmask 253952  }
 0x100   : > { %1470 = vmatprep.subr.mxu1 %v1357_v8  ;;  %v1389_v8 = vld [vmem:[%s7534_s3 + $0x148] sm:$0xff] }
 0x101   : > { %v5064_v15 = vpop.permute.xlu1 %585  ;;  %1471 = vmatpush1.msra.mxu1 %v1356_v9  ;;  %v1106_v9 = vrot.slane %v5386_v45, 2 }
 0x102   : > { %v5066_v16 = vpop.permute.xlu0 %583  ;;  %v725_v36 = vsel %vm717_vm7, %v716_v34, %v5064_v15  ;;  %1472 = vmatprep.subr.mxu1 %v1355_v11  ;;  %v1352_v15 = vld [vmem:[%s7534_s3 + $0x20] sm:$0xff]  ;;  %v1107_v11 = vrot.slane %v5388_v63, 2 }
 0x103   : > { %v724_v33 = vsel %vm717_vm7, %v715_v61, %v5066_v16  ;;  %1473 = vmatpush1.msra.mxu1 %v1354_v13  ;;  %v1351_v16 = vld [vmem:[%s7534_s3 + $0x18] sm:$0xff]  ;;  %v1404_v34 = vld [vmem:[%s7534_s3 + $0x1c0] sm:$0xff]  ;;  %vm3347_vm7 = vcmask 15360  }
 0x104   : > { %1474 = vmatprep.subr.mxu1 %v1353_v14  ;;  %v1403_v61 = vld [vmem:[%s7534_s3 + $0x1b8] sm:$0xff]  ;;  %v1386_v14 = vld [vmem:[%s7534_s3 + $0x130] sm:$0xff] }
 0x105   : > { %v610_v19 = vpop.permute.xlu1 %609  ;;  %1475 = vmatpush1.msra.mxu1 %v1352_v15  ;;  %v1387_v13 = vld [vmem:[%s7534_s3 + $0x138] sm:$0xff]  ;;  %v935_v15 = vadd.f32 0.5, %v927_v1 }
 0x106   : > { %v608_v20 = vpop.permute.xlu0 %607  ;;  %v734_v37 = vsel %vm726_vm8, %v725_v36, %v610_v19  ;;  %v925_v19 = vcvt.s32.f32 %v917_v12  ;;  %1476 = vmatprep.subr.mxu1 %v1351_v16  ;;  %v1401_v36 = vld [vmem:[%s7534_s3 + $0x1a8] sm:$0xff]  ;;  %v1388_v12 = vld [vmem:[%s7534_s3 + $0x140] sm:$0xff]  ;;  %v934_v16 = vadd.f32 0.5, %v926_v3 }
 0x107   : > { %v733_v38 = vsel %vm726_vm8, %v724_v33, %v608_v20  ;;  %v1350_v20 = vld [vmem:[%s7534_s3 + $0x10] sm:$0xff]  ;;  %v1400_v33 = vld [vmem:[%s7534_s3 + $0x1a0] sm:$0xff] }
 0x108   : > { %1477 = vmatpush1.msra.mxu1 %v1350_v20  ;;  %v1108_v20 = vsel %vm458_vm2, %v1106_v9, %v1107_v11 }
 0x109   : > { %v634_v25 = vpop.permute.xlu1 %633  ;;  %1478 = vmatprep.subr.mxu1 %v1349_v21  ;;  %v1384_v21 = vld [vmem:[%s7534_s3 + $0x120] sm:$0xff] }
 0x10a   : > { %v632_v26 = vpop.permute.xlu0 %631  ;;  %v743_v39 = vsel %vm735_vm9, %v734_v37, %v634_v25  ;;  %v933_v25 = vadd.f32 0.5, %v925_v19  ;;  %1479 = vmatpush1.msra.mxu1 %v1348_v23  ;;  %v948_v37 = vfloor.f32 %v940_v32  ;;  %v1383_v23 = vld [vmem:[%s7534_s3 + $0x118] sm:$0xff] }
 0x10b   : > { %v742_v40 = vsel %vm735_vm9, %v733_v38, %v632_v26  ;;  %v1409_v26 = vld [vmem:[%s7534_s3 + $0x1e8] sm:$0xff]  ;;  %1480 = vmatprep.subr.mxu1 %v1411_v0  ;;  %v1399_v38 = vld [vmem:[%s7534_s3 + $0x198] sm:$0xff] }
 0x10c   : > { %1481 = vmatpush2.msra.mxu1 %v1410_v24  ;;  %v941_v17 = vmul.f32 0.125, %v933_v25  ;;  %v982_v2 = vmul.f32 0.14285715, %v948_v37  ;;  %v942_v25 = vmul.f32 0.125, %v934_v16 }
 0x10d   : > { %v658_v35 = vpop.permute.xlu1 %657  ;;  %1482 = vmatprep.subr.mxu1 %v1409_v26  ;;  %v1382_v26 = vld [vmem:[%s7534_s3 + $0x110] sm:$0xff] }
 0x10e   : > { %v656_v7 = vpop.permute.xlu0 %655  ;;  %v752_v41 = vsel %vm744_vm10, %v743_v39, %v658_v35  ;;  %1483 = vmatpush2.msra.mxu1 %v1408_v28  ;;  %v1402_v35 = vld [vmem:[%s7534_s3 + $0x1b0] sm:$0xff] }
 0x10f   : > { %v751_v42 = vsel %vm744_vm10, %v742_v40, %v656_v7  ;;  %1484 = vmatprep.subr.mxu1 %v1407_v29  ;;  %v949_v7 = vfloor.f32 %v941_v17  ;;  %v1398_v39 = vld [vmem:[%s7534_s3 + $0x190] sm:$0xff]  ;;  %v1381_v17 = vld [vmem:[%s7534_s3 + $0x108] sm:$0xff] }
 0x110   : > { %1485 = vmatpush2.msra.mxu1 %v1406_v30 }
 0x111   : > { %v682_v43 = vpop.permute.xlu1 %681  ;;  %1486 = vmatprep.subr.mxu1 %v1405_v31  ;;  %v957_v40 = vmul.f32 8.0, %v949_v7  ;;  %v983_v56 = vmul.f32 0.14285715, %v949_v7  ;;  %v1380_v31 = vld [vmem:[%s7534_s3 + $0x100] sm:$0xff]  ;;  %v1083_v7 = vrot.slane %v5388_v63, 1  ;;  %v920_v63 = vadd.s32 32, %v5273_v10 }
 0x112   : > { %v680_v44 = vpop.permute.xlu0 %679  ;;  %v761_v46 = vsel %vm753_vm11, %v752_v41, %v682_v43  ;;  %1487 = vmatpush2.msra.mxu1 %v1404_v34  ;;  %v1397_v41 = vld [vmem:[%s7534_s3 + $0x188] sm:$0xff]  ;;  %v956_v43 = vmul.f32 8.0, %v948_v37 }
 0x113   : > { %v760_v47 = vsel %vm753_vm11, %v751_v42, %v680_v44  ;;  %1488 = vmatprep.subr.mxu1 %v1403_v61  ;;  %v1396_v42 = vld [vmem:[%s7534_s3 + $0x180] sm:$0xff]  ;;  %v1395_v44 = vld [vmem:[%s7534_s3 + $0x178] sm:$0xff]  ;;  %v965_v48 = vsub.f32 %v925_v19, %v957_v40  ;;  %v1385_v19 = vld [vmem:[%s7534_s3 + $0x128] sm:$0xff] }
 0x114   : > { %4268 = vmatprep.mubr.msk.f32.mxu1 %vm773_vm12, %v760_v47  ;;  %1489 = vmatpush2.msra.mxu1 %v1402_v35  ;;  %v1394_v47 = vld [vmem:[%s7534_s3 + $0x170] sm:$0xff]  ;;  %v964_v55 = vsub.f32 %v924_v22, %v956_v43  ;;  %v943_v22 = vmul.f32 0.125, %v935_v15  ;;  %v1082_v35 = vrot.slane %v5386_v45, 1 }
 0x115   : > { %4269 = vmatmul.mubr.msk.f32.gmra.mxu1 %vm773_vm12, %v761_v46  ;;  %1490 = vmatprep.subr.mxu1 %v1401_v36  ;;  %v5355_v46 = vld [vmem:[%s7533_s2] ss:$0 sm:$0xff]  ;;  %v1000_v62 = vmul.f32 0.14285715, %v965_v48 }
 0x116   : > { %1491 = vmatpush2.msra.mxu1 %v1400_v33  ;;  %v999_v6 = vmul.f32 0.14285715, %v964_v55  ;;  %v1084_v43 = vsel %vm433_vm3, %v1082_v35, %v1083_v7 }
 0x117   : > { %1492 = vmatprep.subr.mxu1 %v1399_v38  ;;  %v951_v38 = vfloor.f32 %v943_v22 }
 0x118   : > { %1493 = vmatpush2.msra.mxu1 %v1398_v39 }
 0x119   : > { %1494 = vmatprep.subr.mxu1 %v1397_v41  ;;  %v950_v41 = vfloor.f32 %v942_v25 }
 0x11a   : > { %1495 = vmatpush2.msra.mxu1 %v1396_v42  ;;  %v5464_v42 = vld [vmem:[#allocation4] sm:$0xff] }
 0x11b   : > { %1496 = vmatprep.subr.mxu1 %v1395_v44 }
 0x11c   : > { %1497 = vmatpush2.msra.mxu1 %v1394_v47  ;;  %v959_v47 = vmul.f32 8.0, %v951_v38 }
 0x11d   : > { %1498 = vmatprep.subr.mxu1 %v1393_v50  ;;  %v958_v50 = vmul.f32 8.0, %v950_v41 }
 0x11e   : > { %1499 = vmatpush2.msra.mxu1 %v1392_v57 }
 0x11f   : > { %1500 = vmatprep.subr.mxu1 %v1391_v58 }
 0x120   : > { %1501 = vmatpush2.msra.mxu1 %v1390_v59 }
 0x121   : > { %1502 = vmatprep.subr.mxu1 %v1389_v8  ;;  %v928_v8 = vcvt.s32.f32 %v920_v63 }
 0x122   : > { %1503 = vmatpush2.msra.mxu1 %v1388_v12 }
 0x123   : > { %1504 = vmatprep.subr.mxu1 %v1387_v13 }
 0x124   : > { %1505 = vmatpush2.msra.mxu1 %v1386_v14 }
 0x125   : > { %1506 = vmatprep.subr.mxu1 %v1385_v19 }
 0x126   : > { %1507 = vmatpush2.msra.mxu1 %v1384_v21 }
 0x127   : > { %1508 = vmatprep.subr.mxu1 %v1383_v23  ;;  %v936_v23 = vadd.f32 0.5, %v928_v8 }
 0x128   : > { %1509 = vmatpush2.msra.mxu1 %v1382_v26 }
 0x129   : > { %1510 = vmatprep.subr.mxu1 %v1381_v17  ;;  %v944_v17 = vmul.f32 0.125, %v936_v23 }
 0x12a   : > { %1511 = vmatpush2.msra.mxu1 %v1380_v31 }
 0x180   : > { %v4261_v51 = vpop.f32.mrf.mxu1 }
 0x181   : > { %v874_v54 = vadd.f32 %v4261_v51, %v5355_v46  ;;  %v967_v51 = vsub.f32 %v927_v1, %v959_v47 }
 0x182   : > { %v868_v4 = vpop.f32.mrf.mxu1 }
 0x183   : > { %v908_v60 = vmax.f32 %v874_v54, 0.0  ;;  %v869_v18 = vadd.f32 %v5355_v46, %v868_v4  ;;  %v985_v4 = vmul.f32 0.14285715, %v951_v38  ;;  %v1002_v59 = vmul.f32 0.14285715, %v967_v51 }
 0x185   : > { %974 = vst.msk [vmem:[%s5374_s27 + $0x8] sm:$0xff] %vm972_vm13, %v908_v60  ;;  %1039 = vst.msk [vmem:[#allocation3 + $0x21] sm:$0xff] %vm972_vm13, %v908_v60  ;;  %v907_v53 = vmax.f32 %v869_v18, 0.0 }
 0x186   : > { %992 = vst.msk [vmem:[%s5374_s27 + $0x8] sm:$0xff] %vm990_vm15, %v983_v56  ;;  %v966_v56 = vsub.f32 %v926_v3, %v958_v50  ;;  %v929_v3 = vcvt.s32.f32 %v921_v52  ;;  %v923_v50 = vadd.s32 56, %v5273_v10 }
 0x187   : > { %1009 = vst.msk [vmem:[%s5374_s27 + $0x8] sm:$0xff] %vm1007_vm0, %v1000_v62  ;;  %v984_v62 = vmul.f32 0.14285715, %v950_v41 }
 0x188   : > { %973 = vst.msk [vmem:[%s5374_s27] sm:$0xff] %vm972_vm13, %v907_v53  ;;  %1038 = vst.msk [vmem:[#allocation3 + $0x11] sm:$0xff] %vm972_vm13, %v907_v53  ;;  %v1001_v18 = vmul.f32 0.14285715, %v966_v56  ;;  %v937_v21 = vadd.f32 0.5, %v929_v3  ;;  %v931_v56 = vcvt.s32.f32 %v923_v50 }
 0x189   : > { %991 = vst.msk [vmem:[%s5374_s27] sm:$0xff] %vm990_vm15, %v982_v2 }
 0x18a   : > { %1008 = vst.msk [vmem:[%s5374_s27] sm:$0xff] %vm1007_vm0, %v999_v6 }
 0x18c   : > { %v5434_v0 = vld [vmem:[#allocation3 + $0x20] sm:$0xff]  ;;  %v1051_v24 = vld [vmem:[#allocation3 + $0x28] sm:$0x3] }
 0x18d   : > { %v4292_v27 = vpack.i.bf16 %v1108_v20, %v5434_v0  ;;  %v1089_v28 = vrot.slane %v1051_v24, 1  ;;  %v1112_v29 = vrot.slane %v5434_v0, 2  ;;  %v1113_v30 = vrot.slane %v1051_v24, 2 }
 0x18e   : > { %v1088_v34 = vrot.slane %v5434_v0, 1 }
 0x18f   : > { %v5447_v32 = vld [vmem:[#allocation3 + $0x10] sm:$0xff]  ;;  %v1049_v61 = vld [vmem:[#allocation3 + $0x18] sm:$0x3]  ;;  %4293 = vrot.lane.b32.xlu1 %v4292_v27, %s4708_s19  ;;  %v5454_v36 = vsel %vm458_vm2, %v1112_v29, %v1113_v30  ;;  %v945_v29 = vmul.f32 0.125, %v937_v21 }
 0x190   : > { %v1109_v33 = vrot.slane %v5447_v32, 2  ;;  %v1110_v37 = vrot.slane %v1049_v61, 2  ;;  %3912 = vmatmul.mubr.msk.f32.vlgmr.msra.gmra.mxu0 %vm972_vm13, %v5454_v36  ;;  %v5460_v39 = vsel %vm433_vm3, %v1088_v34, %v1089_v28  ;;  %v1085_v1 = vrot.slane %v5447_v32, 1 }
 0x191   : > { %v4297_v40 = vpack.i.bf16 %v5447_v32, %v5460_v39  ;;  %1631 = vmatprep.mubr.f32.mxu0 %v5464_v42  ;;  %v1086_v2 = vrot.slane %v1049_v61, 1  ;;  %v953_v34 = vfloor.f32 %v945_v29  ;;  %v952_v61 = vfloor.f32 %v944_v17 }
 0x192   : > { %v1111_v44 = vsel %vm458_vm2, %v1109_v33, %v1110_v37 }
 0x193   : > { %4298 = vrot.lane.b32.xlu0 %v4297_v40, %s4709_s20  ;;  %v4307_v48 = vpack.i.bf16 %v1084_v43, %v1111_v44  ;;  %v5504_v15 = vsel %vm433_vm3, %v1085_v1, %v1086_v2  ;;  %v961_v35 = vmul.f32 8.0, %v953_v34  ;;  %v960_v7 = vmul.f32 8.0, %v952_v61 }
 0x194   : > { %v4312_v25 = vpack.i.bf16 %v5504_v15, %v5454_v36  ;;  %v987_v40 = vmul.f32 0.14285715, %v953_v34 }
 0x195   : > { %v968_v38 = vsub.f32 %v928_v8, %v960_v7 }
 0x197   : > { %4308 = vrot.lane.b32.xlu0 %v4307_v48, %s4710_s21  ;;  %v986_v48 = vmul.f32 0.14285715, %v952_v61 }
 0x198   : > { %v4264_v54 = vpop.f32.mrf.mxu1 }
 0x199   : > { %v884_v55 = vadd.f32 %v4264_v54, %v5355_v46  ;;  %v1003_v54 = vmul.f32 0.14285715, %v968_v38 }
 0x19a   : > { %v878_v57 = vpop.f32.mrf.mxu1 }
 0x19b   : > { %v910_v58 = vmax.f32 %v884_v55, 0.0  ;;  %v879_v60 = vadd.f32 %v5355_v46, %v878_v57  ;;  %v922_v55 = vadd.s32 48, %v5273_v10 }
 0x19d   : > { %976 = vst.msk [vmem:[%s5374_s27 + $0x18] sm:$0xff] %vm972_vm13, %v910_v58  ;;  %1041 = vst.msk [vmem:[#allocation3 + $0x41] sm:$0xff] %vm972_vm13, %v910_v58  ;;  %v909_v49 = vmax.f32 %v879_v60, 0.0  ;;  %v930_v58 = vcvt.s32.f32 %v922_v55 }
 0x19e   : > { %994 = vst.msk [vmem:[%s5374_s27 + $0x18] sm:$0xff] %vm990_vm15, %v985_v4 }
 0x19f   : > { %1011 = vst.msk [vmem:[%s5374_s27 + $0x18] sm:$0xff] %vm1007_vm0, %v1002_v59 }
 0x1a0   : > { %975 = vst.msk [vmem:[%s5374_s27 + $0x10] sm:$0xff] %vm972_vm13, %v909_v49  ;;  %1040 = vst.msk [vmem:[#allocation3 + $0x31] sm:$0xff] %vm972_vm13, %v909_v49 }
 0x1a1   : > { %993 = vst.msk [vmem:[%s5374_s27 + $0x10] sm:$0xff] %vm990_vm15, %v984_v62  ;;  %v939_v62 = vadd.f32 0.5, %v931_v56 }
 0x1a2   : > { %1010 = vst.msk [vmem:[%s5374_s27 + $0x10] sm:$0xff] %vm1007_vm0, %v1001_v18 }
 0x1a4   : > { %v5494_v53 = vld [vmem:[#allocation3 + $0x40] sm:$0xff]  ;;  %v1055_v6 = vld [vmem:[#allocation3 + $0x48] sm:$0x3] }
 0x1a5   : > { %v4302_v9 = vpack.i.bf16 %v5454_v36, %v5494_v53  ;;  %v1094_v11 = vrot.slane %v5494_v53, 1  ;;  %v1095_v12 = vrot.slane %v1055_v6, 1  ;;  %v1118_v26 = vrot.slane %v5494_v53, 2 }
 0x1a6   : > { %v1119_v27 = vrot.slane %v1055_v6, 2  ;;  %v969_v36 = vsub.f32 %v929_v3, %v961_v35  ;;  %v938_v3 = vadd.f32 0.5, %v930_v58 }
 0x1a7   : > { %v5499_v13 = vld [vmem:[#allocation3 + $0x30] sm:$0xff]  ;;  %v5501_v14 = vld [vmem:[#allocation3 + $0x38] sm:$0x3]  ;;  %4303 = vrot.lane.b32.xlu1 %v4302_v9, %s4708_s19  ;;  %v5511_v22 = vsel %vm433_vm3, %v1094_v11, %v1095_v12  ;;  %v947_v12 = vmul.f32 0.125, %v939_v62 }
 0x1a8   : > { %v4317_v16 = vpack.i.bf16 %v1111_v44, %v5499_v13  ;;  %v1115_v19 = vrot.slane %v5499_v13, 2  ;;  %v1116_v20 = vrot.slane %v5501_v14, 2  ;;  %v4322_v28 = vpack.i.bf16 %v5499_v13, %v5511_v22 }
 0x1a9   : > { %v5525_v30 = vsel %vm458_vm2, %v1118_v26, %v1119_v27  ;;  %v1004_v44 = vmul.f32 0.14285715, %v969_v36  ;;  %v1092_v4 = vrot.slane %v5501_v14, 1  ;;  %v1091_v57 = vrot.slane %v5499_v13, 1 }
 0x1aa   : > { %4318 = vrot.lane.b32.xlu0 %v4317_v16, %s4708_s19  ;;  %v1117_v24 = vsel %vm458_vm2, %v1115_v19, %v1116_v20  ;;  %v955_v26 = vfloor.f32 %v947_v12 }
 0x1ab   : > { %3913 = vmatmul.mubr.msk.f32.gmra.mxu0 %vm972_vm13, %v1117_v24  ;;  %4313 = vrot.lane.b32.xlu1 %v4312_v25, %s4710_s21  ;;  %v4337_v31 = vpack.i.bf16 %v5460_v39, %v1117_v24  ;;  %v5560_v2 = vsel %vm433_vm3, %v1091_v57, %v1092_v4 }
 0x1ac   : > { %1637 = vmatprep.mubr.f32.mxu0 %v5464_v42  ;;  %v4332_v16 = vpack.i.bf16 %v5434_v0, %v5560_v2  ;;  %v963_v34 = vmul.f32 8.0, %v955_v26  ;;  %v989_v38 = vmul.f32 0.14285715, %v955_v26 }
 0x1ae   : > { %4323 = vrot.lane.b32.xlu0 %v4322_v28, %s4709_s20  ;;  %v4342_v28 = vpack.i.bf16 %v5560_v2, %v5525_v30  ;;  %v971_v35 = vsub.f32 %v931_v56, %v963_v34 }
 0x1af   : > { %3914 = vmatmul.mubr.msk.f32.gmra.mxu0 %vm972_vm13, %v5525_v30 }
 0x1b0   : > { %1643 = vmatprep.mubr.f32.mxu0 %v5464_v42 }
 0x1b2   : > { %4338 = vrot.lane.b32.xlu0 %v4337_v31, %s4710_s21 }
 0x1b8   : > { %v4267_v33 = vpop.f32.mrf.mxu1 }
 0x1b9   : > { %v894_v37 = vadd.f32 %v4267_v33, %v5355_v46 }
 0x1ba   : > { %v888_v41 = vpop.f32.mrf.mxu1 }
 0x1bb   : > { %v912_v43 = vmax.f32 %v894_v37, 0.0  ;;  %v889_v47 = vadd.f32 %v5355_v46, %v888_v41 }
 0x1bd   : > { %978 = vst.msk [vmem:[%s5374_s27 + $0x28] sm:$0xff] %vm972_vm13, %v912_v43  ;;  %1043 = vst.msk [vmem:[#allocation3 + $0x61] sm:$0xff] %vm972_vm13, %v912_v43  ;;  %v911_v51 = vmax.f32 %v889_v47, 0.0  ;;  %v1006_v43 = vmul.f32 0.14285715, %v971_v35 }
 0x1be   : > { %996 = vst.msk [vmem:[%s5374_s27 + $0x28] sm:$0xff] %vm990_vm15, %v987_v40 }
 0x1bf   : > { %1013 = vst.msk [vmem:[%s5374_s27 + $0x28] sm:$0xff] %vm1007_vm0, %v1004_v44 }
 0x1c0   : > { %977 = vst.msk [vmem:[%s5374_s27 + $0x20] sm:$0xff] %vm972_vm13, %v911_v51  ;;  %1042 = vst.msk [vmem:[#allocation3 + $0x51] sm:$0xff] %vm972_vm13, %v911_v51 }
 0x1c1   : > { %995 = vst.msk [vmem:[%s5374_s27 + $0x20] sm:$0xff] %vm990_vm15, %v986_v48 }
 0x1c2   : > { %1012 = vst.msk [vmem:[%s5374_s27 + $0x20] sm:$0xff] %vm1007_vm0, %v1003_v54 }
 0x1c4   : > { %v5552_v59 = vld [vmem:[#allocation3 + $0x60] sm:$0xff]  ;;  %v1059_v60 = vld [vmem:[#allocation3 + $0x68] sm:$0x3] }
 0x1c5   : > { %v4327_v49 = vpack.i.bf16 %v5525_v30, %v5552_v59  ;;  %v1100_v18 = vrot.slane %v5552_v59, 1  ;;  %v1101_v52 = vrot.slane %v1059_v60, 1  ;;  %v1124_v19 = vrot.slane %v5552_v59, 2 }
 0x1c6   : > { %v1125_v20 = vrot.slane %v1059_v60, 2 }
 0x1c7   : > { %v5557_v63 = vld [vmem:[#allocation3 + $0x50] sm:$0xff]  ;;  %v1057_v1 = vld [vmem:[#allocation3 + $0x58] sm:$0x3]  ;;  %4328 = vrot.lane.b32.xlu1 %v4327_v49, %s4708_s19  ;;  %v5566_v11 = vsel %vm433_vm3, %v1100_v18, %v1101_v52 }
 0x1c8   : > { %v4347_v6 = vpack.i.bf16 %v1117_v24, %v5557_v63  ;;  %v1121_v8 = vrot.slane %v5557_v63, 2  ;;  %v1122_v9 = vrot.slane %v1057_v1, 2  ;;  %v1098_v21 = vrot.slane %v1057_v1, 1 }
 0x1c9   : > { %v1097_v23 = vrot.slane %v5557_v63, 1  ;;  %v946_v24 = vmul.f32 0.125, %v938_v3  ;;  %v4352_v25 = vpack.i.bf16 %v5557_v63, %v5566_v11  ;;  %v5581_v27 = vsel %vm458_vm2, %v1124_v19, %v1125_v20 }
 0x1ca   : > { %4348 = vrot.lane.b32.xlu0 %v4347_v6, %s4708_s19  ;;  %v1123_v14 = vsel %vm458_vm2, %v1121_v8, %v1122_v9 }
 0x1cb   : > { %3915 = vmatmul.mubr.msk.f32.gmra.mxu0 %vm972_vm13, %v1123_v14  ;;  %4333 = vrot.lane.b32.xlu1 %v4332_v16, %s4709_s20  ;;  %v5588_v29 = vsel %vm433_vm3, %v1097_v23, %v1098_v21  ;;  %v954_v17 = vfloor.f32 %v946_v24  ;;  %v4362_v31 = vpack.i.bf16 %v5511_v22, %v1123_v14  ;;  %v1065_v16 = vld [vmem:[#allocation3 + $0x98] sm:$0x3] }
 0x1cc   : > { %1649 = vmatprep.mubr.f32.mxu0 %v5464_v42  ;;  %v4357_v30 = vpack.i.bf16 %v5494_v53, %v5588_v29  ;;  %v4367_v36 = vpack.i.bf16 %v5588_v29, %v5581_v27  ;;  %v1152_v23 = vrot.slane %v1065_v16, 2 }
 0x1cd   : > { %v962_v61 = vmul.f32 8.0, %v954_v17  ;;  %v988_v47 = vmul.f32 0.14285715, %v954_v17 }
 0x1ce   : > { %4353 = vrot.lane.b32.xlu0 %v4352_v25, %s4709_s20  ;;  %v1149_v25 = vrot.slane %v1065_v16, 1 }
 0x1cf   : > { %3916 = vmatmul.mubr.msk.f32.gmra.mxu0 %vm972_vm13, %v5581_v27  ;;  %4343 = vrot.lane.b32.xlu1 %v4342_v28, %s4710_s21  ;;  %v970_v37 = vsub.f32 %v930_v58, %v962_v61 }
 0x1d0   : > { %1655 = vmatprep.mubr.f32.mxu0 %v5464_v42 }
 0x1d1   : > { %v1005_v50 = vmul.f32 0.14285715, %v970_v37 }
 0x1d2   : > { %4363 = vrot.lane.b32.xlu0 %v4362_v31, %s4710_s21 }
 0x1d3   : > { %4358 = vrot.lane.b32.xlu1 %v4357_v30, %s4709_s20 }
 0x1d5   : > { %v4270_v7 = vpop.f32.mrf.mxu1 }
 0x1d6   : > { %v904_v33 = vadd.f32 %v4270_v7, %v5355_v46 }
 0x1d7   : > { %4368 = vrot.lane.b32.xlu1 %v4367_v36, %s4710_s21  ;;  %v898_v40 = vpop.f32.mrf.mxu1 }
 0x1d8   : > { %v914_v41 = vmax.f32 %v904_v33, 0.0  ;;  %v899_v44 = vadd.f32 %v5355_v46, %v898_v40 }
 0x1da   : > { %980 = vst.msk [vmem:[%s5374_s27 + $0x38] sm:$0xff] %vm972_vm13, %v914_v41  ;;  %1045 = vst.msk [vmem:[#allocation3 + $0x81] sm:$0xff] %vm972_vm13, %v914_v41  ;;  %v913_v48 = vmax.f32 %v899_v44, 0.0 }
 0x1db   : > { %998 = vst.msk [vmem:[%s5374_s27 + $0x38] sm:$0xff] %vm990_vm15, %v989_v38 }
 0x1dc   : > { %1015 = vst.msk [vmem:[%s5374_s27 + $0x38] sm:$0xff] %vm1007_vm0, %v1006_v43 }
 0x1dd   : > { %979 = vst.msk [vmem:[%s5374_s27 + $0x30] sm:$0xff] %vm972_vm13, %v913_v48  ;;  %1044 = vst.msk [vmem:[#allocation3 + $0x71] sm:$0xff] %vm972_vm13, %v913_v48 }
 0x1de   : > { %997 = vst.msk [vmem:[%s5374_s27 + $0x30] sm:$0xff] %vm990_vm15, %v988_v47 }
 0x1df   : > { %1014 = vst.msk [vmem:[%s5374_s27 + $0x30] sm:$0xff] %vm1007_vm0, %v1005_v50 }
 0x1e1   : > { %v1062_v46 = vld [vmem:[#allocation3 + $0x80] sm:$0xff]  ;;  %v1063_v51 = vld [vmem:[#allocation3 + $0x88] sm:$0x3] }
 0x1e2   : > { %v1132_v62 = vrot.slane %v1062_v46, 1  ;;  %v1133_v49 = vrot.slane %v1063_v51, 1  ;;  %v1143_v52 = vrot.slane %v1062_v46, 2  ;;  %v1144_v1 = vrot.slane %v1063_v51, 2 }
 0x1e3   : > { %v4382_v19 = vpack.i.bf16 %v5581_v27, %v1062_v46 }
 0x1e4   : > { %v5616_v54 = vld [vmem:[#allocation3 + $0x70] sm:$0xff]  ;;  %v1061_v55 = vld [vmem:[#allocation3 + $0x78] sm:$0x3]  ;;  %v5632_v9 = vsel %vm433_vm3, %v1132_v62, %v1133_v49  ;;  %v1145_v12 = vsel %vm458_vm2, %v1143_v52, %v1144_v1 }
 0x1e5   : > { %v4372_v56 = vpack.i.bf16 %v1123_v14, %v5616_v54  ;;  %v1104_v4 = vrot.slane %v1061_v55, 1  ;;  %v1127_v57 = vrot.slane %v5616_v54, 2  ;;  %v1128_v58 = vrot.slane %v1061_v55, 2  ;;  %v1064_v14 = vld [vmem:[#allocation3 + $0x90] sm:$0xff] }
 0x1e6   : > { %v1103_v60 = vrot.slane %v5616_v54, 1  ;;  %v4392_v20 = vpack.i.bf16 %v5616_v54, %v5632_v9  ;;  %v1151_v21 = vrot.slane %v1064_v14, 2  ;;  %v1148_v24 = vrot.slane %v1064_v14, 1 }
 0x1e7   : > { %4373 = vrot.lane.b32.xlu0 %v4372_v56, %s4708_s19  ;;  %v1129_v18 = vsel %vm458_vm2, %v1127_v57, %v1128_v58 }
 0x1e8   : > { %3917 = vmatmul.mubr.msk.f32.gmra.mxu0 %vm972_vm13, %v1129_v18  ;;  %v5625_v3 = vsel %vm433_vm3, %v1103_v60, %v1104_v4  ;;  %v4387_v6 = vpack.i.bf16 %v5566_v11, %v1129_v18  ;;  %v1153_v26 = vsel %vm458_vm2, %v1151_v21, %v1152_v23  ;;  %v4402_v27 = vpack.i.bf16 %v1129_v18, %v1064_v14 }
 0x1e9   : > { %v4377_v8 = vpack.i.bf16 %v5552_v59, %v5625_v3  ;;  %1661 = vmatprep.mubr.f32.mxu0 %v5464_v42  ;;  %v4397_v28 = vpack.i.bf16 %v5625_v3, %v1145_v12  ;;  %v1150_v17 = vsel %vm433_vm3, %v1148_v24, %v1149_v25 }
 0x1ea   : > { %v4407_v31 = vpack.i.bf16 %v1062_v46, %v1150_v17 }
 0x1eb   : > { %4378 = vrot.lane.b32.xlu1 %v4377_v8, %s4709_s20  ;;  %4388 = vrot.lane.b32.xlu0 %v4387_v6, %s4710_s21 }
 0x1ec   : > { %3918 = vmatmul.mubr.msk.f32.gmra.mxu0 %vm972_vm13, %v1145_v12 }
 0x1ed   : > { %1667 = vmatprep.mubr.f32.mxu0 %v5464_v42 }
 0x1ef   : > { %4383 = vrot.lane.b32.xlu1 %v4382_v19, %s4708_s19  ;;  %4393 = vrot.lane.b32.xlu0 %v4392_v20, %s4709_s20 }
 0x1f0   : > { %3919 = vmatmul.mubr.msk.f32.gmra.mxu0 %vm972_vm13, %v1153_v26 }
 0x1f3   : > { %4398 = vrot.lane.b32.xlu1 %v4397_v28, %s4710_s21  ;;  %4403 = vrot.lane.b32.xlu0 %v4402_v27, %s4708_s19 }
 0x1f7   : > { %4408 = vrot.lane.b32.xlu1 %v4407_v31, %s4709_s20 }
 0x201   : > { %v4294_v30 = vpop.permute.xlu1 %4293 }
 0x202   : > { %v4296_v36 = vunpack.i.h.bf16 %v4294_v30  ;;  %v4295_v33 = vunpack.i.l.bf16 %v4294_v30 }
 0x205   : > { %v4299_v34 = vpop.permute.xlu0 %4298 }
 0x206   : > { %v4301_v37 = vunpack.i.h.bf16 %v4299_v34  ;;  %v4300_v38 = vunpack.i.l.bf16 %v4299_v34 }
 0x209   : > { %v4309_v61 = vpop.permute.xlu0 %4308 }
 0x20a   : > { %v4311_v35 = vunpack.i.h.bf16 %v4309_v61  ;;  %v4310_v7 = vunpack.i.l.bf16 %v4309_v61 }
 0x20c   : > { %v1298_v40 = vsel %vm972_vm13, %v5386_v45, %v4311_v35  ;;  %v1324_v41 = vsel %vm972_vm13, %v5504_v15, %v4310_v7 }
 0x20d   : > { %v1332_v43 = vsel %vm1306_vm1, %v1324_v41, %v4295_v33  ;;  %v1307_v44 = vsel %vm1306_vm1, %v1298_v40, %v4296_v36 }
 0x20e   : > { %v1340_v47 = vsel %vm1315_vm4, %v1332_v43, %v4300_v38  ;;  %v1316_v48 = vsel %vm1315_vm4, %v1307_v44, %v4301_v37 }
 0x20f   : > { %1512 = vmatprep.mubr.f32.mxu1 %v1340_v47 }
 0x210   : > { %1513 = vmatmul.mubr.f32.vlgmr.msra.gmra.mxu1 %v1316_v48 }
 0x219   : > { %v4304_v46 = vpop.permute.xlu1 %4303 }
 0x21a   : > { %v4305_v52 = vunpack.i.l.bf16 %v4304_v46 }
 0x21c   : > { %v4319_v50 = vpop.permute.xlu0 %4318 }
 0x21d   : > { %v4314_v55 = vpop.permute.xlu1 %4313  ;;  %v4321_v1 = vunpack.i.h.bf16 %v4319_v50  ;;  %v4320_v6 = vunpack.i.l.bf16 %v4319_v50 }
 0x21e   : > { %v4316_v4 = vunpack.i.h.bf16 %v4314_v55  ;;  %v4315_v45 = vunpack.i.l.bf16 %v4314_v55 }
 0x220   : > { %v4324_v51 = vpop.permute.xlu0 %4323  ;;  %v1325_v62 = vsel %vm972_vm13, %v5460_v39, %v4315_v45  ;;  %v1299_v49 = vsel %vm972_vm13, %v5447_v32, %v4316_v4  ;;  %v4306_v32 = vunpack.i.h.bf16 %v4304_v46 }
 0x221   : > { %v1333_v19 = vsel %vm1306_vm1, %v1325_v62, %v4320_v6  ;;  %v1308_v20 = vsel %vm1306_vm1, %v1299_v49, %v4321_v1  ;;  %v4325_v23 = vunpack.i.l.bf16 %v4324_v51  ;;  %v4326_v31 = vunpack.i.h.bf16 %v4324_v51 }
 0x224   : > { %v4339_v56 = vpop.permute.xlu0 %4338 }
 0x225   : > { %v4340_v57 = vunpack.i.l.bf16 %v4339_v56  ;;  %v4341_v15 = vunpack.i.h.bf16 %v4339_v56 }
 0x227   : > { %v1326_v18 = vsel %vm972_vm13, %v5560_v2, %v4340_v57  ;;  %v1300_v39 = vsel %vm972_vm13, %v5434_v0, %v4341_v15 }
 0x228   : > { %v1334_v21 = vsel %vm1306_vm1, %v1326_v18, %v4305_v52  ;;  %v1309_v17 = vsel %vm1306_vm1, %v1300_v39, %v4306_v32 }
 0x229   : > { %v1342_v27 = vsel %vm1315_vm4, %v1334_v21, %v4325_v23  ;;  %v1318_v38 = vsel %vm1315_vm4, %v1309_v17, %v4326_v31 }
 0x239   : > { %v4329_v58 = vpop.permute.xlu1 %4328 }
 0x23a   : > { %v4330_v7 = vunpack.i.l.bf16 %v4329_v58  ;;  %v4331_v48 = vunpack.i.h.bf16 %v4329_v58 }
 0x23c   : > { %v4349_v60 = vpop.permute.xlu0 %4348 }
 0x23d   : > { %v4334_v8 = vpop.permute.xlu1 %4333  ;;  %v4351_v36 = vunpack.i.h.bf16 %v4349_v60  ;;  %v4350_v33 = vunpack.i.l.bf16 %v4349_v60 }
 0x23e   : > { %v4336_v12 = vunpack.i.h.bf16 %v4334_v8  ;;  %v4335_v14 = vunpack.i.l.bf16 %v4334_v8 }
 0x240   : > { %v4354_v16 = vpop.permute.xlu0 %4353  ;;  %v1341_v2 = vsel %vm1315_vm4, %v1333_v19, %v4335_v14  ;;  %v1317_v24 = vsel %vm1315_vm4, %v1308_v20, %v4336_v12 }
 0x241   : > { %v4344_v25 = vpop.permute.xlu1 %4343  ;;  %1518 = vmatprep.mubr.f32.mxu1 %v1341_v2  ;;  %v4355_v50 = vunpack.i.l.bf16 %v4354_v16  ;;  %v4356_v56 = vunpack.i.h.bf16 %v4354_v16 }
 0x242   : > { %v4346_v26 = vunpack.i.h.bf16 %v4344_v25  ;;  %v4345_v28 = vunpack.i.l.bf16 %v4344_v25  ;;  %1519 = vmatmul.mubr.f32.gmra.mxu1 %v1317_v24 }
 0x243   : > { %1524 = vmatprep.mubr.f32.mxu1 %v1342_v27 }
 0x244   : > { %v4364_v34 = vpop.permute.xlu0 %4363  ;;  %v1327_v61 = vsel %vm972_vm13, %v5511_v22, %v4345_v28  ;;  %v1301_v35 = vsel %vm972_vm13, %v5499_v13, %v4346_v26 }
 0x245   : > { %v4366_v30 = vunpack.i.h.bf16 %v4364_v34  ;;  %v4365_v0 = vunpack.i.l.bf16 %v4364_v34  ;;  %v4359_v37 = vpop.permute.xlu1 %4358  ;;  %v1335_v44 = vsel %vm1306_vm1, %v1327_v61, %v4350_v33  ;;  %v1310_v47 = vsel %vm1306_vm1, %v1301_v35, %v4351_v36 }
 0x246   : > { %v4361_v40 = vunpack.i.h.bf16 %v4359_v37  ;;  %v4360_v41 = vunpack.i.l.bf16 %v4359_v37  ;;  %1525 = vmatmul.mubr.f32.gmra.mxu1 %v1318_v38 }
 0x247   : > { %v1328_v43 = vsel %vm972_vm13, %v5588_v29, %v4365_v0  ;;  %v1302_v13 = vsel %vm972_vm13, %v5494_v53, %v4366_v30 }
 0x248   : > { %v1336_v22 = vsel %vm1306_vm1, %v1328_v43, %v4330_v7  ;;  %v1343_v46 = vsel %vm1315_vm4, %v1335_v44, %v4360_v41  ;;  %v1319_v51 = vsel %vm1315_vm4, %v1310_v47, %v4361_v40  ;;  %v1311_v29 = vsel %vm1306_vm1, %v1302_v13, %v4331_v48  ;;  %v2451_v41 = vld [vmem:[%s7536_s5 + $0xf0] sm:$0xff]  ;;  %v2450_v44 = vld [vmem:[%s7536_s5 + $0xe8] sm:$0xff]  ;;  %v2433_v13 = vld [vmem:[%s7536_s5 + $0x60] sm:$0xff] }
 0x249   : > { %1530 = vmatprep.mubr.f32.mxu1 %v1343_v46  ;;  %v1344_v55 = vsel %vm1315_vm4, %v1336_v22, %v4355_v50  ;;  %v1320_v4 = vsel %vm1315_vm4, %v1311_v29, %v4356_v56  ;;  %v4369_v45 = vpop.permute.xlu1 %4368  ;;  %v2435_v43 = vld [vmem:[%s7536_s5 + $0x70] sm:$0xff]  ;;  %v2434_v47 = vld [vmem:[%s7536_s5 + $0x68] sm:$0xff]  ;;  %v2449_v22 = vld [vmem:[%s7536_s5 + $0xe0] sm:$0xff] }
 0x24a   : > { %1531 = vmatmul.mubr.f32.gmra.mxu1 %v1319_v51  ;;  %v4371_v53 = vunpack.i.h.bf16 %v4369_v45  ;;  %v4370_v58 = vunpack.i.l.bf16 %v4369_v45  ;;  %v2448_v48 = vld [vmem:[%s7536_s5 + $0xd8] sm:$0xff]  ;;  %v2447_v46 = vld [vmem:[%s7536_s5 + $0xd0] sm:$0xff]  ;;  %v2430_v29 = vld [vmem:[%s7536_s5 + $0x48] sm:$0xff] }
 0x24b   : > { %1536 = vmatprep.mubr.f32.mxu1 %v1344_v55  ;;  %v2432_v50 = vld [vmem:[%s7536_s5 + $0x58] sm:$0xff]  ;;  %v2431_v51 = vld [vmem:[%s7536_s5 + $0x50] sm:$0xff]  ;;  %v2446_v55 = vld [vmem:[%s7536_s5 + $0xc8] sm:$0xff] }
 0x24c   : > { %v1329_v1 = vsel %vm972_vm13, %v5566_v11, %v4370_v58  ;;  %v1303_v6 = vsel %vm972_vm13, %v5557_v63, %v4371_v53  ;;  %v2445_v56 = vld [vmem:[%s7536_s5 + $0xc0] sm:$0xff]  ;;  %v1428_v53 = vsub.s32 1, %v5273_v10  ;;  %v2444_v58 = vld [vmem:[%s7536_s5 + $0xb8] sm:$0xff] }
 0x24d   : > { %v2429_v45 = vld [vmem:[%s7536_s5 + $0x40] sm:$0xff] }
 0x24e   : > { %1537 = vmatmul.mubr.f32.gmra.mxu1 %v1320_v4  ;;  %v1424_v4 = vsub.s32 0, %v5273_v10  ;;  %v2427_v10 = vld [vmem:[%s7536_s5 + $0x30] sm:$0xff] }
 0x259   : > { %v4374_v57 = vpop.permute.xlu0 %4373 }
 0x25a   : > { %v4376_v15 = vunpack.i.h.bf16 %v4374_v57  ;;  %v4375_v60 = vunpack.i.l.bf16 %v4374_v57  ;;  %v1420_v57 = vld [vmem:[%s7535_s4] sm:$0x3] }
 0x25c   : > { %v1337_v14 = vsel %vm1306_vm1, %v1329_v1, %v4375_v60  ;;  %v1312_v16 = vsel %vm1306_vm1, %v1303_v6, %v4376_v15  ;;  %v2428_v15 = vld [vmem:[%s7536_s5 + $0x38] sm:$0xff]  ;;  %v2443_v60 = vld [vmem:[%s7536_s5 + $0xb0] sm:$0xff]  ;;  %v2442_v1 = vld [vmem:[%s7536_s5 + $0xa8] sm:$0xff] }
 0x25d   : > { %v4379_v62 = vpop.permute.xlu1 %4378  ;;  %v4389_v49 = vpop.permute.xlu0 %4388  ;;  %v2426_v6 = vld [vmem:[%s7536_s5 + $0x28] sm:$0xff] }
 0x25e   : > { %v4381_v18 = vunpack.i.h.bf16 %v4379_v62  ;;  %v4380_v52 = vunpack.i.l.bf16 %v4379_v62  ;;  %v4391_v8 = vunpack.i.h.bf16 %v4389_v49  ;;  %v4390_v12 = vunpack.i.l.bf16 %v4389_v49 }
 0x25f   : > { %v5777_v62 = vrot.slane %v1420_v57, %v1424_v4  ;;  %v5782_v49 = vrot.slane %v1420_v57, %v1428_v53 }
 0x260   : > { %v1345_v19 = vsel %vm1315_vm4, %v1337_v14, %v4380_v52  ;;  %v1321_v20 = vsel %vm1315_vm4, %v1312_v16, %v4381_v18  ;;  %v1330_v63 = vsel %vm972_vm13, %v5625_v3, %v4390_v12  ;;  %v1304_v24 = vsel %vm972_vm13, %v5552_v59, %v4391_v8  ;;  %v1627_v18 = vpop.f32.mrf.mxu0  ;;  %v2441_v8 = vld [vmem:[%s7536_s5 + $0xa0] sm:$0xff] }
 0x261   : > { %v4384_v21 = vpop.permute.xlu1 %4383  ;;  %1542 = vmatprep.mubr.f32.mxu1 %v1345_v19  ;;  %v4394_v39 = vpop.permute.xlu0 %4393  ;;  %v2425_v14 = vld [vmem:[%s7536_s5 + $0x20] sm:$0xff] }
 0x262   : > { %v4386_v32 = vunpack.i.h.bf16 %v4384_v21  ;;  %v4385_v23 = vunpack.i.l.bf16 %v4384_v21  ;;  %v4396_v2 = vunpack.i.h.bf16 %v4394_v39  ;;  %v4395_v11 = vunpack.i.l.bf16 %v4394_v39  ;;  %1543 = vmatmul.mubr.f32.gmra.mxu1 %v1321_v20  ;;  %v1629_v21 = vpop.f32.mrf.mxu0  ;;  %v2440_v39 = vld [vmem:[%s7536_s5 + $0x98] sm:$0xff] }
 0x264   : > { %v1338_v25 = vsel %vm1306_vm1, %v1330_v63, %v4385_v23  ;;  %v1313_v26 = vsel %vm1306_vm1, %v1304_v24, %v4386_v32  ;;  %v2424_v32 = vld [vmem:[%s7536_s5 + $0x18] sm:$0xff]  ;;  %v2439_v23 = vld [vmem:[%s7536_s5 + $0x90] sm:$0xff] }
 0x265   : > { %v4399_v28 = vpop.permute.xlu1 %4398  ;;  %v4404_v27 = vpop.permute.xlu0 %4403  ;;  %v1346_v17 = vsel %vm1315_vm4, %v1338_v25, %v4395_v11  ;;  %v1322_v31 = vsel %vm1315_vm4, %v1313_v26, %v4396_v2  ;;  %v2423_v63 = vld [vmem:[%s7536_s5 + $0x10] sm:$0xff] }
 0x266   : > { %v4401_v34 = vunpack.i.h.bf16 %v4399_v28  ;;  %v4400_v30 = vunpack.i.l.bf16 %v4399_v28  ;;  %1548 = vmatprep.mubr.f32.mxu1 %v1346_v17  ;;  %v4406_v0 = vunpack.i.h.bf16 %v4404_v27  ;;  %v4405_v61 = vunpack.i.l.bf16 %v4404_v27  ;;  %v2438_v28 = vld [vmem:[%s7536_s5 + $0x88] sm:$0xff]  ;;  %v2437_v17 = vld [vmem:[%s7536_s5 + $0x80] sm:$0xff] }
 0x267   : > { %1549 = vmatmul.mubr.f32.gmra.mxu1 %v1322_v31  ;;  %v2422_v27 = vld [vmem:[%s7536_s5 + $0x8] sm:$0xff]  ;;  %v5819_v31 = vld [vmem:[#allocation4 + $0x10] sm:$0x3] }
 0x268   : > { %v1331_v3 = vsel %vm972_vm13, %v5632_v9, %v4400_v30  ;;  %v1305_v59 = vsel %vm972_vm13, %v5616_v54, %v4401_v34  ;;  %v2452_v9 = vld [vmem:[%s7536_s5 + $0xf8] sm:$0xff]  ;;  %v2421_v34 = vld [vmem:[%s7536_s5] sm:$0xff]  ;;  %v1885_v30 = vrot.slane %v5464_v42, 1 }
 0x269   : > { %v4409_v35 = vpop.permute.xlu1 %4408  ;;  %v1339_v33 = vsel %vm1306_vm1, %v1331_v3, %v4405_v61  ;;  %v1314_v37 = vsel %vm1306_vm1, %v1305_v59, %v4406_v0  ;;  %v2436_v54 = vld [vmem:[%s7536_s5 + $0x78] sm:$0xff]  ;;  %3971 = vmatprep.subr.mxu0 %v2452_v9  ;;  %v1886_v0 = vrot.slane %v5819_v31, 1 }
 0x26a   : > { %v4411_v7 = vunpack.i.h.bf16 %v4409_v35  ;;  %v4410_v36 = vunpack.i.l.bf16 %v4409_v35  ;;  %3972 = vmatpush3.msra.mxu0 %v2436_v54 }
 0x26b   : > { %3973 = vmatprep.subr.mxu0 %v2451_v41  ;;  %v1887_v59 = vsel %vm433_vm3, %v1885_v30, %v1886_v0 }
 0x26c   : > { %v1347_v38 = vsel %vm1315_vm4, %v1339_v33, %v4410_v36  ;;  %v1323_v40 = vsel %vm1315_vm4, %v1314_v37, %v4411_v7  ;;  %3974 = vmatpush3.msra.mxu0 %v2435_v43  ;;  %v1633_v37 = vpop.f32.mrf.mxu0 }
 0x26d   : > { %1554 = vmatprep.mubr.f32.mxu1 %v1347_v38  ;;  %3975 = vmatprep.subr.mxu0 %v2450_v44 }
 0x26e   : > { %1555 = vmatmul.mubr.f32.gmra.mxu1 %v1323_v40  ;;  %3976 = vmatpush3.msra.mxu0 %v2434_v47  ;;  %v1635_v38 = vpop.f32.mrf.mxu0 }
 0x26f   : > { %3977 = vmatprep.subr.mxu0 %v2449_v22 }
 0x270   : > { %3978 = vmatpush3.msra.mxu0 %v2433_v13  ;;  %v1639_v40 = vpop.f32.mrf.mxu0 }
 0x271   : > { %3979 = vmatprep.subr.mxu0 %v2448_v48 }
 0x272   : > { %3980 = vmatpush3.msra.mxu0 %v2432_v50  ;;  %v1641_v41 = vpop.f32.mrf.mxu0 }
 0x273   : > { %3981 = vmatprep.subr.mxu0 %v2447_v46 }
 0x274   : > { %3982 = vmatpush3.msra.mxu0 %v2431_v51 }
 0x275   : > { %3983 = vmatprep.subr.mxu0 %v2446_v55 }
 0x276   : > { %3984 = vmatpush3.msra.mxu0 %v2430_v29 }
 0x277   : > { %3985 = vmatprep.subr.mxu0 %v2445_v56 }
 0x278   : > { %3986 = vmatpush3.msra.mxu0 %v2429_v45 }
 0x279   : > { %3987 = vmatprep.subr.mxu0 %v2444_v58 }
 0x27a   : > { %3988 = vmatpush3.msra.mxu0 %v2428_v15 }
 0x27b   : > { %3989 = vmatprep.subr.mxu0 %v2443_v60 }
 0x27c   : > { %3990 = vmatpush3.msra.mxu0 %v2427_v10 }
 0x27d   : > { %3991 = vmatprep.subr.mxu0 %v2442_v1 }
 0x27e   : > { %3992 = vmatpush3.msra.mxu0 %v2426_v6 }
 0x27f   : > { %3993 = vmatprep.subr.mxu0 %v2441_v8 }
 0x280   : > { %3994 = vmatpush3.msra.mxu0 %v2425_v14 }
 0x281   : > { %3995 = vmatprep.subr.mxu0 %v2440_v39 }
 0x282   : > { %3996 = vmatpush3.msra.mxu0 %v2424_v32 }
 0x283   : > { %3997 = vmatprep.subr.mxu0 %v2439_v23 }
 0x284   : > { %3998 = vmatpush3.msra.mxu0 %v2423_v63 }
 0x285   : > { %3999 = vmatprep.subr.mxu0 %v2438_v28 }
 0x286   : > { %4000 = vmatpush3.msra.mxu0 %v2422_v27 }
 0x287   : > { %4001 = vmatprep.subr.mxu0 %v2437_v17 }
 0x288   : > { %4002 = vmatpush3.msra.mxu0 %v2421_v34 }
 0x28b   : > { %v1645_v22 = vpop.f32.mrf.mxu0 }
 0x28d   : > { %v1647_v45 = vpop.f32.mrf.mxu0 }
 0x28f   : > { %v1651_v8 = vpop.f32.mrf.mxu0 }
 0x2d0   : > { %v1514_v52 = vpop.f32.mrf.mxu1 }
 0x2d1   : > { %v1515_v12 = vadd.f32 %v1514_v52, %v5777_v62 }
 0x2d2   : > { %v1516_v16 = vpop.f32.mrf.mxu1 }
 0x2d3   : > { %v1628_v19 = vadd.f32 %v1627_v18, %v1515_v12  ;;  %v1517_v20 = vadd.f32 %v1516_v16, %v5782_v49 }
 0x2d5   : > { %v1674_v2 = vmax.f32 %v1628_v19, 0.0  ;;  %v1630_v11 = vadd.f32 %v1629_v21, %v1517_v20 }
 0x2d7   : > { %v1746_v24 = vrot.slane %v1674_v2, 7  ;;  %v1675_v25 = vmax.f32 %v1630_v11, 0.0  ;;  %v1653_v11 = vpop.f32.mrf.mxu0 }
 0x2d9   : > { %1779 = vst [vmem:[#allocation4 + $0x20] sm:$0xfe] %v1746_v24  ;;  %1782 = vst [vmem:[#allocation4 + $0x30] sm:$0x1] %v1746_v24  ;;  %v1747_v26 = vrot.slane %v1675_v25, 7 }
 0x2db   : > { %1781 = vst.msk [vmem:[#allocation4 + $0x28] sm:$0xfe] %vm1780_vm5, %v1747_v26 }
 0x2dc   : > { %1784 = vst.msk [vmem:[#allocation4 + $0x38] sm:$0x1] %vm1783_vm6, %v1747_v26 }
 0x2e0   : > { %v5828_v61 = vld [vmem:[#allocation4 + $0x20] sm:$0xff]  ;;  %v5830_v3 = vld [vmem:[#allocation4 + $0x30] sm:$0x3] }
 0x2e1   : > { %v1891_v35 = vrot.slane %v5828_v61, 1  ;;  %v1892_v7 = vrot.slane %v5830_v3, 1 }
 0x2e3   : > { %v1893_v36 = vsel %vm433_vm3, %v1891_v35, %v1892_v7 }
 0x2e4   : > { %v4412_v33 = vpack.i.bf16 %v1893_v36, %v1887_v59  ;;  %2898 = vmatprep.mubr.f32.mxu1 %v1893_v36 }
 0x2e6   : > { %4413 = vrot.lane.b32.xlu0 %v4412_v33, %s4710_s21 }
 0x302   : > { %v1520_v9 = vpop.f32.mrf.mxu1 }
 0x303   : > { %v1521_v54 = vadd.f32 %v1520_v9, %v5777_v62 }
 0x304   : > { %v1522_v43 = vpop.f32.mrf.mxu1 }
 0x305   : > { %v1634_v44 = vadd.f32 %v1633_v37, %v1521_v54  ;;  %v1523_v47 = vadd.f32 %v1522_v43, %v5782_v49  ;;  %v2484_v37 = vld [vmem:[%s7536_s5 + $0x1f8] sm:$0xff]  ;;  %v5883_v43 = vld [vmem:[#allocation4 + $0x8] sm:$0xff] }
 0x306   : > { %v1526_v13 = vpop.f32.mrf.mxu1  ;;  %4027 = vmatprep.subr.mxu0 %v2484_v37 }
 0x307   : > { %v1676_v48 = vmax.f32 %v1634_v44, 0.0  ;;  %v1636_v50 = vadd.f32 %v1635_v38, %v1523_v47  ;;  %v1527_v46 = vadd.f32 %v1526_v13, %v5777_v62  ;;  %v5885_v44 = vld [vmem:[#allocation4 + $0x18] sm:$0x3]  ;;  %v5887_v47 = vld [vmem:[#allocation4] sm:$0xff]  ;;  %v1934_v13 = vrot.slane %v5819_v31, 2 }
 0x308   : > { %v1528_v51 = vpop.f32.mrf.mxu1 }
 0x309   : > { %v1748_v55 = vrot.slane %v1676_v48, 7  ;;  %v1677_v29 = vmax.f32 %v1636_v50, 0.0  ;;  %v1640_v56 = vadd.f32 %v1639_v40, %v1527_v46  ;;  %v1529_v4 = vadd.f32 %v1528_v51, %v5782_v49  ;;  %v1657_v48 = vpop.f32.mrf.mxu0 }
 0x30a   : > { %v1532_v57 = vpop.f32.mrf.mxu1  ;;  %v1936_v51 = vrot.slane %v5883_v43, 2 }
 0x30b   : > { %1785 = vst [vmem:[#allocation4 + $0x40] sm:$0xfe] %v1748_v55  ;;  %1787 = vst [vmem:[#allocation4 + $0x50] sm:$0x1] %v1748_v55  ;;  %v1749_v53 = vrot.slane %v1677_v29, 7  ;;  %v1678_v58 = vmax.f32 %v1640_v56, 0.0  ;;  %v1642_v15 = vadd.f32 %v1641_v41, %v1529_v4  ;;  %v1533_v60 = vadd.f32 %v1532_v57, %v5777_v62  ;;  %v1659_v57 = vpop.f32.mrf.mxu0 }
 0x30c   : > { %v1534_v10 = vpop.f32.mrf.mxu1  ;;  %v1937_v55 = vrot.slane %v5885_v44, 2 }
 0x30d   : > { %1786 = vst.msk [vmem:[#allocation4 + $0x48] sm:$0xfe] %vm1780_vm5, %v1749_v53  ;;  %v1750_v18 = vrot.slane %v1678_v58, 7  ;;  %v1679_v52 = vmax.f32 %v1642_v15, 0.0  ;;  %v1646_v1 = vadd.f32 %v1645_v22, %v1533_v60  ;;  %v1535_v6 = vadd.f32 %v1534_v10, %v5782_v49  ;;  %v2516_v10 = vld [vmem:[%s7536_s5 + $0x2f8] sm:$0xff] }
 0x30e   : > { %1788 = vst.msk [vmem:[#allocation4 + $0x58] sm:$0x1] %vm1783_vm6, %v1749_v53  ;;  %v1538_v12 = vpop.f32.mrf.mxu1  ;;  %v1933_v22 = vrot.slane %v5887_v47, 2  ;;  %v1938_v60 = vsel %vm458_vm2, %v1936_v51, %v1937_v55  ;;  %4083 = vmatprep.subr.mxu1 %v2516_v10 }
 0x30f   : > { %1789 = vst [vmem:[#allocation4 + $0x60] sm:$0xfe] %v1750_v18  ;;  %1791 = vst [vmem:[#allocation4 + $0x70] sm:$0x1] %v1750_v18  ;;  %v1751_v14 = vrot.slane %v1679_v52, 7  ;;  %v1680_v16 = vmax.f32 %v1646_v1, 0.0  ;;  %v1648_v19 = vadd.f32 %v1647_v45, %v1535_v6  ;;  %v1539_v20 = vadd.f32 %v1538_v12, %v5777_v62 }
 0x310   : > { %v1540_v21 = vpop.f32.mrf.mxu1  ;;  %v1935_v15 = vsel %vm458_vm2, %v1933_v22, %v1934_v13  ;;  %v2500_v6 = vld [vmem:[%s7536_s5 + $0x278] sm:$0xff]  ;;  %v2497_v13 = vld [vmem:[%s7536_s5 + $0x260] sm:$0xff] }
 0x311   : > { %1790 = vst.msk [vmem:[#allocation4 + $0x68] sm:$0xfe] %vm1780_vm5, %v1751_v14  ;;  %v1752_v39 = vrot.slane %v1680_v16, 7  ;;  %v1681_v32 = vmax.f32 %v1648_v19, 0.0  ;;  %v1652_v23 = vadd.f32 %v1651_v8, %v1539_v20  ;;  %v1541_v2 = vadd.f32 %v1540_v21, %v5782_v49  ;;  %v2515_v20 = vld [vmem:[%s7536_s5 + $0x2f0] sm:$0xff]  ;;  %v1663_v21 = vpop.f32.mrf.mxu0  ;;  %4084 = vmatpush3.msra.mxu1 %v2500_v6 }
 0x312   : > { %1792 = vst.msk [vmem:[#allocation4 + $0x78] sm:$0x1] %vm1783_vm6, %v1751_v14  ;;  %v5851_v63 = vld [vmem:[#allocation4 + $0x40] sm:$0xff]  ;;  %v5853_v24 = vld [vmem:[#allocation4 + $0x50] sm:$0x3]  ;;  %v4432_v14 = vpack.i.bf16 %v1938_v60, %v1935_v15  ;;  %4085 = vmatprep.subr.mxu1 %v2515_v20 }
 0x313   : > { %1793 = vst [vmem:[#allocation4 + $0x80] sm:$0xfe] %v1752_v39  ;;  %1795 = vst [vmem:[#allocation4 + $0x90] sm:$0x1] %v1752_v39  ;;  %v1753_v25 = vrot.slane %v1681_v32, 7  ;;  %v1682_v26 = vmax.f32 %v1652_v23, 0.0  ;;  %v1654_v28 = vadd.f32 %v1653_v11, %v1541_v2 }
 0x314   : > { %v1897_v34 = vrot.slane %v5851_v63, 1  ;;  %v1898_v0 = vrot.slane %v5853_v24, 1  ;;  %v5920_v16 = vld [vmem:[#allocation4 + $0x48] sm:$0xff]  ;;  %v2499_v39 = vld [vmem:[%s7536_s5 + $0x270] sm:$0xff]  ;;  %v1946_v22 = vrot.slane %v5853_v24, 2 }
 0x315   : > { %1794 = vst.msk [vmem:[#allocation4 + $0x88] sm:$0xfe] %vm1780_vm5, %v1753_v25  ;;  %v1754_v27 = vrot.slane %v1682_v26, 7  ;;  %v1683_v17 = vmax.f32 %v1654_v28, 0.0  ;;  %v5922_v19 = vld [vmem:[#allocation4 + $0x58] sm:$0x3]  ;;  %4086 = vmatpush3.msra.mxu1 %v2499_v39 }
 0x316   : > { %1796 = vst.msk [vmem:[#allocation4 + $0x98] sm:$0x1] %vm1783_vm6, %v1753_v25  ;;  %v5859_v59 = vld [vmem:[#allocation4 + $0x60] sm:$0xff]  ;;  %v5861_v35 = vld [vmem:[#allocation4 + $0x70] sm:$0x3]  ;;  %v5871_v38 = vsel %vm433_vm3, %v1897_v34, %v1898_v0  ;;  %v2514_v32 = vld [vmem:[%s7536_s5 + $0x2e8] sm:$0xff] }
 0x317   : > { %1797 = vst [vmem:[#allocation4 + $0xa0] sm:$0xfe] %v1754_v27  ;;  %1799 = vst [vmem:[#allocation4 + $0xb0] sm:$0x1] %v1754_v27  ;;  %v1755_v7 = vrot.slane %v1683_v17, 7  ;;  %v1903_v36 = vrot.slane %v5859_v59, 1  ;;  %4087 = vmatprep.subr.mxu1 %v2514_v32 }
 0x318   : > { %v1904_v33 = vrot.slane %v5861_v35, 1  ;;  %v1948_v26 = vrot.slane %v5920_v16, 2  ;;  %v1949_v28 = vrot.slane %v5922_v19, 2  ;;  %v2498_v27 = vld [vmem:[%s7536_s5 + $0x268] sm:$0xff]  ;;  %v2511_v15 = vld [vmem:[%s7536_s5 + $0x2d0] sm:$0xff] }
 0x319   : > { %1798 = vst.msk [vmem:[#allocation4 + $0xa8] sm:$0xfe] %vm1780_vm5, %v1755_v7  ;;  %4088 = vmatpush3.msra.mxu1 %v2498_v27  ;;  %v2495_v60 = vld [vmem:[%s7536_s5 + $0x250] sm:$0xff]  ;;  %v2510_v32 = vld [vmem:[%s7536_s5 + $0x2c8] sm:$0xff] }
 0x31a   : > { %1800 = vst.msk [vmem:[#allocation4 + $0xb8] sm:$0x1] %vm1783_vm6, %v1755_v7  ;;  %v5874_v40 = vsel %vm433_vm3, %v1903_v36, %v1904_v33  ;;  %v5878_v54 = vld [vmem:[#allocation4 + $0x80] sm:$0xff]  ;;  %v5880_v41 = vld [vmem:[#allocation4 + $0x90] sm:$0x3]  ;;  %v1665_v36 = vpop.f32.mrf.mxu0  ;;  %v5955_v24 = vsel %vm458_vm2, %v1948_v26, %v1949_v28 }
 0x31b   : > { %v4417_v9 = vpack.i.bf16 %v5874_v40, %v5871_v38  ;;  %v1909_v50 = vrot.slane %v5878_v54, 1  ;;  %v1910_v46 = vrot.slane %v5880_v41, 1  ;;  %v2513_v7 = vld [vmem:[%s7536_s5 + $0x2e0] sm:$0xff]  ;;  %v4462_v27 = vpack.i.bf16 %v5878_v54, %v5859_v59 }
 0x31c   : > { %4089 = vmatprep.subr.mxu1 %v2513_v7  ;;  %v6011_v7 = vld [vmem:[#allocation4 + $0x28] sm:$0xff] }
 0x31d   : > { %4418 = vrot.lane.b32.xlu1 %v4417_v9, %s4710_s21  ;;  %v5902_v31 = vsel %vm433_vm3, %v1909_v50, %v1910_v46  ;;  %v1945_v9 = vrot.slane %v5851_v63, 2  ;;  %v4442_v46 = vpack.i.bf16 %v5851_v63, %v5828_v61  ;;  %4090 = vmatpush3.msra.mxu1 %v2497_v13 }
 0x31e   : > { %v5895_v29 = vld [vmem:[#allocation4 + $0xa0] sm:$0xff]  ;;  %v5897_v56 = vld [vmem:[#allocation4 + $0xb0] sm:$0x3] }
 0x31f   : > { %v1915_v4 = vrot.slane %v5895_v29, 1  ;;  %v1916_v45 = vrot.slane %v5897_v56, 1 }
 0x321   : > { %v5905_v58 = vsel %vm433_vm3, %v1915_v4, %v1916_v45  ;;  %v1669_v4 = vpop.f32.mrf.mxu0  ;;  %v5957_v45 = vld [vmem:[#allocation4 + $0x88] sm:$0xff] }
 0x322   : > { %v1544_v53 = vpop.f32.mrf.mxu1  ;;  %v4422_v52 = vpack.i.bf16 %v5905_v58, %v5902_v31 }
 0x323   : > { %v1545_v18 = vadd.f32 %v1544_v53, %v5777_v62  ;;  %v5965_v53 = vld [vmem:[#allocation4 + $0x98] sm:$0x3]  ;;  %v1671_v20 = vpop.f32.mrf.mxu0 }
 0x324   : > { %v1546_v1 = vpop.f32.mrf.mxu1  ;;  %4423 = vrot.lane.b32.xlu0 %v4422_v52, %s4710_s21  ;;  %v1961_v39 = vrot.slane %v5965_v53, 2 }
 0x325   : > { %v1658_v8 = vadd.f32 %v1657_v48, %v1545_v18  ;;  %v1547_v12 = vadd.f32 %v1546_v1, %v5782_v49  ;;  %v2512_v48 = vld [vmem:[%s7536_s5 + $0x2d8] sm:$0xff]  ;;  %v5974_v1 = vsel %vm458_vm2, %v1945_v9, %v1946_v22  ;;  %v1888_v9 = vrot.slane %v5883_v43, 1 }
 0x326   : > { %4091 = vmatprep.subr.mxu1 %v2512_v48 }
 0x327   : > { %v1684_v23 = vmax.f32 %v1658_v8, 0.0  ;;  %v1660_v2 = vadd.f32 %v1659_v57, %v1547_v12  ;;  %v1550_v11 = vpop.f32.mrf.mxu1  ;;  %v2496_v57 = vld [vmem:[%s7536_s5 + $0x258] sm:$0xff]  ;;  %v5979_v8 = vpack.i.bf16 %v5955_v24, %v5974_v1 }
 0x328   : > { %v1551_v25 = vadd.f32 %v1550_v11, %v5777_v62  ;;  %4433 = vrot.lane.b32.xlu0 %v4432_v14, %s4708_s19  ;;  %4092 = vmatpush3.msra.mxu1 %v2496_v57  ;;  %v1958_v11 = vrot.slane %v5880_v41, 2  ;;  %v2493_v41 = vld [vmem:[%s7536_s5 + $0x240] sm:$0xff] }
 0x329   : > { %v1756_v17 = vrot.slane %v1684_v23, 7  ;;  %v1685_v34 = vmax.f32 %v1660_v2, 0.0  ;;  %v1552_v0 = vpop.f32.mrf.mxu1  ;;  %4093 = vmatprep.subr.mxu1 %v2511_v15  ;;  %v2494_v2 = vld [vmem:[%s7536_s5 + $0x248] sm:$0xff] }
 0x32a   : > { %v1664_v33 = vadd.f32 %v1663_v21, %v1551_v25  ;;  %v1553_v37 = vadd.f32 %v1552_v0, %v5782_v49  ;;  %v1960_v21 = vrot.slane %v5957_v45, 2  ;;  %4094 = vmatpush3.msra.mxu1 %v2495_v60  ;;  %v1957_v25 = vrot.slane %v5878_v54, 2 }
 0x32b   : > { %1801 = vst [vmem:[#allocation4 + $0xc0] sm:$0xfe] %v1756_v17  ;;  %1803 = vst [vmem:[#allocation4 + $0xd0] sm:$0x1] %v1756_v17  ;;  %v1757_v50 = vrot.slane %v1685_v34, 7  ;;  %4095 = vmatprep.subr.mxu1 %v2510_v32 }
 0x32c   : > { %v1686_v51 = vmax.f32 %v1664_v33, 0.0  ;;  %v1666_v55 = vadd.f32 %v1665_v36, %v1553_v37  ;;  %4443 = vrot.lane.b32.xlu0 %v4442_v46, %s4709_s20  ;;  %4096 = vmatpush3.msra.mxu1 %v2494_v2  ;;  %v6009_v0 = vsel %vm458_vm2, %v1960_v21, %v1961_v39  ;;  %v6013_v36 = vld [vmem:[#allocation4 + $0x38] sm:$0x3]  ;;  %v6022_v48 = vsel %vm458_vm2, %v1957_v25, %v1958_v11  ;;  %v2491_v21 = vld [vmem:[%s7536_s5 + $0x230] sm:$0xff]  ;;  %v2506_v2 = vld [vmem:[%s7536_s5 + $0x2a8] sm:$0xff] }
 0x32d   : > { %1802 = vst.msk [vmem:[#allocation4 + $0xc8] sm:$0xfe] %vm1780_vm5, %v1757_v50  ;;  %v6032_v57 = vpack.i.bf16 %v6009_v0, %v6022_v48 }
 0x32e   : > { %1804 = vst.msk [vmem:[#allocation4 + $0xd8] sm:$0x1] %vm1783_vm6, %v1757_v50  ;;  %v1758_v10 = vrot.slane %v1686_v51, 7  ;;  %v1687_v18 = vmax.f32 %v1666_v55, 0.0  ;;  %v1556_v52 = vpop.f32.mrf.mxu1  ;;  %v1889_v51 = vrot.slane %v5885_v44, 1  ;;  %v2508_v55 = vld [vmem:[%s7536_s5 + $0x2b8] sm:$0xff] }
 0x32f   : > { %v1557_v6 = vadd.f32 %v1556_v52, %v5777_v62 }
 0x330   : > { %1805 = vst [vmem:[#allocation4 + $0xe0] sm:$0xfe] %v1758_v10  ;;  %1807 = vst [vmem:[#allocation4 + $0xf0] sm:$0x1] %v1758_v10  ;;  %v1759_v12 = vrot.slane %v1687_v18, 7  ;;  %v1558_v14 = vpop.f32.mrf.mxu1  ;;  %4453 = vrot.lane.b32.xlu0 %v5979_v8, %s4708_s19  ;;  %v1894_v10 = vrot.slane %v6011_v7, 1 }
 0x331   : > { %v1559_v62 = vadd.f32 %v1558_v14, %v5782_v49  ;;  %v1670_v23 = vadd.f32 %v1669_v4, %v1557_v6  ;;  %v2509_v49 = vld [vmem:[%s7536_s5 + $0x2c0] sm:$0xff]  ;;  %v1895_v18 = vrot.slane %v6013_v36, 1  ;;  %v2492_v14 = vld [vmem:[%s7536_s5 + $0x238] sm:$0xff] }
 0x332   : > { %1806 = vst.msk [vmem:[#allocation4 + $0xe8] sm:$0xfe] %vm1780_vm5, %v1759_v12  ;;  %v6001_v17 = vld [vmem:[#allocation4 + $0xc0] sm:$0xff]  ;;  %v6003_v34 = vld [vmem:[#allocation4 + $0xd0] sm:$0x3]  ;;  %4097 = vmatprep.subr.mxu1 %v2509_v49  ;;  %v1890_v49 = vsel %vm433_vm3, %v1888_v9, %v1889_v51  ;;  %v1939_v51 = vrot.slane %v5828_v61, 2 }
 0x333   : > { %1808 = vst.msk [vmem:[#allocation4 + $0xf8] sm:$0x1] %vm1783_vm6, %v1759_v12  ;;  %v1688_v26 = vmax.f32 %v1670_v23, 0.0  ;;  %v1672_v28 = vadd.f32 %v1671_v20, %v1559_v62  ;;  %4098 = vmatpush3.msra.mxu1 %v2493_v41  ;;  %v1921_v50 = vrot.slane %v6001_v17, 1  ;;  %v1922_v46 = vrot.slane %v6003_v34, 1  ;;  %v2507_v20 = vld [vmem:[%s7536_s5 + $0x2b0] sm:$0xff] }
 0x334   : > { %4463 = vrot.lane.b32.xlu0 %v4462_v27, %s4709_s20  ;;  %v6017_v22 = vld [vmem:[#allocation4 + $0xc8] sm:$0xff]  ;;  %4099 = vmatprep.subr.mxu1 %v2508_v55  ;;  %v1970_v62 = vrot.slane %v6003_v34, 2  ;;  %v1969_v23 = vrot.slane %v6001_v17, 2  ;;  %v4482_v25 = vpack.i.bf16 %v6001_v17, %v5895_v29  ;;  %v1942_v34 = vrot.slane %v6011_v7, 2  ;;  %v1828_v9 = vld [vmem:[#allocation4 + $0x78] sm:$0x3] }
 0x335   : > { %v1760_v33 = vrot.slane %v1688_v26, 7  ;;  %v1689_v37 = vmax.f32 %v1672_v28, 0.0  ;;  %v6019_v13 = vld [vmem:[#allocation4 + $0xd8] sm:$0x3]  ;;  %v1972_v6 = vrot.slane %v6017_v22, 2  ;;  %4100 = vmatpush3.msra.mxu1 %v2492_v14  ;;  %v6058_v39 = vsel %vm433_vm3, %v1921_v50, %v1922_v46  ;;  %v2490_v26 = vld [vmem:[%s7536_s5 + $0x228] sm:$0xff] }
 0x336   : > { %v1973_v12 = vrot.slane %v6019_v13, 2  ;;  %4101 = vmatprep.subr.mxu1 %v2507_v20  ;;  %v6077_v28 = vsel %vm433_vm3, %v1894_v10, %v1895_v18  ;;  %v1943_v41 = vrot.slane %v6013_v36, 2  ;;  %v2489_v50 = vld [vmem:[%s7536_s5 + $0x220] sm:$0xff]  ;;  %v1940_v46 = vrot.slane %v5830_v3, 2  ;;  %v2504_v10 = vld [vmem:[%s7536_s5 + $0x298] sm:$0xff] }
 0x337   : > { %1809 = vst [vmem:[#allocation4 + $0x100] sm:$0xfe] %v1760_v33  ;;  %1811 = vst [vmem:[#allocation4 + $0x110] sm:$0x1] %v1760_v33  ;;  %v1761_v4 = vrot.slane %v1689_v37, 7  ;;  %v6034_v15 = vld [vmem:[#allocation4 + $0xe0] sm:$0xff]  ;;  %4102 = vmatpush3.msra.mxu1 %v2491_v21  ;;  %v6096_v36 = vsel %vm458_vm2, %v1969_v23, %v1970_v62  ;;  %v4437_v55 = vpack.i.bf16 %v6077_v28, %v1890_v49 }
 0x338   : > { %v6036_v60 = vld [vmem:[#allocation4 + $0xf0] sm:$0x3]  ;;  %v1927_v44 = vrot.slane %v6034_v15, 1  ;;  %4473 = vrot.lane.b32.xlu0 %v6032_v57, %s4708_s19  ;;  %v6080_v27 = vsel %vm458_vm2, %v1972_v6, %v1973_v12  ;;  %4103 = vmatprep.subr.mxu1 %v2506_v2  ;;  %v2505_v33 = vld [vmem:[%s7536_s5 + $0x2a0] sm:$0xff]  ;;  %v6089_v37 = vld [vmem:[#allocation4 + $0x68] sm:$0xff]  ;;  %v1944_v18 = vsel %vm458_vm2, %v1942_v34, %v1943_v41  ;;  %v1941_v14 = vsel %vm458_vm2, %v1939_v51, %v1940_v46 }
 0x339   : > { %v1928_v52 = vrot.slane %v6036_v60, 1  ;;  %1810 = vst.msk [vmem:[#allocation4 + $0x108] sm:$0xfe] %vm1780_vm5, %v1761_v4  ;;  %4104 = vmatpush3.msra.mxu1 %v2490_v26  ;;  %v2488_v6 = vld [vmem:[%s7536_s5 + $0x218] sm:$0xff]  ;;  %v2503_v12 = vld [vmem:[%s7536_s5 + $0x290] sm:$0xff]  ;;  %v1900_v20 = vrot.slane %v5920_v16, 1  ;;  %v4447_v62 = vpack.i.bf16 %v1944_v18, %v1941_v14  ;;  %v4522_v14 = vpack.i.bf16 %v5920_v16, %v6011_v7 }
 0x33a   : > { %1812 = vst.msk [vmem:[#allocation4 + $0x118] sm:$0x1] %vm1783_vm6, %v1761_v4  ;;  %v6102_v4 = vpack.i.bf16 %v6080_v27, %v6096_v36  ;;  %4105 = vmatprep.subr.mxu1 %v2505_v33  ;;  %v1901_v21 = vrot.slane %v5922_v19, 1  ;;  %v2487_v2 = vld [vmem:[%s7536_s5 + $0x210] sm:$0xff]  ;;  %v1954_v49 = vrot.slane %v6089_v37, 2  ;;  %v2502_v19 = vld [vmem:[%s7536_s5 + $0x288] sm:$0xff] }
 0x33b   : > { %v6061_v32 = vsel %vm433_vm3, %v1927_v44, %v1928_v52  ;;  %v1906_v44 = vrot.slane %v6089_v37, 1  ;;  %v1907_v52 = vrot.slane %v1828_v9, 1  ;;  %4106 = vmatpush3.msra.mxu1 %v2489_v50  ;;  %v6137_v26 = vld [vmem:[#allocation4 + $0xa8] sm:$0xff]  ;;  %v1836_v34 = vld [vmem:[#allocation4 + $0xb8] sm:$0x3]  ;;  %v1952_v33 = vrot.slane %v5861_v35, 2 }
 0x33c   : > { %v4427_v11 = vpack.i.bf16 %v6061_v32, %v6058_v39  ;;  %4483 = vrot.lane.b32.xlu0 %v4482_v25, %s4709_s20  ;;  %4107 = vmatprep.subr.mxu1 %v2504_v10  ;;  %v1955_v25 = vrot.slane %v1828_v9, 2  ;;  %v2486_v41 = vld [vmem:[%s7536_s5 + $0x208] sm:$0xff]  ;;  %v6144_v9 = vsel %vm433_vm3, %v1900_v20, %v1901_v21  ;;  %v1951_v50 = vrot.slane %v5859_v59, 2  ;;  %v2501_v51 = vld [vmem:[%s7536_s5 + $0x280] sm:$0xff] }
 0x33d   : > { %4108 = vmatpush3.msra.mxu1 %v2488_v6  ;;  %v1918_v10 = vrot.slane %v6137_v26, 1  ;;  %v1919_v35 = vrot.slane %v1836_v34, 1  ;;  %v2485_v18 = vld [vmem:[%s7536_s5 + $0x200] sm:$0xff]  ;;  %v1913_v6 = vrot.slane %v5965_v53, 1  ;;  %v1966_v21 = vrot.slane %v6137_v26, 2  ;;  %v6179_v53 = vld [vmem:[#allocation4 + $0xe8] sm:$0xff] }
 0x33e   : > { %4428 = vrot.lane.b32.xlu1 %v4427_v11, %s4710_s21  ;;  %v6108_v3 = vld [vmem:[#allocation4 + $0x100] sm:$0xff]  ;;  %v6129_v11 = vsel %vm433_vm3, %v1906_v44, %v1907_v52  ;;  %4109 = vmatprep.subr.mxu1 %v2503_v12  ;;  %v6162_v44 = vsel %vm458_vm2, %v1951_v50, %v1952_v33  ;;  %v1912_v52 = vrot.slane %v5957_v45, 1  ;;  %v1924_v50 = vrot.slane %v6017_v22, 1 }
 0x33f   : > { %v4497_v23 = vpack.i.bf16 %v6108_v3, %v6034_v15  ;;  %4110 = vmatpush3.msra.mxu1 %v2487_v2  ;;  %v4457_v46 = vpack.i.bf16 %v6129_v11, %v6144_v9  ;;  %v6173_v20 = vsel %vm433_vm3, %v1918_v10, %v1919_v35  ;;  %v1964_v2 = vrot.slane %v5897_v56, 2 }
 0x340   : > { %4493 = vrot.lane.b32.xlu0 %v6102_v4, %s4708_s19  ;;  %4111 = vmatprep.subr.mxu1 %v2502_v19  ;;  %v4542_v10 = vpack.i.bf16 %v5895_v29, %v5878_v54 }
 0x341   : > { %4112 = vmatpush3.msra.mxu1 %v2486_v41  ;;  %v1930_v41 = vrot.slane %v6179_v53, 1 }
 0x342   : > { %4438 = vrot.lane.b32.xlu1 %v4437_v55, %s4710_s21  ;;  %v6153_v55 = vsel %vm458_vm2, %v1954_v49, %v1955_v25  ;;  %4113 = vmatprep.subr.mxu1 %v2501_v51  ;;  %v6183_v25 = vsel %vm433_vm3, %v1912_v52, %v1913_v6  ;;  %v1963_v49 = vrot.slane %v5895_v29, 2  ;;  %v2580_v52 = vld [vmem:[%s7536_s5 + $0x4f8] sm:$0xff] }
 0x343   : > { %v6168_v12 = vpack.i.bf16 %v6153_v55, %v6162_v44  ;;  %4114 = vmatpush3.msra.mxu1 %v2485_v18  ;;  %v4477_v19 = vpack.i.bf16 %v6173_v20, %v6183_v25  ;;  %v1978_v18 = vrot.slane %v6179_v53, 2 }
 0x344   : > { %4498 = vrot.lane.b32.xlu0 %v4497_v23, %s4709_s20  ;;  %v1844_v23 = vld [vmem:[#allocation4 + $0xf8] sm:$0x3]  ;;  %v6196_v56 = vsel %vm458_vm2, %v1963_v49, %v1964_v2  ;;  %4195 = vmatprep.subr.mxu1 %v2580_v52  ;;  %v6269_v52 = vld [vmem:[#allocation4 + $0x110] sm:$0x3] }
 0x345   : > { %v1931_v33 = vrot.slane %v1844_v23, 1 }
 0x346   : > { %4448 = vrot.lane.b32.xlu1 %v4447_v62, %s4708_s19 }
 0x347   : > { %v6207_v35 = vsel %vm433_vm3, %v1930_v41, %v1931_v33  ;;  %v4562_v33 = vpack.i.bf16 %v6034_v15, %v6001_v17 }
 0x348   : > { %4513 = vrot.lane.b32.xlu0 %v4447_v62, %s4710_s21  ;;  %v1967_v62 = vrot.slane %v1836_v34, 2 }
 0x34a   : > { %4458 = vrot.lane.b32.xlu1 %v4457_v46, %s4710_s21  ;;  %v6189_v34 = vsel %vm458_vm2, %v1966_v21, %v1967_v62  ;;  %v1925_v46 = vrot.slane %v6019_v13, 1  ;;  %v1976_v13 = vrot.slane %v6036_v60, 2 }
 0x34b   : > { %v6202_v51 = vpack.i.bf16 %v6189_v34, %v6196_v56 }
 0x34c   : > { %4523 = vrot.lane.b32.xlu0 %v4522_v14, %s4709_s20  ;;  %v6218_v6 = vsel %vm433_vm3, %v1924_v50, %v1925_v46  ;;  %v1975_v14 = vrot.slane %v6034_v15, 2  ;;  %v2483_v50 = vld [vmem:[%s7536_s5 + $0x1f0] sm:$0xff]  ;;  %v6260_v46 = vld [vmem:[#allocation4 + $0x108] sm:$0xff] }
 0x34d   : > { %v4502_v21 = vpack.i.bf16 %v6207_v35, %v6218_v6 }
 0x34e   : > { %4468 = vrot.lane.b32.xlu1 %v6168_v12, %s4708_s19  ;;  %v6234_v49 = vsel %vm458_vm2, %v1975_v14, %v1976_v13  ;;  %v2010_v13 = vrot.slane %v6260_v46, 2 }
 0x350   : > { %4533 = vrot.lane.b32.xlu0 %v5979_v8, %s4710_s21  ;;  %v1979_v8 = vrot.slane %v1844_v23, 2 }
 0x352   : > { %4478 = vrot.lane.b32.xlu1 %v4477_v19, %s4710_s21  ;;  %v6224_v62 = vsel %vm458_vm2, %v1978_v18, %v1979_v8  ;;  %v2467_v18 = vld [vmem:[%s7536_s5 + $0x170] sm:$0xff]  ;;  %v4517_v8 = vpack.i.bf16 %v5859_v59, %v5851_v63 }
 0x353   : > { %v6238_v19 = vpack.i.bf16 %v6224_v62, %v6234_v49 }
 0x354   : > { %4543 = vrot.lane.b32.xlu0 %v4542_v10, %s4708_s19  ;;  %v6262_v10 = vld [vmem:[#allocation4 + $0x118] sm:$0x3] }
 0x355   : > { %v2011_v14 = vrot.slane %v6262_v10, 2 }
 0x356   : > { %4488 = vrot.lane.b32.xlu1 %v6202_v51, %s4708_s19 }
 0x358   : > { %v6227_v23 = vpop.permute.xlu0 %4413  ;;  %4553 = vrot.lane.b32.xlu0 %v6032_v57, %s4710_s21  ;;  %v2468_v57 = vld [vmem:[%s7536_s5 + $0x178] sm:$0xff] }
 0x359   : > { %v4416_v60 = vunpack.i.h.bf16 %v6227_v23  ;;  %v4415_v2 = vunpack.i.l.bf16 %v6227_v23  ;;  %v2545_v23 = vld [vmem:[%s7536_s5 + $0x3e0] sm:$0xff] }
 0x35a   : > { %4503 = vrot.lane.b32.xlu1 %v4502_v21, %s4710_s21  ;;  %v2466_v21 = vld [vmem:[%s7536_s5 + $0x168] sm:$0xff] }
 0x35b   : > { %v2373_v41 = vsel %vm972_vm13, %v5883_v43, %v4415_v2  ;;  %v2374_v43 = vsel %vm972_vm13, %v6011_v7, %v4416_v60  ;;  %v2482_v7 = vld [vmem:[%s7536_s5 + $0x1e8] sm:$0xff] }
 0x35c   : > { %2688 = vmatprep.mubr.f32.mxu0 %v2373_v41  ;;  %4563 = vrot.lane.b32.xlu0 %v4562_v33, %s4708_s19  ;;  %v2481_v41 = vld [vmem:[%s7536_s5 + $0x1e0] sm:$0xff]  ;;  %v4527_v33 = vpack.i.bf16 %v5957_v45, %v6089_v37 }
 0x35d   : > { %2689 = vmatmul.mubr.f32.vlgmr.msra.gmra.mxu0 %v5887_v47 }
 0x35e   : > { %4508 = vrot.lane.b32.xlu1 %v6238_v19, %s4708_s19  ;;  %2693 = vmatprep.mubr.f32.mxu0 %v2374_v43  ;;  %v2465_v43 = vld [vmem:[%s7536_s5 + $0x160] sm:$0xff] }
 0x35f   : > { %4028 = vmatpush3.msra.mxu0 %v2468_v57  ;;  %v2007_v57 = vrot.slane %v6108_v3, 2 }
 0x360   : > { %4029 = vmatprep.subr.mxu0 %v2483_v50  ;;  %4568 = vrot.lane.b32.xlu0 %v6102_v4, %s4710_s21  ;;  %v2008_v50 = vrot.slane %v6269_v52, 2  ;;  %v4582_v4 = vpack.i.bf16 %v5920_v16, %v6108_v3 }
 0x361   : > { %4030 = vmatpush3.msra.mxu0 %v2467_v18  ;;  %v6300_v18 = vsel %vm458_vm2, %v2010_v13, %v2011_v14  ;;  %v2463_v13 = vld [vmem:[%s7536_s5 + $0x150] sm:$0xff] }
 0x362   : > { %4518 = vrot.lane.b32.xlu1 %v4517_v8, %s4708_s19  ;;  %2694 = vmatmul.mubr.f32.gmra.mxu0 %v5828_v61  ;;  %v2480_v61 = vld [vmem:[%s7536_s5 + $0x1d8] sm:$0xff] }
 0x363   : > { %4031 = vmatprep.subr.mxu0 %v2482_v7  ;;  %v2464_v8 = vld [vmem:[%s7536_s5 + $0x158] sm:$0xff]  ;;  %v2479_v7 = vld [vmem:[%s7536_s5 + $0x1d0] sm:$0xff] }
 0x364   : > { %4032 = vmatpush3.msra.mxu0 %v2466_v21  ;;  %4583 = vrot.lane.b32.xlu0 %v4582_v4, %s4708_s19  ;;  %v6310_v21 = vsel %vm458_vm2, %v2007_v57, %v2008_v50  ;;  %v2477_v57 = vld [vmem:[%s7536_s5 + $0x1c0] sm:$0xff]  ;;  %v4547_v50 = vpack.i.bf16 %v6017_v22, %v6137_v26  ;;  %v2476_v4 = vld [vmem:[%s7536_s5 + $0x1b8] sm:$0xff] }
 0x365   : > { %4033 = vmatprep.subr.mxu0 %v2481_v41  ;;  %v4597_v14 = vpack.i.bf16 %v6300_v18, %v6310_v21  ;;  %v2478_v41 = vld [vmem:[%s7536_s5 + $0x1c8] sm:$0xff] }
 0x366   : > { %4528 = vrot.lane.b32.xlu1 %v4527_v33, %s4709_s20  ;;  %4034 = vmatpush3.msra.mxu0 %v2465_v43  ;;  %v2462_v33 = vld [vmem:[%s7536_s5 + $0x148] sm:$0xff]  ;;  %v4602_v43 = vpack.i.bf16 %v6129_v11, %v5874_v40 }
 0x367   : > { %4035 = vmatprep.subr.mxu0 %v2480_v61  ;;  %v2460_v61 = vld [vmem:[%s7536_s5 + $0x138] sm:$0xff] }
 0x368   : > { %4036 = vmatpush3.msra.mxu0 %v2464_v8  ;;  %4598 = vrot.lane.b32.xlu0 %v4597_v14, %s4710_s21  ;;  %v2475_v8 = vld [vmem:[%s7536_s5 + $0x1b0] sm:$0xff]  ;;  %v2474_v14 = vld [vmem:[%s7536_s5 + $0x1a8] sm:$0xff] }
 0x369   : > { %4037 = vmatprep.subr.mxu0 %v2479_v7  ;;  %v2459_v7 = vld [vmem:[%s7536_s5 + $0x130] sm:$0xff] }
 0x36a   : > { %4538 = vrot.lane.b32.xlu1 %v6168_v12, %s4710_s21  ;;  %4038 = vmatpush3.msra.mxu0 %v2463_v13  ;;  %v2461_v12 = vld [vmem:[%s7536_s5 + $0x140] sm:$0xff]  ;;  %v4612_v13 = vpack.i.bf16 %v6183_v25, %v5902_v31 }
 0x36b   : > { %4039 = vmatprep.subr.mxu0 %v2478_v41  ;;  %v2458_v41 = vld [vmem:[%s7536_s5 + $0x128] sm:$0xff] }
 0x36c   : > { %4040 = vmatpush3.msra.mxu0 %v2462_v33  ;;  %4603 = vrot.lane.b32.xlu0 %v4602_v43, %s4709_s20  ;;  %v2473_v33 = vld [vmem:[%s7536_s5 + $0x1a0] sm:$0xff]  ;;  %v1988_v43 = vrot.slane %v6260_v46, 1 }
 0x36d   : > { %4041 = vmatprep.subr.mxu0 %v2477_v57  ;;  %v4572_v57 = vpack.i.bf16 %v6260_v46, %v6179_v53 }
 0x36e   : > { %4548 = vrot.lane.b32.xlu1 %v4547_v50, %s4709_s20  ;;  %4042 = vmatpush3.msra.mxu0 %v2461_v12  ;;  %v4622_v50 = vpack.i.bf16 %v6179_v53, %v6017_v22  ;;  %v2472_v12 = vld [vmem:[%s7536_s5 + $0x198] sm:$0xff] }
 0x36f   : > { %4043 = vmatprep.subr.mxu0 %v2476_v4  ;;  %v1989_v4 = vrot.slane %v6262_v10, 1  ;;  %v2455_v10 = vld [vmem:[%s7536_s5 + $0x110] sm:$0xff] }
 0x370   : > { %4044 = vmatpush3.msra.mxu0 %v2460_v61  ;;  %4613 = vrot.lane.b32.xlu0 %v4612_v13, %s4709_s20  ;;  %v2456_v61 = vld [vmem:[%s7536_s5 + $0x118] sm:$0xff]  ;;  %v1986_v13 = vrot.slane %v6269_v52, 1  ;;  %v2454_v52 = vld [vmem:[%s7536_s5 + $0x108] sm:$0xff] }
 0x371   : > { %4045 = vmatprep.subr.mxu0 %v2475_v8  ;;  %v2471_v8 = vld [vmem:[%s7536_s5 + $0x190] sm:$0xff] }
 0x372   : > { %4558 = vrot.lane.b32.xlu1 %v6202_v51, %s4710_s21  ;;  %4046 = vmatpush3.msra.mxu0 %v2459_v7  ;;  %v2457_v51 = vld [vmem:[%s7536_s5 + $0x120] sm:$0xff]  ;;  %v1985_v7 = vrot.slane %v6108_v3, 1  ;;  %v6397_v3 = vsel %vm433_vm3, %v1988_v43, %v1989_v4  ;;  %v4592_v43 = vpack.i.bf16 %v6089_v37, %v5887_v47  ;;  %v4607_v4 = vpack.i.bf16 %v6137_v26, %v5957_v45 }
 0x373   : > { %4047 = vmatprep.subr.mxu0 %v2474_v14  ;;  %v4632_v14 = vpack.i.bf16 %v6207_v35, %v6061_v32  ;;  %v4627_v47 = vpack.i.bf16 %v6218_v6, %v6058_v39 }
 0x374   : > { %4048 = vmatpush3.msra.mxu0 %v2458_v41  ;;  %4623 = vrot.lane.b32.xlu0 %v4622_v50, %s4708_s19  ;;  %v2470_v41 = vld [vmem:[%s7536_s5 + $0x188] sm:$0xff] }
 0x375   : > { %4049 = vmatprep.subr.mxu0 %v2473_v33  ;;  %v2469_v33 = vld [vmem:[%s7536_s5 + $0x180] sm:$0xff] }
 0x376   : > { %4573 = vrot.lane.b32.xlu1 %v4572_v57, %s4709_s20  ;;  %4050 = vmatpush3.msra.mxu0 %v2457_v51  ;;  %v4587_v57 = vpack.i.bf16 %v6144_v9, %v5871_v38  ;;  %v2453_v51 = vld [vmem:[%s7536_s5 + $0x100] sm:$0xff] }
 0x377   : > { %4051 = vmatprep.subr.mxu0 %v2472_v12  ;;  %v2548_v12 = vld [vmem:[%s7536_s5 + $0x3f8] sm:$0xff] }
 0x378   : > { %4052 = vmatpush3.msra.mxu0 %v2456_v61  ;;  %4633 = vrot.lane.b32.xlu0 %v4632_v14, %s4709_s20  ;;  %v4617_v61 = vpack.i.bf16 %v6173_v20, %v5905_v58 }
 0x379   : > { %4053 = vmatprep.subr.mxu0 %v2471_v8  ;;  %v1851_v8 = vld [vmem:[#allocation4 + $0x130] sm:$0x3] }
 0x37a   : > { %4578 = vrot.lane.b32.xlu1 %v6238_v19, %s4710_s21  ;;  %4054 = vmatpush3.msra.mxu0 %v2455_v10  ;;  %v6409_v19 = vsel %vm433_vm3, %v1985_v7, %v1986_v13  ;;  %v1852_v7 = vld [vmem:[#allocation4 + $0x138] sm:$0x3]  ;;  %v1850_v13 = vld [vmem:[#allocation4 + $0x128] sm:$0xff]  ;;  %v2018_v14 = vrot.slane %v1851_v8, 1 }
 0x37b   : > { %4055 = vmatprep.subr.mxu0 %v2470_v41  ;;  %v4642_v50 = vpack.i.bf16 %v6397_v3, %v6409_v19  ;;  %v2020_v10 = vrot.slane %v1850_v13, 1  ;;  %v2021_v41 = vrot.slane %v1852_v7, 1 }
 0x37c   : > { %4056 = vmatpush3.msra.mxu0 %v2454_v52  ;;  %v2019_v52 = vsel %vm433_vm3, %v1885_v30, %v2018_v14 }
 0x37d   : > { %4057 = vmatprep.subr.mxu0 %v2469_v33  ;;  %4643 = vrot.lane.b32.xlu0 %v4642_v50, %s4709_s20  ;;  %v2022_v33 = vsel %vm433_vm3, %v2020_v10, %v2021_v41 }
 0x37e   : > { %4588 = vrot.lane.b32.xlu1 %v4587_v57, %s4709_s20  ;;  %4058 = vmatpush3.msra.mxu0 %v2453_v51  ;;  %v4637_v51 = vpack.i.bf16 %v1850_v13, %v6260_v46 }
 0x37f   : > { %4139 = vmatprep.subr.mxu0 %v2548_v12 }
 0x382   : > { %4593 = vrot.lane.b32.xlu1 %v4592_v43, %s4708_s19  ;;  %v4647_v43 = vpack.i.bf16 %v2022_v33, %v2019_v52 }
 0x386   : > { %4608 = vrot.lane.b32.xlu1 %v4607_v4, %s4708_s19 }
 0x38a   : > { %4618 = vrot.lane.b32.xlu1 %v4617_v61, %s4709_s20 }
 0x38e   : > { %4628 = vrot.lane.b32.xlu1 %v4627_v47, %s4709_s20 }
 0x38f   : > { %v6437_v57 = vpop.permute.xlu1 %4418 }
 0x390   : > { %v4421_v50 = vunpack.i.h.bf16 %v6437_v57  ;;  %v4420_v12 = vunpack.i.l.bf16 %v6437_v57  ;;  %v2541_v57 = vld [vmem:[%s7536_s5 + $0x3c0] sm:$0xff] }
 0x392   : > { %4638 = vrot.lane.b32.xlu1 %v4637_v51, %s4708_s19  ;;  %v2375_v42 = vsel %vm972_vm13, %v5920_v16, %v4420_v12  ;;  %v2376_v30 = vsel %vm972_vm13, %v6089_v37, %v4421_v50 }
 0x393   : > { %2698 = vmatprep.mubr.f32.mxu0 %v2375_v42 }
 0x394   : > { %2699 = vmatmul.mubr.f32.gmra.mxu0 %v5851_v63 }
 0x395   : > { %2703 = vmatprep.mubr.f32.mxu0 %v2376_v30 }
 0x396   : > { %4648 = vrot.lane.b32.xlu1 %v4647_v43, %s4709_s20  ;;  %v6453_v46 = vpop.permute.xlu0 %4423 }
 0x397   : > { %v4426_v4 = vunpack.i.h.bf16 %v6453_v46  ;;  %v4425_v61 = vunpack.i.l.bf16 %v6453_v46  ;;  %v2578_v46 = vld [vmem:[%s7536_s5 + $0x4e8] sm:$0xff] }
 0x398   : > { %2704 = vmatmul.mubr.f32.gmra.mxu0 %v5859_v59 }
 0x399   : > { %v2377_v63 = vsel %vm972_vm13, %v5957_v45, %v4425_v61  ;;  %v2378_v37 = vsel %vm972_vm13, %v6137_v26, %v4426_v4 }
 0x39a   : > { %v4434_v16 = vpop.permute.xlu0 %4433  ;;  %2708 = vmatprep.mubr.f32.mxu0 %v2377_v63 }
 0x39b   : > { %v4436_v26 = vunpack.i.h.bf16 %v4434_v16  ;;  %v4435_v41 = vunpack.i.l.bf16 %v4434_v16 }
 0x39c   : > { %2709 = vmatmul.mubr.f32.gmra.mxu0 %v5878_v54 }
 0x39d   : > { %2713 = vmatprep.mubr.f32.mxu0 %v2378_v37  ;;  %v2125_v42 = vsel %vm1306_vm1, %v4435_v41, %v4436_v26 }
 0x39e   : > { %v6467_v8 = vpop.permute.xlu0 %4443 }
 0x39f   : > { %v4445_v33 = vunpack.i.l.bf16 %v6467_v8 }
 0x3a0   : > { %2714 = vmatmul.mubr.f32.gmra.mxu0 %v5895_v29 }
 0x3a2   : > { %v6470_v59 = vpop.permute.xlu0 %4453 }
 0x3a3   : > { %v4455_v26 = vunpack.i.l.bf16 %v6470_v59 }
 0x3a6   : > { %v6472_v7 = vpop.permute.xlu0 %4463 }
 0x3aa   : > { %v6474_v13 = vpop.permute.xlu0 %4473 }
 0x3ae   : > { %v6478_v10 = vpop.permute.xlu0 %4483 }
 0x3b0   : > { %v6476_v45 = vpop.permute.xlu1 %4428 }
 0x3b1   : > { %v7542_v54 = vunpack.i.h.bf16 %v6476_v45  ;;  %v7543_v14 = vunpack.i.l.bf16 %v6476_v45 }
 0x3b2   : > { %v6486_v52 = vpop.permute.xlu0 %4493 }
 0x3b3   : > { %v2379_v29 = vsel %vm972_vm13, %v6017_v22, %v7543_v14  ;;  %v2380_v43 = vsel %vm972_vm13, %v6179_v53, %v7542_v54  ;;  %v4456_v53 = vunpack.i.h.bf16 %v6470_v59  ;;  %v2547_v59 = vld [vmem:[%s7536_s5 + $0x3f0] sm:$0xff] }
 0x3b4   : > { %v4439_v47 = vpop.permute.xlu1 %4438  ;;  %2718 = vmatprep.mubr.f32.mxu0 %v2379_v29  ;;  %v4446_v29 = vunpack.i.h.bf16 %v6467_v8 }
 0x3b5   : > { %v4440_v51 = vunpack.i.l.bf16 %v4439_v47  ;;  %2719 = vmatmul.mubr.f32.gmra.mxu0 %v6001_v17  ;;  %v2389_v17 = vsel %vm1315_vm4, %v2125_v42, %v4445_v33 }
 0x3b6   : > { %2723 = vmatprep.mubr.f32.mxu0 %v2380_v43  ;;  %v6495_v63 = vpop.permute.xlu0 %4498  ;;  %v4441_v43 = vunpack.i.h.bf16 %v4439_v47 }
 0x3b7   : > { %v2069_v22 = vsel %vm972_vm13, %v4415_v2, %v4440_v51  ;;  %v7544_v51 = vunpack.i.l.bf16 %v6472_v7 }
 0x3b8   : > { %v4449_v30 = vpop.permute.xlu1 %4448  ;;  %v2381_v42 = vsel %vm1306_vm1, %v2069_v22, %v4435_v41  ;;  %v2546_v41 = vld [vmem:[%s7536_s5 + $0x3e8] sm:$0xff]  ;;  %v2070_v22 = vsel %vm972_vm13, %v4416_v60, %v4441_v43 }
 0x3b9   : > { %v4451_v16 = vunpack.i.h.bf16 %v4449_v30  ;;  %v4450_v37 = vunpack.i.l.bf16 %v4449_v30  ;;  %2724 = vmatmul.mubr.f32.gmra.mxu0 %v6034_v15 }
 0x3ba   : > { %2793 = vmatprep.mubr.f32.mxu0 %v2389_v17  ;;  %v6510_v15 = vpop.permute.xlu0 %4513 }
 0x3bb   : > { %v2126_v2 = vsel %vm1306_vm1, %v4450_v37, %v4451_v16  ;;  %v2531_v16 = vld [vmem:[%s7536_s5 + $0x370] sm:$0xff] }
 0x3bc   : > { %v4459_v30 = vpop.permute.xlu1 %4458  ;;  %v2390_v17 = vsel %vm1315_vm4, %v2126_v2, %v4446_v29  ;;  %v2530_v2 = vld [vmem:[%s7536_s5 + $0x368] sm:$0xff] }
 0x3bd   : > { %v4460_v47 = vunpack.i.l.bf16 %v4459_v30  ;;  %2794 = vmatmul.mubr.f32.vlgmr.msra.gmra.mxu0 %v2381_v42  ;;  %v2127_v42 = vsel %vm1306_vm1, %v4455_v26, %v4456_v53  ;;  %v2529_v53 = vld [vmem:[%s7536_s5 + $0x360] sm:$0xff] }
 0x3be   : > { %4140 = vmatpush3.msra.mxu0 %v2532_v5  ;;  %2798 = vmatprep.mubr.f32.mxu0 %v2390_v17  ;;  %v4524_v14 = vpop.permute.xlu0 %4523  ;;  %v2382_v5 = vsel %vm1306_vm1, %v2070_v22, %v4450_v37  ;;  %v2391_v17 = vsel %vm1315_vm4, %v2127_v42, %v7544_v51  ;;  %v2544_v22 = vld [vmem:[%s7536_s5 + $0x3d8] sm:$0xff] }
 0x3bf   : > { %4141 = vmatprep.subr.mxu0 %v2547_v59  ;;  %v4525_v59 = vunpack.i.l.bf16 %v4524_v14  ;;  %v2071_v37 = vsel %vm972_vm13, %v4420_v12, %v4460_v47  ;;  %v4476_v12 = vunpack.i.h.bf16 %v6474_v13  ;;  %v4475_v47 = vunpack.i.l.bf16 %v6474_v13  ;;  %v2527_v13 = vld [vmem:[%s7536_s5 + $0x350] sm:$0xff] }
 0x3c0   : > { %4142 = vmatpush3.msra.mxu0 %v2531_v16  ;;  %v4469_v54 = vpop.permute.xlu1 %4468  ;;  %v4466_v16 = vunpack.i.h.bf16 %v6472_v7 }
 0x3c1   : > { %v4471_v60 = vunpack.i.h.bf16 %v4469_v54  ;;  %v4470_v43 = vunpack.i.l.bf16 %v4469_v54  ;;  %4143 = vmatprep.subr.mxu0 %v2546_v41  ;;  %2799 = vmatmul.mubr.f32.gmra.mxu0 %v2382_v5  ;;  %v4461_v54 = vunpack.i.h.bf16 %v4459_v30  ;;  %v4526_v41 = vunpack.i.h.bf16 %v4524_v14  ;;  %v2528_v5 = vld [vmem:[%s7536_s5 + $0x358] sm:$0xff] }
 0x3c2   : > { %4144 = vmatpush3.msra.mxu0 %v2530_v2  ;;  %2803 = vmatprep.mubr.f32.mxu0 %v2391_v17  ;;  %v2181_v42 = vsel %vm1315_vm4, %v4445_v33, %v4525_v59  ;;  %v2383_v17 = vsel %vm1306_vm1, %v2071_v37, %v4455_v26  ;;  %v2543_v33 = vld [vmem:[%s7536_s5 + $0x3d0] sm:$0xff]  ;;  %v4485_v30 = vunpack.i.l.bf16 %v6478_v10  ;;  %v2542_v26 = vld [vmem:[%s7536_s5 + $0x3c8] sm:$0xff] }
 0x3c3   : > { %4145 = vmatprep.subr.mxu0 %v2545_v23  ;;  %v2128_v51 = vsel %vm1306_vm1, %v4470_v43, %v4471_v60  ;;  %2899 = vmatmul.mubr.f32.vlgmr.msra.gmra.mxu1 %v2181_v42  ;;  %v2182_v60 = vsel %vm1315_vm4, %v4446_v29, %v4526_v41  ;;  %v2526_v59 = vld [vmem:[%s7536_s5 + $0x348] sm:$0xff]  ;;  %v2525_v29 = vld [vmem:[%s7536_s5 + $0x340] sm:$0xff]  ;;  %v4486_v41 = vunpack.i.h.bf16 %v6478_v10  ;;  %v2540_v42 = vld [vmem:[%s7536_s5 + $0x3b8] sm:$0xff] }
 0x3c4   : > { %4146 = vmatpush3.msra.mxu0 %v2529_v53  ;;  %v6556_v2 = vpop.permute.xlu1 %4478  ;;  %v2392_v14 = vsel %vm1315_vm4, %v2128_v51, %v4466_v16  ;;  %2903 = vmatprep.mubr.f32.mxu1 %v5871_v38  ;;  %v2072_v51 = vsel %vm972_vm13, %v4421_v50, %v4461_v54  ;;  %v2129_v38 = vsel %vm1306_vm1, %v4475_v47, %v4476_v12  ;;  %v2564_v54 = vld [vmem:[%s7536_s5 + $0x478] sm:$0xff] }
 0x3c5   : > { %v4480_v23 = vunpack.i.l.bf16 %v6556_v2  ;;  %4147 = vmatprep.subr.mxu0 %v2544_v22  ;;  %2804 = vmatmul.mubr.f32.gmra.mxu0 %v2383_v17  ;;  %v2384_v37 = vsel %vm1306_vm1, %v2072_v51, %v4470_v43  ;;  %v2393_v8 = vsel %vm1315_vm4, %v2129_v38, %v4485_v30  ;;  %v4496_v17 = vunpack.i.h.bf16 %v6486_v52 }
 0x3c6   : > { %4148 = vmatpush3.msra.mxu0 %v2528_v5  ;;  %2808 = vmatprep.mubr.f32.mxu0 %v2392_v14  ;;  %v4481_v5 = vunpack.i.h.bf16 %v6556_v2  ;;  %v4495_v14 = vunpack.i.l.bf16 %v6486_v52  ;;  %v2579_v52 = vld [vmem:[%s7536_s5 + $0x4f0] sm:$0xff] }
 0x3c7   : > { %4149 = vmatprep.subr.mxu0 %v2543_v33  ;;  %2904 = vmatmul.mubr.f32.gmra.mxu1 %v2182_v60  ;;  %v2073_v43 = vsel %vm972_vm13, %v4425_v61, %v4480_v23  ;;  %v2524_v61 = vld [vmem:[%s7536_s5 + $0x338] sm:$0xff]  ;;  %v6612_v33 = vpop.permute.xlu0 %4533  ;;  %v2563_v60 = vld [vmem:[%s7536_s5 + $0x470] sm:$0xff] }
 0x3c8   : > { %4150 = vmatpush3.msra.mxu0 %v2527_v13  ;;  %v4489_v53 = vpop.permute.xlu1 %4488  ;;  %2908 = vmatprep.mubr.f32.mxu1 %v5874_v40  ;;  %v2385_v2 = vsel %vm1306_vm1, %v2073_v43, %v4475_v47  ;;  %v2539_v13 = vld [vmem:[%s7536_s5 + $0x3b0] sm:$0xff] }
 0x3c9   : > { %v4491_v50 = vunpack.i.h.bf16 %v4489_v53  ;;  %v4490_v22 = vunpack.i.l.bf16 %v4489_v53  ;;  %4151 = vmatprep.subr.mxu0 %v2542_v26  ;;  %2809 = vmatmul.mubr.f32.gmra.mxu0 %v2384_v37  ;;  %v4500_v26 = vunpack.i.l.bf16 %v6495_v63  ;;  %v2523_v47 = vld [vmem:[%s7536_s5 + $0x330] sm:$0xff]  ;;  %v2074_v53 = vsel %vm972_vm13, %v4426_v4, %v4481_v5  ;;  %v2522_v37 = vld [vmem:[%s7536_s5 + $0x328] sm:$0xff] }
 0x3ca   : > { %4152 = vmatpush3.msra.mxu0 %v2526_v59  ;;  %2813 = vmatprep.mubr.f32.mxu0 %v2393_v8  ;;  %v2538_v59 = vld [vmem:[%s7536_s5 + $0x3a8] sm:$0xff]  ;;  %v2537_v8 = vld [vmem:[%s7536_s5 + $0x3a0] sm:$0xff] }
 0x3cb   : > { %4153 = vmatprep.subr.mxu0 %v2541_v57  ;;  %v2130_v12 = vsel %vm1306_vm1, %v4490_v22, %v4491_v50  ;;  %4196 = vmatpush3.msra.mxu1 %v2564_v54  ;;  %v2386_v57 = vsel %vm1306_vm1, %v2074_v53, %v4490_v22  ;;  %v2131_v50 = vsel %vm1306_vm1, %v4495_v14, %v4496_v17  ;;  %v2521_v22 = vld [vmem:[%s7536_s5 + $0x320] sm:$0xff]  ;;  %v7545_v54 = vunpack.i.l.bf16 %v6476_v45  ;;  %v2562_v5 = vld [vmem:[%s7536_s5 + $0x468] sm:$0xff]  ;;  %v2536_v17 = vld [vmem:[%s7536_s5 + $0x398] sm:$0xff] }
 0x3cc   : > { %4154 = vmatpush3.msra.mxu0 %v2525_v29  ;;  %v6614_v23 = vpop.permute.xlu1 %4503  ;;  %v2394_v40 = vsel %vm1315_vm4, %v2130_v12, %v4486_v41  ;;  %4197 = vmatprep.subr.mxu1 %v2579_v52  ;;  %v2395_v43 = vsel %vm1315_vm4, %v2131_v50, %v4500_v26  ;;  %v6664_v12 = vpop.permute.xlu0 %4543  ;;  %v4516_v52 = vunpack.i.h.bf16 %v6510_v15  ;;  %v2577_v53 = vld [vmem:[%s7536_s5 + $0x4e0] sm:$0xff] }
 0x3cd   : > { %v4505_v51 = vunpack.i.l.bf16 %v6614_v23  ;;  %4155 = vmatprep.subr.mxu0 %v2540_v42  ;;  %2814 = vmatmul.mubr.f32.gmra.mxu0 %v2385_v2  ;;  %v4506_v2 = vunpack.i.h.bf16 %v6614_v23 }
 0x3ce   : > { %4156 = vmatpush3.msra.mxu0 %v2524_v61  ;;  %2818 = vmatprep.mubr.f32.mxu0 %v2394_v40  ;;  %v4501_v61 = vunpack.i.h.bf16 %v6495_v63  ;;  %v2520_v40 = vld [vmem:[%s7536_s5 + $0x318] sm:$0xff] }
 0x3cf   : > { %4157 = vmatprep.subr.mxu0 %v2539_v13  ;;  %4198 = vmatpush3.msra.mxu1 %v2563_v60  ;;  %v2075_v42 = vsel %vm972_vm13, %v7545_v54, %v4505_v51  ;;  %v4515_v51 = vunpack.i.l.bf16 %v6510_v15 }
 0x3d0   : > { %4158 = vmatpush3.msra.mxu0 %v2523_v47  ;;  %v4509_v38 = vpop.permute.xlu1 %4508  ;;  %4199 = vmatprep.subr.mxu1 %v2578_v46  ;;  %v2387_v60 = vsel %vm1306_vm1, %v2075_v42, %v4495_v14  ;;  %v2519_v14 = vld [vmem:[%s7536_s5 + $0x310] sm:$0xff]  ;;  %v6704_v46 = vpop.permute.xlu0 %4553  ;;  %v4536_v42 = vunpack.i.h.bf16 %v6612_v33 }
 0x3d1   : > { %v4511_v4 = vunpack.i.h.bf16 %v4509_v38  ;;  %v4510_v29 = vunpack.i.l.bf16 %v4509_v38  ;;  %4159 = vmatprep.subr.mxu0 %v2538_v59  ;;  %2819 = vmatmul.mubr.f32.gmra.mxu0 %v2386_v57  ;;  %v2535_v59 = vld [vmem:[%s7536_s5 + $0x390] sm:$0xff]  ;;  %v2534_v38 = vld [vmem:[%s7536_s5 + $0x388] sm:$0xff]  ;;  %v7546_v57 = vunpack.i.h.bf16 %v6476_v45  ;;  %v2237_v54 = vsel %vm972_vm13, %v4515_v51, %v4516_v52  ;;  %v2576_v45 = vld [vmem:[%s7536_s5 + $0x4d8] sm:$0xff] }
 0x3d2   : > { %4160 = vmatpush3.msra.mxu0 %v2522_v37  ;;  %2823 = vmatprep.mubr.f32.mxu0 %v2395_v43  ;;  %v2561_v37 = vld [vmem:[%s7536_s5 + $0x460] sm:$0xff]  ;;  %v2560_v52 = vld [vmem:[%s7536_s5 + $0x458] sm:$0xff] }
 0x3d3   : > { %4161 = vmatprep.subr.mxu0 %v2537_v8  ;;  %v2132_v13 = vsel %vm1306_vm1, %v4510_v29, %v4511_v4  ;;  %4200 = vmatpush3.msra.mxu1 %v2562_v5  ;;  %v2076_v50 = vsel %vm972_vm13, %v7546_v57, %v4506_v2  ;;  %v2518_v8 = vld [vmem:[%s7536_s5 + $0x308] sm:$0xff]  ;;  %v4535_v5 = vunpack.i.l.bf16 %v6612_v33  ;;  %v2517_v2 = vld [vmem:[%s7536_s5 + $0x300] sm:$0xff] }
 0x3d4   : > { %4162 = vmatpush3.msra.mxu0 %v2521_v22  ;;  %v6676_v47 = vpop.permute.xlu1 %4518  ;;  %v2396_v23 = vsel %vm1315_vm4, %v2132_v13, %v4501_v61  ;;  %4201 = vmatprep.subr.mxu1 %v2577_v53  ;;  %v2388_v43 = vsel %vm1306_vm1, %v2076_v50, %v4510_v29  ;;  %v2533_v22 = vld [vmem:[%s7536_s5 + $0x380] sm:$0xff]  ;;  %v7547_v13 = vunpack.i.l.bf16 %v6472_v7  ;;  %v2575_v50 = vld [vmem:[%s7536_s5 + $0x4d0] sm:$0xff] }
 0x3d5   : > { %v4520_v15 = vunpack.i.l.bf16 %v6676_v47  ;;  %4163 = vmatprep.subr.mxu0 %v2536_v17  ;;  %2824 = vmatmul.mubr.f32.gmra.mxu0 %v2387_v60  ;;  %v2238_v57 = vsel %vm972_vm13, %v4535_v5, %v4536_v42  ;;  %v2574_v42 = vld [vmem:[%s7536_s5 + $0x4c8] sm:$0xff] }
 0x3d6   : > { %4164 = vmatpush3.msra.mxu0 %v2520_v40  ;;  %2828 = vmatprep.mubr.f32.mxu0 %v2396_v23  ;;  %v4521_v40 = vunpack.i.h.bf16 %v6676_v47 }
 0x3d7   : > { %4165 = vmatprep.subr.mxu0 %v2535_v59  ;;  %4202 = vmatpush3.msra.mxu1 %v2561_v37  ;;  %v2405_v29 = vsel %vm1306_vm1, %v2237_v54, %v4520_v15  ;;  %v2596_v59 = vld [vmem:[%s7536_s5 + $0x578] sm:$0xff]  ;;  %v6736_v37 = vld [vmem:[#allocation4] sm:$0xff] }
 0x3d8   : > { %4166 = vmatpush3.msra.mxu0 %v2519_v14  ;;  %v4529_v4 = vpop.permute.xlu1 %4528  ;;  %4203 = vmatprep.subr.mxu1 %v2576_v45 }
 0x3d9   : > { %v4530_v17 = vunpack.i.l.bf16 %v4529_v4  ;;  %4167 = vmatprep.subr.mxu0 %v2534_v38  ;;  %2829 = vmatmul.mubr.f32.gmra.mxu0 %v2388_v43  ;;  %v4531_v60 = vunpack.i.h.bf16 %v4529_v4  ;;  %v2397_v38 = vsel %vm972_vm13, %v6077_v28, %v4515_v51  ;;  %v2406_v4 = vsel %vm1306_vm1, %v2238_v57, %v4521_v40  ;;  %v2559_v28 = vld [vmem:[%s7536_s5 + $0x450] sm:$0xff] }
 0x3da   : > { %4168 = vmatpush3.msra.mxu0 %v2518_v8  ;;  %3003 = vmatprep.mubr.f32.mxu0 %v2405_v29  ;;  %v6746_v8 = vpop.permute.xlu0 %4563  ;;  %v4545_v43 = vunpack.i.l.bf16 %v6664_v12  ;;  %v2398_v29 = vsel %vm972_vm13, %v6144_v9, %v4535_v5  ;;  %v2593_v5 = vld [vmem:[%s7536_s5 + $0x560] sm:$0xff] }
 0x3db   : > { %4169 = vmatprep.subr.mxu0 %v2533_v22  ;;  %v2183_v33 = vsel %vm1315_vm4, %v7547_v13, %v4530_v17  ;;  %4204 = vmatpush3.msra.mxu1 %v2560_v52  ;;  %v2184_v54 = vsel %vm1315_vm4, %v4466_v16, %v4531_v60  ;;  %v2594_v17 = vld [vmem:[%s7536_s5 + $0x568] sm:$0xff]  ;;  %v4555_v13 = vunpack.i.l.bf16 %v6704_v46 }
 0x3dc   : > { %4170 = vmatpush3.msra.mxu0 %v2517_v2  ;;  %v6729_v23 = vpop.permute.xlu1 %4538  ;;  %2909 = vmatmul.mubr.f32.gmra.mxu1 %v2183_v33  ;;  %v2558_v16 = vld [vmem:[%s7536_s5 + $0x448] sm:$0xff]  ;;  %v4556_v2 = vunpack.i.h.bf16 %v6704_v46  ;;  %v2573_v33 = vld [vmem:[%s7536_s5 + $0x4c0] sm:$0xff] }
 0x3dd   : > { %v4541_v53 = vunpack.i.h.bf16 %v6729_v23  ;;  %v4540_v14 = vunpack.i.l.bf16 %v6729_v23  ;;  %3149 = vmatprep.subr.mxu0 %v6736_v37  ;;  %2913 = vmatprep.mubr.f32.mxu1 %v5902_v31  ;;  %v2595_v31 = vld [vmem:[%s7536_s5 + $0x570] sm:$0xff]  ;;  %v2400_v10 = vsel %vm972_vm13, %v6183_v25, %v4555_v13 }
 0x3de   : > { %3004 = vmatmul.mubr.f32.vlgmr.msra.gmra.mxu0 %v2397_v38  ;;  %4205 = vmatprep.subr.mxu1 %v2575_v50  ;;  %v6784_v9 = vpop.permute.xlu0 %4568  ;;  %v4546_v38 = vunpack.i.h.bf16 %v6664_v12  ;;  %v2597_v12 = vld [vmem:[%s7536_s5 + $0x580] sm:$0xff] }
 0x3df   : > { %3150 = vmatpush1.msra.mxu0 %v2596_v59  ;;  %3008 = vmatprep.mubr.f32.mxu0 %v2406_v4  ;;  %v2239_v51 = vsel %vm972_vm13, %v4540_v14, %v4541_v53  ;;  %v2572_v59 = vld [vmem:[%s7536_s5 + $0x4b8] sm:$0xff]  ;;  %v2240_v53 = vsel %vm972_vm13, %v4555_v13, %v4556_v2  ;;  %v2399_v50 = vsel %vm972_vm13, %v6129_v11, %v4540_v14  ;;  %v2591_v14 = vld [vmem:[%s7536_s5 + $0x550] sm:$0xff]  ;;  %v4571_v2 = vunpack.i.h.bf16 %v6784_v9  ;;  %v2589_v13 = vld [vmem:[%s7536_s5 + $0x540] sm:$0xff] }
 0x3e0   : > { %3151 = vmatprep.subr.mxu0 %v6736_v37  ;;  %v4549_v22 = vpop.permute.xlu1 %4548  ;;  %2914 = vmatmul.mubr.f32.gmra.mxu1 %v2184_v54  ;;  %v2407_v7 = vsel %vm1306_vm1, %v2239_v51, %v4545_v43  ;;  %v2556_v4 = vld [vmem:[%s7536_s5 + $0x438] sm:$0xff]  ;;  %v2408_v11 = vsel %vm1306_vm1, %v2240_v53, %v4546_v38  ;;  %v4565_v54 = vunpack.i.l.bf16 %v6746_v8  ;;  %v4566_v53 = vunpack.i.h.bf16 %v6746_v8 }
 0x3e1   : > { %3152 = vmatpush1.msra.mxu0 %v2595_v31  ;;  %v4550_v45 = vunpack.i.l.bf16 %v4549_v22  ;;  %4206 = vmatpush3.msra.mxu1 %v2559_v28  ;;  %v4551_v57 = vunpack.i.h.bf16 %v4549_v22  ;;  %v2571_v28 = vld [vmem:[%s7536_s5 + $0x4b0] sm:$0xff] }
 0x3e2   : > { %3153 = vmatprep.subr.mxu0 %v6736_v37  ;;  %2918 = vmatprep.mubr.f32.mxu1 %v5905_v58  ;;  %v2557_v58 = vld [vmem:[%s7536_s5 + $0x440] sm:$0xff]  ;;  %v6820_v51 = vpop.permute.xlu0 %4583 }
 0x3e3   : > { %3009 = vmatmul.mubr.f32.gmra.mxu0 %v2398_v29  ;;  %4207 = vmatprep.subr.mxu1 %v2574_v42  ;;  %v2185_v46 = vsel %vm1315_vm4, %v4485_v30, %v4550_v45  ;;  %v2592_v30 = vld [vmem:[%s7536_s5 + $0x558] sm:$0xff]  ;;  %v2186_v42 = vsel %vm1315_vm4, %v4486_v41, %v4551_v57  ;;  %v2570_v29 = vld [vmem:[%s7536_s5 + $0x4a8] sm:$0xff] }
 0x3e4   : > { %3154 = vmatpush1.msra.mxu0 %v2594_v17  ;;  %v6789_v52 = vpop.permute.xlu1 %4558  ;;  %3013 = vmatprep.mubr.f32.mxu0 %v2407_v7  ;;  %v2590_v7 = vld [vmem:[%s7536_s5 + $0x548] sm:$0xff] }
 0x3e5   : > { %4208 = vmatpush3.msra.mxu1 %v2558_v16  ;;  %3155 = vmatprep.subr.mxu0 %v6736_v37  ;;  %v4561_v60 = vunpack.i.h.bf16 %v6789_v52  ;;  %v4560_v23 = vunpack.i.l.bf16 %v6789_v52  ;;  %v2554_v16 = vld [vmem:[%s7536_s5 + $0x428] sm:$0xff]  ;;  %v2587_v52 = vld [vmem:[%s7536_s5 + $0x530] sm:$0xff] }
 0x3e6   : > { %4209 = vmatprep.subr.mxu1 %v2573_v33  ;;  %3156 = vmatpush1.msra.mxu0 %v2593_v5  ;;  %v4570_v33 = vunpack.i.l.bf16 %v6784_v9  ;;  %v2569_v5 = vld [vmem:[%s7536_s5 + $0x4a0] sm:$0xff]  ;;  %v6863_v25 = vpop.permute.xlu0 %4598 }
 0x3e7   : > { %2919 = vmatmul.mubr.f32.gmra.mxu1 %v2185_v46  ;;  %3157 = vmatprep.subr.mxu0 %v6736_v37  ;;  %v2241_v22 = vsel %vm972_vm13, %v4560_v23, %v4561_v60 }
 0x3e8   : > { %4210 = vmatpush3.msra.mxu1 %v2557_v58  ;;  %v6814_v31 = vpop.permute.xlu1 %4573  ;;  %2923 = vmatprep.mubr.f32.mxu1 %v6058_v39  ;;  %v2555_v39 = vld [vmem:[%s7536_s5 + $0x430] sm:$0xff]  ;;  %v2409_v41 = vsel %vm1306_vm1, %v2241_v22, %v4565_v54 }
 0x3e9   : > { %3014 = vmatmul.mubr.f32.gmra.mxu0 %v2399_v50  ;;  %4211 = vmatprep.subr.mxu1 %v2572_v59  ;;  %v4575_v45 = vunpack.i.l.bf16 %v6814_v31  ;;  %v2588_v59 = vld [vmem:[%s7536_s5 + $0x538] sm:$0xff]  ;;  %v4576_v57 = vunpack.i.h.bf16 %v6814_v31  ;;  %v2401_v50 = vsel %vm972_vm13, %v6173_v20, %v4560_v23  ;;  %v2567_v31 = vld [vmem:[%s7536_s5 + $0x490] sm:$0xff]  ;;  %v4585_v23 = vunpack.i.l.bf16 %v6820_v51 }
 0x3ea   : > { %3158 = vmatpush1.msra.mxu0 %v2592_v30  ;;  %3018 = vmatprep.mubr.f32.mxu0 %v2408_v11  ;;  %v2242_v30 = vsel %vm972_vm13, %v4570_v33, %v4571_v2  ;;  %v6902_v11 = vpop.permute.xlu0 %4603  ;;  %v4600_v2 = vunpack.i.l.bf16 %v6863_v25 }
 0x3eb   : > { %4212 = vmatpush3.msra.mxu1 %v2556_v4  ;;  %3159 = vmatprep.subr.mxu0 %v6736_v37  ;;  %v2187_v46 = vsel %vm1315_vm4, %v4500_v26, %v4575_v45  ;;  %v2568_v26 = vld [vmem:[%s7536_s5 + $0x498] sm:$0xff]  ;;  %v2410_v20 = vsel %vm1306_vm1, %v2242_v30, %v4566_v53  ;;  %v2188_v45 = vsel %vm1315_vm4, %v4501_v61, %v4576_v57 }
 0x3ec   : > { %4213 = vmatprep.subr.mxu1 %v2571_v28  ;;  %v6840_v17 = vpop.permute.xlu1 %4578  ;;  %3160 = vmatpush1.msra.mxu0 %v2591_v14  ;;  %v2552_v4 = vld [vmem:[%s7536_s5 + $0x418] sm:$0xff]  ;;  %v2551_v14 = vld [vmem:[%s7536_s5 + $0x410] sm:$0xff]  ;;  %v2402_v61 = vsel %vm972_vm13, %v6218_v6, %v4570_v33 }
 0x3ed   : > { %2924 = vmatmul.mubr.f32.gmra.mxu1 %v2186_v42  ;;  %3161 = vmatprep.subr.mxu0 %v6736_v37  ;;  %v4581_v58 = vunpack.i.h.bf16 %v6840_v17  ;;  %v4580_v60 = vunpack.i.l.bf16 %v6840_v17  ;;  %v2566_v42 = vld [vmem:[%s7536_s5 + $0x488] sm:$0xff]  ;;  %v2584_v30 = vld [vmem:[%s7536_s5 + $0x518] sm:$0xff] }
 0x3ee   : > { %4214 = vmatpush3.msra.mxu1 %v2555_v39  ;;  %2928 = vmatprep.mubr.f32.mxu1 %v6061_v32  ;;  %v2553_v32 = vld [vmem:[%s7536_s5 + $0x420] sm:$0xff]  ;;  %v4614_v33 = vpop.permute.xlu0 %4613 }
 0x3ef   : > { %3019 = vmatmul.mubr.f32.gmra.mxu0 %v2400_v10  ;;  %4215 = vmatprep.subr.mxu1 %v2570_v29  ;;  %v2586_v10 = vld [vmem:[%s7536_s5 + $0x528] sm:$0xff] }
 0x3f0   : > { %3162 = vmatpush1.msra.mxu0 %v2590_v7  ;;  %v6871_v9 = vpop.permute.xlu1 %4588  ;;  %3023 = vmatprep.mubr.f32.mxu0 %v2409_v41  ;;  %v4586_v7 = vunpack.i.h.bf16 %v6820_v51  ;;  %v2550_v41 = vld [vmem:[%s7536_s5 + $0x408] sm:$0xff] }
 0x3f1   : > { %4216 = vmatpush3.msra.mxu1 %v2554_v16  ;;  %3163 = vmatprep.subr.mxu0 %v6736_v37  ;;  %v4591_v39 = vunpack.i.h.bf16 %v6871_v9  ;;  %v4590_v22 = vunpack.i.l.bf16 %v6871_v9  ;;  %v4601_v16 = vunpack.i.h.bf16 %v6863_v25  ;;  %v2549_v25 = vld [vmem:[%s7536_s5 + $0x400] sm:$0xff] }
 0x3f2   : > { %4217 = vmatprep.subr.mxu1 %v2569_v5  ;;  %3164 = vmatpush1.msra.mxu0 %v2589_v13  ;;  %v2565_v5 = vld [vmem:[%s7536_s5 + $0x480] sm:$0xff]  ;;  %v6982_v47 = vpop.permute.xlu0 %4623 }
 0x3f3   : > { %2929 = vmatmul.mubr.f32.gmra.mxu1 %v2187_v46  ;;  %3165 = vmatprep.subr.mxu0 %v6736_v37  ;;  %v2585_v13 = vld [vmem:[%s7536_s5 + $0x520] sm:$0xff]  ;;  %v2349_v9 = vsel %vm1315_vm4, %v4590_v22, %v4591_v39 }
 0x3f4   : > { %4218 = vmatpush3.msra.mxu1 %v2553_v32  ;;  %v6896_v28 = vpop.permute.xlu1 %4593  ;;  %2933 = vmatprep.mubr.f32.mxu1 %v6409_v19  ;;  %v2243_v19 = vsel %vm972_vm13, %v4580_v60, %v4581_v58  ;;  %v2293_v32 = vsel %vm1306_vm1, %v4520_v15, %v4586_v7  ;;  %v4606_v58 = vunpack.i.h.bf16 %v6902_v11  ;;  %v2403_v15 = vsel %vm972_vm13, %v6207_v35, %v4580_v60 }
 0x3f5   : > { %3024 = vmatmul.mubr.f32.gmra.mxu0 %v2401_v50  ;;  %4219 = vmatprep.subr.mxu1 %v2568_v26  ;;  %v2411_v63 = vsel %vm1306_vm1, %v2243_v19, %v4585_v23  ;;  %v4596_v6 = vunpack.i.h.bf16 %v6896_v28  ;;  %v4595_v46 = vunpack.i.l.bf16 %v6896_v28  ;;  %v4605_v26 = vunpack.i.l.bf16 %v6902_v11  ;;  %v2583_v11 = vld [vmem:[%s7536_s5 + $0x510] sm:$0xff]  ;;  %v4688_v28 = vld [vmem:[#allocation4 + $0x138] sm:$0x3] }
 0x3f6   : > { %3166 = vmatpush1.msra.mxu0 %v2588_v59  ;;  %3028 = vmatprep.mubr.f32.mxu0 %v2410_v20  ;;  %v2413_v59 = vsel %vm1315_vm4, %v2293_v32, %v4590_v22  ;;  %v4616_v35 = vunpack.i.h.bf16 %v4614_v33  ;;  %v4615_v60 = vunpack.i.l.bf16 %v4614_v33  ;;  %v2404_v19 = vsel %vm972_vm13, %v6397_v3, %v4600_v2 }
 0x3f7   : > { %4220 = vmatpush3.msra.mxu1 %v2552_v4  ;;  %3167 = vmatprep.subr.mxu0 %v6736_v37  ;;  %v2244_v4 = vsel %vm972_vm13, %v4600_v2, %v4601_v16  ;;  %v2350_v20 = vsel %vm1315_vm4, %v4605_v26, %v4606_v58  ;;  %v2599_v16 = vld [vmem:[%s7536_s5 + $0x590] sm:$0xff]  ;;  %v4625_v2 = vunpack.i.l.bf16 %v6982_v47 }
 0x3f8   : > { %4221 = vmatprep.subr.mxu1 %v2567_v31  ;;  %v6926_v29 = vpop.permute.xlu1 %4608  ;;  %3168 = vmatpush1.msra.mxu0 %v2587_v52  ;;  %v2294_v31 = vsel %vm1306_vm1, %v4521_v40, %v4596_v6  ;;  %v2412_v17 = vsel %vm1306_vm1, %v2244_v4, %v4595_v46  ;;  %v2582_v52 = vld [vmem:[%s7536_s5 + $0x508] sm:$0xff]  ;;  %v2351_v3 = vsel %vm1315_vm4, %v4615_v60, %v4616_v35  ;;  %v2027_v35 = vrot.slane %v4688_v28, 2 }
 0x3f9   : > { %2934 = vmatmul.mubr.f32.gmra.mxu1 %v2188_v45  ;;  %3169 = vmatprep.subr.mxu0 %v6736_v37  ;;  %v4610_v50 = vunpack.i.l.bf16 %v6926_v29  ;;  %v2414_v40 = vsel %vm1315_vm4, %v2294_v31, %v4605_v26  ;;  %v2581_v45 = vld [vmem:[%s7536_s5 + $0x500] sm:$0xff]  ;;  %v4611_v7 = vunpack.i.h.bf16 %v6926_v29  ;;  %v4626_v26 = vunpack.i.h.bf16 %v6982_v47 }
 0x3fa   : > { %4222 = vmatpush3.msra.mxu1 %v2551_v14  ;;  %3029 = vmatmul.mubr.f32.gmra.mxu0 %v2402_v61 }
 0x3fb   : > { %4223 = vmatprep.subr.mxu1 %v2566_v42  ;;  %3170 = vmatpush1.msra.mxu0 %v2586_v10  ;;  %v2295_v22 = vsel %vm1306_vm1, %v4545_v43, %v4610_v50  ;;  %v2600_v43 = vld [vmem:[%s7536_s5 + $0x598] sm:$0xff]  ;;  %v2298_v4 = vsel %vm1306_vm1, %v4566_v53, %v4626_v26  ;;  %v4687_v53 = vld [vmem:[#allocation4 + $0x128] sm:$0xff]  ;;  %v7115_v26 = vld [vmem:[%s7537_s6] ss:$0 sm:$0xff] }
 0x3fc   : > { %3033 = vmatprep.mubr.f32.mxu0 %v2411_v63  ;;  %4224 = vmatpush3.msra.mxu1 %v2550_v41  ;;  %v4619_v57 = vpop.permute.xlu1 %4618  ;;  %v2415_v10 = vsel %vm1315_vm4, %v2295_v22, %v4615_v60  ;;  %v4634_v41 = vpop.permute.xlu0 %4633  ;;  %v4689_v60 = vld [vmem:[#allocation4 + $0x130] sm:$0x3] }
 0x3fd   : > { %3171 = vmatprep.subr.mxu0 %v6736_v37  ;;  %4225 = vmatprep.subr.mxu1 %v2565_v5  ;;  %v4621_v14 = vunpack.i.h.bf16 %v4619_v57  ;;  %v4620_v39 = vunpack.i.l.bf16 %v4619_v57 }
 0x3fe   : > { %3172 = vmatpush1.msra.mxu0 %v2585_v13  ;;  %4226 = vmatpush3.msra.mxu1 %v2549_v25  ;;  %v2598_v13 = vld [vmem:[%s7536_s5 + $0x588] sm:$0xff]  ;;  %v4635_v25 = vunpack.i.l.bf16 %v4634_v41 }
 0x3ff   : > { %3108 = vmatprep.mubr.f32.mxu1 %v2349_v9  ;;  %3173 = vmatprep.subr.mxu0 %v6736_v37  ;;  %v2352_v29 = vsel %vm1315_vm4, %v4620_v39, %v4621_v14  ;;  %v2297_v9 = vsel %vm1306_vm1, %v4565_v54, %v4625_v2 }
 0x400   : > { %3034 = vmatmul.mubr.f32.gmra.mxu0 %v2403_v15  ;;  %3109 = vmatmul.mubr.f32.vlgmr.msra.gmra.mxu1 %v2413_v59  ;;  %v4629_v42 = vpop.permute.xlu1 %4628  ;;  %v4644_v32 = vpop.permute.xlu0 %4643 }
 0x401   : > { %3174 = vmatpush1.msra.mxu0 %v2584_v30  ;;  %3113 = vmatprep.mubr.f32.mxu1 %v2350_v20  ;;  %v4631_v63 = vunpack.i.h.bf16 %v4629_v42  ;;  %v4630_v61 = vunpack.i.l.bf16 %v4629_v42  ;;  %v4646_v59 = vunpack.i.h.bf16 %v4644_v32  ;;  %v4645_v30 = vunpack.i.l.bf16 %v4644_v32 }
 0x402   : > { %3175 = vmatprep.subr.mxu0 %v6736_v37  ;;  %3038 = vmatprep.mubr.f32.mxu0 %v2412_v17 }
 0x403   : > { %3176 = vmatpush1.msra.mxu0 %v2583_v11  ;;  %v2353_v6 = vsel %vm1315_vm4, %v4630_v61, %v4631_v63  ;;  %v2417_v58 = vsel %vm1315_vm4, %v2297_v9, %v4630_v61 }
 0x404   : > { %3177 = vmatprep.subr.mxu0 %v6736_v37  ;;  %3039 = vmatmul.mubr.f32.gmra.mxu0 %v2404_v19  ;;  %v4639_v33 = vpop.permute.xlu1 %4638 }
 0x405   : > { %3114 = vmatmul.mubr.f32.gmra.mxu1 %v2414_v40  ;;  %3178 = vmatpush1.msra.mxu0 %v2582_v52  ;;  %v4640_v57 = vunpack.i.l.bf16 %v4639_v33  ;;  %v4641_v17 = vunpack.i.h.bf16 %v4639_v33 }
 0x406   : > { %3118 = vmatprep.mubr.f32.mxu1 %v2351_v3  ;;  %3179 = vmatprep.subr.mxu0 %v6736_v37  ;;  %v4711_v3 = vmov -1.0  }
 0x407   : > { %3921 = vmatprep.mubr.msk.f32.mxu0 %vm972_vm13, %v5955_v24  ;;  %3180 = vmatpush1.msra.mxu0 %v2581_v45  ;;  %v2296_v24 = vsel %vm1306_vm1, %v4546_v38, %v4611_v7  ;;  %v4636_v38 = vunpack.i.h.bf16 %v4634_v41  ;;  %v2299_v11 = vsel %vm1306_vm1, %v4585_v23, %v4640_v57  ;;  %v2026_v23 = vrot.slane %v4687_v53, 2  ;;  %3348 = vst.msk [vmem:[#allocation5] sm:$0xff] %vm3347_vm7, %v4711_v3 }
 0x408   : > { %3205 = vmatprep.subr.mxu0 %v6736_v37  ;;  %v2416_v5 = vsel %vm1315_vm4, %v2296_v24, %v4620_v39  ;;  %v4649_v15 = vpop.permute.xlu1 %4648  ;;  %3351 = vst.msk [vmem:[#allocation5 + $0x10] sm:$0xff] %vm3347_vm7, %v4711_v3  ;;  %3353 = vst.msk [vmem:[#allocation5 + $0x20] sm:$0xff] %vm3347_vm7, %v4711_v3 }
 0x409   : > { %3119 = vmatmul.mubr.f32.gmra.mxu1 %v2415_v10  ;;  %3206 = vmatpush2.msra.mxu0 %v2600_v43  ;;  %v2354_v54 = vsel %vm1315_vm4, %v4635_v25, %v4636_v38  ;;  %v4651_v50 = vunpack.i.h.bf16 %v4649_v15  ;;  %v4650_v31 = vunpack.i.l.bf16 %v4649_v15  ;;  %3355 = vst.msk [vmem:[#allocation5 + $0x30] sm:$0xff] %vm3347_vm7, %v4711_v3  ;;  %3357 = vst.msk [vmem:[#allocation5 + $0x40] sm:$0xff] %vm3347_vm7, %v4711_v3 }
 0x40a   : > { %3207 = vmatprep.subr.mxu0 %v6736_v37  ;;  %3123 = vmatprep.mubr.f32.mxu1 %v2352_v29  ;;  %3359 = vst.msk [vmem:[#allocation5 + $0x50] sm:$0xff] %vm3347_vm7, %v4711_v3  ;;  %3361 = vst.msk [vmem:[#allocation5 + $0x60] sm:$0xff] %vm3347_vm7, %v4711_v3 }
 0x40b   : > { %3208 = vmatpush2.msra.mxu0 %v2599_v16  ;;  %v2356_v8 = vsel %vm1315_vm4, %v4650_v31, %v4651_v50  ;;  %3363 = vst.msk [vmem:[#allocation5 + $0x70] sm:$0xff] %vm3347_vm7, %v4711_v3  ;;  %3365 = vst.msk [vmem:[#allocation5 + $0x80] sm:$0xff] %vm3347_vm7, %v4711_v3 }
 0x40c   : > { %3209 = vmatprep.subr.mxu0 %v6736_v37  ;;  %3367 = vst.msk [vmem:[#allocation5 + $0x90] sm:$0xff] %vm3347_vm7, %v4711_v3 }
 0x40d   : > { %3124 = vmatmul.mubr.f32.gmra.mxu1 %v2416_v5  ;;  %3210 = vmatpush2.msra.mxu0 %v2598_v13 }
 0x40e   : > { %3211 = vmatprep.subr.mxu0 %v6736_v37  ;;  %3128 = vmatprep.mubr.f32.mxu1 %v2353_v6 }
 0x40f   : > { %3212 = vmatpush2.msra.mxu0 %v2597_v12 }
 0x410   : > { %3214 = vmatmul.mubr.f32.vlgmr.msra.gmra.mxu0 %v5974_v1  ;;  %v2418_v1 = vsel %vm1315_vm4, %v2298_v4, %v4635_v25 }
 0x411   : > { %3129 = vmatmul.mubr.f32.gmra.mxu1 %v2417_v58  ;;  %3922 = vmatprep.mubr.msk.f32.mxu0 %vm972_vm13, %v6153_v55  ;;  %v2355_v55 = vsel %vm1315_vm4, %v4645_v30, %v4646_v59 }
 0x412   : > { %3133 = vmatprep.mubr.f32.mxu1 %v2354_v54 }
 0x414   : > { %3219 = vmatmul.mubr.f32.gmra.mxu0 %v6162_v44  ;;  %v2419_v44 = vsel %vm1315_vm4, %v2299_v11, %v4645_v30 }
 0x415   : > { %3134 = vmatmul.mubr.f32.gmra.mxu1 %v2418_v1  ;;  %3923 = vmatprep.mubr.msk.f32.mxu0 %vm972_vm13, %v6009_v0  ;;  %v2300_v0 = vsel %vm1306_vm1, %v4595_v46, %v4641_v17 }
 0x416   : > { %3138 = vmatprep.mubr.f32.mxu1 %v2355_v55  ;;  %v2420_v51 = vsel %vm1315_vm4, %v2300_v0, %v4650_v31 }
 0x418   : > { %3224 = vmatmul.mubr.f32.gmra.mxu0 %v6022_v48 }
 0x419   : > { %3139 = vmatmul.mubr.f32.gmra.mxu1 %v2419_v44  ;;  %3924 = vmatprep.mubr.msk.f32.mxu0 %vm972_vm13, %v6189_v34 }
 0x41a   : > { %3143 = vmatprep.mubr.f32.mxu1 %v2356_v8 }
 0x41c   : > { %3229 = vmatmul.mubr.f32.gmra.mxu0 %v6196_v56 }
 0x41d   : > { %3144 = vmatmul.mubr.f32.gmra.mxu1 %v2420_v51  ;;  %3925 = vmatprep.mubr.msk.f32.mxu0 %vm972_vm13, %v6080_v27  ;;  %v4003_v48 = vpop.f32.mrf.mxu0  ;;  %v2023_v27 = vrot.slane %v6736_v37, 2 }
 0x41f   : > { %v4004_v34 = vpop.f32.mrf.mxu0 }
 0x420   : > { %3234 = vmatmul.mubr.f32.gmra.mxu0 %v6096_v36  ;;  %v7062_v46 = vadd.f32 %v4004_v34, %v4003_v48  ;;  %v2024_v36 = vrot.slane %v4689_v60, 2 }
 0x421   : > { %3926 = vmatprep.mubr.msk.f32.mxu0 %vm972_vm13, %v6224_v62  ;;  %v2028_v62 = vsel %vm458_vm2, %v2026_v23, %v2027_v35 }
 0x422   : > { %v4006_v56 = vpop.f32.mrf.mxu0  ;;  %v2025_v40 = vsel %vm458_vm2, %v2023_v27, %v2024_v36  ;;  %vm3349_vm2 = vcmask 9216  }
 0x423   : > { %3350 = vst.msk [vmem:[#allocation5 + $0x8] sm:$0x3] %vm3349_vm2, %v4711_v3  ;;  %3352 = vst.msk [vmem:[#allocation5 + $0x18] sm:$0x3] %vm3349_vm2, %v4711_v3 }
 0x424   : > { %3239 = vmatmul.mubr.f32.gmra.mxu0 %v6234_v49  ;;  %v4007_v20 = vpop.f32.mrf.mxu0  ;;  %3368 = vst.msk [vmem:[#allocation5 + $0x98] sm:$0x3] %vm3349_vm2, %v4711_v3  ;;  %3354 = vst.msk [vmem:[#allocation5 + $0x28] sm:$0x3] %vm3349_vm2, %v4711_v3 }
 0x425   : > { %3927 = vmatprep.mubr.msk.f32.mxu0 %vm972_vm13, %v6300_v18  ;;  %v7069_v47 = vadd.f32 %v4007_v20, %v4006_v56  ;;  %3356 = vst.msk [vmem:[#allocation5 + $0x38] sm:$0x3] %vm3349_vm2, %v4711_v3  ;;  %3358 = vst.msk [vmem:[#allocation5 + $0x48] sm:$0x3] %vm3349_vm2, %v4711_v3 }
 0x426   : > { %3360 = vst.msk [vmem:[#allocation5 + $0x58] sm:$0x3] %vm3349_vm2, %v4711_v3  ;;  %3362 = vst.msk [vmem:[#allocation5 + $0x68] sm:$0x3] %vm3349_vm2, %v4711_v3 }
 0x427   : > { %3364 = vst.msk [vmem:[#allocation5 + $0x78] sm:$0x3] %vm3349_vm2, %v4711_v3  ;;  %3366 = vst.msk [vmem:[#allocation5 + $0x88] sm:$0x3] %vm3349_vm2, %v4711_v3 }
 0x428   : > { %3244 = vmatmul.mubr.f32.gmra.mxu0 %v6310_v21 }
 0x429   : > { %3928 = vmatprep.mubr.msk.f32.mxu0 %vm972_vm13, %v2028_v62 }
 0x42c   : > { %3249 = vmatmul.mubr.f32.gmra.mxu0 %v2025_v40 }
 0x454   : > { %v4009_v49 = vpop.f32.mrf.mxu0 }
 0x456   : > { %v4010_v52 = vpop.f32.mrf.mxu0 }
 0x457   : > { %v7074_v19 = vadd.f32 %v4010_v52, %v4009_v49 }
 0x458   : > { %v4012_v18 = vpop.f32.mrf.mxu0 }
 0x45a   : > { %v4013_v37 = vpop.f32.mrf.mxu0 }
 0x45b   : > { %v7076_v14 = vadd.f32 %v4013_v37, %v4012_v18 }
 0x45c   : > { %v4015_v39 = vpop.f32.mrf.mxu0 }
 0x45e   : > { %v4016_v22 = vpop.f32.mrf.mxu0 }
 0x45f   : > { %v7078_v45 = vadd.f32 %v4016_v22, %v4015_v39 }
 0x460   : > { %v4018_v42 = vpop.f32.mrf.mxu0 }
 0x462   : > { %v4019_v7 = vpop.f32.mrf.mxu0 }
 0x463   : > { %v4020_v21 = vadd.f32 %v4019_v7, %v4018_v42 }
 0x465   : > { %v2716_v30 = vadd.f32 %v4020_v21, %v7115_v26 }
 0x475   : > { %v4021_v10 = vpop.f32.mrf.mxu0 }
 0x477   : > { %v4022_v43 = vpop.f32.mrf.mxu0 }
 0x478   : > { %v4023_v63 = vadd.f32 %v4022_v43, %v4021_v10 }
 0x479   : > { %v4024_v61 = vpop.f32.mrf.mxu0 }
 0x47a   : > { %v2721_v1 = vadd.f32 %v4023_v63, %v7115_v26 }
 0x47b   : > { %v4025_v29 = vpop.f32.mrf.mxu0 }
 0x47c   : > { %v4026_v41 = vadd.f32 %v4025_v29, %v4024_v61 }
 0x47d   : > { %v4059_v16 = vpop.f32.mrf.mxu0 }
 0x47e   : > { %v2726_v44 = vadd.f32 %v4026_v41, %v7115_v26 }
 0x47f   : > { %v4060_v2 = vpop.f32.mrf.mxu0 }
 0x480   : > { %v4061_v29 = vadd.f32 %v4060_v2, %v4059_v16 }
 0x481   : > { %v4062_v24 = vpop.f32.mrf.mxu0 }
 0x483   : > { %v4063_v5 = vpop.f32.mrf.mxu0  ;;  %v4115_v25 = vpop.f32.mrf.mxu1 }
 0x485   : > { %v7100_v13 = vpop.f32.mrf.mxu0  ;;  %v4116_v58 = vpop.f32.mrf.mxu1 }
 0x487   : > { %v7102_v6 = vpop.f32.mrf.mxu0  ;;  %v4118_v15 = vpop.f32.mrf.mxu1 }
 0x489   : > { %v7104_v12 = vpop.f32.mrf.mxu0  ;;  %v4119_v11 = vpop.f32.mrf.mxu1 }
 0x48b   : > { %v7106_v33 = vpop.f32.mrf.mxu0 }
 0x48d   : > { %v7108_v38 = vpop.f32.mrf.mxu0 }
 0x48f   : > { %v7110_v9 = vpop.f32.mrf.mxu0 }
 0x491   : > { %v4074_v32 = vpop.f32.mrf.mxu0 }
 0x493   : > { %v4075_v59 = vpop.f32.mrf.mxu0 }
 0x494   : > { %v4076_v57 = vadd.f32 %v4075_v59, %v4074_v32  ;;  %v2691_v59 = vadd.f32 %v7062_v46, %v7115_v26 }
 0x495   : > { %v4077_v54 = vpop.f32.mrf.mxu0 }
 0x496   : > { %v7118_v50 = vadd.f32 %v4076_v57, %v2716_v30  ;;  %v4117_v30 = vadd.f32 %v4116_v58, %v4115_v25 }
 0x497   : > { %v4078_v4 = vpop.f32.mrf.mxu0 }
 0x498   : > { %v4079_v31 = vadd.f32 %v4078_v4, %v4077_v54  ;;  %v2796_v54 = vadd.f32 %v4061_v29, %v2691_v59  ;;  %v4064_v4 = vadd.f32 %v4063_v5, %v4062_v24  ;;  %v2701_v24 = vadd.f32 %v7074_v19, %v7115_v26 }
 0x499   : > { %v4080_v55 = vpop.f32.mrf.mxu0  ;;  %v2706_v19 = vadd.f32 %v7076_v14, %v7115_v26  ;;  %v2711_v14 = vadd.f32 %v7078_v45, %v7115_v26 }
 0x49a   : > { %v7121_v17 = vadd.f32 %v4079_v31, %v2721_v1 }
 0x49b   : > { %v4081_v8 = vpop.f32.mrf.mxu0 }
 0x49c   : > { %v4082_v0 = vadd.f32 %v4081_v8, %v4080_v55  ;;  %v4121_v51 = vpop.f32.mrf.mxu1  ;;  %v2696_v8 = vadd.f32 %v7069_v47, %v7115_v26 }
 0x49e   : > { %v7124_v48 = vadd.f32 %v4082_v0, %v2726_v44  ;;  %v4171_v34 = vpop.f32.mrf.mxu0  ;;  %v4122_v53 = vpop.f32.mrf.mxu1  ;;  %v2901_v44 = vadd.f32 %v4117_v30, %v2796_v54  ;;  %v4120_v0 = vadd.f32 %v4119_v11, %v4118_v15  ;;  %v4070_v11 = vadd.f32 %v7106_v33, %v7104_v12 }
 0x49f   : > { %v4123_v5 = vadd.f32 %v4122_v53, %v4121_v51  ;;  %v4073_v12 = vadd.f32 %v7110_v9, %v7108_v38 }
 0x4a0   : > { %7548 = vst [vmem:[#allocation6_spill] sm:$0xff] %v7124_v48  ;;  %v4172_v23 = vpop.f32.mrf.mxu0  ;;  %v4124_v28 = vpop.f32.mrf.mxu1  ;;  %v4067_v48 = vadd.f32 %v7102_v6, %v7100_v13 }
 0x4a1   : > { %v4173_v1 = vadd.f32 %v4172_v23, %v4171_v34  ;;  %v2816_v9 = vadd.f32 %v4073_v12, %v2711_v14 }
 0x4a2   : > { %v4125_v56 = vpop.f32.mrf.mxu1  ;;  %v2806_v15 = vadd.f32 %v4067_v48, %v2701_v24 }
 0x4a3   : > { %v4174_v35 = vpop.f32.mrf.mxu0  ;;  %v3006_v46 = vadd.f32 %v4173_v1, %v2901_v44 }
 0x4a4   : > { %v2911_v51 = vadd.f32 %v4123_v5, %v2806_v15 }
 0x4a5   : > { %v4175_v27 = vpop.f32.mrf.mxu0 }
 0x4a6   : > { %v4176_v25 = vadd.f32 %v4175_v27, %v4174_v35  ;;  %v4126_v27 = vadd.f32 %v4125_v56, %v4124_v28 }
 0x4a7   : > { %v7126_v60 = vpop.f32.mrf.mxu1 }
 0x4a9   : > { %v4177_v36 = vpop.f32.mrf.mxu0  ;;  %v7128_v20 = vpop.f32.mrf.mxu1 }
 0x4aa   : > { %v4129_v28 = vadd.f32 %v7128_v20, %v7126_v60 }
 0x4ab   : > { %v4178_v62 = vpop.f32.mrf.mxu0 }
 0x4ac   : > { %v4179_v6 = vadd.f32 %v4178_v62, %v4177_v36  ;;  %v2921_v26 = vadd.f32 %v4129_v28, %v2816_v9 }
 0x4ad   : > { %v7130_v40 = vpop.f32.mrf.mxu1 }
 0x4ae   : > { %v3016_v36 = vadd.f32 %v4179_v6, %v2911_v51 }
 0x4af   : > { %v4180_v49 = vpop.f32.mrf.mxu0  ;;  %v7132_v52 = vpop.f32.mrf.mxu1 }
 0x4b0   : > { %v4132_v60 = vadd.f32 %v7132_v52, %v7130_v40 }
 0x4b1   : > { %v4181_v18 = vpop.f32.mrf.mxu0 }
 0x4b2   : > { %v4182_v62 = vadd.f32 %v4181_v18, %v4180_v49 }
 0x4b3   : > { %v7134_v37 = vpop.f32.mrf.mxu1 }
 0x4b5   : > { %v7136_v39 = vpop.f32.mrf.mxu0  ;;  %v7138_v22 = vpop.f32.mrf.mxu1 }
 0x4b7   : > { %v7140_v42 = vpop.f32.mrf.mxu0 }
 0x4b8   : > { %v4185_v18 = vadd.f32 %v7140_v42, %v7136_v39  ;;  %v4135_v42 = vadd.f32 %v7138_v22, %v7134_v37 }
 0x4b9   : > { %v7142_v7 = vpop.f32.mrf.mxu1 }
 0x4ba   : > { %v7144_v21 = vpop.f32.mrf.mxu0  ;;  %v3026_v5 = vadd.f32 %v4185_v18, %v2921_v26  ;;  %v2931_v6 = vadd.f32 %v4135_v42, %v7121_v17  ;;  %v7551_v17 = vld [vmem:[#allocation6_spill] sm:$0xff] }
 0x4bb   : > { %v7146_v3 = vpop.f32.mrf.mxu1 }
 0x4bc   : > { %7549 = vst [vmem:[#allocation7_spill] sm:$0xff] %v7146_v3  ;;  %v7148_v10 = vpop.f32.mrf.mxu0  ;;  %v2801_v3 = vadd.f32 %v4064_v4, %v2696_v8 }
 0x4be   : > { %v2906_v23 = vadd.f32 %v4120_v0, %v2801_v3 }
 0x4c0   : > { %v4227_v43 = vpop.f32.mrf.mxu1  ;;  %v7150_v63 = vpop.f32.mrf.mxu0  ;;  %v3011_v13 = vadd.f32 %v4176_v25, %v2906_v23  ;;  %v4188_v23 = vadd.f32 %v7148_v10, %v7144_v21 }
 0x4c2   : > { %v4228_v61 = vpop.f32.mrf.mxu1  ;;  %v7152_v32 = vpop.f32.mrf.mxu0 }
 0x4c3   : > { %v4229_v16 = vadd.f32 %v4228_v61, %v4227_v43  ;;  %v7550_v37 = vld [vmem:[#allocation7_spill] sm:$0xff] }
 0x4c4   : > { %v7156_v55 = vpop.f32.mrf.mxu0  ;;  %v4138_v22 = vadd.f32 %v7550_v37, %v7142_v7 }
 0x4c5   : > { %v4230_v41 = vpop.f32.mrf.mxu1  ;;  %v3111_v59 = vadd.f32 %v4229_v16, %v3006_v46 }
 0x4c6   : > { %v7164_v34 = vpop.f32.mrf.mxu0 }
 0x4c7   : > { %v4231_v57 = vpop.f32.mrf.mxu1 }
 0x4c8   : > { %v4232_v29 = vadd.f32 %v4231_v57, %v4230_v41  ;;  %v2811_v57 = vadd.f32 %v4070_v11, %v2706_v19 }
 0x4c9   : > { %v4233_v31 = vpop.f32.mrf.mxu1 }
 0x4ca   : > { %v3116_v48 = vadd.f32 %v4232_v29, %v3011_v13  ;;  %v2916_v1 = vadd.f32 %v4126_v27, %v2811_v57  ;;  %v4191_v13 = vadd.f32 %v7152_v32, %v7150_v63  ;;  %v4194_v63 = vadd.f32 %v7164_v34, %v7156_v55 }
 0x4cb   : > { %v4234_v2 = vpop.f32.mrf.mxu1 }
 0x4cc   : > { %v4235_v3 = vadd.f32 %v4234_v2, %v4233_v31  ;;  %v3021_v49 = vadd.f32 %v4182_v62, %v2916_v1 }
 0x4cd   : > { %v4236_v58 = vpop.f32.mrf.mxu1 }
 0x4ce   : > { %v3121_v38 = vadd.f32 %v4235_v3, %v3016_v36 }
 0x4cf   : > { %v4237_v47 = vpop.f32.mrf.mxu1 }
 0x4d0   : > { %v3215_v43 = vpop.f32.mrf.mxu0  ;;  %v4238_v31 = vadd.f32 %v4237_v47, %v4236_v58  ;;  %v2926_v47 = vadd.f32 %v4132_v60, %v7118_v50 }
 0x4d1   : > { %v7168_v61 = vadd.f32 %v3215_v43, %v3111_v59  ;;  %v4239_v35 = vpop.f32.mrf.mxu1 }
 0x4d2   : > { %v3217_v53 = vpop.f32.mrf.mxu0  ;;  %v3126_v25 = vadd.f32 %v4238_v31, %v3021_v49  ;;  %v3031_v43 = vadd.f32 %v4188_v23, %v2926_v47 }
 0x4d3   : > { %v3929_v41 = vmul.f32 -1.442695, %v7168_v61  ;;  %v4240_v30 = vpop.f32.mrf.mxu1 }
 0x4d4   : > { %v3220_v33 = vpop.f32.mrf.mxu0  ;;  %v4241_v20 = vadd.f32 %v4240_v30, %v4239_v35 }
 0x4d5   : > { %4652 = vpow2.f32 %v3929_v41  ;;  %v7175_v54 = vadd.f32 %v3220_v33, %v3116_v48  ;;  %v4242_v4 = vpop.f32.mrf.mxu1  ;;  %v3036_v41 = vadd.f32 %v4191_v13, %v2931_v6  ;;  %v2936_v48 = vadd.f32 %v4138_v22, %v7551_v17 }
 0x4d6   : > { %v3222_v56 = vpop.f32.mrf.mxu0  ;;  %v3131_v59 = vadd.f32 %v4241_v20, %v3026_v5  ;;  %v3378_v20 = vld [vmem:[#allocation5] sm:$0xff] }
 0x4d7   : > { %v3930_v8 = vmul.f32 -1.442695, %v7175_v54  ;;  %v4243_v44 = vpop.f32.mrf.mxu1  ;;  %v3406_v5 = vrot.slane %v3378_v20, 7  ;;  %v3462_v23 = vrot.slane %v3378_v20, 1 }
 0x4d8   : > { %v3225_v0 = vpop.f32.mrf.mxu0  ;;  %v4244_v40 = vadd.f32 %v4243_v44, %v4242_v4  ;;  %v3041_v4 = vadd.f32 %v4194_v63, %v2936_v48 }
 0x4d9   : > { %4654 = vpow2.f32 %v3930_v8  ;;  %v7184_v16 = vadd.f32 %v3225_v0, %v3121_v38  ;;  %v4245_v45 = vpop.f32.mrf.mxu1  ;;  %v7552_v8 = vlaneseq }
 0x4da   : > { %v3227_v2 = vpop.f32.mrf.mxu0  ;;  %v3136_v53 = vadd.f32 %v4244_v40, %v3031_v43 }
 0x4db   : > { %v3931_v46 = vmul.f32 -1.442695, %v7184_v16  ;;  %v4246_v58 = vpop.f32.mrf.mxu1  ;;  %v7215_v44 = vand.u32 127, %v7552_v8 }
 0x4dc   : > { %v3230_v24 = vpop.f32.mrf.mxu0  ;;  %v4247_v19 = vadd.f32 %v4246_v58, %v4245_v45 }
 0x4dd   : > { %4656 = vpow2.f32 %v3931_v46  ;;  %v7191_v39 = vadd.f32 %v3230_v24, %v3126_v25  ;;  %v4248_v15 = vpop.f32.mrf.mxu1  ;;  %vm3256_vm8 = vcmp.lt.s32.totalorder %v7215_v44, 2  ;;  %v3379_v25 = vld [vmem:[#allocation5 + $0x8] sm:$0x3]  ;;  %v7410_v44 = vld [vmem:[#allocation5 + $0x98] sm:$0x3] }
 0x4de   : > { %v3232_v29 = vpop.f32.mrf.mxu0  ;;  %v3141_v36 = vadd.f32 %v4247_v19, %v3036_v41  ;;  %v3463_v42 = vrot.slane %v3379_v25, 1 }
 0x4df   : > { %v3932_v52 = vmul.f32 -1.442695, %v7191_v39  ;;  %v4249_v27 = vpop.f32.mrf.mxu1 }
 0x4e0   : > { %v3235_v11 = vpop.f32.mrf.mxu0  ;;  %v4250_v12 = vadd.f32 %v4249_v27, %v4248_v15  ;;  %v3464_v43 = vsel %vm433_vm3, %v3462_v23, %v3463_v42 }
 0x4e1   : > { %4658 = vpow2.f32 %v3932_v52  ;;  %v7199_v21 = vadd.f32 %v3235_v11, %v3131_v59 }
 0x4e2   : > { %v4653_v10 = vpop.eup %4652  ;;  %v3237_v50 = vpop.f32.mrf.mxu0  ;;  %v3146_v1 = vadd.f32 %v4250_v12, %v3041_v4 }
 0x4e3   : > { %v3281_v35 = vadd.f32 1.0, %v4653_v10  ;;  %v3933_v51 = vmul.f32 -1.442695, %v7199_v21 }
 0x4e4   : > { %v3240_v3 = vpop.f32.mrf.mxu0 }
 0x4e5   : > { %4660 = vrcp.f32 %v3281_v35  ;;  %v7207_v32 = vadd.f32 %v3240_v3, %v3136_v53 }
 0x4e6   : > { %v4655_v30 = vpop.eup %4654  ;;  %4662 = vpow2.f32 %v3933_v51  ;;  %v3242_v7 = vpop.f32.mrf.mxu0 }
 0x4e7   : > { %v3282_v57 = vadd.f32 1.0, %v4655_v30  ;;  %v3934_v33 = vmul.f32 -1.442695, %v7207_v32 }
 0x4e8   : > { %v3245_v62 = vpop.f32.mrf.mxu0 }
 0x4e9   : > { %4664 = vrcp.f32 %v3282_v57  ;;  %v7211_v14 = vadd.f32 %v3245_v62, %v3141_v36 }
 0x4ea   : > { %v4657_v28 = vpop.eup %4656  ;;  %v3247_v55 = vpop.f32.mrf.mxu0  ;;  %4666 = vpow2.f32 %v3934_v33 }
 0x4eb   : > { %v3283_v34 = vadd.f32 1.0, %v4657_v28  ;;  %v3935_v56 = vmul.f32 -1.442695, %v7211_v14 }
 0x4ec   : > { %v3250_v31 = vpop.f32.mrf.mxu0 }
 0x4ed   : > { %4668 = vrcp.f32 %v3283_v34  ;;  %v7217_v38 = vadd.f32 %v3250_v31, %v3146_v1 }
 0x4ee   : > { %v4659_v9 = vpop.eup %4658  ;;  %4670 = vpow2.f32 %v3935_v56  ;;  %v3252_v0 = vpop.f32.mrf.mxu0 }
 0x4ef   : > { %v3284_v49 = vadd.f32 1.0, %v4659_v9  ;;  %v3936_v18 = vmul.f32 -1.442695, %v7217_v38 }
 0x4f1   : > { %4672 = vrcp.f32 %v3284_v49 }
 0x4f2   : > { %v4661_v45 = vpop.eup %4660  ;;  %4674 = vpow2.f32 %v3936_v18 }
 0x4f3   : > { %v4663_v26 = vpop.eup %4662  ;;  %v3305_v2 = vsel %vm3256_vm8, %v4661_v45, %v7168_v61 }
 0x4f4   : > { %v3285_v60 = vadd.f32 1.0, %v4663_v26  ;;  %3313 = vxpose.xlu0.b32.start [1/8] (short) (narrow) %v3305_v2, 16  ;;  %3370 = vst.msk [vmem:[#allocation5 + $0x11] sm:$0xff] %vm3347_vm7, %v3305_v2 }
 0x4f6   : > { %v4665_v46 = vpop.eup %4664  ;;  %4676 = vrcp.f32 %v3285_v60 }
 0x4f7   : > { %v3306_v58 = vsel %vm3256_vm8, %v4665_v46, %v7175_v54  ;;  %v4667_v24 = vpop.eup %4666 }
 0x4f8   : > { %3371 = vst.msk [vmem:[#allocation5 + $0x21] sm:$0xff] %vm3347_vm7, %v3306_v58  ;;  %3314 = vxpose.xlu0.b32.cont [2/8] (short) (narrow) %v3306_v58, 16  ;;  %v3286_v47 = vadd.f32 1.0, %v4667_v24 }
 0x4fa   : > { %v4669_v61 = vpop.eup %4668  ;;  %4678 = vrcp.f32 %v3286_v47 }
 0x4fb   : > { %v4671_v29 = vpop.eup %4670  ;;  %v7229_v40 = vld [vmem:[#allocation5 + $0x10] sm:$0xff]  ;;  %v7231_v52 = vld [vmem:[#allocation5 + $0x18] sm:$0x3]  ;;  %v3307_v59 = vsel %vm3256_vm8, %v4669_v61, %v7184_v16 }
 0x4fc   : > { %v3287_v15 = vadd.f32 1.0, %v4671_v29  ;;  %v3422_v54 = vmax.f32 %v7229_v40, %v3406_v5  ;;  %v3423_v11 = vmax.f32 %v7231_v52, %v3406_v5  ;;  %3372 = vst.msk [vmem:[#allocation5 + $0x31] sm:$0xff] %vm3347_vm7, %v3307_v59  ;;  %3315 = vxpose.xlu0.b32.cont [3/8] (short) (narrow) %v3307_v59, 16  ;;  %v3465_v37 = vrot.slane %v7229_v40, 1 }
 0x4fd   : > { %v3466_v22 = vrot.slane %v7231_v52, 1  ;;  %v3407_v16 = vrot.slane %v7229_v40, 7 }
 0x4fe   : > { %v4673_v13 = vpop.eup %4672  ;;  %v3438_v10 = vmax.f32 %v3422_v54, %v3378_v20  ;;  %v3439_v6 = vmax.f32 %v3423_v11, %v3379_v25  ;;  %4680 = vrcp.f32 %v3287_v15 }
 0x4ff   : > { %v4675_v50 = vpop.eup %4674  ;;  %v7243_v35 = vld [vmem:[#allocation5 + $0x20] sm:$0xff]  ;;  %v7245_v19 = vld [vmem:[#allocation5 + $0x28] sm:$0x3]  ;;  %v3308_v51 = vsel %vm3256_vm8, %v4673_v13, %v7191_v39  ;;  %v3467_v48 = vsel %vm433_vm3, %v3465_v37, %v3466_v22 }
 0x500   : > { %v3288_v53 = vadd.f32 1.0, %v4675_v50  ;;  %v3502_v27 = vmax.f32 %v3438_v10, %v3464_v43  ;;  %v3503_v3 = vmax.f32 %v3439_v6, %v3463_v42  ;;  %3373 = vst.msk [vmem:[#allocation5 + $0x41] sm:$0xff] %vm3347_vm7, %v3308_v51  ;;  %3316 = vxpose.xlu0.b32.cont [4/8] (short) (narrow) %v3308_v51, 16  ;;  %v3468_v41 = vrot.slane %v7243_v35, 1 }
 0x501   : > { %v3469_v63 = vrot.slane %v7245_v19, 1  ;;  %v3424_v30 = vmax.f32 %v7243_v35, %v3407_v16  ;;  %v3425_v17 = vmax.f32 %v7245_v19, %v3407_v16  ;;  %v3408_v39 = vrot.slane %v7243_v35, 7 }
 0x502   : > { %v3521_v7 = vmax.f32 %v3502_v27, %v3407_v16  ;;  %v3522_v57 = vmax.f32 %v3503_v3, %v3407_v16  ;;  %4682 = vrcp.f32 %v3288_v53 }
 0x503   : > { %v3470_v12 = vsel %vm433_vm3, %v3468_v41, %v3469_v63  ;;  %v3440_v33 = vmax.f32 %v3424_v30, %v7229_v40  ;;  %v3441_v36 = vmax.f32 %v3425_v17, %v7231_v52  ;;  %v7260_v62 = vld [vmem:[#allocation5 + $0x30] sm:$0xff]  ;;  %v7262_v4 = vld [vmem:[#allocation5 + $0x38] sm:$0x3]  ;;  %v4677_v28 = vpop.eup %4676 }
 0x504   : > { %v3537_v55 = vmax.f32 %v3521_v7, %v7229_v40  ;;  %v3538_v34 = vmax.f32 %v3522_v57, %v7231_v52  ;;  %v3409_v56 = vrot.slane %v7260_v62, 7  ;;  %v3426_v1 = vmax.f32 %v7260_v62, %v3408_v39 }
 0x505   : > { %v3504_v31 = vmax.f32 %v3440_v33, %v3467_v48  ;;  %v3505_v8 = vmax.f32 %v3441_v36, %v3466_v22  ;;  %v3427_v9 = vmax.f32 %v7262_v4, %v3408_v39  ;;  %v3471_v0 = vrot.slane %v7260_v62, 1 }
 0x506   : > { %v3559_v49 = vmax.f32 %v3537_v55, %v3467_v48  ;;  %v3560_v18 = vmax.f32 %v3538_v34, %v3466_v22  ;;  %v3442_v45 = vmax.f32 %v3426_v1, %v7243_v35  ;;  %v7272_v26 = vrot.slane %v7262_v4, 1 }
 0x507   : > { %v3523_v2 = vmax.f32 %v3504_v31, %v3408_v39  ;;  %v3524_v60 = vmax.f32 %v3505_v8, %v3408_v39  ;;  %v3443_v20 = vmax.f32 %v3427_v9, %v7245_v19  ;;  %v7275_v46 = vld [vmem:[#allocation5 + $0x40] sm:$0xff]  ;;  %v3309_v25 = vsel %vm3256_vm8, %v4677_v28, %v7199_v21  ;;  %v7282_v42 = vld [vmem:[#allocation5 + $0x48] sm:$0x3]  ;;  %v7294_v37 = vpop.eup %4678 }
 0x508   : > { %v3578_v58 = vmax.f32 %v3559_v49, %v3408_v39  ;;  %v3579_v24 = vmax.f32 %v3560_v18, %v3408_v39  ;;  %v3473_v5 = vsel %vm433_vm3, %v3471_v0, %v7272_v26  ;;  %v3506_v23 = vmax.f32 %v3442_v45, %v3470_v12  ;;  %3374 = vst.msk [vmem:[#allocation5 + $0x51] sm:$0xff] %vm3347_vm7, %v3309_v25  ;;  %v7315_v28 = vld [vmem:[#allocation4] sm:$0xff] }
 0x509   : > { %3317 = vxpose.xlu0.b32.cont [5/8] (short) (narrow) %v3309_v25, 16  ;;  %v3539_v61 = vmax.f32 %v3523_v2, %v7243_v35  ;;  %v3540_v29 = vmax.f32 %v3524_v60, %v7245_v19  ;;  %v3507_v47 = vmax.f32 %v3443_v20, %v3469_v63  ;;  %v7288_v59 = vrot.slane %v7275_v46, 7 }
 0x50a   : > { %v3594_v21 = vmax.f32 %v3578_v58, %v7243_v35  ;;  %v3595_v15 = vmax.f32 %v3579_v24, %v7245_v19  ;;  %v3525_v54 = vmax.f32 %v3506_v23, %v3409_v56  ;;  %v3428_v11 = vmax.f32 %v7275_v46, %v3409_v56 }
 0x50b   : > { %v3561_v43 = vmax.f32 %v3539_v61, %v3470_v12  ;;  %v3562_v13 = vmax.f32 %v3540_v29, %v3469_v63  ;;  %v3526_v10 = vmax.f32 %v3507_v47, %v3409_v56  ;;  %v3429_v6 = vmax.f32 %v7282_v42, %v3409_v56  ;;  %v7298_v53 = vpop.eup %4680 }
 0x50c   : > { %v3616_v22 = vmax.f32 %v3594_v21, %v3470_v12  ;;  %v3617_v50 = vmax.f32 %v3595_v15, %v3469_v63  ;;  %v3541_v16 = vmax.f32 %v3525_v54, %v7260_v62  ;;  %v3444_v51 = vmax.f32 %v3428_v11, %v7260_v62 }
 0x50d   : > { %v3542_v27 = vmax.f32 %v3526_v10, %v7262_v4  ;;  %v3580_v3 = vmax.f32 %v3561_v43, %v3409_v56  ;;  %v3581_v41 = vmax.f32 %v3562_v13, %v3409_v56  ;;  %v3445_v30 = vmax.f32 %v3429_v6, %v7262_v4 }
 0x50e   : > { %vm3632_vm9 = vcmp.eq.f32.partialorder %v3616_v22, %v7229_v40  ;;  %vm3633_vm10 = vcmp.eq.f32.partialorder %v3617_v50, %v7231_v52  ;;  %v3563_v17 = vmax.f32 %v3541_v16, %v3473_v5  ;;  %v3474_v63 = vrot.slane %v7275_v46, 1 }
 0x50f   : > { %v3648_v48 = vsel %vm3632_vm9, %v7229_v40, 0.0  ;;  %v3649_v7 = vsel %vm3633_vm10, %v7231_v52, 0.0  ;;  %v3564_v57 = vmax.f32 %v3542_v27, %v7272_v26  ;;  %v3596_v39 = vmax.f32 %v3580_v3, %v7260_v62  ;;  %v7309_v12 = vpop.eup %4682  ;;  %v7341_v25 = vld [vmem:[#allocation5 + $0x50] sm:$0xff] }
 0x510   : > { %vm3664_vm11 = vcmp.gt.f32.partialorder %v3648_v48, 0.5  ;;  %vm3665_vm12 = vcmp.gt.f32.partialorder %v3649_v7, 0.5  ;;  %v3597_v33 = vmax.f32 %v3581_v41, %v7262_v4  ;;  %v7313_v36 = vrot.slane %v7282_v42, 1 }
 0x511   : > { %v3937_v55 = vsel %vm3664_vm11, 1.0, %v7315_v28  ;;  %v3938_v40 = vsel %vm3665_vm12, 1.0, %v7315_v28  ;;  %v3618_v52 = vmax.f32 %v3596_v39, %v3473_v5  ;;  %v3508_v34 = vmax.f32 %v3444_v51, %v3473_v5  ;;  %v7346_v5 = vld [vmem:[#allocation5 + $0x58] sm:$0x3] }
 0x512   : > { %v3728_v56 = vrot.slane %v3937_v55, 1  ;;  %v3729_v1 = vrot.slane %v3938_v40, 1  ;;  %v3619_v31 = vmax.f32 %v3597_v33, %v7272_v26  ;;  %v3476_v8 = vsel %vm433_vm3, %v3474_v63, %v7313_v36 }
 0x513   : > { %vm3634_vm13 = vcmp.eq.f32.partialorder %v3618_v52, %v7243_v35  ;;  %v3509_v9 = vmax.f32 %v3445_v30, %v7272_v26  ;;  %v3527_v0 = vmax.f32 %v3508_v34, %v7288_v59  ;;  %v3582_v49 = vmax.f32 %v3563_v17, %v7288_v59 }
 0x514   : > { %v3730_v18 = vsel %vm433_vm3, %v3728_v56, %v3729_v1  ;;  %vm3635_vm14 = vcmp.eq.f32.partialorder %v3619_v31, %v7245_v19  ;;  %v3650_v45 = vsel %vm3634_vm13, %v7243_v35, 0.0  ;;  %v3583_v2 = vmax.f32 %v3564_v57, %v7288_v59  ;;  %v7414_v56 = vld [vmem:[#allocation5 + $0x90] sm:$0xff] }
 0x515   : > { %3760 = vst.msk [vmem:[%s7323_s28] sm:$0xff] %vm3347_vm7, %v3730_v18  ;;  %v3651_v60 = vsel %vm3635_vm14, %v7245_v19, 0.0  ;;  %vm3666_vm15 = vcmp.gt.f32.partialorder %v3650_v45, 0.5  ;;  %v3528_v20 = vmax.f32 %v3509_v9, %v7288_v59  ;;  %v3543_v26 = vmax.f32 %v3527_v0, %v7275_v46 }
 0x516   : > { %vm3667_vm0 = vcmp.gt.f32.partialorder %v3651_v60, 0.5  ;;  %v3939_v58 = vsel %vm3666_vm15, 1.0, %v7315_v28  ;;  %v3598_v24 = vmax.f32 %v3582_v49, %v7275_v46  ;;  %v3599_v35 = vmax.f32 %v3583_v2, %v7282_v42 }
 0x517   : > { %v3940_v23 = vsel %vm3667_vm0, 1.0, %v7315_v28  ;;  %v3731_v19 = vrot.slane %v3939_v58, 1  ;;  %v3544_v61 = vmax.f32 %v3528_v20, %v7282_v42  ;;  %v3565_v29 = vmax.f32 %v3543_v26, %v3476_v8 }
 0x518   : > { %v3732_v47 = vrot.slane %v3940_v23, 1  ;;  %v3620_v21 = vmax.f32 %v3598_v24, %v3476_v8  ;;  %v3621_v15 = vmax.f32 %v3599_v35, %v7313_v36  ;;  %v7352_v54 = vrot.slane %v7341_v25, 7 }
 0x519   : > { %v3566_v11 = vmax.f32 %v3544_v61, %v7313_v36  ;;  %v3430_v43 = vmax.f32 %v7341_v25, %v7288_v59  ;;  %v3431_v13 = vmax.f32 %v7346_v5, %v7288_v59  ;;  %v3477_v10 = vrot.slane %v7341_v25, 1 }
 0x51a   : > { %v3733_v6 = vsel %vm433_vm3, %v3731_v19, %v3732_v47  ;;  %vm3636_vm4 = vcmp.eq.f32.partialorder %v3620_v21, %v7260_v62  ;;  %vm3637_vm5 = vcmp.eq.f32.partialorder %v3621_v15, %v7262_v4  ;;  %v7364_v22 = vrot.slane %v7346_v5, 1 }
 0x51b   : > { %3761 = vst.msk [vmem:[%s7323_s28 + $0x8] sm:$0xff] %vm3347_vm7, %v3733_v6  ;;  %v3652_v50 = vsel %vm3636_vm4, %v7260_v62, 0.0  ;;  %v3653_v16 = vsel %vm3637_vm5, %v7262_v4, 0.0  ;;  %v3446_v51 = vmax.f32 %v3430_v43, %v7275_v46  ;;  %v3447_v59 = vmax.f32 %v3431_v13, %v7282_v42 }
 0x51c   : > { %vm3668_vm6 = vcmp.gt.f32.partialorder %v3652_v50, 0.5  ;;  %vm3669_vm2 = vcmp.gt.f32.partialorder %v3653_v16, 0.5  ;;  %v7374_v27 = vsel %vm433_vm3, %v3477_v10, %v7364_v22  ;;  %v3584_v3 = vmax.f32 %v3565_v29, %v7352_v54 }
 0x51d   : > { %v3941_v41 = vsel %vm3668_vm6, 1.0, %v7315_v28  ;;  %v3942_v30 = vsel %vm3669_vm2, 1.0, %v7315_v28  ;;  %v3510_v17 = vmax.f32 %v3446_v51, %v3476_v8  ;;  %v3511_v62 = vmax.f32 %v3447_v59, %v7313_v36 }
 0x51e   : > { %v3734_v4 = vrot.slane %v3941_v41, 1  ;;  %v3735_v63 = vrot.slane %v3942_v30, 1  ;;  %v3585_v48 = vmax.f32 %v3566_v11, %v7352_v54  ;;  %v3600_v7 = vmax.f32 %v3584_v3, %v7341_v25 }
 0x51f   : > { %v3529_v57 = vmax.f32 %v3510_v17, %v7352_v54  ;;  %v3530_v39 = vmax.f32 %v3511_v62, %v7352_v54  ;;  %v3310_v33 = vsel %vm3256_vm8, %v7294_v37, %v7207_v32  ;;  %v3311_v36 = vsel %vm3256_vm8, %v7298_v53, %v7211_v14 }
 0x520   : > { %v3736_v55 = vsel %vm433_vm3, %v3734_v4, %v3735_v63  ;;  %v3601_v40 = vmax.f32 %v3585_v48, %v7346_v5  ;;  %v3622_v52 = vmax.f32 %v3600_v7, %v7374_v27  ;;  %3375 = vst.msk [vmem:[#allocation5 + $0x61] sm:$0xff] %vm3347_vm7, %v3310_v33  ;;  %3318 = vxpose.xlu0.b32.cont [6/8] (short) (narrow) %v3310_v33, 16  ;;  %3376 = vst.msk [vmem:[#allocation5 + $0x71] sm:$0xff] %vm3347_vm7, %v3311_v36 }
 0x521   : > { %v3312_v32 = vsel %vm3256_vm8, %v7309_v12, %v7217_v38  ;;  %3762 = vst.msk [vmem:[%s7323_s28 + $0x10] sm:$0xff] %vm3347_vm7, %v3736_v55  ;;  %v3545_v14 = vmax.f32 %v3529_v57, %v7341_v25  ;;  %v3546_v53 = vmax.f32 %v3530_v39, %v7346_v5  ;;  %v3611_v8 = vrot.slane %v7414_v56, 1 }
 0x522   : > { %3377 = vst.msk [vmem:[#allocation5 + $0x81] sm:$0xff] %vm3347_vm7, %v3312_v32  ;;  %v3623_v37 = vmax.f32 %v3601_v40, %v7364_v22  ;;  %vm3638_vm9 = vcmp.eq.f32.partialorder %v3622_v52, %v7275_v46 }
 0x523   : > { %v3654_v34 = vsel %vm3638_vm9, %v7275_v46, 0.0  ;;  %v3567_v1 = vmax.f32 %v3545_v14, %v7374_v27  ;;  %v3568_v46 = vmax.f32 %v3546_v53, %v7364_v22 }
 0x524   : > { %vm3639_vm10 = vcmp.eq.f32.partialorder %v3623_v37, %v7282_v42  ;;  %vm3670_vm11 = vcmp.gt.f32.partialorder %v3654_v34, 0.5  ;;  %3319 = vxpose.xlu0.b32.cont [7/8] (short) (narrow) %v3311_v36, 16 }
 0x525   : > { %v3655_v38 = vsel %vm3639_vm10, %v7282_v42, 0.0  ;;  %v3943_v12 = vsel %vm3670_vm11, 1.0, %v7315_v28  ;;  %v3612_v42 = vrot.slane %v7410_v44, 1 }
 0x526   : > { %vm3671_vm8 = vcmp.gt.f32.partialorder %v3655_v38, 0.5  ;;  %v3737_v31 = vrot.slane %v3943_v12, 1 }
 0x527   : > { %v3944_v9 = vsel %vm3671_vm8, 1.0, %v7315_v28  ;;  %v7420_v0 = vld [vmem:[#allocation5 + $0x60] sm:$0xff]  ;;  %v7422_v49 = vld [vmem:[#allocation5 + $0x68] sm:$0x3]  ;;  %v7424_v18 = vld [vmem:[#allocation5 + $0x70] sm:$0xff] }
 0x528   : > { %v3738_v45 = vrot.slane %v3944_v9, 1  ;;  %v3412_v2 = vrot.slane %v7420_v0, 7  ;;  %v3432_v60 = vmax.f32 %v7420_v0, %v7352_v54  ;;  %v3433_v20 = vmax.f32 %v7422_v49, %v7352_v54  ;;  %v7432_v26 = vld [vmem:[#allocation5 + $0x78] sm:$0x3]  ;;  %3320 = vxpose.xlu0.b32.end [8/8] (short) (narrow) %v3312_v32, 16 }
 0x529   : > { %v3480_v58 = vrot.slane %v7420_v0, 1  ;;  %v3481_v24 = vrot.slane %v7422_v49, 1  ;;  %v3413_v35 = vrot.slane %v7424_v18, 7  ;;  %v3483_v23 = vrot.slane %v7424_v18, 1  ;;  %v7441_v21 = vld [vmem:[#allocation5 + $0x80] sm:$0xff] }
 0x52a   : > { %v3739_v19 = vsel %vm433_vm3, %v3737_v31, %v3738_v45  ;;  %v3448_v61 = vmax.f32 %v3432_v60, %v7341_v25  ;;  %v3449_v29 = vmax.f32 %v3433_v20, %v7346_v5  ;;  %v3586_v47 = vmax.f32 %v3567_v1, %v3412_v2  ;;  %v7452_v16 = vld [vmem:[#allocation5 + $0x88] sm:$0x3] }
 0x52b   : > { %3763 = vst.msk [vmem:[%s7323_s28 + $0x18] sm:$0xff] %vm3347_vm7, %v3739_v19  ;;  %v3482_v15 = vsel %vm433_vm3, %v3480_v58, %v3481_v24  ;;  %v3587_v54 = vmax.f32 %v3568_v46, %v3412_v2  ;;  %v3434_v11 = vmax.f32 %v7424_v18, %v3412_v2  ;;  %v3435_v43 = vmax.f32 %v7432_v26, %v3412_v2 }
 0x52c   : > { %v3512_v13 = vmax.f32 %v3448_v61, %v7374_v27  ;;  %v3513_v10 = vmax.f32 %v3449_v29, %v7364_v22  ;;  %v3602_v6 = vmax.f32 %v3586_v47, %v7420_v0  ;;  %v3484_v50 = vrot.slane %v7432_v26, 1 }
 0x52d   : > { %v3603_v51 = vmax.f32 %v3587_v54, %v7422_v49  ;;  %v3450_v59 = vmax.f32 %v3434_v11, %v7420_v0  ;;  %v3451_v3 = vmax.f32 %v3435_v43, %v7422_v49  ;;  %v3436_v41 = vmax.f32 %v7441_v21, %v3413_v35 }
 0x52e   : > { %v3531_v30 = vmax.f32 %v3512_v13, %v3412_v2  ;;  %v3532_v17 = vmax.f32 %v3513_v10, %v3412_v2  ;;  %v3624_v62 = vmax.f32 %v3602_v6, %v3482_v15  ;;  %v3485_v27 = vsel %vm433_vm3, %v3483_v23, %v3484_v50 }
 0x52f   : > { %v3625_v22 = vmax.f32 %v3603_v51, %v3481_v24  ;;  %v3514_v4 = vmax.f32 %v3450_v59, %v3482_v15  ;;  %v3515_v63 = vmax.f32 %v3451_v3, %v3481_v24  ;;  %v3437_v48 = vmax.f32 %v7452_v16, %v3413_v35 }
 0x530   : > { %v3547_v7 = vmax.f32 %v3531_v30, %v7420_v0  ;;  %v3548_v57 = vmax.f32 %v3532_v17, %v7422_v49  ;;  %vm3640_vm12 = vcmp.eq.f32.partialorder %v3624_v62, %v7341_v25  ;;  %v3452_v39 = vmax.f32 %v3436_v41, %v7424_v18 }
 0x531   : > { %vm3641_vm13 = vcmp.eq.f32.partialorder %v3625_v22, %v7346_v5  ;;  %v3656_v33 = vsel %vm3640_vm12, %v7341_v25, 0.0  ;;  %v3533_v36 = vmax.f32 %v3514_v4, %v3413_v35  ;;  %v3534_v55 = vmax.f32 %v3515_v63, %v3413_v35 }
 0x532   : > { %v3569_v40 = vmax.f32 %v3547_v7, %v3482_v15  ;;  %v3570_v52 = vmax.f32 %v3548_v57, %v3481_v24  ;;  %v3657_v32 = vsel %vm3641_vm13, %v7346_v5, 0.0  ;;  %vm3672_vm14 = vcmp.gt.f32.partialorder %v3656_v33, 0.5 }
 0x533   : > { %vm3673_vm15 = vcmp.gt.f32.partialorder %v3657_v32, 0.5  ;;  %v3945_v14 = vsel %vm3672_vm14, 1.0, %v7315_v28  ;;  %v3549_v37 = vmax.f32 %v3533_v36, %v7424_v18  ;;  %v3550_v53 = vmax.f32 %v3534_v55, %v7432_v26 }
 0x534   : > { %v3946_v34 = vsel %vm3673_vm15, 1.0, %v7315_v28  ;;  %v3740_v38 = vrot.slane %v3945_v14, 1  ;;  %v3588_v12 = vmax.f32 %v3569_v40, %v3413_v35  ;;  %v3589_v25 = vmax.f32 %v3570_v52, %v3413_v35 }
 0x535   : > { %v3741_v1 = vrot.slane %v3946_v34, 1  ;;  %v3453_v31 = vmax.f32 %v3437_v48, %v7432_v26  ;;  %v3516_v46 = vmax.f32 %v3452_v39, %v3485_v27  ;;  %v3519_v5 = vrot.slane %v7441_v21, 7 }
 0x536   : > { %v3604_v9 = vmax.f32 %v3588_v12, %v7424_v18  ;;  %v3605_v45 = vmax.f32 %v3589_v25, %v7432_v26  ;;  %v3554_v2 = vrot.slane %v7441_v21, 1  ;;  %v3555_v60 = vrot.slane %v7452_v16, 1 }
 0x537   : > { %v3742_v20 = vsel %vm433_vm3, %v3740_v38, %v3741_v1  ;;  %v3517_v58 = vmax.f32 %v3453_v31, %v3484_v50  ;;  %v3535_v24 = vmax.f32 %v3516_v46, %v3519_v5  ;;  %v3571_v23 = vmax.f32 %v3549_v37, %v3485_v27 }
 0x538   : > { %3764 = vst.msk [vmem:[%s7323_s28 + $0x20] sm:$0xff] %vm3347_vm7, %v3742_v20  ;;  %v3626_v35 = vmax.f32 %v3604_v9, %v3485_v27  ;;  %v3627_v19 = vmax.f32 %v3605_v45, %v3484_v50  ;;  %v3572_v61 = vmax.f32 %v3550_v53, %v3484_v50  ;;  %v3576_v29 = vrot.slane %v7414_v56, 7 }
 0x539   : > { %v3536_v47 = vmax.f32 %v3517_v58, %v3519_v5  ;;  %v3551_v15 = vmax.f32 %v3535_v24, %v7441_v21  ;;  %v3590_v54 = vmax.f32 %v3571_v23, %v3519_v5  ;;  %v3613_v11 = vsel %vm433_vm3, %v3611_v8, %v3612_v42 }
 0x53a   : > { %vm3642_vm0 = vcmp.eq.f32.partialorder %v3626_v35, %v7420_v0  ;;  %vm3643_vm4 = vcmp.eq.f32.partialorder %v3627_v19, %v7422_v49  ;;  %v3556_v43 = vsel %vm433_vm3, %v3554_v2, %v3555_v60  ;;  %v3591_v13 = vmax.f32 %v3572_v61, %v3519_v5 }
 0x53b   : > { %v3658_v10 = vsel %vm3642_vm0, %v7420_v0, 0.0  ;;  %v3659_v6 = vsel %vm3643_vm4, %v7422_v49, 0.0  ;;  %v3552_v50 = vmax.f32 %v3536_v47, %v7452_v16  ;;  %v3573_v51 = vmax.f32 %v3551_v15, %v3556_v43 }
 0x53c   : > { %vm3674_vm5 = vcmp.gt.f32.partialorder %v3658_v10, 0.5  ;;  %vm3675_vm6 = vcmp.gt.f32.partialorder %v3659_v6, 0.5  ;;  %v3606_v59 = vmax.f32 %v3590_v54, %v7441_v21  ;;  %v3607_v8 = vmax.f32 %v3591_v13, %v7452_v16 }
 0x53d   : > { %v3947_v3 = vsel %vm3674_vm5, 1.0, %v7315_v28  ;;  %v3948_v41 = vsel %vm3675_vm6, 1.0, %v7315_v28  ;;  %v3574_v30 = vmax.f32 %v3552_v50, %v3555_v60  ;;  %v3592_v17 = vmax.f32 %v3573_v51, %v3576_v29 }
 0x53e   : > { %v3743_v62 = vrot.slane %v3947_v3, 1  ;;  %v3744_v0 = vrot.slane %v3948_v41, 1  ;;  %v3628_v27 = vmax.f32 %v3606_v59, %v3556_v43  ;;  %v3629_v49 = vmax.f32 %v3607_v8, %v3555_v60 }
 0x53f   : > { %v3593_v22 = vmax.f32 %v3574_v30, %v3576_v29  ;;  %v3608_v4 = vmax.f32 %v3592_v17, %v7414_v56 }
 0x540   : > { %v3745_v63 = vsel %vm433_vm3, %v3743_v62, %v3744_v0  ;;  %vm3644_vm2 = vcmp.eq.f32.partialorder %v3628_v27, %v7424_v18  ;;  %vm3645_vm9 = vcmp.eq.f32.partialorder %v3629_v49, %v7432_v26 }
 0x541   : > { %3765 = vst.msk [vmem:[%s7323_s28 + $0x28] sm:$0xff] %vm3347_vm7, %v3745_v63  ;;  %v3609_v48 = vmax.f32 %v3593_v22, %v7410_v44  ;;  %v3630_v7 = vmax.f32 %v3608_v4, %v3613_v11  ;;  %v3660_v57 = vsel %vm3644_vm2, %v7424_v18, 0.0  ;;  %v3661_v39 = vsel %vm3645_vm9, %v7432_v26, 0.0 }
 0x542   : > { %vm3676_vm10 = vcmp.gt.f32.partialorder %v3660_v57, 0.5  ;;  %vm3677_vm11 = vcmp.gt.f32.partialorder %v3661_v39, 0.5 }
 0x543   : > { %v3631_v56 = vmax.f32 %v3609_v48, %v3612_v42  ;;  %vm3646_vm8 = vcmp.eq.f32.partialorder %v3630_v7, %v7441_v21  ;;  %v3949_v33 = vsel %vm3676_vm10, 1.0, %v7315_v28  ;;  %v3950_v36 = vsel %vm3677_vm11, 1.0, %v7315_v28 }
 0x544   : > { %v3662_v55 = vsel %vm3646_vm8, %v7441_v21, 0.0  ;;  %v3746_v40 = vrot.slane %v3949_v33, 1  ;;  %v3747_v18 = vrot.slane %v3950_v36, 1 }
 0x545   : > { %vm3647_vm12 = vcmp.eq.f32.partialorder %v3631_v56, %v7452_v16  ;;  %vm3678_vm13 = vcmp.gt.f32.partialorder %v3662_v55, 0.5 }
 0x546   : > { %v3663_v26 = vsel %vm3647_vm12, %v7452_v16, 0.0  ;;  %v3951_v44 = vsel %vm3678_vm13, 1.0, %v7315_v28  ;;  %v3748_v42 = vsel %vm433_vm3, %v3746_v40, %v3747_v18 }
 0x547   : > { %vm3679_vm14 = vcmp.gt.f32.partialorder %v3663_v26, 0.5  ;;  %v3749_v52 = vrot.slane %v3951_v44, 1  ;;  %3766 = vst.msk [vmem:[%s7323_s28 + $0x30] sm:$0xff] %vm3347_vm7, %v3748_v42 }
 0x548   : > { %v3952_v32 = vsel %vm3679_vm14, 1.0, %v7315_v28 }
 0x549   : > { %v3750_v14 = vrot.slane %v3952_v32, 1 }
 0x54b   : > { %v3751_v21 = vsel %vm433_vm3, %v3749_v52, %v3750_v14 }
 0x54c   : > { %3767 = vst.msk [vmem:[%s7323_s28 + $0x38] sm:$0xff] %vm3347_vm7, %v3751_v21 }
 0x588   : > { %v3329_v16 = vpop.trf.xlu0 }
 0x589   : > { %3345 = vst.msk [vmem:[%s347_s13] sm:$0xff] %vm1306_vm1, %v3329_v16 }
 0x58c   : > { %v3330_v37 = vpop.trf.xlu0 }
 0x58d   : > { %3346 = vst.msk [vmem:[%s347_s13 + $0x8] sm:$0xff] %vm1306_vm1, %v3330_v37 }
 0x58e PF: > { %s20_s30 = sadd.s32 1, %s4697_s30  }
 0x58f   : > { %p17_p4 = scmp.ge.s32.totalorder %s20_s30, 4  }
 0x591   :  { %19 = sbr.rel (!%p17_p4) target bundleno = 1 (0x1), region = 106 }

// kernel: ctrbox_forward.3
= control target key start
LH: loop header
LB: loop body
LE: loop exit
PB: predicated region body
PF: predicated region fallthrough
CT: control target
= control target key end

     0   :  { %vm61_vm0 = vcmask 277504   ;;  %v8245_v0 = vmov 0.0   ;;  %vm5680_vm1 = vmmov 0   ;;  %vm338_vm2 = vcmask 1043456   ;;  %s8231_s0 = inlined_call_operand.vmem [shape: f32[2,20,34], index: 0, kind: input, shape index: {}]   ;;  %s8232_s1 = inlined_call_operand.vmem [shape: f32[2,40,34], index: 1, kind: input, shape index: {}]   ;;  %s8233_s10 = inlined_call_operand.vmem [shape: f32[20,800], index: 10, kind: input, shape index: {}]   ;;  %s8234_s2 = inlined_call_operand.vmem [shape: f32[37,34], index: 2, kind: input, shape index: {}]   ;;  %s8235_s3 = inlined_call_operand.vmem [shape: f32[37,34], index: 3, kind: input, shape index: {}]   ;;  %s8236_s4 = inlined_call_operand.vmem [shape: f32[35,3], index: 4, kind: input, shape index: {}]   ;;  %s8237_s9 = inlined_call_operand.<no memory space> [shape: f32[1,1], index: 9, kind: input, shape index: {}]   ;;  %s8238_s5 = inlined_call_operand.vmem [shape: f32[35,1], index: 5, kind: input, shape index: {}]   ;;  %s8239_s7 = inlined_call_operand.vmem [shape: f32[17,1], index: 7, kind: input, shape index: {}]   ;;  %s8240_s11 = inlined_call_operand.vmem [shape: f32[40,800], index: 11, kind: input, shape index: {}]   ;;  %s8241_s6 = inlined_call_operand.vmem [shape: f32[17,35], index: 6, kind: input, shape index: {}]   ;;  %s8242_s8 = inlined_call_operand.vmem [shape: f32[1,17], index: 8, kind: input, shape index: {}]   ;;  %s8243_s12 = inlined_call_operand.vmem [shape: f32[2,800], index: 12, kind: output, shape index: {}]  }
   0x1   :  { %5335 = vmatprep.subr.mxu0 %v8245_v0  ;;  %v50_v1 = vld [vmem:[%s8231_s0 + $0x10] sm:$0xf]  ;;  %5341 = vmatprep.mubr.msk.f32.mxu0 %vm5680_vm1, %v8245_v0  ;;  %v49_v2 = vld [vmem:[%s8231_s0 + $0x8] sm:$0xff]  ;;  %v55_v3 = vld [vmem:[%s8232_s1 + $0x20] sm:$0xff]  ;;  %v5681_v32 = vmov 1   ;;  %v17_v35 = vstv %s8237_s9  ;;  %v5682_v37 = vmov 0  }
   0x2   :  { %5336 = vmatpush3.xpose.msk.msra.mxu0 %vm61_vm0, %v50_v1  ;;  %5356 = vmatprep.subr.mxu1 %v8245_v0  ;;  %v54_v4 = vld [vmem:[%s8232_s1 + $0x18] sm:$0xff]  ;;  %v48_v5 = vld [vmem:[%s8231_s0] sm:$0xff]  ;;  %v53_v7 = vld [vmem:[%s8232_s1 + $0x10] sm:$0xff]  ;;  %18 = vst [vmem:[#allocation2] sm:$0x1] %v17_v35  ;;  %v5683_v39 = vmov 2  }
   0x3   :  { %5337 = vmatprep.subr.mxu0 %v8245_v0  ;;  %5366 = vmatprep.mubr.msk.f32.mxu1 %vm5680_vm1, %v8245_v0  ;;  %v316_v6 = vld [vmem:[%s8233_s10 + $0x78] sm:$0xf]  ;;  %v56_v8 = vld [vmem:[%s8234_s2] sm:$0xff]  ;;  %v315_v9 = vld [vmem:[%s8233_s10 + $0x70] sm:$0xf]  ;;  %vm322_vm3 = vcmask 162816  }
   0x4   :  { %5357 = vmatpush3.xpose.msk.msra.mxu1 %vm61_vm0, %v55_v3  ;;  %v309_v10 = vld [vmem:[%s8233_s10 + $0x40] sm:$0xff]  ;;  %v52_v11 = vld [vmem:[%s8232_s1 + $0x8] sm:$0xff]  ;;  %v308_v12 = vld [vmem:[%s8233_s10 + $0x38] sm:$0xff]  ;;  %5583 = vset.pattern.permute.xlu0 %v5681_v32  ;;  %vm770_vm4 = vcmask 326656   ;;  %vm1777_vm13 = vcmask 1042432  }
   0x5   :  { %5358 = vmatprep.subr.mxu1 %v8245_v0  ;;  %v57_v13 = vld [vmem:[%s8234_s2 + $0x8] sm:$0xff]  ;;  %v51_v15 = vld [vmem:[%s8232_s1] sm:$0xff]  ;;  %v58_v16 = vld [vmem:[%s8234_s2 + $0x10] sm:$0xff]  ;;  %5581 = vset.pattern.permute.xlu1 %v5681_v32 }
   0x6   :  { %5338 = vmatpush3.xpose.msk.msra.mxu0 %vm61_vm0, %v49_v2  ;;  %v302_v14 = vld [vmem:[%s8233_s10 + $0x8] sm:$0xff]  ;;  %v176_v18 = vld [vmem:[%s8235_s3] sm:$0xff]  ;;  %v59_v20 = vld [vmem:[%s8234_s2 + $0x18] sm:$0xff] }
   0x7   :  { %5339 = vmatprep.subr.mxu0 %v8245_v0  ;;  %v318_v17 = vld [vmem:[%s8233_s10 + $0x88] sm:$0xf]  ;;  %v317_v19 = vld [vmem:[%s8233_s10 + $0x80] sm:$0xf]  ;;  %v311_v21 = vld [vmem:[%s8233_s10 + $0x50] sm:$0xff] }
   0x8   :  { %5359 = vmatpush3.xpose.msk.msra.mxu1 %vm61_vm0, %v54_v4  ;;  %v310_v22 = vld [vmem:[%s8233_s10 + $0x48] sm:$0xff]  ;;  %v304_v24 = vld [vmem:[%s8233_s10 + $0x18] sm:$0xff]  ;;  %v60_v25 = vld [vmem:[%s8234_s2 + $0x20] sm:$0x1f] }
   0x9   :  { %5360 = vmatprep.subr.mxu1 %v8245_v0  ;;  %v177_v23 = vld [vmem:[%s8235_s3 + $0x8] sm:$0xff]  ;;  %v178_v26 = vld [vmem:[%s8235_s3 + $0x10] sm:$0xff]  ;;  %v179_v27 = vld [vmem:[%s8235_s3 + $0x18] sm:$0xff] }
   0xa   :  { %5340 = vmatpush3.xpose.msk.msra.mxu0 %vm61_vm0, %v48_v5  ;;  %v180_v28 = vld [vmem:[%s8235_s3 + $0x20] sm:$0x1f]  ;;  %v303_v30 = vld [vmem:[%s8233_s10 + $0x10] sm:$0xff]  ;;  %v320_v31 = vld [vmem:[%s8233_s10 + $0x98] sm:$0xf] }
   0xb   :  { %5044 = vmatprep.subr.msk.mxu0 %vm338_vm2, %v316_v6  ;;  %v301_v29 = vld [vmem:[%s8233_s10] sm:$0xff]  ;;  %v46_v34 = vld [vmem:[%s8236_s4 + $0x18] sm:$0xff]  ;;  %v45_v36 = vld [vmem:[%s8236_s4 + $0x10] sm:$0xff] }
   0xc   :  { %5361 = vmatpush3.xpose.msk.msra.mxu1 %vm61_vm0, %v53_v7  ;;  %v47_v33 = vld [vmem:[%s8236_s4 + $0x20] sm:$0x7]  ;;  %1423 = vperm.xlu0 %5583, %v46_v34   ;;  %v44_v38 = vld [vmem:[%s8236_s4 + $0x8] sm:$0xff]  ;;  %v5921_v42 = vld [vmem:[%s8238_s5 + $0x10] sm:$0xff] }
   0xd   :  { %5342 = vmatmul.mubr.msk.f32.vlgmr.msra.gmra.mxu0 %vm61_vm0, %v56_v8  ;;  %5362 = vmatprep.subr.mxu1 %v8245_v0  ;;  %v43_v40 = vld [vmem:[%s8236_s4] sm:$0xff]  ;;  %v1751_v43 = vld [vmem:[%s8239_s7 + $0x10] sm:$0x1]  ;;  %v1649_v45 = vld [vmem:[%s8238_s5 + $0x18] sm:$0xff] }
   0xe   :  { %5344 = vmatprep.mubr.msk.f32.mxu0 %vm5680_vm1, %v8245_v0  ;;  %5045 = vmatpush1.msk.msra.mxu0 %vm338_vm2, %v315_v9  ;;  %v1650_v41 = vld [vmem:[%s8238_s5 + $0x20] sm:$0x7]  ;;  %v4104_v46 = vld [vmem:[%s8238_s5 + $0x8] sm:$0xff]  ;;  %v319_v48 = vld [vmem:[%s8233_s10 + $0x90] sm:$0xf] }
   0xf   :  { %388 = vmatprep.subr.mxu0 %v309_v10  ;;  %1427 = vperm.xlu1 %5581, %v47_v33   ;;  %v5930_v44 = vld [vmem:[%s8239_s7] sm:$0xff]  ;;  %v312_v53 = vld [vmem:[%s8233_s10 + $0x58] sm:$0xff]  ;;  %v314_v54 = vld [vmem:[%s8233_s10 + $0x68] sm:$0xff] }
  0x10   :  { %5363 = vmatpush3.xpose.msk.msra.mxu1 %vm61_vm0, %v52_v11  ;;  %389 = vmatpush1.msra.mxu0 %v308_v12  ;;  %v321_v49 = vld [vmem:[%s8233_s10 + $0xa0] sm:$0xf]  ;;  %v306_v55 = vld [vmem:[%s8233_s10 + $0x28] sm:$0xff]  ;;  %v307_v59 = vld [vmem:[%s8233_s10 + $0x30] sm:$0xff] }
  0x11   :  { %5345 = vmatmul.mubr.msk.f32.gmra.mxu0 %vm61_vm0, %v57_v13  ;;  %5364 = vmatprep.subr.mxu1 %v8245_v0  ;;  %v313_v50 = vld [vmem:[%s8233_s10 + $0x60] sm:$0xff]  ;;  %v764_v60 = vld [vmem:[%s8240_s11 + $0xe8] sm:$0xff]  ;;  %v766_v61 = vld [vmem:[%s8240_s11 + $0xf8] sm:$0xff] }
  0x12   :  { %5347 = vmatprep.mubr.msk.f32.mxu0 %vm5680_vm1, %v8245_v0  ;;  %390 = vmatprep.subr.mxu0 %v302_v14  ;;  %v305_v58 = vld [vmem:[%s8233_s10 + $0x20] sm:$0xff]  ;;  %v4208_v3 = vld [vmem:[%s8239_s7 + $0x10] sm:$0x1] }
  0x13   :  { %391 = vmatpush1.msra.mxu0 %v301_v29  ;;  %5582 = vset.pattern.permute.xlu1 %v5682_v37  ;;  %v6017_v8 = vld [vmem:[%s8238_s5] sm:$0xff]  ;;  %v765_v12 = vld [vmem:[%s8240_s11 + $0xf0] sm:$0xff]  ;;  %v744_v29 = vld [vmem:[%s8240_s11 + $0x48] sm:$0xff] }
  0x14   :  { %5365 = vmatpush3.xpose.msk.msra.mxu1 %vm61_vm0, %v51_v15  ;;  %5058 = vmatprep.subr.msk.mxu0 %vm338_vm2, %v320_v31  ;;  %v763_v11 = vld [vmem:[%s8240_s11 + $0xe0] sm:$0xff]  ;;  %v757_v14 = vld [vmem:[%s8240_s11 + $0xb0] sm:$0xff]  ;;  %v738_v31 = vld [vmem:[%s8240_s11 + $0x18] sm:$0xff] }
  0x15   :  { %5348 = vmatmul.mubr.msk.f32.gmra.mxu0 %vm61_vm0, %v58_v16  ;;  %5051 = vmatprep.subr.msk.mxu1 %vm338_vm2, %v318_v17  ;;  %v759_v15 = vld [vmem:[%s8240_s11 + $0xc0] sm:$0xff]  ;;  %v756_v17 = vld [vmem:[%s8240_s11 + $0xa8] sm:$0xff] }
  0x16   :  { %5350 = vmatprep.mubr.msk.f32.mxu0 %vm5680_vm1, %v8245_v0  ;;  %1419 = vperm.xlu0 %5583, %v45_v36   ;;  %v767_v35 = vld [vmem:[%s8240_s11 + $0x100] sm:$0xff] }
  0x17   :  { %5367 = vmatmul.mubr.msk.f32.vlgmr.msra.gmra.mxu1 %vm61_vm0, %v176_v18  ;;  %1299 = vperm.xlu1 %5582, %v45_v36   ;;  %v758_v18 = vld [vmem:[%s8240_s11 + $0xb8] sm:$0xff] }
  0x18   :  { %5369 = vmatprep.mubr.msk.f32.mxu1 %vm5680_vm1, %v8245_v0  ;;  %5052 = vmatpush1.msk.msra.mxu1 %vm338_vm2, %v317_v19 }
  0x19   :  { %5351 = vmatmul.mubr.msk.f32.gmra.mxu0 %vm61_vm0, %v59_v20  ;;  %483 = vmatprep.subr.mxu1 %v311_v21  ;;  %v750_v20 = vld [vmem:[%s8240_s11 + $0x78] sm:$0xff]  ;;  %v752_v21 = vld [vmem:[%s8240_s11 + $0x88] sm:$0xff] }
  0x1a   :  { %5353 = vmatprep.mubr.msk.f32.mxu0 %vm5680_vm1, %v8245_v0  ;;  %484 = vmatpush1.msra.mxu1 %v310_v22 }
  0x1b   :  { %5370 = vmatmul.mubr.msk.f32.gmra.mxu1 %vm61_vm0, %v177_v23  ;;  %485 = vmatprep.subr.mxu1 %v304_v24  ;;  %v749_v23 = vld [vmem:[%s8240_s11 + $0x70] sm:$0xff]  ;;  %v751_v24 = vld [vmem:[%s8240_s11 + $0x80] sm:$0xff] }
  0x1c   :  { %5372 = vmatprep.mubr.msk.f32.mxu1 %vm5680_vm1, %v8245_v0  ;;  %486 = vmatpush1.msra.mxu1 %v303_v30  ;;  %v736_v30 = vld [vmem:[%s8240_s11 + $0x8] sm:$0xff] }
  0x1d   :  { %5354 = vmatmul.mubr.msk.f32.gmra.mxu0 %vm61_vm0, %v60_v25  ;;  %5381 = vmatprep.subr.mxu1 %v8245_v0 }
  0x1e   :  { %424 = vmatprep.mubr.f32.mxu0 %v8245_v0  ;;  %5590 = vset.pattern.permute.xlu0 %v5683_v39 }
  0x1f   :  { %5373 = vmatmul.mubr.msk.f32.gmra.mxu1 %vm61_vm0, %v178_v26  ;;  %5584 = vset.pattern.permute.xlu1 %v5683_v39  ;;  %v743_v26 = vld [vmem:[%s8240_s11 + $0x40] sm:$0xff] }
  0x20   :  { %5375 = vmatprep.mubr.msk.f32.mxu1 %vm5680_vm1, %v8245_v0  ;;  %1533 = vperm.xlu0 %5590, %v44_v38  }
  0x21   :  { %1545 = vperm.xlu1 %5584, %v47_v33  }
  0x23   :  { %5376 = vmatmul.mubr.msk.f32.gmra.mxu1 %vm61_vm0, %v179_v27  ;;  %v745_v27 = vld [vmem:[%s8240_s11 + $0x50] sm:$0xff] }
  0x24   :  { %5378 = vmatprep.mubr.msk.f32.mxu1 %vm5680_vm1, %v8245_v0  ;;  %5591 = vset.pattern.permute.xlu0 %v5682_v37 }
  0x25   :  { %5585 = vset.pattern.permute.xlu1 %v5682_v37  ;;  %1309 = vperm.xlu0 %5591, %v47_v33   ;;  %v737_v33 = vld [vmem:[%s8240_s11 + $0x10] sm:$0xff] }
  0x26   :  { %1294 = vperm.xlu1 %5585, %v44_v38  }
  0x27   :  { %5379 = vmatmul.mubr.msk.f32.gmra.mxu1 %vm61_vm0, %v180_v28  ;;  %v742_v28 = vld [vmem:[%s8240_s11 + $0x38] sm:$0xff] }
  0x28   :  { %519 = vmatprep.mubr.f32.mxu1 %v8245_v0 }
  0x29   :  { %1304 = vperm.xlu0 %5591, %v46_v34  }
  0x2a   :  { %5586 = vset.pattern.permute.xlu1 %v5683_v39 }
  0x2b   :  { %1541 = vperm.xlu1 %5586, %v46_v34   ;;  %v768_v34 = vld [vmem:[%s8240_s11 + $0x108] sm:$0xff] }
  0x2d   :  { %1289 = vperm.xlu0 %5591, %v43_v40  }
  0x2f   :  { %5587 = vset.pattern.permute.xlu1 %v5681_v32 }
  0x30   :  { %1415 = vperm.xlu1 %5587, %v44_v38   ;;  %v760_v38 = vld [vmem:[%s8240_s11 + $0xc8] sm:$0xff] }
  0x31   :  { %1673 = vperm.xlu0 %5591, %v1650_v41   ;;  %v753_v41 = vld [vmem:[%s8240_s11 + $0x90] sm:$0xff] }
  0x34   :  { %5588 = vset.pattern.permute.xlu1 %v5683_v39 }
  0x35   :  { %1537 = vperm.xlu1 %5588, %v45_v36   ;;  %1663 = vperm.xlu0 %5591, %v5921_v42   ;;  %v769_v36 = vld [vmem:[%s8240_s11 + $0x110] sm:$0xff] }
  0x39   :  { %5589 = vset.pattern.permute.xlu1 %v5681_v32  ;;  %1764 = vperm.xlu0 %5591, %v1751_v43   ;;  %v735_v32 = vld [vmem:[%s8240_s11] sm:$0xff] }
  0x3a   :  { %1411 = vperm.xlu1 %5589, %v43_v40   ;;  %v755_v43 = vld [vmem:[%s8240_s11 + $0xa0] sm:$0xff] }
  0x3d   :  { %1754 = vperm.xlu0 %5591, %v5930_v44  }
  0x3e   :  { %5592 = vset.pattern.permute.xlu1 %v5682_v37 }
  0x3f   :  { %1668 = vperm.xlu1 %5592, %v1649_v45  }
  0x41   :  { %4125 = vperm.xlu0 %5591, %v1649_v45   ;;  %v746_v45 = vld [vmem:[%s8240_s11 + $0x58] sm:$0xff] }
  0x43   :  { %5593 = vset.pattern.permute.xlu1 %v5683_v39  ;;  %v762_v39 = vld [vmem:[%s8240_s11 + $0xd8] sm:$0xff] }
  0x44   :  { %1529 = vperm.xlu1 %5593, %v43_v40   ;;  %v754_v40 = vld [vmem:[%s8240_s11 + $0x98] sm:$0xff] }
  0x45   :  { %4115 = vperm.xlu0 %5591, %v4104_v46  }
  0x48   :  { %5594 = vset.pattern.permute.xlu1 %v5682_v37  ;;  %v761_v37 = vld [vmem:[%s8240_s11 + $0xd0] sm:$0xff] }
  0x49   :  { %4221 = vperm.xlu0 %5591, %v4208_v3   ;;  %1658 = vperm.xlu1 %5594, %v4104_v46   ;;  %v748_v46 = vld [vmem:[%s8240_s11 + $0x68] sm:$0xff] }
  0x4d   :  { %4211 = vperm.xlu0 %5591, %v5930_v44   ;;  %1653 = vperm.xlu1 %5594, %v6017_v8   ;;  %v747_v44 = vld [vmem:[%s8240_s11 + $0x60] sm:$0xff] }
  0xcd   :  { %v5939_v47 = vpop.f32.mrf.mxu0 }
  0xce   :  { %5046 = vmatmul.mubr.msk.f32.vlgmr.msra.gmra.mxu0 %vm322_vm3, %v5939_v47  ;;  %5053 = vmatmul.mubr.msk.f32.vlgmr.msra.gmra.mxu1 %vm322_vm3, %v5939_v47 }
  0xcf   :  { %v5343_v51 = vpop.f32.mrf.mxu0  ;;  %430 = vmatprep.mubr.f32.mxu0 %v8245_v0  ;;  %525 = vmatprep.mubr.f32.mxu1 %v8245_v0 }
  0xd0   :  { %5059 = vmatpush1.msk.msra.mxu0 %vm338_vm2, %v319_v48  ;;  %5382 = vmatpush3.msk.msra.mxu1 %vm338_vm2, %v321_v49  ;;  %v739_v48 = vld [vmem:[%s8240_s11 + $0x20] sm:$0xff]  ;;  %v741_v49 = vld [vmem:[%s8240_s11 + $0x30] sm:$0xff]  ;;  %v1750_v51 = vld [vmem:[%s8239_s7 + $0x8] sm:$0xff] }
  0xd1   :  { %v5958_v52 = vpop.f32.mrf.mxu0  ;;  %578 = vmatprep.subr.mxu0 %v313_v50  ;;  %5383 = vmatprep.subr.mxu1 %v8245_v0  ;;  %v4605_v50 = vld [vmem:[#allocation2] sm:$0x1] }
  0xd2   :  { %5047 = vmatmul.mubr.msk.f32.gmra.mxu0 %vm322_vm3, %v5958_v52  ;;  %5054 = vmatmul.mubr.msk.f32.gmra.mxu1 %vm322_vm3, %v5958_v52 }
  0xd3   :  { %v5346_v56 = vpop.f32.mrf.mxu0  ;;  %436 = vmatprep.mubr.f32.mxu0 %v8245_v0  ;;  %531 = vmatprep.mubr.f32.mxu1 %v8245_v0 }
  0xd4   :  { %579 = vmatpush1.msra.mxu0 %v312_v53  ;;  %5384 = vmatpush3.msra.mxu1 %v314_v54 }
  0xd5   :  { %v5976_v57 = vpop.f32.mrf.mxu0  ;;  %580 = vmatprep.subr.mxu0 %v306_v55  ;;  %5385 = vmatprep.subr.mxu1 %v8245_v0 }
  0xd6   :  { %5048 = vmatmul.mubr.msk.f32.gmra.mxu0 %vm322_vm3, %v5976_v57  ;;  %5055 = vmatmul.mubr.msk.f32.gmra.mxu1 %vm322_vm3, %v5976_v57 }
  0xd7   :  { %v5349_v62 = vpop.f32.mrf.mxu0  ;;  %442 = vmatprep.mubr.f32.mxu0 %v8245_v0  ;;  %537 = vmatprep.mubr.f32.mxu1 %v8245_v0  ;;  %v5997_v63 = vpop.f32.mrf.mxu1 }
  0xd8   :  { %581 = vmatpush1.msra.mxu0 %v305_v58  ;;  %5386 = vmatpush3.msra.mxu1 %v307_v59 }
  0xd9   :  { %v5999_v1 = vpop.f32.mrf.mxu0  ;;  %808 = vmatprep.subr.mxu0 %v764_v60  ;;  %903 = vmatprep.subr.mxu1 %v766_v61  ;;  %v5368_v2 = vpop.f32.mrf.mxu1 }
  0xda   :  { %5049 = vmatmul.mubr.msk.f32.gmra.mxu0 %vm322_vm3, %v5999_v1  ;;  %5056 = vmatmul.mubr.msk.f32.gmra.mxu1 %vm322_vm3, %v5999_v1 }
  0xdb   :  { %v5352_v4 = vpop.f32.mrf.mxu0  ;;  %448 = vmatprep.mubr.f32.mxu0 %v8245_v0  ;;  %543 = vmatprep.mubr.f32.mxu1 %v8245_v0  ;;  %v6010_v5 = vpop.f32.mrf.mxu1 }
  0xdc   :  { %4608 = vperm.xlu0 %5591, %v4605_v50   ;;  %1759 = vperm.xlu1 %5594, %v1750_v51  }
  0xdd   :  { %v6012_v6 = vpop.f32.mrf.mxu0  ;;  %v5371_v7 = vpop.f32.mrf.mxu1 }
  0xde   :  { %5050 = vmatmul.mubr.msk.f32.gmra.mxu0 %vm322_vm3, %v6012_v6  ;;  %5057 = vmatmul.mubr.msk.f32.gmra.mxu1 %vm322_vm3, %v6012_v6 }
  0xdf   :  { %v5355_v9 = vpop.f32.mrf.mxu0  ;;  %614 = vmatprep.mubr.f32.mxu0 %v8245_v0  ;;  %5387 = vmatprep.mubr.msk.f32.mxu1 %vm5680_vm1, %v8245_v0  ;;  %v6026_v10 = vpop.f32.mrf.mxu1 }
  0xe1   :  { %v5374_v13 = vpop.f32.mrf.mxu1 }
  0xe2   :  { %5060 = vmatmul.mubr.msk.f32.vlgmr.msra.gmra.mxu0 %vm322_vm3, %v5939_v47  ;;  %5388 = vmatmul.mubr.msk.f32.vlgmr.msra.gmra.mxu1 %vm322_vm3, %v5939_v47  ;;  %v740_v47 = vld [vmem:[%s8240_s11 + $0x28] sm:$0xff] }
  0xe3   :  { %620 = vmatprep.mubr.f32.mxu0 %v8245_v0  ;;  %5390 = vmatprep.mubr.msk.f32.mxu1 %vm5680_vm1, %v8245_v0  ;;  %v6049_v16 = vpop.f32.mrf.mxu1 }
  0xe4   :  { %809 = vmatpush1.msra.mxu0 %v763_v11  ;;  %904 = vmatpush1.msra.mxu1 %v765_v12 }
  0xe5   :  { %810 = vmatprep.subr.mxu0 %v757_v14  ;;  %905 = vmatprep.subr.mxu1 %v759_v15  ;;  %v5377_v19 = vpop.f32.mrf.mxu1 }
  0xe6   :  { %5061 = vmatmul.mubr.msk.f32.gmra.mxu0 %vm322_vm3, %v5958_v52  ;;  %5391 = vmatmul.mubr.msk.f32.gmra.mxu1 %vm322_vm3, %v5958_v52  ;;  %v4107_v52 = vld [vmem:[%s8238_s5 + $0x20] sm:$0x7] }
  0xe7   :  { %626 = vmatprep.mubr.f32.mxu0 %v8245_v0  ;;  %5393 = vmatprep.mubr.msk.f32.mxu1 %vm5680_vm1, %v8245_v0  ;;  %v6070_v22 = vpop.f32.mrf.mxu1 }
  0xe8   :  { %811 = vmatpush1.msra.mxu0 %v756_v17  ;;  %906 = vmatpush1.msra.mxu1 %v758_v18 }
  0xe9   :  { %812 = vmatprep.subr.mxu0 %v750_v20  ;;  %907 = vmatprep.subr.mxu1 %v752_v21  ;;  %v5380_v25 = vpop.f32.mrf.mxu1 }
  0xea   :  { %5062 = vmatmul.mubr.msk.f32.gmra.mxu0 %vm322_vm3, %v5976_v57  ;;  %5394 = vmatmul.mubr.msk.f32.gmra.mxu1 %vm322_vm3, %v5976_v57 }
  0xeb   :  { %632 = vmatprep.mubr.f32.mxu0 %v8245_v0  ;;  %5396 = vmatprep.mubr.msk.f32.mxu1 %vm5680_vm1, %v8245_v0 }
  0xec   :  { %813 = vmatpush1.msra.mxu0 %v749_v23  ;;  %908 = vmatpush1.msra.mxu1 %v751_v24 }
  0xed   :  { %814 = vmatprep.subr.mxu0 %v743_v26  ;;  %909 = vmatprep.subr.mxu1 %v745_v27 }
  0xee   :  { %5063 = vmatmul.mubr.msk.f32.gmra.mxu0 %vm322_vm3, %v5999_v1  ;;  %5397 = vmatmul.mubr.msk.f32.gmra.mxu1 %vm322_vm3, %v5999_v1 }
  0xef   :  { %638 = vmatprep.mubr.f32.mxu0 %v8245_v0  ;;  %5399 = vmatprep.mubr.msk.f32.mxu1 %vm5680_vm1, %v8245_v0 }
  0xf0   :  { %815 = vmatpush1.msra.mxu0 %v742_v28  ;;  %910 = vmatpush1.msra.mxu1 %v744_v29 }
  0xf1   :  { %816 = vmatprep.subr.mxu0 %v736_v30  ;;  %911 = vmatprep.subr.mxu1 %v738_v31 }
  0xf2   :  { %5064 = vmatmul.mubr.msk.f32.gmra.mxu0 %vm322_vm3, %v6012_v6  ;;  %5400 = vmatmul.mubr.msk.f32.gmra.mxu1 %vm322_vm3, %v6012_v6 }
  0xf3   :  { %817 = vmatpush1.msra.mxu0 %v735_v32  ;;  %850 = vmatprep.mubr.f32.mxu0 %v8245_v0 }
  0xf4   :  { %912 = vmatpush1.msra.mxu1 %v737_v33  ;;  %945 = vmatprep.mubr.f32.mxu1 %v8245_v0 }
  0xf5   :  { %998 = vmatprep.subr.mxu0 %v768_v34  ;;  %5402 = vmatprep.subr.mxu1 %v8245_v0 }
  0xf6   :  { %5071 = vmatmul.mubr.msk.f32.vlgmr.msra.gmra.mxu0 %vm770_vm4, %v5997_v63  ;;  %5076 = vmatmul.mubr.msk.f32.vlgmr.msra.gmra.mxu1 %vm770_vm4, %v5997_v63 }
  0xf7   :  { %856 = vmatprep.mubr.f32.mxu0 %v8245_v0  ;;  %951 = vmatprep.mubr.f32.mxu1 %v8245_v0 }
  0xf8   :  { %999 = vmatpush1.msra.mxu0 %v767_v35  ;;  %5403 = vmatpush3.msra.mxu1 %v769_v36 }
  0xf9   :  { %1000 = vmatprep.subr.mxu0 %v761_v37  ;;  %5404 = vmatprep.subr.mxu1 %v8245_v0 }
  0xfa   :  { %5072 = vmatmul.mubr.msk.f32.gmra.mxu0 %vm770_vm4, %v6010_v5  ;;  %5077 = vmatmul.mubr.msk.f32.gmra.mxu1 %vm770_vm4, %v6010_v5 }
  0xfb   :  { %862 = vmatprep.mubr.f32.mxu0 %v8245_v0  ;;  %957 = vmatprep.mubr.f32.mxu1 %v8245_v0 }
  0xfc   :  { %1001 = vmatpush1.msra.mxu0 %v760_v38  ;;  %5405 = vmatpush3.msra.mxu1 %v762_v39  ;;  %v6311_v38 = vpop.permute.xlu0 %1423 }
  0xfd   :  { %1002 = vmatprep.subr.mxu0 %v754_v40  ;;  %5406 = vmatprep.subr.mxu1 %v8245_v0 }
  0xfe   :  { %5073 = vmatmul.mubr.msk.f32.gmra.mxu0 %vm770_vm4, %v6026_v10  ;;  %5078 = vmatmul.mubr.msk.f32.gmra.mxu1 %vm770_vm4, %v6026_v10 }
  0xff   :  { %868 = vmatprep.mubr.f32.mxu0 %v8245_v0  ;;  %963 = vmatprep.mubr.f32.mxu1 %v8245_v0 }
 0x100   :  { %1003 = vmatpush1.msra.mxu0 %v753_v41  ;;  %5407 = vmatpush3.msra.mxu1 %v755_v43  ;;  %v6319_v50 = vpop.permute.xlu0 %1419 }
 0x101   :  { %1004 = vmatprep.subr.mxu0 %v747_v44  ;;  %5408 = vmatprep.subr.mxu1 %v8245_v0  ;;  %8291 = vst [vmem:[#allocation8_spill] sm:$0xff] %v6319_v50 }
 0x102   :  { %5074 = vmatmul.mubr.msk.f32.gmra.mxu0 %vm770_vm4, %v6049_v16  ;;  %5079 = vmatmul.mubr.msk.f32.gmra.mxu1 %vm770_vm4, %v6049_v16 }
 0x103   :  { %874 = vmatprep.mubr.f32.mxu0 %v8245_v0  ;;  %969 = vmatprep.mubr.f32.mxu1 %v8245_v0 }
 0x104   :  { %1005 = vmatpush1.msra.mxu0 %v746_v45  ;;  %5409 = vmatpush3.msra.mxu1 %v748_v46  ;;  %v6317_v46 = vpop.permute.xlu1 %1427 }
 0x105   :  { %1006 = vmatprep.subr.mxu0 %v740_v47  ;;  %5410 = vmatprep.subr.mxu1 %v8245_v0  ;;  %v8244_v47 = vlaneseq }
 0x106   :  { %5075 = vmatmul.mubr.msk.f32.gmra.mxu0 %vm770_vm4, %v6070_v22  ;;  %5080 = vmatmul.mubr.msk.f32.gmra.mxu1 %vm770_vm4, %v6070_v22 }
 0x107   :  { %1007 = vmatpush1.msra.mxu0 %v739_v48  ;;  %1040 = vmatprep.mubr.f32.mxu0 %v8245_v0 }
 0x108   :  { %5411 = vmatpush3.msra.mxu1 %v741_v49  ;;  %5412 = vmatprep.mubr.msk.f32.mxu1 %vm5680_vm1, %v8245_v0 }
 0x109   :  { %4130 = vperm.xlu1 %5594, %v4107_v52  }
 0x10a   :  { %5081 = vmatmul.mubr.msk.f32.vlgmr.msra.gmra.mxu0 %vm770_vm4, %v5997_v63  ;;  %5413 = vmatmul.mubr.msk.f32.vlgmr.msra.gmra.mxu1 %vm770_vm4, %v5997_v63 }
 0x10b   :  { %1046 = vmatprep.mubr.f32.mxu0 %v8245_v0  ;;  %5415 = vmatprep.mubr.msk.f32.mxu1 %vm5680_vm1, %v8245_v0 }
 0x10d   :  { %4120 = vperm.xlu1 %5594, %v5921_v42   ;;  %v2150_v42 = vld [vmem:[#allocation2] sm:$0x1] }
 0x10e   :  { %5082 = vmatmul.mubr.msk.f32.gmra.mxu0 %vm770_vm4, %v6010_v5  ;;  %5416 = vmatmul.mubr.msk.f32.gmra.mxu1 %vm770_vm4, %v6010_v5 }
 0x10f   :  { %1052 = vmatprep.mubr.f32.mxu0 %v8245_v0  ;;  %5418 = vmatprep.mubr.msk.f32.mxu1 %vm5680_vm1, %v8245_v0 }
 0x111   :  { %4110 = vperm.xlu1 %5594, %v6017_v8  }
 0x112   :  { %5083 = vmatmul.mubr.msk.f32.gmra.mxu0 %vm770_vm4, %v6026_v10  ;;  %5419 = vmatmul.mubr.msk.f32.gmra.mxu1 %vm770_vm4, %v6026_v10 }
 0x113   :  { %1058 = vmatprep.mubr.f32.mxu0 %v8245_v0  ;;  %5421 = vmatprep.mubr.msk.f32.mxu1 %vm5680_vm1, %v8245_v0 }
 0x115   :  { %4216 = vperm.xlu1 %5594, %v1750_v51  }
 0x116   :  { %5084 = vmatmul.mubr.msk.f32.gmra.mxu0 %vm770_vm4, %v6049_v16  ;;  %5422 = vmatmul.mubr.msk.f32.gmra.mxu1 %vm770_vm4, %v6049_v16 }
 0x117   :  { %1064 = vmatprep.mubr.f32.mxu0 %v8245_v0  ;;  %5424 = vmatprep.mubr.msk.f32.mxu1 %vm5680_vm1, %v8245_v0 }
 0x119   :  { %2153 = vperm.xlu1 %5594, %v2150_v42   ;;  %v6322_v42 = vshrl.u32 %v8244_v47, 7 }
 0x11a   :  { %5085 = vmatmul.mubr.msk.f32.gmra.mxu0 %vm770_vm4, %v6070_v22  ;;  %5425 = vmatmul.mubr.msk.f32.gmra.mxu1 %vm770_vm4, %v6070_v22 }
 0x11b   :  { %1863 = vmatprep.mubr.f32.mxu0 %v8245_v0  ;;  %1946 = vmatprep.mubr.f32.mxu1 %v8245_v0  ;;  %8292 = vst [vmem:[#allocation9_spill] sm:$0xff] %v6322_v42 }
 0x18e   :  { %v426_v53 = vpop.f32.mrf.mxu0  ;;  %v521_v54 = vpop.f32.mrf.mxu1 }
 0x190   :  { %v6245_v55 = vpop.f32.mrf.mxu0  ;;  %v6247_v56 = vpop.f32.mrf.mxu1 }
 0x192   :  { %v432_v57 = vpop.f32.mrf.mxu0  ;;  %v527_v58 = vpop.f32.mrf.mxu1 }
 0x194   :  { %v6249_v59 = vpop.f32.mrf.mxu0  ;;  %v6251_v60 = vpop.f32.mrf.mxu1 }
 0x196   :  { %v6253_v61 = vpop.f32.mrf.mxu0  ;;  %v6255_v62 = vpop.f32.mrf.mxu1 }
 0x198   :  { %v6257_v63 = vpop.f32.mrf.mxu0  ;;  %v6259_v1 = vpop.f32.mrf.mxu1 }
 0x19a   :  { %v6261_v2 = vpop.f32.mrf.mxu0  ;;  %v6263_v3 = vpop.f32.mrf.mxu1 }
 0x19c   :  { %v6265_v4 = vpop.f32.mrf.mxu0  ;;  %v6267_v5 = vpop.f32.mrf.mxu1 }
 0x19e   :  { %v6269_v6 = vpop.f32.mrf.mxu0  ;;  %v6271_v7 = vpop.f32.mrf.mxu1 }
 0x1a0   :  { %v6273_v8 = vpop.f32.mrf.mxu0  ;;  %v6275_v9 = vpop.f32.mrf.mxu1 }
 0x1a2   :  { %v6277_v10 = vpop.f32.mrf.mxu0  ;;  %v6279_v11 = vpop.f32.mrf.mxu1 }
 0x1a4   :  { %v6281_v12 = vpop.f32.mrf.mxu0  ;;  %v5389_v13 = vpop.f32.mrf.mxu1 }
 0x1a6   :  { %v6283_v14 = vpop.f32.mrf.mxu0  ;;  %v6285_v15 = vpop.f32.mrf.mxu1 }
 0x1a8   :  { %v6287_v16 = vpop.f32.mrf.mxu0  ;;  %v5392_v17 = vpop.f32.mrf.mxu1 }
 0x1a9   :  { %v6326_v17 = vpop.permute.xlu0 %1533 }
 0x1aa   :  { %v6289_v18 = vpop.f32.mrf.mxu0  ;;  %v6291_v19 = vpop.f32.mrf.mxu1  ;;  %8294 = vst [vmem:[#allocation11_spill] sm:$0xff] %v6326_v17 }
 0x1ab   :  { %8286 = vst [vmem:[#allocation3_spill] sm:$0xff] %v6289_v18 }
 0x1ac   :  { %v6293_v20 = vpop.f32.mrf.mxu0  ;;  %v5395_v21 = vpop.f32.mrf.mxu1 }
 0x1ae   :  { %v6295_v22 = vpop.f32.mrf.mxu0  ;;  %v6297_v23 = vpop.f32.mrf.mxu1 }
 0x1b0   :  { %v6299_v24 = vpop.f32.mrf.mxu0  ;;  %v5398_v25 = vpop.f32.mrf.mxu1 }
 0x1b1   :  { %v6330_v25 = vsub.s32 3, %v6322_v42 }
 0x1b2   :  { %v6301_v26 = vpop.f32.mrf.mxu0  ;;  %v6303_v27 = vpop.f32.mrf.mxu1 }
 0x1b4   :  { %v6305_v28 = vpop.f32.mrf.mxu0  ;;  %v5401_v29 = vpop.f32.mrf.mxu1 }
 0x1b6   :  { %v852_v30 = vpop.f32.mrf.mxu0  ;;  %v947_v31 = vpop.f32.mrf.mxu1 }
 0x1b7   :  { %v6307_v32 = vadd.f32 %v852_v30, %v426_v53  ;;  %v6309_v33 = vadd.f32 %v947_v31, %v521_v54  ;;  %v6334_v30 = vsub.s32 4, %v6322_v42 }
 0x1b8   :  { %v854_v34 = vpop.f32.mrf.mxu0  ;;  %v949_v35 = vpop.f32.mrf.mxu1 }
 0x1b9   :  { %8287 = vst [vmem:[#allocation4_spill] sm:$0xff] %v6307_v32  ;;  %8288 = vst [vmem:[#allocation5_spill] sm:$0xff] %v6309_v33  ;;  %v6340_v47 = vadd.f32 %v949_v35, %v6247_v56 }
 0x1ba   :  { %v858_v36 = vpop.f32.mrf.mxu0  ;;  %v953_v37 = vpop.f32.mrf.mxu1 }
 0x1bb   :  { %v6313_v39 = vadd.f32 %v858_v36, %v432_v57  ;;  %v6315_v40 = vadd.f32 %v953_v37, %v527_v58  ;;  %v6324_v57 = vpop.permute.xlu1 %1299  ;;  %v6337_v37 = vadd.f32 %v854_v34, %v6245_v55  ;;  %8296 = vst [vmem:[#allocation13_spill] sm:$0xff] %v6340_v47 }
 0x1bc   :  { %v860_v41 = vpop.f32.mrf.mxu0  ;;  %v955_v43 = vpop.f32.mrf.mxu1  ;;  %8293 = vst [vmem:[#allocation10_spill] sm:$0xff] %v6324_v57 }
 0x1bd   :  { %8289 = vst [vmem:[#allocation6_spill] sm:$0xff] %v6313_v39  ;;  %8290 = vst [vmem:[#allocation7_spill] sm:$0xff] %v6315_v40  ;;  %v6343_v33 = vadd.f32 %v860_v41, %v6249_v59  ;;  %v6346_v32 = vadd.f32 %v955_v43, %v6251_v60 }
 0x1be   :  { %v864_v44 = vpop.f32.mrf.mxu0  ;;  %v959_v45 = vpop.f32.mrf.mxu1  ;;  %8295 = vst [vmem:[#allocation12_spill] sm:$0xff] %v6337_v37 }
 0x1bf   :  { %8297 = vst [vmem:[#allocation14_spill] sm:$0xff] %v6343_v33  ;;  %8298 = vst [vmem:[#allocation15_spill] sm:$0xff] %v6346_v32  ;;  %v6349_v40 = vadd.f32 %v864_v44, %v6253_v61  ;;  %v6352_v55 = vpop.permute.xlu1 %1545  ;;  %v6361_v60 = vadd.f32 %v959_v45, %v6255_v62  ;;  %v6369_v37 = vpop.permute.xlu0 %1309 }
 0x1c0   :  { %v866_v48 = vpop.f32.mrf.mxu0  ;;  %v961_v49 = vpop.f32.mrf.mxu1  ;;  %8303 = vst [vmem:[#allocation20_spill] sm:$0xff] %v6369_v37 }
 0x1c1   :  { %8299 = vst [vmem:[#allocation16_spill] sm:$0xff] %v6349_v40  ;;  %8300 = vst [vmem:[#allocation17_spill] sm:$0xff] %v6361_v60  ;;  %v6364_v61 = vadd.f32 %v866_v48, %v6257_v63  ;;  %v6367_v41 = vadd.f32 %v961_v49, %v6259_v1 }
 0x1c2   :  { %v870_v51 = vpop.f32.mrf.mxu0  ;;  %v965_v52 = vpop.f32.mrf.mxu1 }
 0x1c3   :  { %8301 = vst [vmem:[#allocation18_spill] sm:$0xff] %v6364_v61  ;;  %8302 = vst [vmem:[#allocation19_spill] sm:$0xff] %v6367_v41  ;;  %v6372_v32 = vadd.f32 %v870_v51, %v6261_v2  ;;  %v6389_v2 = vadd.f32 %v965_v52, %v6263_v3 }
 0x1c4   :  { %v872_v53 = vpop.f32.mrf.mxu0  ;;  %v967_v54 = vpop.f32.mrf.mxu1 }
 0x1c5   :  { %v6397_v51 = vadd.f32 %v872_v53, %v6265_v4 }
 0x1c6   :  { %v876_v58 = vpop.f32.mrf.mxu0  ;;  %v971_v13 = vpop.f32.mrf.mxu1 }
 0x1c7   :  { %v1161_v21 = vsub.f32 %v876_v58, %v6269_v6  ;;  %v1163_v29 = vsub.f32 %v971_v13, %v6271_v7 }
 0x1c8   :  { %v878_v31 = vpop.f32.mrf.mxu0  ;;  %v973_v36 = vpop.f32.mrf.mxu1 }
 0x1c9   :  { %v1168_v0 = vmul.f32 %v1161_v21, %v1161_v21  ;;  %v1170_v18 = vmul.f32 %v1163_v29, %v1163_v29  ;;  %v1162_v42 = vsub.f32 %v878_v31, %v6273_v8  ;;  %v6355_v56 = vrot.slane %v1161_v21, %v6330_v25 }
 0x1ca   :  { %v1042_v39 = vpop.f32.mrf.mxu0  ;;  %v1137_v17 = vpop.f32.mrf.mxu1  ;;  %v6358_v59 = vrot.slane %v1163_v29, %v6330_v25  ;;  %v6382_v63 = vrot.slane %v1161_v21, %v6334_v30  ;;  %v6385_v1 = vrot.slane %v1163_v29, %v6334_v30  ;;  %v6400_v21 = vadd.f32 %v967_v54, %v6267_v5 }
 0x1cb   :  { %v1182_v34 = vrot.slane %v1168_v0, 1  ;;  %v1184_v35 = vrot.slane %v1170_v18, 1  ;;  %v1169_v43 = vmul.f32 %v1162_v42, %v1162_v42  ;;  %v6379_v62 = vrot.slane %v1162_v42, %v6330_v25 }
 0x1cc   :  { %v1044_v44 = vpop.f32.mrf.mxu0  ;;  %v5414_v47 = vpop.f32.mrf.mxu1  ;;  %v1280_v29 = vadd.f32 %v876_v58, %v6269_v6  ;;  %v1281_v41 = vadd.f32 %v878_v31, %v6273_v8  ;;  %v1486_v5 = vmul.f32 %v6382_v63, %v6317_v46  ;;  %v1488_v6 = vmul.f32 %v6385_v1, %v6317_v46 }
 0x1cd   :  { %v6374_v33 = vadd.f32 %v1182_v34, %v1168_v0  ;;  %v6376_v40 = vadd.f32 %v1184_v35, %v1170_v18  ;;  %v1183_v45 = vrot.slane %v1169_v43, 1  ;;  %v1164_v47 = vsub.f32 %v973_v36, %v6275_v9  ;;  %v6404_v34 = vpop.permute.xlu1 %1294 }
 0x1ce   :  { %v1048_v48 = vpop.f32.mrf.mxu0  ;;  %v1142_v49 = vpop.f32.mrf.mxu1  ;;  %v1368_v0 = vmul.f32 %v6355_v56, %v6369_v37  ;;  %v1370_v18 = vmul.f32 %v6358_v59, %v6369_v37  ;;  %8304 = vst [vmem:[#allocation21_spill] sm:$0xff] %v6404_v34  ;;  %v1282_v35 = vadd.f32 %v971_v13, %v6271_v7  ;;  %v1369_v4 = vmul.f32 %v6379_v62, %v6369_v37 }
 0x1cf   :  { %5595 = vrsqrt.f32 %v6374_v33  ;;  %v6407_v60 = vadd.f32 %v1183_v45, %v1169_v43  ;;  %v1171_v53 = vmul.f32 %v1164_v47, %v1164_v47  ;;  %v6417_v54 = vrot.slane %v1164_v47, %v6330_v25 }
 0x1d0   :  { %5597 = vrsqrt.f32 %v6376_v40  ;;  %v1050_v3 = vpop.f32.mrf.mxu0  ;;  %v5417_v52 = vpop.f32.mrf.mxu1  ;;  %v1403_v13 = vadd.f32 %v1368_v0, %v1280_v29  ;;  %v1405_v43 = vadd.f32 %v1370_v18, %v1282_v35  ;;  %v6423_v8 = vrot.slane %v1162_v42, %v6334_v30 }
 0x1d1   :  { %5599 = vrsqrt.f32 %v6407_v60  ;;  %v1185_v31 = vrot.slane %v1171_v53, 1  ;;  %v1283_v45 = vadd.f32 %v973_v36, %v6275_v9  ;;  %v1371_v52 = vmul.f32 %v6417_v54, %v6369_v37  ;;  %v6463_v35 = vpop.permute.xlu0 %1304 }
 0x1d2   :  { %v6419_v58 = vpop.f32.mrf.mxu0  ;;  %v1147_v7 = vpop.f32.mrf.mxu1  ;;  %v6429_v34 = vrot.slane %v1164_v47, %v6334_v30  ;;  %v6432_v0 = vadd.f32 %v1042_v39, %v6277_v10  ;;  %v6435_v18 = vadd.f32 %v1137_v17, %v6279_v11  ;;  %v6438_v42 = vadd.f32 %v1044_v44, %v6281_v12 }
 0x1d3   :  { %8305 = vst [vmem:[#allocation22_spill] sm:$0xff] %v6419_v58  ;;  %v1404_v58 = vadd.f32 %v1369_v4, %v1281_v41  ;;  %vm1205_vm5 = vcmp.eq.f32.partialorder %v6374_v33, inf  ;;  %v1208_v9 = vand.u32 2147483648, %v6374_v33  ;;  %v6442_v36 = vadd.f32 %v1185_v31, %v1171_v53  ;;  %v6447_v10 = vpop.permute.xlu1 %1541 }
 0x1d4   :  { %v1056_v61 = vpop.f32.mrf.mxu0  ;;  %v5420_v50 = vpop.f32.mrf.mxu1  ;;  %8306 = vst [vmem:[#allocation23_spill] sm:$0xff] %v6432_v0  ;;  %8307 = vst [vmem:[#allocation24_spill] sm:$0xff] %v6435_v18  ;;  %v1406_v47 = vadd.f32 %v1371_v52, %v1283_v45  ;;  %v6445_v29 = vadd.f32 %v1142_v49, %v6285_v15  ;;  %vm1207_vm6 = vcmp.eq.f32.partialorder %v6374_v33, 0.0  ;;  %v6450_v11 = vadd.f32 %v1486_v5, %v1403_v13 }
 0x1d5   :  { %8308 = vst [vmem:[#allocation25_spill] sm:$0xff] %v6438_v42  ;;  %8310 = vst [vmem:[#allocation27_spill] sm:$0xff] %v6447_v10  ;;  %vm1219_vm7 = vcmp.eq.f32.partialorder %v6376_v40, inf  ;;  %v1487_v12 = vmul.f32 %v6423_v8, %v6317_v46  ;;  %v6456_v39 = vadd.f32 %v1147_v7, %v6291_v19  ;;  %vm1221_vm8 = vcmp.eq.f32.partialorder %v6376_v40, 0.0 }
 0x1d6   :  { %8309 = vst [vmem:[#allocation26_spill] sm:$0xff] %v6445_v29  ;;  %v1060_v50 = vpop.f32.mrf.mxu0  ;;  %v1152_v41 = vpop.f32.mrf.mxu1  ;;  %v1222_v15 = vand.u32 2147483648, %v6376_v40  ;;  %5601 = vrsqrt.f32 %v6442_v36  ;;  %v1489_v17 = vmul.f32 %v6429_v34, %v6317_v46  ;;  %v6465_v4 = vadd.f32 %v1488_v6, %v1405_v43 }
 0x1d7   :  { %8311 = vst [vmem:[#allocation28_spill] sm:$0xff] %v6456_v39  ;;  %v1215_v5 = vand.u32 2147483648, %v6407_v60  ;;  %v6468_v53 = vadd.f32 %v1487_v12, %v1404_v58  ;;  %v6471_v19 = vadd.f32 %v1048_v48, %v6283_v14  ;;  %vm1212_vm9 = vcmp.eq.f32.partialorder %v6407_v60, inf }
 0x1d8   :  { %v1062_v44 = vpop.f32.mrf.mxu0  ;;  %v5423_v49 = vpop.f32.mrf.mxu1  ;;  %v6475_v13 = vadd.f32 %v1489_v17, %v1406_v47  ;;  %v6478_v31 = vadd.f32 %v1050_v3, %v6287_v16  ;;  %v6481_v45 = vadd.f32 %v1056_v61, %v6293_v20  ;;  %vm1214_vm10 = vcmp.eq.f32.partialorder %v6407_v60, 0.0 }
 0x1d9   :  { %8312 = vst [vmem:[#allocation29_spill] sm:$0xff] %v6471_v19  ;;  %v6485_v58 = vadd.f32 %v1060_v50, %v6295_v22  ;;  %v1362_v52 = vmul.f32 %v6379_v62, %v6463_v35  ;;  %v6492_v16 = vadd.f32 %v1152_v41, %v6297_v23  ;;  %v6495_v20 = vadd.f32 %v1062_v44, %v6299_v24  ;;  %v6511_v24 = vpop.permute.xlu1 %1415 }
 0x1da   :  { %8313 = vst [vmem:[#allocation30_spill] sm:$0xff] %v6478_v31  ;;  %8314 = vst [vmem:[#allocation31_spill] sm:$0xff] %v6481_v45  ;;  %v1066_v6 = vpop.f32.mrf.mxu0  ;;  %v1157_v43 = vpop.f32.mrf.mxu1  ;;  %v6499_v3 = vmul.f32 %v6423_v8, %v6311_v38  ;;  %v1364_v22 = vmul.f32 %v6417_v54, %v6463_v35  ;;  %v6509_v23 = vmul.f32 %v6429_v34, %v6311_v38  ;;  %vm1226_vm11 = vcmp.eq.f32.partialorder %v6442_v36, inf }
 0x1db   :  { %8315 = vst [vmem:[#allocation32_spill] sm:$0xff] %v6485_v58  ;;  %v1165_v14 = vsub.f32 %v1066_v6, %v6301_v26  ;;  %v1167_v48 = vsub.f32 %v1157_v43, %v6303_v27  ;;  %8317 = vst [vmem:[#allocation34_spill] sm:$0xff] %v6511_v24  ;;  %v1284_v44 = vadd.f32 %v1066_v6, %v6301_v26  ;;  %v6524_v31 = vpop.permute.xlu0 %1289  ;;  %vm1228_vm12 = vcmp.eq.f32.partialorder %v6442_v36, 0.0 }
 0x1dc   :  { %v5596_v47 = vpop.eup %5595  ;;  %v5426_v61 = vpop.f32.mrf.mxu1  ;;  %v1286_v7 = vadd.f32 %v1157_v43, %v6303_v27  ;;  %v1397_v19 = vadd.f32 %v1362_v52, %v6397_v51  ;;  %8318 = vst [vmem:[#allocation35_spill] sm:$0xff] %v6524_v31  ;;  %v8321_v45 = vand.u32 2147483648, %v6442_v36 }
 0x1dd   :  { %v5598_v50 = vpop.eup %5597  ;;  %v1204_v12 = vmul.f32 %v5596_v47, %v6374_v33  ;;  %v1172_v17 = vmul.f32 %v1165_v14, %v1165_v14  ;;  %v6505_v49 = vrot.slane %v1165_v14, %v6330_v25  ;;  %v1174_v61 = vmul.f32 %v1167_v48, %v1167_v48 }
 0x1de   :  { %v1218_v41 = vmul.f32 %v5598_v50, %v6376_v40  ;;  %v6521_v42 = vrot.slane %v1167_v48, %v6330_v25  ;;  %v5600_v18 = vpop.eup %5599 }
 0x1df   :  { %8316 = vst [vmem:[#allocation33_spill] sm:$0xff] %v6505_v49  ;;  %v1206_v47 = vsel %vm1205_vm5, %v6374_v33, %v1204_v12  ;;  %v1186_v0 = vrot.slane %v1172_v17, 1  ;;  %v1372_v6 = vmul.f32 %v6505_v49, %v6369_v37  ;;  %v1188_v43 = vrot.slane %v1174_v61, 1 }
 0x1e0   :  { %v1209_v26 = vsel %vm1207_vm6, %v1208_v9, %v1206_v47  ;;  %v1220_v27 = vsel %vm1219_vm7, %v6376_v40, %v1218_v41  ;;  %v1211_v52 = vmul.f32 %v5600_v18, %v6407_v60  ;;  %v6546_v12 = vrot.slane %v1165_v14, %v6334_v30  ;;  %v6559_v18 = vpop.permute.xlu1 %1537 }
 0x1e1   :  { %v6535_v50 = vrot.slane %v1209_v26, %v6330_v25  ;;  %v1223_v51 = vsel %vm1221_vm8, %v1222_v15, %v1220_v27  ;;  %v6540_v33 = vadd.f32 %v1186_v0, %v1172_v17  ;;  %v6548_v41 = vadd.f32 %v1188_v43, %v1174_v61  ;;  %8320 = vst [vmem:[#allocation37_spill] sm:$0xff] %v6559_v18 }
 0x1e2   :  { %v6543_v9 = vrot.slane %v1223_v51, %v6330_v25  ;;  %8319 = vst [vmem:[#allocation36_spill] sm:$0xff] %v6546_v12  ;;  %v1399_v47 = vadd.f32 %v1364_v22, %v6400_v21  ;;  %v1213_v40 = vsel %vm1212_vm9, %v6407_v60, %v1211_v52  ;;  %v1374_v0 = vmul.f32 %v6521_v42, %v6369_v37  ;;  %v1068_v51 = vpop.f32.mrf.mxu0  ;;  %v6575_v52 = vpop.permute.xlu0 %1673 }
 0x1e3   :  { %v1604_v26 = vmul.f32 %v6535_v50, %v6352_v55  ;;  %5603 = vrsqrt.f32 %v6540_v33  ;;  %v1216_v21 = vsel %vm1214_vm10, %v1215_v5, %v1213_v40  ;;  %v1407_v14 = vadd.f32 %v1372_v6, %v1284_v44  ;;  %v5602_v17 = vpop.eup %5601 }
 0x1e4   :  { %v1606_v15 = vmul.f32 %v6543_v9, %v6352_v55  ;;  %v1361_v22 = vmul.f32 %v6355_v56, %v6463_v35  ;;  %v6569_v27 = vrot.slane %v1216_v21, %v6330_v25  ;;  %5605 = vrsqrt.f32 %v6548_v41 }
 0x1e5   :  { %v1639_v61 = vadd.f32 %v1604_v26, %v6450_v11  ;;  %v6573_v43 = vrot.slane %v1167_v48, %v6334_v30  ;;  %v1225_v5 = vmul.f32 %v5602_v17, %v6442_v36  ;;  %v1490_v44 = vmul.f32 %v6546_v12, %v6317_v46 }
 0x1e6   :  { %v1641_v60 = vadd.f32 %v1606_v15, %v6465_v4  ;;  %v1479_v11 = vmul.f32 %v6382_v63, %v6311_v38  ;;  %v1605_v26 = vmul.f32 %v6569_v27, %v6352_v55  ;;  %v1236_v48 = vand.u32 2147483648, %v6540_v33 }
 0x1e7   :  { %v1704_v6 = vadd.f32 %v6575_v52, %v1639_v61  ;;  %v1409_v40 = vadd.f32 %v1374_v0, %v1286_v7  ;;  %v1227_v4 = vsel %vm1226_vm11, %v6442_v36, %v1225_v5  ;;  %v6590_v15 = vadd.f32 %v1490_v44, %v1407_v14  ;;  %v6607_v5 = vpop.permute.xlu1 %1411 }
 0x1e8   :  { %v1166_v17 = vsub.f32 %v1068_v51, %v6305_v28  ;;  %v6595_v29 = vadd.f32 %v6575_v52, %v1641_v60  ;;  %v1640_v61 = vadd.f32 %v1605_v26, %v6468_v53  ;;  %v1230_v7 = vsel %vm1228_vm12, %v8321_v45, %v1227_v4  ;;  %8322 = vst [vmem:[#allocation38_spill] sm:$0xff] %v6607_v5 }
 0x1e9   :  { %v1492_v0 = vmul.f32 %v6573_v43, %v6317_v46  ;;  %v6605_v14 = vrot.slane %v1230_v7, %v6330_v25  ;;  %vm1233_vm14 = vcmp.eq.f32.partialorder %v6540_v33, inf  ;;  %v1285_v60 = vadd.f32 %v1068_v51, %v6305_v28 }
 0x1ea   :  { %v1173_v44 = vmul.f32 %v1166_v17, %v1166_v17  ;;  %v6612_v53 = vrot.slane %v1166_v17, %v6330_v25  ;;  %v1739_v26 = vmax.f32 %v1704_v6, 0.0  ;;  %vm1235_vm15 = vcmp.eq.f32.partialorder %v6540_v33, 0.0 }
 0x1eb   :  { %v1705_v36 = vadd.f32 %v6575_v52, %v1640_v61  ;;  %v1515_v45 = vadd.f32 %v6499_v3, %v1397_v19  ;;  %v1598_v4 = vmul.f32 %v6569_v27, %v6447_v10  ;;  %v1607_v7 = vmul.f32 %v6605_v14, %v6352_v55  ;;  %v6632_v12 = vpop.permute.xlu1 %1668 }
 0x1ec   :  { %vm1247_vm5 = vcmp.eq.f32.partialorder %v6548_v41, inf  ;;  %v1187_v21 = vrot.slane %v1173_v44, 1  ;;  %v1373_v28 = vmul.f32 %v6612_v53, %v6369_v37  ;;  %v6625_v51 = vrot.slane %v1166_v17, %v6334_v30 }
 0x1ed   :  { %vm1249_vm6 = vcmp.eq.f32.partialorder %v6548_v41, 0.0  ;;  %v1740_v6 = vmax.f32 %v1705_v36, 0.0  ;;  %v1633_v61 = vadd.f32 %v1598_v4, %v1515_v45  ;;  %v1517_v19 = vadd.f32 %v6509_v23, %v1399_v47 }
 0x1ee   :  { %v1600_v3 = vmul.f32 %v6605_v14, %v6447_v10  ;;  %v1642_v58 = vadd.f32 %v1607_v7, %v6475_v13  ;;  %v1527_v49 = vadd.f32 %v1492_v0, %v1409_v40  ;;  %v6634_v39 = vadd.f32 %v1187_v21, %v1173_v44 }
 0x1ef   :  { %v1396_v37 = vadd.f32 %v1361_v22, %v6372_v32  ;;  %v1741_v17 = vmax.f32 %v6595_v29, 0.0  ;;  %5091 = vmatprep.subr.msk.mxu0 %vm1777_vm13, %v1740_v6  ;;  %v1698_v36 = vadd.f32 %v6632_v12, %v1633_v61  ;;  %v1363_v23 = vmul.f32 %v6358_v59, %v6463_v35 }
 0x1f0   :  { %v1635_v45 = vadd.f32 %v1600_v3, %v1517_v19  ;;  %v5604_v47 = vpop.eup %5603  ;;  %5607 = vrsqrt.f32 %v6634_v39  ;;  %v1408_v13 = vadd.f32 %v1373_v28, %v1285_v60  ;;  %v1491_v40 = vmul.f32 %v6625_v51, %v6317_v46  ;;  %5092 = vmatpush1.msk.msra.mxu0 %vm1777_vm13, %v1739_v26 }
 0x1f1   :  { %v1597_v32 = vmul.f32 %v6535_v50, %v6447_v10  ;;  %v1232_v29 = vmul.f32 %v5604_v47, %v6540_v33  ;;  %v1243_v22 = vand.u32 2147483648, %v6634_v39  ;;  %v1707_v21 = vadd.f32 %v6575_v52, %v1642_v58  ;;  %v5606_v44 = vpop.eup %5605 }
 0x1f2   :  { %v1733_v0 = vmax.f32 %v1698_v36, 0.0  ;;  %v1700_v4 = vadd.f32 %v6632_v12, %v1635_v45  ;;  %v1514_v7 = vadd.f32 %v1479_v11, %v1396_v37  ;;  %v1398_v60 = vadd.f32 %v1363_v23, %v6389_v2  ;;  %v8323_v23 = vld [vmem:[#allocation8_spill] sm:$0xff] }
 0x1f3   :  { %v1481_v28 = vmul.f32 %v6385_v1, %v6311_v38  ;;  %v1234_v26 = vsel %vm1233_vm14, %v6540_v33, %v1232_v29  ;;  %v1246_v6 = vmul.f32 %v5606_v44, %v6548_v41  ;;  %v1742_v61 = vmax.f32 %v1707_v21, 0.0 }
 0x1f4   :  { %1823 = vmatprep.subr.mxu0 %v1733_v0  ;;  %v1599_v58 = vmul.f32 %v6543_v9, %v6447_v10  ;;  %v1237_v19 = vsel %vm1235_vm15, %v1236_v48, %v1234_v26  ;;  %v1735_v37 = vmax.f32 %v1700_v4, 0.0  ;;  %v1632_v11 = vadd.f32 %v1597_v32, %v1514_v7  ;;  %v8325_v4 = vld [vmem:[#allocation18_spill] sm:$0xff] }
 0x1f5   :  { %v1516_v2 = vadd.f32 %v1481_v28, %v1398_v60  ;;  %v6664_v3 = vrot.slane %v1237_v19, %v6330_v25  ;;  %v1248_v36 = vsel %vm1247_vm5, %v6548_v41, %v1246_v6  ;;  %5096 = vmatprep.subr.msk.mxu1 %vm1777_vm13, %v1742_v61  ;;  %v1355_v45 = vmul.f32 %v6379_v62, %v6324_v57  ;;  %v8326_v19 = vld [vmem:[#allocation19_spill] sm:$0xff] }
 0x1f6   :  { %v1473_v47 = vmul.f32 %v6423_v8, %v8323_v23  ;;  %v8324_v33 = vand.u32 2147483648, %v6548_v41  ;;  %5097 = vmatpush1.msk.msra.mxu1 %vm1777_vm13, %v1741_v17  ;;  %v1697_v32 = vadd.f32 %v6632_v12, %v1632_v11  ;;  %v1591_v21 = vmul.f32 %v6569_v27, %v6559_v18 }
 0x1f7   :  { %v1634_v29 = vadd.f32 %v1599_v58, %v1516_v2  ;;  %v1608_v0 = vmul.f32 %v6664_v3, %v6352_v55  ;;  %vm1240_vm7 = vcmp.eq.f32.partialorder %v6634_v39, inf  ;;  %1906 = vmatprep.subr.mxu1 %v1735_v37  ;;  %v1390_v41 = vadd.f32 %v1355_v45, %v8325_v4 }
 0x1f8   :  { %v1251_v48 = vsel %vm1249_vm6, %v8324_v33, %v1248_v36  ;;  %v1357_v17 = vmul.f32 %v6417_v54, %v6324_v57  ;;  %vm1242_vm8 = vcmp.eq.f32.partialorder %v6634_v39, 0.0  ;;  %v1732_v7 = vmax.f32 %v1697_v32, 0.0 }
 0x1f9   :  { %v6685_v44 = vrot.slane %v1251_v48, %v6330_v25  ;;  %v1699_v60 = vadd.f32 %v6632_v12, %v1634_v29  ;;  %v1475_v28 = vmul.f32 %v6429_v34, %v8323_v23  ;;  %v1593_v26 = vmul.f32 %v6605_v14, %v6559_v18  ;;  %v6707_v29 = vpop.permute.xlu0 %1663 }
 0x1fa   :  { %v1643_v6 = vadd.f32 %v1608_v0, %v6590_v15  ;;  %v1508_v58 = vadd.f32 %v1473_v47, %v1390_v41  ;;  %v1392_v37 = vadd.f32 %v1357_v17, %v8326_v19  ;;  %v1526_v11 = vadd.f32 %v1491_v40, %v1408_v13  ;;  %1824 = vmatpush1.msra.mxu0 %v1732_v7  ;;  %v8327_v13 = vld [vmem:[#allocation16_spill] sm:$0xff] }
 0x1fb   :  { %v1610_v61 = vmul.f32 %v6685_v44, %v6352_v55  ;;  %v1734_v2 = vmax.f32 %v1699_v60, 0.0  ;;  %v1354_v36 = vmul.f32 %v6355_v56, %v6324_v57  ;;  %v1472_v45 = vmul.f32 %v6382_v63, %v8323_v23 }
 0x1fc   :  { %v1626_v48 = vadd.f32 %v1591_v21, %v1508_v58  ;;  %v1510_v32 = vadd.f32 %v1475_v28, %v1392_v37  ;;  %v1590_v15 = vmul.f32 %v6535_v50, %v6559_v18  ;;  %v6710_v47 = vadd.f32 %v6575_v52, %v1643_v6  ;;  %v8328_v6 = vld [vmem:[#allocation17_spill] sm:$0xff]  ;;  %v6727_v37 = vpop.permute.xlu1 %1529 }
 0x1fd   :  { %v1645_v33 = vadd.f32 %v1610_v61, %v1527_v49  ;;  %1907 = vmatpush1.msra.mxu1 %v1734_v2  ;;  %v1389_v40 = vadd.f32 %v1354_v36, %v8327_v13  ;;  %v1356_v0 = vmul.f32 %v6358_v59, %v6324_v57  ;;  %v1474_v4 = vmul.f32 %v6385_v1, %v8323_v23  ;;  %v5608_v49 = vpop.eup %5607  ;;  %v8329_v58 = vld [vmem:[#allocation21_spill] sm:$0xff]  ;;  %v8331_v13 = vld [vmem:[#allocation14_spill] sm:$0xff] }
 0x1fe   :  { %v1691_v41 = vadd.f32 %v6707_v29, %v1626_v48  ;;  %v1628_v17 = vadd.f32 %v1593_v26, %v1510_v32  ;;  %v1592_v7 = vmul.f32 %v6543_v9, %v6559_v18  ;;  %v1239_v60 = vmul.f32 %v5608_v49, %v6634_v39  ;;  %8330 = vst [vmem:[#allocation18_spill] sm:$0xff] %v6727_v37 }
 0x1ff   :  { %v6718_v21 = vadd.f32 %v6575_v52, %v1645_v33  ;;  %v1507_v28 = vadd.f32 %v1472_v45, %v1389_v40  ;;  %v1391_v61 = vadd.f32 %v1356_v0, %v8328_v6  ;;  %v1348_v19 = vmul.f32 %v6379_v62, %v8329_v58 }
 0x200   :  { %v1726_v36 = vmax.f32 %v1691_v41, 0.0  ;;  %v1693_v33 = vadd.f32 %v6707_v29, %v1628_v17  ;;  %v1466_v26 = vmul.f32 %v6423_v8, %v6511_v24  ;;  %v1241_v48 = vsel %vm1240_vm7, %v6634_v39, %v1239_v60  ;;  %v8332_v41 = vld [vmem:[#allocation11_spill] sm:$0xff] }
 0x201   :  { %v1625_v45 = vadd.f32 %v1590_v15, %v1507_v28  ;;  %v1509_v32 = vadd.f32 %v1474_v4, %v1391_v61  ;;  %v1383_v40 = vadd.f32 %v1348_v19, %v8331_v13  ;;  %v1244_v0 = vsel %vm1242_vm8, %v1243_v22, %v1241_v48  ;;  %v8333_v28 = vld [vmem:[#allocation15_spill] sm:$0xff] }
 0x202   :  { %1825 = vmatprep.subr.mxu0 %v1726_v36  ;;  %v1728_v49 = vmax.f32 %v1693_v33, 0.0  ;;  %v1584_v17 = vmul.f32 %v6569_v27, %v8332_v41  ;;  %v1350_v6 = vmul.f32 %v6417_v54, %v8329_v58  ;;  %v6746_v2 = vrot.slane %v1244_v0, %v6330_v25 }
 0x203   :  { %v1690_v15 = vadd.f32 %v6707_v29, %v1625_v45  ;;  %v1627_v4 = vadd.f32 %v1592_v7, %v1509_v32  ;;  %v1501_v60 = vadd.f32 %v1466_v26, %v1383_v40  ;;  %v1468_v39 = vmul.f32 %v6429_v34, %v6511_v24  ;;  %v6759_v26 = vpop.permute.xlu1 %1658  ;;  %v8334_v32 = vld [vmem:[#allocation6_spill] sm:$0xff] }
 0x204   :  { %1908 = vmatprep.subr.mxu1 %v1728_v49  ;;  %v1385_v61 = vadd.f32 %v1350_v6, %v8333_v28  ;;  %v1586_v22 = vmul.f32 %v6605_v14, %v8332_v41  ;;  %v1347_v19 = vmul.f32 %v6355_v56, %v8329_v58  ;;  %v1609_v36 = vmul.f32 %v6746_v2, %v6352_v55 }
 0x205   :  { %v1725_v33 = vmax.f32 %v1690_v15, 0.0  ;;  %v1692_v48 = vadd.f32 %v6707_v29, %v1627_v4  ;;  %v1619_v7 = vadd.f32 %v1584_v17, %v1501_v60  ;;  %v1465_v40 = vmul.f32 %v6382_v63, %v6511_v24 }
 0x206   :  { %v1503_v45 = vadd.f32 %v1468_v39, %v1385_v61  ;;  %v1382_v13 = vadd.f32 %v1347_v19, %v8334_v32  ;;  %v1583_v0 = vmul.f32 %v6535_v50, %v8332_v41  ;;  %v1644_v49 = vadd.f32 %v1609_v36, %v1526_v11  ;;  %v8335_v19 = vld [vmem:[#allocation7_spill] sm:$0xff] }
 0x207   :  { %1826 = vmatpush1.msra.mxu0 %v1725_v33  ;;  %v1727_v6 = vmax.f32 %v1692_v48, 0.0  ;;  %v1684_v28 = vadd.f32 %v6759_v26, %v1619_v7  ;;  %v1349_v15 = vmul.f32 %v6358_v59, %v8329_v58  ;;  %v1467_v60 = vmul.f32 %v6385_v1, %v6511_v24 }
 0x208   :  { %v1621_v17 = vadd.f32 %v1586_v22, %v1503_v45  ;;  %v1500_v4 = vadd.f32 %v1465_v40, %v1382_v13  ;;  %v1585_v61 = vmul.f32 %v6543_v9, %v8332_v41  ;;  %v1341_v11 = vmul.f32 %v6379_v62, %v6524_v31  ;;  %v8336_v13 = vld [vmem:[#allocation12_spill] sm:$0xff] }
 0x209   :  { %1909 = vmatpush1.msra.mxu1 %v1727_v6  ;;  %v1719_v39 = vmax.f32 %v1684_v28, 0.0  ;;  %v1384_v32 = vadd.f32 %v1349_v15, %v8335_v19  ;;  %v1459_v36 = vmul.f32 %v6423_v8, %v6607_v5  ;;  %v1577_v48 = vmul.f32 %v6569_v27, %v6727_v37 }
 0x20a   :  { %v1686_v33 = vadd.f32 %v6759_v26, %v1621_v17  ;;  %v1618_v22 = vadd.f32 %v1583_v0, %v1500_v4  ;;  %v1343_v7 = vmul.f32 %v6417_v54, %v6524_v31  ;;  %v1376_v40 = vadd.f32 %v1341_v11, %v8336_v13  ;;  %v8337_v0 = vld [vmem:[#allocation13_spill] sm:$0xff] }
 0x20b   :  { %1827 = vmatprep.subr.mxu0 %v1719_v39  ;;  %v1502_v45 = vadd.f32 %v1467_v60, %v1384_v32  ;;  %v1461_v6 = vmul.f32 %v6429_v34, %v6607_v5  ;;  %v1579_v62 = vmul.f32 %v6605_v14, %v6727_v37  ;;  %v1340_v27 = vmul.f32 %v6355_v56, %v6524_v31  ;;  %v8338_v14 = vld [vmem:[#allocation4_spill] sm:$0xff] }
 0x20c   :  { %v1721_v8 = vmax.f32 %v1686_v33, 0.0  ;;  %v1683_v28 = vadd.f32 %v6759_v26, %v1618_v22  ;;  %v1378_v15 = vadd.f32 %v1343_v7, %v8337_v0  ;;  %v1494_v54 = vadd.f32 %v1459_v36, %v1376_v40  ;;  %v6804_v36 = vpop.permute.xlu1 %1653  ;;  %v8339_v22 = vld [vmem:[#allocation5_spill] sm:$0xff] }
 0x20d   :  { %v1620_v17 = vadd.f32 %v1585_v61, %v1502_v45  ;;  %v1458_v4 = vmul.f32 %v6382_v63, %v6607_v5  ;;  %v1576_v60 = vmul.f32 %v6535_v50, %v6727_v37  ;;  %v1375_v19 = vadd.f32 %v1340_v27, %v8338_v14  ;;  %v6831_v14 = vld [vmem:[%s8241_s6] sm:$0xff] }
 0x20e   :  { %1910 = vmatprep.subr.mxu1 %v1721_v8  ;;  %v1718_v34 = vmax.f32 %v1683_v28, 0.0  ;;  %v1496_v39 = vadd.f32 %v1461_v6, %v1378_v15  ;;  %v1342_v32 = vmul.f32 %v6358_v59, %v6524_v31  ;;  %vm1767_vm9 = vcmask 285696  }
 0x20f   :  { %v1685_v11 = vadd.f32 %v6759_v26, %v1620_v17  ;;  %v1612_v56 = vadd.f32 %v1577_v48, %v1494_v54  ;;  %v1460_v61 = vmul.f32 %v6385_v1, %v6607_v5  ;;  %v1578_v63 = vmul.f32 %v6543_v9, %v6727_v37 }
 0x210   :  { %1828 = vmatpush1.msra.mxu0 %v1718_v34  ;;  %v1614_v50 = vadd.f32 %v1579_v62, %v1496_v39  ;;  %v1493_v33 = vadd.f32 %v1458_v4, %v1375_v19  ;;  %v1377_v7 = vadd.f32 %v1342_v32, %v8339_v22  ;;  %v1709_v45 = vadd.f32 %v6575_v52, %v1644_v49  ;;  %v8342_v22 = vld [vmem:[#allocation36_spill] sm:$0xff] }
 0x211   :  { %v1720_v59 = vmax.f32 %v1685_v11, 0.0  ;;  %v1677_v13 = vadd.f32 %v6804_v36, %v1612_v56  ;;  %v1367_v48 = vmul.f32 %v6521_v42, %v6463_v35  ;;  %v1485_v1 = vmul.f32 %v6573_v43, %v6311_v38  ;;  %v8340_v56 = vld [vmem:[#allocation28_spill] sm:$0xff] }
 0x212   :  { %v1679_v9 = vadd.f32 %v6804_v36, %v1614_v50  ;;  %v1611_v40 = vadd.f32 %v1576_v60, %v1493_v33  ;;  %v1495_v6 = vadd.f32 %v1460_v61, %v1377_v7  ;;  %v1744_v8 = vmax.f32 %v1709_v45, 0.0 }
 0x213   :  { %1911 = vmatpush1.msra.mxu1 %v1720_v59  ;;  %v1712_v62 = vmax.f32 %v1677_v13, 0.0  ;;  %v1402_v28 = vadd.f32 %v1367_v48, %v6492_v16  ;;  %v1603_v52 = vmul.f32 %v6685_v44, %v6447_v10  ;;  %v1366_v49 = vmul.f32 %v6612_v53, %v6463_v35 }
 0x214   :  { %v1714_v0 = vmax.f32 %v1679_v9, 0.0  ;;  %v1676_v15 = vadd.f32 %v6804_v36, %v1611_v40  ;;  %v1613_v27 = vadd.f32 %v1578_v63, %v1495_v6  ;;  %v1484_v17 = vmul.f32 %v6625_v51, %v6311_v38  ;;  %v8341_v63 = vld [vmem:[#allocation33_spill] sm:$0xff]  ;;  %v6854_v40 = vld [vmem:[%s8241_s6 + $0x8] sm:$0xff] }
 0x215   :  { %1829 = vmatprep.subr.mxu0 %v1712_v62  ;;  %v1520_v54 = vadd.f32 %v1485_v1, %v1402_v28  ;;  %v1401_v4 = vadd.f32 %v1366_v49, %v6495_v20  ;;  %v1602_v16 = vmul.f32 %v6746_v2, %v6447_v10  ;;  %v1360_v60 = vmul.f32 %v6521_v42, %v6324_v57  ;;  %v8344_v6 = vld [vmem:[#allocation32_spill] sm:$0xff]  ;;  %v8345_v28 = vld [vmem:[#allocation31_spill] sm:$0xff] }
 0x216   :  { %1912 = vmatprep.subr.mxu1 %v1714_v0  ;;  %v1711_v34 = vmax.f32 %v1676_v15, 0.0  ;;  %v1678_v39 = vadd.f32 %v6804_v36, %v1613_v27  ;;  %v1478_v19 = vmul.f32 %v6573_v43, %v8323_v23  ;;  %v1596_v20 = vmul.f32 %v6685_v44, %v6559_v18 }
 0x217   :  { %v1638_v32 = vadd.f32 %v1603_v52, %v1520_v54  ;;  %v1519_v11 = vadd.f32 %v1484_v17, %v1401_v4  ;;  %v1395_v61 = vadd.f32 %v1360_v60, %v8340_v56  ;;  %v1365_v50 = vmul.f32 %v8341_v63, %v6463_v35  ;;  %v8348_v56 = vld [vmem:[#allocation3_spill] sm:$0xff] }
 0x218   :  { %1830 = vmatpush1.msra.mxu0 %v1711_v34  ;;  %v1713_v33 = vmax.f32 %v1678_v39, 0.0  ;;  %v1483_v7 = vmul.f32 %v8342_v22, %v6311_v38  ;;  %v1601_v45 = vmul.f32 %v6664_v3, %v6447_v10  ;;  %v1359_v59 = vmul.f32 %v6612_v53, %v6324_v57 }
 0x219   :  { %5093 = vmatmul.mubr.msk.f32.vlgmr.msra.gmra.mxu0 %vm1767_vm9, %v6831_v14  ;;  %5101 = vmatprep.subr.msk.mxu0 %vm1777_vm13, %v1744_v8  ;;  %v1703_v13 = vadd.f32 %v6632_v12, %v1638_v32  ;;  %v1637_v48 = vadd.f32 %v1602_v16, %v1519_v11  ;;  %v1513_v1 = vadd.f32 %v1478_v19, %v1395_v61  ;;  %v8343_v9 = vmov 0.0   ;;  %v6885_v19 = vld [vmem:[%s8241_s6 + $0x10] sm:$0x1]  ;;  %v8347_v32 = vld [vmem:[#allocation26_spill] sm:$0xff] }
 0x21a   :  { %1913 = vmatpush1.msra.mxu1 %v1713_v33  ;;  %1869 = vmatprep.mubr.f32.mxu0 %v8343_v9  ;;  %v1400_v62 = vadd.f32 %v1365_v50, %v8344_v6  ;;  %v1394_v52 = vadd.f32 %v1359_v59, %v8345_v28  ;;  %v1477_v49 = vmul.f32 %v6625_v51, %v8323_v23  ;;  %v8346_v27 = vmax.f32 %v6718_v21, 0.0  ;;  %v8349_v61 = vld [vmem:[#allocation22_spill] sm:$0xff] }
 0x21b   :  { %5098 = vmatmul.mubr.msk.f32.vlgmr.msra.gmra.mxu1 %vm1767_vm9, %v6831_v14  ;;  %5427 = vmatprep.subr.mxu1 %v8343_v9  ;;  %v1702_v8 = vadd.f32 %v6632_v12, %v1637_v48  ;;  %v1631_v0 = vadd.f32 %v1596_v20, %v1513_v1  ;;  %v1595_v15 = vmul.f32 %v6746_v2, %v6559_v18  ;;  %v1738_v17 = vmax.f32 %v1703_v13, 0.0 }
 0x21c   :  { %1952 = vmatprep.mubr.f32.mxu1 %v8343_v9  ;;  %5428 = vmatpush3.msk.msra.mxu1 %vm1777_vm13, %v8346_v27  ;;  %v1518_v54 = vadd.f32 %v1483_v7, %v1400_v62  ;;  %v1512_v4 = vadd.f32 %v1477_v49, %v1394_v52  ;;  %v1353_v16 = vmul.f32 %v6521_v42, %v8329_v58  ;;  %v1743_v60 = vmax.f32 %v6710_v47, 0.0  ;;  %v8350_v27 = vld [vmem:[#allocation30_spill] sm:$0xff] }
 0x21d   :  { %5094 = vmatmul.mubr.msk.f32.gmra.mxu0 %vm1767_vm9, %v6854_v40  ;;  %5429 = vmatprep.subr.mxu1 %v8343_v9  ;;  %v1696_v34 = vadd.f32 %v6707_v29, %v1631_v0  ;;  %v1471_v21 = vmul.f32 %v6573_v43, %v6511_v24  ;;  %v1589_v39 = vmul.f32 %v6685_v44, %v8332_v41  ;;  %v1737_v33 = vmax.f32 %v1702_v8, 0.0 }
 0x21e   :  { %1875 = vmatprep.mubr.f32.mxu0 %v8343_v9  ;;  %5430 = vmatpush3.msra.mxu1 %v1738_v17  ;;  %v1636_v47 = vadd.f32 %v1601_v45, %v1518_v54  ;;  %v1630_v20 = vadd.f32 %v1595_v15, %v1512_v4  ;;  %v1388_v11 = vadd.f32 %v1353_v16, %v8347_v32  ;;  %vm2164_vm10 = vcmask 1040384  }
 0x21f   :  { %v1270_v50 = vadd.f32 %v8349_v61, %v8348_v56  ;;  %5099 = vmatmul.mubr.msk.f32.gmra.mxu1 %vm1767_vm9, %v6854_v40  ;;  %5102 = vmatpush1.msk.msra.mxu0 %vm1777_vm13, %v1743_v60  ;;  %v1358_v7 = vmul.f32 %v8341_v63, %v6324_v57  ;;  %v1476_v59 = vmul.f32 %v8342_v22, %v8323_v23  ;;  %v1731_v45 = vmax.f32 %v1696_v34, 0.0 }
 0x220   :  { %1958 = vmatprep.mubr.f32.mxu1 %v8343_v9  ;;  %5431 = vmatprep.subr.mxu1 %v8343_v9  ;;  %v1701_v13 = vadd.f32 %v6632_v12, %v1636_v47  ;;  %v1695_v48 = vadd.f32 %v6707_v29, %v1630_v20  ;;  %v1506_v1 = vadd.f32 %v1471_v21, %v1388_v11  ;;  %vm2160_vm11 = vcmask 138240  }
 0x221   :  { %5095 = vmatmul.mubr.msk.f32.gmra.mxu0 %vm1767_vm9, %v6885_v19  ;;  %1989 = vmatprep.subr.mxu0 %v1737_v33  ;;  %v1393_v6 = vadd.f32 %v1358_v7, %v1270_v50  ;;  %v1594_v62 = vmul.f32 %v6664_v3, %v6559_v18  ;;  %v1352_v28 = vmul.f32 %v6612_v53, %v8329_v58  ;;  %v8352_v50 = vld [vmem:[#allocation29_spill] sm:$0xff] }
 0x222   :  { %5432 = vmatpush3.msra.mxu1 %v1731_v45  ;;  %v1736_v52 = vmax.f32 %v1701_v13, 0.0  ;;  %v1624_v49 = vadd.f32 %v1589_v39, %v1506_v1  ;;  %v1470_v12 = vmul.f32 %v6625_v51, %v6511_v24  ;;  %v1588_v8 = vmul.f32 %v6746_v2, %v8332_v41  ;;  %2029 = vmatprep.mubr.f32.mxu0 %v8343_v9  ;;  %v8351_v39 = vld [vmem:[#allocation24_spill] sm:$0xff]  ;;  %v8353_v7 = vld [vmem:[#allocation25_spill] sm:$0xff] }
 0x223   :  { %5100 = vmatmul.mubr.msk.f32.gmra.mxu1 %vm1767_vm9, %v6885_v19  ;;  %5433 = vmatprep.subr.mxu1 %v8343_v9  ;;  %v1730_v0 = vmax.f32 %v1695_v48, 0.0  ;;  %v1511_v15 = vadd.f32 %v1476_v59, %v1393_v6  ;;  %v1387_v17 = vadd.f32 %v1352_v28, %v8350_v27  ;;  %v1346_v54 = vmul.f32 %v6521_v42, %v6524_v31  ;;  %v8354_v28 = vld [vmem:[#allocation23_spill] sm:$0xff] }
 0x224   :  { %1990 = vmatpush1.msra.mxu0 %v1736_v52  ;;  %v1689_v4 = vadd.f32 %v6759_v26, %v1624_v49  ;;  %v1464_v16 = vmul.f32 %v6573_v43, %v6607_v5  ;;  %v1582_v60 = vmul.f32 %v6685_v44, %v6727_v37  ;;  %5437 = vmatprep.mubr.msk.f32.mxu1 %vm5680_vm1, %v8343_v9 }
 0x225   :  { %1991 = vmatprep.subr.mxu0 %v1730_v0  ;;  %v1629_v34 = vadd.f32 %v1594_v62, %v1511_v15  ;;  %v1505_v21 = vadd.f32 %v1470_v12, %v1387_v17  ;;  %v1381_v47 = vadd.f32 %v1346_v54, %v8351_v39  ;;  %v1351_v42 = vmul.f32 %v8341_v63, %v8329_v58 }
 0x226   :  { %v1724_v20 = vmax.f32 %v1689_v4, 0.0  ;;  %v1469_v32 = vmul.f32 %v8342_v22, %v6511_v24  ;;  %v1587_v43 = vmul.f32 %v6664_v3, %v8332_v41  ;;  %v1345_v44 = vmul.f32 %v6612_v53, %v6524_v31 }
 0x227   :  { %v1694_v11 = vadd.f32 %v6707_v29, %v1629_v34  ;;  %v1623_v56 = vadd.f32 %v1588_v8, %v1505_v21  ;;  %v1499_v61 = vadd.f32 %v1464_v16, %v1381_v47  ;;  %v1386_v33 = vadd.f32 %v1351_v42, %v8352_v50  ;;  %v6974_v21 = vpop.permute.xlu0 %1764 }
 0x228   :  { %5434 = vmatpush3.msra.mxu1 %v1724_v20  ;;  %v1380_v59 = vadd.f32 %v1345_v44, %v8353_v7  ;;  %v1463_v45 = vmul.f32 %v6625_v51, %v6607_v5  ;;  %v1581_v13 = vmul.f32 %v6746_v2, %v6727_v37  ;;  %v1344_v48 = vmul.f32 %v8341_v63, %v6524_v31  ;;  %v6976_v20 = vpop.permute.xlu1 %1759 }
 0x229   :  { %v1729_v1 = vmax.f32 %v1694_v11, 0.0  ;;  %5435 = vmatprep.subr.mxu1 %v8343_v9  ;;  %v1688_v53 = vadd.f32 %v6759_v26, %v1623_v56  ;;  %v1617_v29 = vadd.f32 %v1582_v60, %v1499_v61  ;;  %v1504_v6 = vadd.f32 %v1469_v32, %v1386_v33 }
 0x22a   :  { %v1498_v62 = vadd.f32 %v1463_v45, %v1380_v59  ;;  %v1379_v52 = vadd.f32 %v1344_v48, %v8354_v28  ;;  %v1462_v49 = vmul.f32 %v8342_v22, %v6607_v5  ;;  %v1580_v51 = vmul.f32 %v6664_v3, %v6727_v37 }
 0x22b   :  { %1992 = vmatpush1.msra.mxu0 %v1729_v1  ;;  %v1723_v2 = vmax.f32 %v1688_v53, 0.0  ;;  %v1682_v63 = vadd.f32 %v6804_v36, %v1617_v29  ;;  %v1622_v12 = vadd.f32 %v1587_v43, %v1504_v6  ;;  %v6981_v56 = vpop.permute.xlu0 %1754 }
 0x22c   :  { %v1616_v8 = vadd.f32 %v1581_v13, %v1498_v62  ;;  %v1497_v0 = vadd.f32 %v1462_v49, %v1379_v52  ;;  %v6995_v52 = vld [vmem:[%s8242_s8] sm:$0x1] }
 0x22d   :  { %1993 = vmatprep.subr.mxu0 %v1723_v2  ;;  %v1717_v15 = vmax.f32 %v1682_v63, 0.0  ;;  %v1687_v27 = vadd.f32 %v6759_v26, %v1622_v12 }
 0x22e   :  { %v1681_v17 = vadd.f32 %v6804_v36, %v1616_v8  ;;  %v1615_v54 = vadd.f32 %v1580_v51, %v1497_v0 }
 0x22f   :  { %5436 = vmatpush3.msra.mxu1 %v1717_v15  ;;  %v1722_v4 = vmax.f32 %v1687_v27, 0.0 }
 0x230   :  { %5438 = vmatmul.mubr.msk.f32.vlgmr.msra.gmra.mxu1 %vm1767_vm9, %v6831_v14  ;;  %v1716_v3 = vmax.f32 %v1681_v17, 0.0  ;;  %v1680_v22 = vadd.f32 %v6804_v36, %v1615_v54 }
 0x231   :  { %1994 = vmatpush1.msra.mxu0 %v1722_v4  ;;  %5440 = vmatprep.mubr.msk.f32.mxu1 %vm5680_vm1, %v8343_v9 }
 0x232   :  { %1995 = vmatprep.subr.mxu0 %v1716_v3  ;;  %v1715_v16 = vmax.f32 %v1680_v22, 0.0 }
 0x234   :  { %1996 = vmatpush1.msra.mxu0 %v1715_v16  ;;  %5441 = vmatmul.mubr.msk.f32.gmra.mxu1 %vm1767_vm9, %v6854_v40 }
 0x235   :  { %5103 = vmatmul.mubr.msk.f32.vlgmr.msra.gmra.mxu0 %vm1767_vm9, %v6831_v14  ;;  %5443 = vmatprep.mubr.msk.f32.mxu1 %vm5680_vm1, %v8343_v9 }
 0x236   :  { %2035 = vmatprep.mubr.f32.mxu0 %v8343_v9 }
 0x238   :  { %5444 = vmatmul.mubr.msk.f32.gmra.mxu1 %vm1767_vm9, %v6885_v19 }
 0x239   :  { %5104 = vmatmul.mubr.msk.f32.gmra.mxu0 %vm1767_vm9, %v6854_v40  ;;  %2392 = vmatprep.mubr.f32.mxu1 %v8343_v9 }
 0x23a   :  { %2041 = vmatprep.mubr.f32.mxu0 %v8343_v9 }
 0x23d   :  { %5105 = vmatmul.mubr.msk.f32.gmra.mxu0 %vm1767_vm9, %v6885_v19 }
 0x23e   :  { %2250 = vmatprep.mubr.f32.mxu0 %v8343_v9 }
 0x2d9   :  { %v1865_v26 = vpop.f32.mrf.mxu0 }
 0x2da   :  { %v1866_v59 = vadd.f32 %v1865_v26, %v6981_v56 }
 0x2db   :  { %v1948_v36 = vpop.f32.mrf.mxu1  ;;  %v1867_v14 = vpop.f32.mrf.mxu0 }
 0x2dc   :  { %v1868_v33 = vadd.f32 %v1867_v14, %v6981_v56  ;;  %v2128_v62 = vmax.f32 %v1866_v59, 0.0  ;;  %v1949_v2 = vadd.f32 %v1948_v36, %v6981_v56 }
 0x2dd   :  { %v1950_v60 = vpop.f32.mrf.mxu1  ;;  %v1871_v34 = vpop.f32.mrf.mxu0 }
 0x2de   :  { %v1872_v61 = vadd.f32 %v1871_v34, %v6976_v20  ;;  %v2129_v29 = vmax.f32 %v1868_v33, 0.0  ;;  %v1951_v49 = vadd.f32 %v1950_v60, %v6981_v56  ;;  %v2130_v27 = vmax.f32 %v1949_v2, 0.0  ;;  %v2702_v2 = vld [vmem:[%s8235_s3 + $0x8] sm:$0xff] }
 0x2df   :  { %v1954_v39 = vpop.f32.mrf.mxu1  ;;  %v1873_v47 = vpop.f32.mrf.mxu0 }
 0x2e0   :  { %v1874_v19 = vadd.f32 %v1873_v47, %v6976_v20  ;;  %v2135_v1 = vmax.f32 %v1872_v61, 0.0  ;;  %v1955_v28 = vadd.f32 %v1954_v39, %v6976_v20  ;;  %v2131_v0 = vmax.f32 %v1951_v49, 0.0  ;;  %v5135_v61 = vld [vmem:[%s8232_s1 + $0x48] sm:$0xff]  ;;  %v2701_v49 = vld [vmem:[%s8235_s3] sm:$0xff] }
 0x2e1   :  { %v1956_v42 = vpop.f32.mrf.mxu1  ;;  %v1877_v40 = vpop.f32.mrf.mxu0 }
 0x2e2   :  { %v1878_v32 = vadd.f32 %v1877_v40, %v6974_v21  ;;  %v2136_v13 = vmax.f32 %v1874_v19, 0.0  ;;  %v1957_v6 = vadd.f32 %v1956_v42, %v6976_v20  ;;  %v2137_v8 = vmax.f32 %v1955_v28, 0.0  ;;  %v5131_v28 = vld [vmem:[%s8232_s1 + $0x28] sm:$0xff] }
 0x2e3   :  { %v1960_v43 = vpop.f32.mrf.mxu1  ;;  %v1879_v44 = vpop.f32.mrf.mxu0 }
 0x2e4   :  { %v1880_v11 = vadd.f32 %v1879_v44, %v6974_v21  ;;  %v2142_v45 = vmax.f32 %v1878_v32, 0.0  ;;  %v1961_v53 = vadd.f32 %v1960_v43, %v6974_v21  ;;  %v2138_v12 = vmax.f32 %v1957_v6, 0.0  ;;  %v5132_v6 = vld [vmem:[%s8232_s1 + $0x30] sm:$0xff] }
 0x2e5   :  { %v1962_v50 = vpop.f32.mrf.mxu1 }
 0x2e6   :  { %v2143_v7 = vmax.f32 %v1880_v11, 0.0  ;;  %v1963_v48 = vadd.f32 %v1962_v50, %v6974_v21  ;;  %v2144_v63 = vmax.f32 %v1961_v53, 0.0  ;;  %v5133_v53 = vld [vmem:[%s8232_s1 + $0x38] sm:$0xff] }
 0x2e8   :  { %5110 = vmatprep.subr.msk.mxu0 %vm2164_vm10, %v2143_v7  ;;  %v2145_v51 = vmax.f32 %v1963_v48, 0.0 }
 0x2e9   :  { %5111 = vmatpush1.msk.msra.mxu0 %vm2164_vm10, %v2142_v45 }
 0x2ea   :  { %2214 = vmatprep.subr.mxu0 %v2136_v13 }
 0x2eb   :  { %2215 = vmatpush1.msra.mxu0 %v2135_v1  ;;  %v5130_v1 = vld [vmem:[%s8231_s0 + $0x28] sm:$0xf] }
 0x2ec   :  { %2216 = vmatprep.subr.mxu0 %v2129_v29  ;;  %v5129_v29 = vld [vmem:[%s8231_s0 + $0x20] sm:$0xff] }
 0x2ed   :  { %2217 = vmatpush1.msra.mxu0 %v2128_v62  ;;  %v5128_v62 = vld [vmem:[%s8231_s0 + $0x18] sm:$0xff] }
 0x2ee   :  { %5112 = vmatmul.mubr.msk.f32.vlgmr.msra.gmra.mxu0 %vm2160_vm11, %v6995_v52  ;;  %5113 = vmatprep.subr.msk.mxu0 %vm2164_vm10, %v2145_v51  ;;  %v2583_v51 = vld [vmem:[%s8234_s2 + $0x8] sm:$0xff] }
 0x2ef   :  { %5114 = vmatpush1.msk.msra.mxu0 %vm2164_vm10, %v2144_v63  ;;  %2321 = vmatprep.mubr.f32.mxu0 %v8343_v9  ;;  %v2584_v63 = vld [vmem:[%s8234_s2 + $0x10] sm:$0xff] }
 0x2f0   :  { %v2114_v15 = vpop.f32.mrf.mxu1  ;;  %2285 = vmatprep.subr.mxu0 %v2138_v12  ;;  %v2703_v12 = vld [vmem:[%s8235_s3 + $0x10] sm:$0xff] }
 0x2f1   :  { %2286 = vmatpush1.msra.mxu0 %v2137_v8  ;;  %v2115_v34 = vadd.f32 %v2114_v15, %v6981_v56  ;;  %v2585_v8 = vld [vmem:[%s8234_s2 + $0x18] sm:$0xff]  ;;  %v2586_v15 = vld [vmem:[%s8234_s2 + $0x20] sm:$0x1f] }
 0x2f2   :  { %v5439_v17 = vpop.f32.mrf.mxu1  ;;  %2287 = vmatprep.subr.mxu0 %v2131_v0  ;;  %v2704_v0 = vld [vmem:[%s8235_s3 + $0x18] sm:$0xff] }
 0x2f3   :  { %2288 = vmatpush1.msra.mxu0 %v2130_v27  ;;  %v2134_v32 = vmax.f32 %v2115_v34, 0.0  ;;  %v2705_v27 = vld [vmem:[%s8235_s3 + $0x20] sm:$0x1f]  ;;  %v2841_v17 = vld [vmem:[%s8233_s10 + $0x78] sm:$0xf] }
 0x2f4   :  { %v2119_v54 = vpop.f32.mrf.mxu1  ;;  %5115 = vmatmul.mubr.msk.f32.vlgmr.msra.gmra.mxu0 %vm2160_vm11, %v6995_v52  ;;  %5446 = vmatprep.subr.mxu0 %v8343_v9  ;;  %v2826_v34 = vld [vmem:[%s8233_s10] sm:$0xff] }
 0x2f5   :  { %v2031_v4 = vpop.f32.mrf.mxu0  ;;  %5452 = vmatprep.mubr.msk.f32.mxu0 %vm5680_vm1, %v8343_v9  ;;  %v2120_v26 = vadd.f32 %v2119_v54, %v6976_v20  ;;  %v2840_v54 = vld [vmem:[%s8233_s10 + $0x70] sm:$0xf] }
 0x2f6   :  { %v5442_v3 = vpop.f32.mrf.mxu1  ;;  %v2032_v59 = vadd.f32 %v2031_v4, %v6981_v56  ;;  %v2843_v4 = vld [vmem:[%s8233_s10 + $0x88] sm:$0xf] }
 0x2f7   :  { %v2033_v22 = vpop.f32.mrf.mxu0  ;;  %v2141_v42 = vmax.f32 %v2120_v26, 0.0  ;;  %v2842_v3 = vld [vmem:[%s8233_s10 + $0x80] sm:$0xf]  ;;  %v2833_v26 = vld [vmem:[%s8233_s10 + $0x38] sm:$0xff] }
 0x2f8   :  { %v2124_v16 = vpop.f32.mrf.mxu1  ;;  %v2034_v33 = vadd.f32 %v2033_v22, %v6981_v56  ;;  %v2132_v56 = vmax.f32 %v2032_v59, 0.0  ;;  %v2834_v22 = vld [vmem:[%s8233_s10 + $0x40] sm:$0xff] }
 0x2f9   :  { %v2037_v36 = vpop.f32.mrf.mxu0  ;;  %v2125_v14 = vadd.f32 %v2124_v16, %v6974_v21  ;;  %v2836_v16 = vld [vmem:[%s8233_s10 + $0x50] sm:$0xff] }
 0x2fa   :  { %v5445_v60 = vpop.f32.mrf.mxu1  ;;  %v2038_v50 = vadd.f32 %v2037_v36, %v6976_v20  ;;  %v2133_v48 = vmax.f32 %v2034_v33, 0.0  ;;  %v2835_v36 = vld [vmem:[%s8233_s10 + $0x48] sm:$0xff] }
 0x2fb   :  { %v2148_v39 = vmax.f32 %v2125_v14, 0.0  ;;  %v2039_v47 = vpop.f32.mrf.mxu0  ;;  %v2827_v14 = vld [vmem:[%s8233_s10 + $0x8] sm:$0xff]  ;;  %v2829_v60 = vld [vmem:[%s8233_s10 + $0x18] sm:$0xff] }
 0x2fc   :  { %v2040_v19 = vadd.f32 %v2039_v47, %v6976_v20  ;;  %v5134_v20 = vld [vmem:[%s8232_s1 + $0x40] sm:$0xff]  ;;  %v2139_v13 = vmax.f32 %v2038_v50, 0.0  ;;  %v2845_v47 = vld [vmem:[%s8233_s10 + $0x98] sm:$0xf] }
 0x2fd   :  { %v2043_v40 = vpop.f32.mrf.mxu0  ;;  %5447 = vmatpush3.msk.msra.mxu0 %vm2164_vm10, %v2148_v39  ;;  %v2828_v39 = vld [vmem:[%s8233_s10 + $0x10] sm:$0xff] }
 0x2fe   :  { %5448 = vmatprep.subr.mxu0 %v8343_v9  ;;  %v2044_v43 = vadd.f32 %v2043_v40, %v6974_v21  ;;  %v2140_v45 = vmax.f32 %v2040_v19, 0.0  ;;  %v8358_v50 = vld [vmem:[#allocation9_spill] sm:$0xff] }
 0x2ff   :  { %v2045_v44 = vpop.f32.mrf.mxu0  ;;  %5449 = vmatpush3.msra.mxu0 %v2141_v42  ;;  %v7174_v42 = vpop.permute.xlu1 %4130  ;;  %v8258_v33 = vsub.s32 0, %v8358_v50 }
 0x300   :  { %v2046_v11 = vadd.f32 %v2045_v44, %v6974_v21  ;;  %5450 = vmatprep.subr.mxu0 %v8343_v9  ;;  %v2146_v21 = vmax.f32 %v2044_v43, 0.0 }
 0x301   :  { %5451 = vmatpush3.msra.mxu0 %v2134_v32 }
 0x302   :  { %v2147_v7 = vmax.f32 %v2046_v11, 0.0  ;;  %5453 = vmatmul.mubr.msk.f32.vlgmr.msra.gmra.mxu0 %vm2160_vm11, %v6995_v52  ;;  %5476 = vmatprep.subr.mxu0 %v8343_v9 }
 0x303   :  { %5477 = vmatpush3.xpose.msk.msra.mxu0 %vm61_vm0, %v5135_v61  ;;  %5486 = vmatprep.mubr.msk.f32.mxu0 %vm5680_vm1, %v8343_v9  ;;  %v7176_v40 = vpop.permute.xlu1 %4120 }
 0x304   :  { %5116 = vmatprep.subr.msk.mxu1 %vm2164_vm10, %v2147_v7  ;;  %5478 = vmatprep.subr.mxu0 %v8343_v9  ;;  %8355 = vst [vmem:[#allocation19_spill] sm:$0xff] %v7176_v40 }
 0x305   :  { %5117 = vmatpush1.msk.msra.mxu1 %vm2164_vm10, %v2146_v21 }
 0x306   :  { %2356 = vmatprep.subr.mxu1 %v2140_v45 }
 0x307   :  { %2357 = vmatpush1.msra.mxu1 %v2139_v13  ;;  %5479 = vmatpush3.xpose.msk.msra.mxu0 %vm61_vm0, %v5134_v20  ;;  %v7178_v32 = vpop.permute.xlu1 %4110 }
 0x308   :  { %2358 = vmatprep.subr.mxu1 %v2133_v48  ;;  %5480 = vmatprep.subr.mxu0 %v8343_v9  ;;  %8356 = vst [vmem:[#allocation16_spill] sm:$0xff] %v7178_v32 }
 0x309   :  { %2359 = vmatpush1.msra.mxu1 %v2132_v56 }
 0x30a   :  { %5118 = vmatmul.mubr.msk.f32.vlgmr.msra.gmra.mxu1 %vm2160_vm11, %v6995_v52  ;;  %5455 = vmatprep.subr.mxu1 %v8343_v9  ;;  %v2582_v52 = vld [vmem:[%s8234_s2] sm:$0xff] }
 0x30b   :  { %5456 = vmatpush3.xpose.msk.msra.mxu1 %vm61_vm0, %v5130_v1  ;;  %5461 = vmatprep.mubr.msk.f32.mxu1 %vm5680_vm1, %v8343_v9  ;;  %v7180_v44 = vpop.permute.xlu1 %4216 }
 0x30c   :  { %5457 = vmatprep.subr.mxu1 %v8343_v9  ;;  %5481 = vmatpush3.xpose.msk.msra.mxu0 %vm61_vm0, %v5133_v53  ;;  %8357 = vst [vmem:[#allocation17_spill] sm:$0xff] %v7180_v44 }
 0x30d   :  { %5482 = vmatprep.subr.mxu0 %v8343_v9 }
 0x30f   :  { %5458 = vmatpush3.xpose.msk.msra.mxu1 %vm61_vm0, %v5129_v29  ;;  %v2154_v61 = vpop.permute.xlu1 %2153 }
 0x310   :  { %5459 = vmatprep.subr.mxu1 %v8343_v9  ;;  %5483 = vmatpush3.xpose.msk.msra.mxu0 %vm61_vm0, %v5132_v6  ;;  %v2159_v59 = vrot.slane %v2154_v61, %v8258_v33  ;;  %v2831_v61 = vld [vmem:[%s8233_s10 + $0x28] sm:$0xff] }
 0x311   :  { %5484 = vmatprep.subr.mxu0 %v8343_v9 }
 0x313   :  { %5460 = vmatpush3.xpose.msk.msra.mxu1 %vm61_vm0, %v5128_v62 }
 0x314   :  { %5485 = vmatpush3.xpose.msk.msra.mxu0 %vm61_vm0, %v5131_v28  ;;  %5154 = vmatprep.subr.msk.mxu1 %vm338_vm2, %v2841_v17 }
 0x315   :  { %5161 = vmatprep.subr.msk.mxu0 %vm338_vm2, %v2843_v4 }
 0x316   :  { %5462 = vmatmul.mubr.msk.f32.vlgmr.msra.gmra.mxu1 %vm61_vm0, %v2582_v52 }
 0x317   :  { %5464 = vmatprep.mubr.msk.f32.mxu1 %vm5680_vm1, %v8343_v9  ;;  %5487 = vmatmul.mubr.msk.f32.vlgmr.msra.gmra.mxu0 %vm61_vm0, %v2701_v49 }
 0x318   :  { %5489 = vmatprep.mubr.msk.f32.mxu0 %vm5680_vm1, %v8343_v9  ;;  %5155 = vmatpush1.msk.msra.mxu1 %vm338_vm2, %v2840_v54 }
 0x319   :  { %5162 = vmatpush1.msk.msra.mxu0 %vm338_vm2, %v2842_v3  ;;  %2911 = vmatprep.subr.mxu1 %v2834_v22  ;;  %v2844_v3 = vld [vmem:[%s8233_s10 + $0x90] sm:$0xf]  ;;  %v2846_v22 = vld [vmem:[%s8233_s10 + $0xa0] sm:$0xf] }
 0x31a   :  { %5465 = vmatmul.mubr.msk.f32.gmra.mxu1 %vm61_vm0, %v2583_v51  ;;  %3006 = vmatprep.subr.mxu0 %v2836_v16 }
 0x31b   :  { %5467 = vmatprep.mubr.msk.f32.mxu1 %vm5680_vm1, %v8343_v9  ;;  %5490 = vmatmul.mubr.msk.f32.gmra.mxu0 %vm61_vm0, %v2702_v2 }
 0x31c   :  { %5492 = vmatprep.mubr.msk.f32.mxu0 %vm5680_vm1, %v8343_v9  ;;  %2912 = vmatpush1.msra.mxu1 %v2833_v26  ;;  %v2838_v26 = vld [vmem:[%s8233_s10 + $0x60] sm:$0xff] }
 0x31d   :  { %3007 = vmatpush1.msra.mxu0 %v2835_v36  ;;  %2913 = vmatprep.subr.mxu1 %v2827_v14 }
 0x31e   :  { %5468 = vmatmul.mubr.msk.f32.gmra.mxu1 %vm61_vm0, %v2584_v63  ;;  %3008 = vmatprep.subr.mxu0 %v2829_v60 }
 0x31f   :  { %5470 = vmatprep.mubr.msk.f32.mxu1 %vm5680_vm1, %v8343_v9  ;;  %5493 = vmatmul.mubr.msk.f32.gmra.mxu0 %vm61_vm0, %v2703_v12 }
 0x320   :  { %5495 = vmatprep.mubr.msk.f32.mxu0 %vm5680_vm1, %v8343_v9  ;;  %2914 = vmatpush1.msra.mxu1 %v2826_v34 }
 0x321   :  { %3009 = vmatpush1.msra.mxu0 %v2828_v39  ;;  %5168 = vmatprep.subr.msk.mxu1 %vm338_vm2, %v2845_v47 }
 0x322   :  { %5471 = vmatmul.mubr.msk.f32.gmra.mxu1 %vm61_vm0, %v2585_v8  ;;  %5501 = vmatprep.subr.mxu0 %v8343_v9 }
 0x323   :  { %5473 = vmatprep.mubr.msk.f32.mxu1 %vm5680_vm1, %v8343_v9  ;;  %5496 = vmatmul.mubr.msk.f32.gmra.mxu0 %vm61_vm0, %v2704_v0 }
 0x324   :  { %5498 = vmatprep.mubr.msk.f32.mxu0 %vm5680_vm1, %v8343_v9 }
 0x326   :  { %5474 = vmatmul.mubr.msk.f32.gmra.mxu1 %vm61_vm0, %v2586_v15 }
 0x327   :  { %5499 = vmatmul.mubr.msk.f32.gmra.mxu0 %vm61_vm0, %v2705_v27  ;;  %2947 = vmatprep.mubr.f32.mxu1 %v8343_v9 }
 0x328   :  { %3042 = vmatprep.mubr.f32.mxu0 %v8343_v9 }
 0x3ae   :  { %v2252_v43 = vpop.f32.mrf.mxu0 }
 0x3af   :  { %v2253_v13 = vadd.f32 %v2252_v43, %v2159_v59  ;;  %v2837_v43 = vld [vmem:[%s8233_s10 + $0x58] sm:$0xff] }
 0x3b0   :  { %v2254_v19 = vpop.f32.mrf.mxu0 }
 0x3b1   :  { %v2255_v45 = vadd.f32 %v2254_v19, %v2159_v59  ;;  %v5121_v62 = vmul.f32 -1.442695, %v2253_v13  ;;  %v2839_v19 = vld [vmem:[%s8233_s10 + $0x68] sm:$0xff] }
 0x3b3   :  { %v5122_v56 = vmul.f32 -1.442695, %v2255_v45 }
 0x3b4   :  { %v2323_v11 = vpop.f32.mrf.mxu0 }
 0x3b5   :  { %v2324_v20 = vadd.f32 %v2323_v11, %v2159_v59 }
 0x3b6   :  { %v2325_v7 = vpop.f32.mrf.mxu0 }
 0x3b7   :  { %v2326_v21 = vadd.f32 %v2325_v7, %v2159_v59  ;;  %v5123_v53 = vmul.f32 -1.442695, %v2324_v20 }
 0x3b9   :  { %v5124_v48 = vmul.f32 -1.442695, %v2326_v21 }
 0x3bb   :  { %5609 = vpow2.f32 %v5124_v48 }
 0x3bc   :  { %5611 = vpow2.f32 %v5122_v56  ;;  %v2830_v56 = vld [vmem:[%s8233_s10 + $0x20] sm:$0xff] }
 0x3bd   :  { %5613 = vpow2.f32 %v5123_v53 }
 0x3be   :  { %5615 = vpow2.f32 %v5121_v62 }
 0x3c2   :  { %v2465_v1 = vpop.f32.mrf.mxu0 }
 0x3c3   :  { %v2466_v29 = vadd.f32 %v2465_v1, %v2159_v59  ;;  %v2832_v1 = vld [vmem:[%s8233_s10 + $0x30] sm:$0xff] }
 0x3c4   :  { %v5454_v6 = vpop.f32.mrf.mxu0 }
 0x3c5   :  { %v5127_v28 = vmul.f32 -1.442695, %v2466_v29  ;;  %v3287_v29 = vld [vmem:[%s8240_s11 + $0xe8] sm:$0xff]  ;;  %v3289_v6 = vld [vmem:[%s8240_s11 + $0xf8] sm:$0xff] }
 0x3c7   :  { %5617 = vpow2.f32 %v5127_v28 }
 0x3c8   :  { %v5610_v8 = vpop.eup %5609 }
 0x3c9   :  { %v5612_v0 = vpop.eup %5611  ;;  %v2493_v27 = vadd.f32 1.0, %v5610_v8 }
 0x3ca   :  { %v2394_v52 = vpop.f32.mrf.mxu1  ;;  %v5614_v15 = vpop.eup %5613  ;;  %v2491_v54 = vadd.f32 1.0, %v5612_v0 }
 0x3cb   :  { %v2395_v49 = vadd.f32 %v2394_v52, %v2159_v59  ;;  %v5616_v17 = vpop.eup %5615  ;;  %v2492_v16 = vadd.f32 1.0, %v5614_v15 }
 0x3cc   :  { %v2396_v51 = vpop.f32.mrf.mxu1  ;;  %v2490_v34 = vadd.f32 1.0, %v5616_v17 }
 0x3cd   :  { %v5125_v2 = vmul.f32 -1.442695, %v2395_v49  ;;  %v2397_v63 = vadd.f32 %v2396_v51, %v2159_v59  ;;  %v5684_v51 = vmov 1966171168  }
 0x3cf   :  { %5619 = vpow2.f32 %v5125_v2  ;;  %v5126_v12 = vmul.f32 -1.442695, %v2397_v63  ;;  %v2522_v2 = vunpack.c.l.s4 %v5684_v51 }
 0x3d1   :  { %5621 = vpow2.f32 %v5126_v12  ;;  %v2523_v17 = vunpack.c.0.s8 %v2522_v2  ;;  %v3266_v2 = vld [vmem:[%s8240_s11 + $0x40] sm:$0xff] }
 0x3d2   :  { %5623 = vrcp.f32 %v2493_v27 }
 0x3d3   :  { %5625 = vrcp.f32 %v2491_v54 }
 0x3d4   :  { %v5618_v14 = vpop.eup %5617  ;;  %5627 = vrcp.f32 %v2492_v16 }
 0x3d5   :  { %v2496_v11 = vadd.f32 1.0, %v5618_v14  ;;  %5629 = vrcp.f32 %v2490_v34  ;;  %v3288_v34 = vld [vmem:[%s8240_s11 + $0xf0] sm:$0xff] }
 0x3d6   :  { %v7185_v4 = vpop.f32.mrf.mxu1 }
 0x3d7   :  { %5156 = vmatmul.mubr.msk.f32.vlgmr.msra.gmra.mxu1 %vm322_vm3, %v7185_v4  ;;  %5163 = vmatmul.mubr.msk.f32.vlgmr.msra.gmra.mxu0 %vm322_vm3, %v7185_v4  ;;  %v7200_v36 = vpop.f32.mrf.mxu0  ;;  %5631 = vrcp.f32 %v2496_v11  ;;  %v3282_v11 = vld [vmem:[%s8240_s11 + $0xc0] sm:$0xff] }
 0x3d8   :  { %v5463_v60 = vpop.f32.mrf.mxu1  ;;  %2953 = vmatprep.mubr.f32.mxu1 %v8343_v9  ;;  %3048 = vmatprep.mubr.f32.mxu0 %v8343_v9 }
 0x3d9   :  { %5169 = vmatpush1.msk.msra.mxu1 %vm338_vm2, %v2844_v3  ;;  %5502 = vmatpush3.msk.msra.mxu0 %vm338_vm2, %v2846_v22  ;;  %v5488_v39 = vpop.f32.mrf.mxu0  ;;  %v3286_v60 = vld [vmem:[%s8240_s11 + $0xe0] sm:$0xff] }
 0x3da   :  { %v7206_v47 = vpop.f32.mrf.mxu1  ;;  %3101 = vmatprep.subr.mxu1 %v2838_v26  ;;  %5503 = vmatprep.subr.mxu0 %v8343_v9 }
 0x3db   :  { %5157 = vmatmul.mubr.msk.f32.gmra.mxu1 %vm322_vm3, %v7206_v47  ;;  %5164 = vmatmul.mubr.msk.f32.gmra.mxu0 %vm322_vm3, %v7206_v47  ;;  %v7222_v7 = vpop.f32.mrf.mxu0 }
 0x3dc   :  { %v5620_v59 = vpop.eup %5619  ;;  %v5466_v21 = vpop.f32.mrf.mxu1  ;;  %2959 = vmatprep.mubr.f32.mxu1 %v8343_v9  ;;  %3054 = vmatprep.mubr.f32.mxu0 %v8343_v9 }
 0x3dd   :  { %v2494_v45 = vadd.f32 1.0, %v5620_v59  ;;  %3102 = vmatpush1.msra.mxu1 %v2837_v43  ;;  %5504 = vmatpush3.msra.mxu0 %v2839_v19  ;;  %v5491_v20 = vpop.f32.mrf.mxu0  ;;  %v7277_v43 = vsub.s32 %v2523_v17, %v8358_v50  ;;  %v3280_v19 = vld [vmem:[%s8240_s11 + $0xb0] sm:$0xff]  ;;  %v3265_v17 = vld [vmem:[%s8240_s11 + $0x38] sm:$0xff] }
 0x3de   :  { %v5622_v13 = vpop.eup %5621  ;;  %v7226_v48 = vpop.f32.mrf.mxu1  ;;  %3103 = vmatprep.subr.mxu1 %v2831_v61  ;;  %5505 = vmatprep.subr.mxu0 %v8343_v9  ;;  %v3281_v20 = vld [vmem:[%s8240_s11 + $0xb8] sm:$0xff] }
 0x3df   :  { %v2495_v53 = vadd.f32 1.0, %v5622_v13  ;;  %5158 = vmatmul.mubr.msk.f32.gmra.mxu1 %vm322_vm3, %v7226_v48  ;;  %5165 = vmatmul.mubr.msk.f32.gmra.mxu0 %vm322_vm3, %v7226_v48  ;;  %v7245_v62 = vpop.f32.mrf.mxu0  ;;  %5633 = vrcp.f32 %v2494_v45  ;;  %v5624_v0 = vpop.eup %5623  ;;  %8359 = vst [vmem:[#allocation14_spill] sm:$0xff] %v7277_v43  ;;  %v3279_v45 = vld [vmem:[%s8240_s11 + $0xa8] sm:$0xff] }
 0x3e0   :  { %v5469_v28 = vpop.f32.mrf.mxu1  ;;  %2965 = vmatprep.mubr.f32.mxu1 %v8343_v9  ;;  %3060 = vmatprep.mubr.f32.mxu0 %v8343_v9  ;;  %v5626_v27 = vpop.eup %5625 }
 0x3e1   :  { %5635 = vrcp.f32 %v2495_v53  ;;  %3104 = vmatpush1.msra.mxu1 %v2830_v56  ;;  %5506 = vmatpush3.msra.mxu0 %v2832_v1  ;;  %v5494_v52 = vpop.f32.mrf.mxu0  ;;  %v5628_v3 = vpop.eup %5627  ;;  %v3273_v1 = vld [vmem:[%s8240_s11 + $0x78] sm:$0xff]  ;;  %v3275_v53 = vld [vmem:[%s8240_s11 + $0x88] sm:$0xff] }
 0x3e2   :  { %v7249_v49 = vpop.f32.mrf.mxu1  ;;  %3330 = vmatprep.subr.mxu1 %v3287_v29  ;;  %3425 = vmatprep.subr.mxu0 %v3289_v6  ;;  %v2519_v16 = vcombine.low %v5628_v3, %v5624_v0  ;;  %v5630_v14 = vpop.eup %5629  ;;  %v3274_v52 = vld [vmem:[%s8240_s11 + $0x80] sm:$0xff]  ;;  %v3267_v3 = vld [vmem:[%s8240_s11 + $0x48] sm:$0xff] }
 0x3e3   :  { %5159 = vmatmul.mubr.msk.f32.gmra.mxu1 %vm322_vm3, %v7249_v49  ;;  %5166 = vmatmul.mubr.msk.f32.gmra.mxu0 %vm322_vm3, %v7249_v49  ;;  %v7255_v63 = vpop.f32.mrf.mxu0  ;;  %v2518_v39 = vcombine.low %v5630_v14, %v5626_v27  ;;  %v8361_v27 = vmov 0  ;;  %v3260_v14 = vld [vmem:[%s8240_s11 + $0x10] sm:$0xff] }
 0x3e4   :  { %v5472_v12 = vpop.f32.mrf.mxu1  ;;  %2971 = vmatprep.mubr.f32.mxu1 %v8343_v9  ;;  %3066 = vmatprep.mubr.f32.mxu0 %v8343_v9  ;;  %v5632_v61 = vpop.eup %5631  ;;  %v2534_v21 = vrot.slane %v2519_v16, %v7277_v43  ;;  %v3259_v16 = vld [vmem:[%s8240_s11 + $0x8] sm:$0xff] }
 0x3e5   :  { %v5497_v8 = vpop.f32.mrf.mxu0  ;;  %v2527_v13 = vrot.slane %v2518_v39, %v7277_v43  ;;  %v2548_v6 = vrot.slane %v5632_v61, %v7277_v43  ;;  %v3268_v12 = vld [vmem:[%s8240_s11 + $0x50] sm:$0xff]  ;;  %v3277_v61 = vld [vmem:[%s8240_s11 + $0x98] sm:$0xff] }
 0x3e6   :  { %v7259_v15 = vpop.f32.mrf.mxu1  ;;  %v3284_v39 = vld [vmem:[%s8240_s11 + $0xd0] sm:$0xff] }
 0x3e7   :  { %5160 = vmatmul.mubr.msk.f32.gmra.mxu1 %vm322_vm3, %v7259_v15  ;;  %5167 = vmatmul.mubr.msk.f32.gmra.mxu0 %vm322_vm3, %v7259_v15  ;;  %v7265_v54 = vpop.f32.mrf.mxu0  ;;  %v2549_v29 = vcombine.low %v2527_v13, %v2534_v21  ;;  %v3278_v21 = vld [vmem:[%s8240_s11 + $0xa0] sm:$0xff]  ;;  %v3263_v13 = vld [vmem:[%s8240_s11 + $0x28] sm:$0xff] }
 0x3e8   :  { %v5475_v22 = vpop.f32.mrf.mxu1  ;;  %3137 = vmatprep.mubr.f32.mxu1 %v8343_v9  ;;  %5507 = vmatprep.mubr.msk.f32.mxu0 %vm5680_vm1, %v8343_v9 }
 0x3e9   :  { %v5500_v26 = vpop.f32.mrf.mxu0  ;;  %v2557_v8 = vrot.slane %v2549_v29, %v7277_v43 }
 0x3ea   :  { %v3261_v26 = vld [vmem:[%s8240_s11 + $0x18] sm:$0xff] }
 0x3eb   :  { %5170 = vmatmul.mubr.msk.f32.vlgmr.msra.gmra.mxu1 %vm322_vm3, %v7185_v4  ;;  %5508 = vmatmul.mubr.msk.f32.vlgmr.msra.gmra.mxu0 %vm322_vm3, %v7185_v4 }
 0x3ec   :  { %3143 = vmatprep.mubr.f32.mxu1 %v8343_v9  ;;  %5510 = vmatprep.mubr.msk.f32.mxu0 %vm5680_vm1, %v8343_v9  ;;  %v5634_v59 = vpop.eup %5633 }
 0x3ed   :  { %3331 = vmatpush1.msra.mxu1 %v3286_v60  ;;  %3426 = vmatpush1.msra.mxu0 %v3288_v34  ;;  %v3291_v60 = vld [vmem:[%s8240_s11 + $0x108] sm:$0xff]  ;;  %v3290_v34 = vld [vmem:[%s8240_s11 + $0x100] sm:$0xff] }
 0x3ee   :  { %v5636_v4 = vpop.eup %5635  ;;  %3332 = vmatprep.subr.mxu1 %v3280_v19  ;;  %3427 = vmatprep.subr.mxu0 %v3282_v11  ;;  %v3283_v19 = vld [vmem:[%s8240_s11 + $0xc8] sm:$0xff]  ;;  %v3285_v11 = vld [vmem:[%s8240_s11 + $0xd8] sm:$0xff] }
 0x3ef   :  { %v2520_v56 = vcombine.low %v5634_v59, %v5636_v4  ;;  %5171 = vmatmul.mubr.msk.f32.gmra.mxu1 %vm322_vm3, %v7206_v47  ;;  %5511 = vmatmul.mubr.msk.f32.gmra.mxu0 %vm322_vm3, %v7206_v47  ;;  %v3272_v47 = vld [vmem:[%s8240_s11 + $0x70] sm:$0xff]  ;;  %v3270_v4 = vld [vmem:[%s8240_s11 + $0x60] sm:$0xff] }
 0x3f0   :  { %3149 = vmatprep.mubr.f32.mxu1 %v8343_v9  ;;  %5513 = vmatprep.mubr.msk.f32.mxu0 %vm5680_vm1, %v8343_v9  ;;  %v3276_v59 = vld [vmem:[%s8240_s11 + $0x90] sm:$0xff] }
 0x3f1   :  { %v2541_v28 = vrot.slane %v2520_v56, %v7277_v43  ;;  %3333 = vmatpush1.msra.mxu1 %v3279_v45  ;;  %3428 = vmatpush1.msra.mxu0 %v3281_v20  ;;  %v3269_v45 = vld [vmem:[%s8240_s11 + $0x58] sm:$0xff]  ;;  %v3271_v20 = vld [vmem:[%s8240_s11 + $0x68] sm:$0xff]  ;;  %v3262_v56 = vld [vmem:[%s8240_s11 + $0x20] sm:$0xff] }
 0x3f2   :  { %3334 = vmatprep.subr.mxu1 %v3273_v1  ;;  %3429 = vmatprep.subr.mxu0 %v3275_v53  ;;  %v3264_v1 = vld [vmem:[%s8240_s11 + $0x30] sm:$0xff] }
 0x3f3   :  { %v2550_v51 = vcombine.low %v2541_v28, %v2548_v6  ;;  %5172 = vmatmul.mubr.msk.f32.gmra.mxu1 %vm322_vm3, %v7226_v48  ;;  %5514 = vmatmul.mubr.msk.f32.gmra.mxu0 %vm322_vm3, %v7226_v48  ;;  %v8360_v48 = vlaneseq }
 0x3f4   :  { %3155 = vmatprep.mubr.f32.mxu1 %v8343_v9  ;;  %5516 = vmatprep.mubr.msk.f32.mxu0 %vm5680_vm1, %v8343_v9 }
 0x3f5   :  { %v2564_v0 = vrot.slane %v2550_v51, %v7277_v43  ;;  %3335 = vmatpush1.msra.mxu1 %v3272_v47  ;;  %3430 = vmatpush1.msra.mxu0 %v3274_v52  ;;  %vm7337_vm0 = vcmp.lt.s32.totalorder %v8360_v48, 800 }
 0x3f6   :  { %v8362_v27 = vsel %vm7337_vm0, 4294967295, %v8361_v27  ;;  %3336 = vmatprep.subr.mxu1 %v3266_v2  ;;  %3431 = vmatprep.subr.mxu0 %v3268_v12 }
 0x3f7   :  { %8363 = vst [vmem:[#allocation15_spill] sm:$0xff] %v8362_v27  ;;  %v2565_v22 = vcombine.low %v2557_v8, %v2564_v0  ;;  %5173 = vmatmul.mubr.msk.f32.gmra.mxu1 %vm322_vm3, %v7249_v49  ;;  %5517 = vmatmul.mubr.msk.f32.gmra.mxu0 %vm322_vm3, %v7249_v49  ;;  %v3258_v49 = vld [vmem:[%s8240_s11] sm:$0xff] }
 0x3f8   :  { %3161 = vmatprep.mubr.f32.mxu1 %v8343_v9  ;;  %5519 = vmatprep.mubr.msk.f32.mxu0 %vm5680_vm1, %v8343_v9 }
 0x3f9   :  { %2571 = vst.msk [vmem:[%s8243_s12] ss:$2 sm:$0x7f] %vm7337_vm0, %v2565_v22  ;;  %3337 = vmatpush1.msra.mxu1 %v3265_v17  ;;  %3432 = vmatpush1.msra.mxu0 %v3267_v3 }
 0x3fa   :  { %3338 = vmatprep.subr.mxu1 %v3259_v16  ;;  %3433 = vmatprep.subr.mxu0 %v3261_v26 }
 0x3fb   :  { %5174 = vmatmul.mubr.msk.f32.gmra.mxu1 %vm322_vm3, %v7259_v15  ;;  %5520 = vmatmul.mubr.msk.f32.gmra.mxu0 %vm322_vm3, %v7259_v15  ;;  %v3292_v15 = vld [vmem:[%s8240_s11 + $0x110] sm:$0xff] }
 0x3fc   :  { %3339 = vmatpush1.msra.mxu1 %v3258_v49  ;;  %3372 = vmatprep.mubr.f32.mxu1 %v8343_v9 }
 0x3fd   :  { %3434 = vmatpush1.msra.mxu0 %v3260_v14  ;;  %3467 = vmatprep.mubr.f32.mxu0 %v8343_v9 }
 0x3fe   :  { %3520 = vmatprep.subr.mxu1 %v3291_v60  ;;  %5522 = vmatprep.subr.mxu0 %v8343_v9 }
 0x3ff   :  { %5181 = vmatmul.mubr.msk.f32.vlgmr.msra.gmra.mxu1 %vm770_vm4, %v7200_v36  ;;  %5186 = vmatmul.mubr.msk.f32.vlgmr.msra.gmra.mxu0 %vm770_vm4, %v7200_v36 }
 0x400   :  { %3378 = vmatprep.mubr.f32.mxu1 %v8343_v9  ;;  %3473 = vmatprep.mubr.f32.mxu0 %v8343_v9 }
 0x401   :  { %3521 = vmatpush1.msra.mxu1 %v3290_v34  ;;  %5523 = vmatpush3.msra.mxu0 %v3292_v15 }
 0x402   :  { %3522 = vmatprep.subr.mxu1 %v3284_v39  ;;  %5524 = vmatprep.subr.mxu0 %v8343_v9 }
 0x403   :  { %5182 = vmatmul.mubr.msk.f32.gmra.mxu1 %vm770_vm4, %v7222_v7  ;;  %5187 = vmatmul.mubr.msk.f32.gmra.mxu0 %vm770_vm4, %v7222_v7 }
 0x404   :  { %3384 = vmatprep.mubr.f32.mxu1 %v8343_v9  ;;  %3479 = vmatprep.mubr.f32.mxu0 %v8343_v9 }
 0x405   :  { %3523 = vmatpush1.msra.mxu1 %v3283_v19  ;;  %5525 = vmatpush3.msra.mxu0 %v3285_v11 }
 0x406   :  { %3524 = vmatprep.subr.mxu1 %v3277_v61  ;;  %5526 = vmatprep.subr.mxu0 %v8343_v9 }
 0x407   :  { %5183 = vmatmul.mubr.msk.f32.gmra.mxu1 %vm770_vm4, %v7245_v62  ;;  %5188 = vmatmul.mubr.msk.f32.gmra.mxu0 %vm770_vm4, %v7245_v62 }
 0x408   :  { %3390 = vmatprep.mubr.f32.mxu1 %v8343_v9  ;;  %3485 = vmatprep.mubr.f32.mxu0 %v8343_v9 }
 0x409   :  { %3525 = vmatpush1.msra.mxu1 %v3276_v59  ;;  %5527 = vmatpush3.msra.mxu0 %v3278_v21 }
 0x40a   :  { %3526 = vmatprep.subr.mxu1 %v3270_v4  ;;  %5528 = vmatprep.subr.mxu0 %v8343_v9 }
 0x40b   :  { %5184 = vmatmul.mubr.msk.f32.gmra.mxu1 %vm770_vm4, %v7255_v63  ;;  %5189 = vmatmul.mubr.msk.f32.gmra.mxu0 %vm770_vm4, %v7255_v63 }
 0x40c   :  { %3396 = vmatprep.mubr.f32.mxu1 %v8343_v9  ;;  %3491 = vmatprep.mubr.f32.mxu0 %v8343_v9 }
 0x40d   :  { %3527 = vmatpush1.msra.mxu1 %v3269_v45  ;;  %5529 = vmatpush3.msra.mxu0 %v3271_v20 }
 0x40e   :  { %3528 = vmatprep.subr.mxu1 %v3263_v13  ;;  %5530 = vmatprep.subr.mxu0 %v8343_v9 }
 0x40f   :  { %5185 = vmatmul.mubr.msk.f32.gmra.mxu1 %vm770_vm4, %v7265_v54  ;;  %5190 = vmatmul.mubr.msk.f32.gmra.mxu0 %vm770_vm4, %v7265_v54 }
 0x410   :  { %3529 = vmatpush1.msra.mxu1 %v3262_v56  ;;  %3562 = vmatprep.mubr.f32.mxu1 %v8343_v9 }
 0x411   :  { %5531 = vmatpush3.msra.mxu0 %v3264_v1  ;;  %5532 = vmatprep.mubr.msk.f32.mxu0 %vm5680_vm1, %v8343_v9 }
 0x413   :  { %5191 = vmatmul.mubr.msk.f32.vlgmr.msra.gmra.mxu1 %vm770_vm4, %v7200_v36  ;;  %5533 = vmatmul.mubr.msk.f32.vlgmr.msra.gmra.mxu0 %vm770_vm4, %v7200_v36 }
 0x414   :  { %3568 = vmatprep.mubr.f32.mxu1 %v8343_v9  ;;  %5535 = vmatprep.mubr.msk.f32.mxu0 %vm5680_vm1, %v8343_v9 }
 0x417   :  { %5192 = vmatmul.mubr.msk.f32.gmra.mxu1 %vm770_vm4, %v7222_v7  ;;  %5536 = vmatmul.mubr.msk.f32.gmra.mxu0 %vm770_vm4, %v7222_v7 }
 0x418   :  { %3574 = vmatprep.mubr.f32.mxu1 %v8343_v9  ;;  %5538 = vmatprep.mubr.msk.f32.mxu0 %vm5680_vm1, %v8343_v9 }
 0x41b   :  { %5193 = vmatmul.mubr.msk.f32.gmra.mxu1 %vm770_vm4, %v7245_v62  ;;  %5539 = vmatmul.mubr.msk.f32.gmra.mxu0 %vm770_vm4, %v7245_v62 }
 0x41c   :  { %3580 = vmatprep.mubr.f32.mxu1 %v8343_v9  ;;  %5541 = vmatprep.mubr.msk.f32.mxu0 %vm5680_vm1, %v8343_v9 }
 0x41f   :  { %5194 = vmatmul.mubr.msk.f32.gmra.mxu1 %vm770_vm4, %v7255_v63  ;;  %5542 = vmatmul.mubr.msk.f32.gmra.mxu0 %vm770_vm4, %v7255_v63 }
 0x420   :  { %3586 = vmatprep.mubr.f32.mxu1 %v8343_v9  ;;  %5544 = vmatprep.mubr.msk.f32.mxu0 %vm5680_vm1, %v8343_v9 }
 0x423   :  { %5195 = vmatmul.mubr.msk.f32.gmra.mxu1 %vm770_vm4, %v7265_v54  ;;  %5545 = vmatmul.mubr.msk.f32.gmra.mxu0 %vm770_vm4, %v7265_v54 }
 0x424   :  { %4318 = vmatprep.mubr.f32.mxu1 %v8343_v9  ;;  %4401 = vmatprep.mubr.f32.mxu0 %v8343_v9 }
 0x497   :  { %v2949_v36 = vpop.f32.mrf.mxu1  ;;  %v3044_v7 = vpop.f32.mrf.mxu0 }
 0x499   :  { %v2951_v62 = vpop.f32.mrf.mxu1  ;;  %v3046_v53 = vpop.f32.mrf.mxu0 }
 0x49b   :  { %v2955_v63 = vpop.f32.mrf.mxu1  ;;  %v3050_v29 = vpop.f32.mrf.mxu0 }
 0x49d   :  { %v7492_v6 = vpop.f32.mrf.mxu1  ;;  %v3052_v28 = vpop.f32.mrf.mxu0 }
 0x49f   :  { %v7494_v47 = vpop.f32.mrf.mxu1  ;;  %v7496_v52 = vpop.f32.mrf.mxu0 }
 0x4a1   :  { %v7498_v51 = vpop.f32.mrf.mxu1  ;;  %v7500_v54 = vpop.f32.mrf.mxu0 }
 0x4a3   :  { %v7502_v2 = vpop.f32.mrf.mxu1  ;;  %v7504_v12 = vpop.f32.mrf.mxu0 }
 0x4a5   :  { %v7506_v8 = vpop.f32.mrf.mxu1  ;;  %v7508_v0 = vpop.f32.mrf.mxu0 }
 0x4a7   :  { %v7510_v48 = vpop.f32.mrf.mxu1  ;;  %v7512_v17 = vpop.f32.mrf.mxu0 }
 0x4a9   :  { %v7514_v3 = vpop.f32.mrf.mxu1  ;;  %v7516_v22 = vpop.f32.mrf.mxu0 }
 0x4ab   :  { %v7518_v16 = vpop.f32.mrf.mxu1  ;;  %v7520_v26 = vpop.f32.mrf.mxu0 }
 0x4ad   :  { %v7522_v49 = vpop.f32.mrf.mxu1  ;;  %v5509_v14 = vpop.f32.mrf.mxu0 }
 0x4af   :  { %v7524_v60 = vpop.f32.mrf.mxu1  ;;  %v7526_v34 = vpop.f32.mrf.mxu0 }
 0x4b1   :  { %v7528_v15 = vpop.f32.mrf.mxu1  ;;  %v5512_v39 = vpop.f32.mrf.mxu0 }
 0x4b3   :  { %v7530_v19 = vpop.f32.mrf.mxu1  ;;  %v7532_v11 = vpop.f32.mrf.mxu0 }
 0x4b4   :  { %8364 = vst [vmem:[#allocation6_spill] sm:$0xff] %v7530_v19 }
 0x4b5   :  { %v7534_v61 = vpop.f32.mrf.mxu1  ;;  %v5515_v59 = vpop.f32.mrf.mxu0 }
 0x4b7   :  { %v7536_v21 = vpop.f32.mrf.mxu1  ;;  %v7538_v4 = vpop.f32.mrf.mxu0 }
 0x4b9   :  { %v7540_v45 = vpop.f32.mrf.mxu1  ;;  %v5518_v20 = vpop.f32.mrf.mxu0 }
 0x4bb   :  { %v7542_v13 = vpop.f32.mrf.mxu1  ;;  %v7544_v56 = vpop.f32.mrf.mxu0 }
 0x4bd   :  { %v7546_v1 = vpop.f32.mrf.mxu1  ;;  %v5521_v14 = vpop.f32.mrf.mxu0 }
 0x4bf   :  { %v3374_v39 = vpop.f32.mrf.mxu1  ;;  %v3469_v33 = vpop.f32.mrf.mxu0 }
 0x4c0   :  { %v7548_v27 = vadd.f32 %v3374_v39, %v2949_v36  ;;  %v7550_v43 = vadd.f32 %v3469_v33, %v3044_v7 }
 0x4c1   :  { %v3376_v59 = vpop.f32.mrf.mxu1  ;;  %v3471_v50 = vpop.f32.mrf.mxu0 }
 0x4c2   :  { %8365 = vst [vmem:[#allocation7_spill] sm:$0xff] %v7548_v27  ;;  %8366 = vst [vmem:[#allocation12_spill] sm:$0xff] %v7550_v43  ;;  %v7552_v44 = vadd.f32 %v3376_v59, %v2951_v62  ;;  %v7554_v19 = vadd.f32 %v3471_v50, %v3046_v53 }
 0x4c3   :  { %v3380_v20 = vpop.f32.mrf.mxu1  ;;  %v3475_v9 = vpop.f32.mrf.mxu0 }
 0x4c4   :  { %8367 = vst [vmem:[#allocation13_spill] sm:$0xff] %v7552_v44  ;;  %8368 = vst [vmem:[#allocation4_spill] sm:$0xff] %v7554_v19  ;;  %v7556_v32 = vadd.f32 %v3380_v20, %v2955_v63  ;;  %v7558_v37 = vadd.f32 %v3475_v9, %v3050_v29 }
 0x4c5   :  { %v3382_v5 = vpop.f32.mrf.mxu1  ;;  %v3477_v14 = vpop.f32.mrf.mxu0 }
 0x4c6   :  { %8369 = vst [vmem:[#allocation5_spill] sm:$0xff] %v7556_v32  ;;  %8370 = vst [vmem:[#allocation28_spill] sm:$0xff] %v7558_v37  ;;  %v7560_v31 = vadd.f32 %v3477_v14, %v3052_v28  ;;  %v7565_v28 = vadd.f32 %v3382_v5, %v7492_v6 }
 0x4c7   :  { %v3386_v36 = vpop.f32.mrf.mxu1  ;;  %v3481_v39 = vpop.f32.mrf.mxu0 }
 0x4c8   :  { %8371 = vst [vmem:[#allocation33_spill] sm:$0xff] %v7560_v31  ;;  %8372 = vst [vmem:[#allocation36_spill] sm:$0xff] %v7565_v28  ;;  %v7568_v14 = vadd.f32 %v3386_v36, %v7494_v47  ;;  %v7578_v18 = vadd.f32 %v3481_v39, %v7496_v52 }
 0x4c9   :  { %v3388_v33 = vpop.f32.mrf.mxu1  ;;  %v3483_v7 = vpop.f32.mrf.mxu0 }
 0x4ca   :  { %8373 = vst [vmem:[#allocation32_spill] sm:$0xff] %v7568_v14  ;;  %8374 = vst [vmem:[#allocation31_spill] sm:$0xff] %v7578_v18  ;;  %v7581_v5 = vadd.f32 %v3388_v33, %v7498_v51  ;;  %v7584_v6 = vadd.f32 %v3483_v7, %v7500_v54 }
 0x4cb   :  { %v3392_v43 = vpop.f32.mrf.mxu1  ;;  %v3487_v27 = vpop.f32.mrf.mxu0 }
 0x4cc   :  { %8375 = vst [vmem:[#allocation26_spill] sm:$0xff] %v7581_v5  ;;  %8376 = vst [vmem:[#allocation3_spill] sm:$0xff] %v7584_v6  ;;  %v7587_v14 = vadd.f32 %v3392_v43, %v7502_v2  ;;  %v7604_v43 = vadd.f32 %v3487_v27, %v7504_v12 }
 0x4cd   :  { %v3394_v62 = vpop.f32.mrf.mxu1  ;;  %v3489_v59 = vpop.f32.mrf.mxu0 }
 0x4ce   :  { %v7612_v2 = vadd.f32 %v3394_v62, %v7506_v8 }
 0x4cf   :  { %v3398_v50 = vpop.f32.mrf.mxu1  ;;  %v3493_v53 = vpop.f32.mrf.mxu0 }
 0x4d0   :  { %v3683_v19 = vsub.f32 %v3398_v50, %v7510_v48  ;;  %v3685_v63 = vsub.f32 %v3493_v53, %v7512_v17 }
 0x4d1   :  { %v3400_v9 = vpop.f32.mrf.mxu1  ;;  %v3495_v29 = vpop.f32.mrf.mxu0 }
 0x4d2   :  { %v3690_v20 = vmul.f32 %v3683_v19, %v3683_v19  ;;  %v3692_v44 = vmul.f32 %v3685_v63, %v3685_v63  ;;  %v3684_v37 = vsub.f32 %v3400_v9, %v7514_v3  ;;  %v7572_v24 = vrot.slane %v3683_v19, %v6330_v25 }
 0x4d3   :  { %v3564_v32 = vpop.f32.mrf.mxu1  ;;  %v3659_v31 = vpop.f32.mrf.mxu0  ;;  %v7575_v40 = vrot.slane %v3685_v63, %v6330_v25  ;;  %v7597_v52 = vrot.slane %v3683_v19, %v6334_v30  ;;  %v7600_v51 = vrot.slane %v3685_v63, %v6334_v30  ;;  %v3686_v39 = vsub.f32 %v3495_v29, %v7516_v22 }
 0x4d4   :  { %v3704_v41 = vrot.slane %v3690_v20, 1  ;;  %v3706_v58 = vrot.slane %v3692_v44, 1  ;;  %v3691_v47 = vmul.f32 %v3684_v37, %v3684_v37  ;;  %v7594_v10 = vrot.slane %v3684_v37, %v6330_v25 }
 0x4d5   :  { %v3566_v36 = vpop.f32.mrf.mxu1  ;;  %v5534_v28 = vpop.f32.mrf.mxu0  ;;  %8377 = vst [vmem:[#allocation22_spill] sm:$0xff] %v7600_v51  ;;  %v7615_v19 = vadd.f32 %v3489_v59, %v7508_v0  ;;  %v3802_v63 = vadd.f32 %v3398_v50, %v7510_v48  ;;  %v3803_v18 = vadd.f32 %v3400_v9, %v7514_v3  ;;  %v3963_v8 = vmul.f32 %v7597_v52, %v6317_v46 }
 0x4d6   :  { %v7589_v23 = vadd.f32 %v3704_v41, %v3690_v20  ;;  %v7591_v57 = vadd.f32 %v3706_v58, %v3692_v44  ;;  %v3705_v54 = vrot.slane %v3691_v47, 1  ;;  %v8378_v58 = vld [vmem:[#allocation20_spill] sm:$0xff]  ;;  %v3804_v20 = vadd.f32 %v3493_v53, %v7512_v17 }
 0x4d7   :  { %v3570_v33 = vpop.f32.mrf.mxu1  ;;  %v3664_v7 = vpop.f32.mrf.mxu0  ;;  %v3865_v41 = vmul.f32 %v7572_v24, %v8378_v58  ;;  %v3867_v44 = vmul.f32 %v7575_v40, %v8378_v58  ;;  %v3866_v6 = vmul.f32 %v7594_v10, %v8378_v58  ;;  %v3965_v0 = vmul.f32 %v7600_v51, %v6317_v46 }
 0x4d8   :  { %5637 = vrsqrt.f32 %v7589_v23  ;;  %v7620_v28 = vadd.f32 %v3705_v54, %v3691_v47  ;;  %v3693_v48 = vmul.f32 %v3686_v39, %v3686_v39  ;;  %v7630_v62 = vrot.slane %v3686_v39, %v6330_v25 }
 0x4d9   :  { %5639 = vrsqrt.f32 %v7591_v57  ;;  %v3572_v27 = vpop.f32.mrf.mxu1  ;;  %v5537_v12 = vpop.f32.mrf.mxu0  ;;  %v3900_v50 = vadd.f32 %v3865_v41, %v3802_v63  ;;  %v3902_v53 = vadd.f32 %v3867_v44, %v3804_v20  ;;  %v7636_v3 = vrot.slane %v3684_v37, %v6334_v30 }
 0x4da   :  { %5641 = vrsqrt.f32 %v7620_v28  ;;  %v3707_v9 = vrot.slane %v3693_v48, 1  ;;  %v3805_v47 = vadd.f32 %v3495_v29, %v7516_v22  ;;  %v3868_v54 = vmul.f32 %v7630_v62, %v8378_v58 }
 0x4db   :  { %v7632_v59 = vpop.f32.mrf.mxu1  ;;  %v3669_v17 = vpop.f32.mrf.mxu0  ;;  %v7642_v12 = vrot.slane %v3686_v39, %v6334_v30  ;;  %v7645_v41 = vadd.f32 %v3564_v32, %v7518_v16  ;;  %v7648_v44 = vadd.f32 %v3659_v31, %v7520_v26  ;;  %v7651_v37 = vadd.f32 %v3566_v36, %v7522_v49 }
 0x4dc   :  { %8379 = vst [vmem:[#allocation30_spill] sm:$0xff] %v7632_v59  ;;  %v3901_v59 = vadd.f32 %v3866_v6, %v3803_v18  ;;  %vm3727_vm2 = vcmp.eq.f32.partialorder %v7589_v23, inf  ;;  %v3730_v22 = vand.u32 2147483648, %v7589_v23  ;;  %v7655_v29 = vadd.f32 %v3707_v9, %v3693_v48 }
 0x4dd   :  { %v3578_v5 = vpop.f32.mrf.mxu1  ;;  %v5540_v51 = vpop.f32.mrf.mxu0  ;;  %8380 = vst [vmem:[#allocation24_spill] sm:$0xff] %v7645_v41  ;;  %8381 = vst [vmem:[#allocation29_spill] sm:$0xff] %v7648_v44  ;;  %v3903_v39 = vadd.f32 %v3868_v54, %v3805_v47  ;;  %v7658_v63 = vadd.f32 %v3664_v7, %v7526_v34  ;;  %vm3729_vm3 = vcmp.eq.f32.partialorder %v7589_v23, 0.0  ;;  %v7661_v32 = vadd.f32 %v3963_v8, %v3900_v50 }
 0x4de   :  { %8382 = vst [vmem:[#allocation25_spill] sm:$0xff] %v7651_v37  ;;  %vm3741_vm4 = vcmp.eq.f32.partialorder %v7591_v57, inf  ;;  %v3964_v31 = vmul.f32 %v7636_v3, %v6317_v46  ;;  %v7667_v16 = vadd.f32 %v3669_v17, %v7532_v11  ;;  %vm3743_vm12 = vcmp.eq.f32.partialorder %v7591_v57, 0.0  ;;  %v7830_v37 = vpop.permute.xlu0 %4125 }
 0x4df   :  { %8383 = vst [vmem:[#allocation23_spill] sm:$0xff] %v7658_v63  ;;  %v3582_v18 = vpop.f32.mrf.mxu1  ;;  %v3674_v6 = vpop.f32.mrf.mxu0  ;;  %v3744_v26 = vand.u32 2147483648, %v7591_v57  ;;  %5643 = vrsqrt.f32 %v7655_v29  ;;  %v3966_v49 = vmul.f32 %v7642_v12, %v6317_v46  ;;  %v7674_v51 = vadd.f32 %v3965_v0, %v3902_v53 }
 0x4e0   :  { %v3737_v7 = vand.u32 2147483648, %v7620_v28  ;;  %v7677_v20 = vadd.f32 %v3964_v31, %v3901_v59  ;;  %v7680_v11 = vadd.f32 %v3570_v33, %v7524_v60  ;;  %vm3734_vm14 = vcmp.eq.f32.partialorder %v7620_v28, inf }
 0x4e1   :  { %v3584_v34 = vpop.f32.mrf.mxu1  ;;  %v5543_v36 = vpop.f32.mrf.mxu0  ;;  %v7684_v48 = vadd.f32 %v3966_v49, %v3903_v39  ;;  %v7687_v17 = vadd.f32 %v3572_v27, %v7528_v15  ;;  %v7690_v50 = vadd.f32 %v3578_v5, %v7534_v61  ;;  %vm3736_vm15 = vcmp.eq.f32.partialorder %v7620_v28, 0.0 }
 0x4e2   :  { %8384 = vst [vmem:[#allocation20_spill] sm:$0xff] %v7680_v11  ;;  %v7694_v59 = vadd.f32 %v3582_v18, %v7536_v21  ;;  %v3859_v9 = vmul.f32 %v7594_v10, %v6463_v35  ;;  %v7701_v15 = vadd.f32 %v3674_v6, %v7538_v4  ;;  %v7704_v61 = vadd.f32 %v3584_v34, %v7540_v45 }
 0x4e3   :  { %8385 = vst [vmem:[#allocation39_spill] sm:$0xff] %v7687_v17  ;;  %v3588_v0 = vpop.f32.mrf.mxu1  ;;  %v3679_v53 = vpop.f32.mrf.mxu0  ;;  %v7708_v27 = vmul.f32 %v7636_v3, %v6311_v38  ;;  %v3861_v21 = vmul.f32 %v7630_v62, %v6463_v35  ;;  %v7718_v4 = vmul.f32 %v7642_v12, %v6311_v38  ;;  %vm3748_vm5 = vcmp.eq.f32.partialorder %v7655_v29, inf }
 0x4e4   :  { %v3687_v60 = vsub.f32 %v3588_v0, %v7542_v13  ;;  %v3689_v33 = vsub.f32 %v3679_v53, %v7544_v56  ;;  %v3806_v6 = vadd.f32 %v3588_v0, %v7542_v13  ;;  %v3808_v34 = vadd.f32 %v3679_v53, %v7544_v56 }
 0x4e5   :  { %v5638_v47 = vpop.eup %5637  ;;  %v5546_v5 = vpop.f32.mrf.mxu0  ;;  %v3894_v8 = vadd.f32 %v3859_v9, %v7612_v2  ;;  %vm3750_vm6 = vcmp.eq.f32.partialorder %v7655_v29, 0.0 }
 0x4e6   :  { %v5640_v54 = vpop.eup %5639  ;;  %v3726_v39 = vmul.f32 %v5638_v47, %v7589_v23  ;;  %v3694_v18 = vmul.f32 %v3687_v60, %v3687_v60  ;;  %v7714_v31 = vrot.slane %v3687_v60, %v6330_v25  ;;  %v3696_v49 = vmul.f32 %v3689_v33, %v3689_v33 }
 0x4e7   :  { %v3740_v45 = vmul.f32 %v5640_v54, %v7591_v57  ;;  %v7728_v5 = vrot.slane %v3689_v33, %v6330_v25  ;;  %v5642_v41 = vpop.eup %5641 }
 0x4e8   :  { %v3728_v36 = vsel %vm3727_vm2, %v7589_v23, %v3726_v39  ;;  %v3708_v47 = vrot.slane %v3694_v18, 1  ;;  %v3869_v56 = vmul.f32 %v7714_v31, %v8378_v58  ;;  %v3710_v0 = vrot.slane %v3696_v49, 1 }
 0x4e9   :  { %v3731_v54 = vsel %vm3729_vm3, %v3730_v22, %v3728_v36  ;;  %v3742_v13 = vsel %vm3741_vm4, %v7591_v57, %v3740_v45  ;;  %v3733_v9 = vmul.f32 %v5642_v41, %v7620_v28  ;;  %v7751_v39 = vrot.slane %v3687_v60, %v6334_v30 }
 0x4ea   :  { %v7740_v53 = vrot.slane %v3731_v54, %v6330_v25  ;;  %v3745_v2 = vsel %vm3743_vm12, %v3744_v26, %v3742_v13  ;;  %v7745_v23 = vadd.f32 %v3708_v47, %v3694_v18  ;;  %v7753_v45 = vadd.f32 %v3710_v0, %v3696_v49  ;;  %v3590_v0 = vpop.f32.mrf.mxu1 }
 0x4eb   :  { %v7748_v22 = vrot.slane %v3745_v2, %v6330_v25  ;;  %v3896_v36 = vadd.f32 %v3861_v21, %v7615_v19  ;;  %v3735_v57 = vsel %vm3734_vm14, %v7620_v28, %v3733_v9  ;;  %v3871_v41 = vmul.f32 %v7728_v5, %v8378_v58 }
 0x4ec   :  { %v4061_v54 = vmul.f32 %v7740_v53, %v6352_v55  ;;  %5645 = vrsqrt.f32 %v7745_v23  ;;  %v3738_v60 = vsel %vm3736_vm15, %v3737_v7, %v3735_v57  ;;  %v3904_v18 = vadd.f32 %v3869_v56, %v3806_v6  ;;  %v5644_v21 = vpop.eup %5643 }
 0x4ed   :  { %v4063_v26 = vmul.f32 %v7748_v22, %v6352_v55  ;;  %v3858_v19 = vmul.f32 %v7572_v24, %v6463_v35  ;;  %v7772_v47 = vrot.slane %v3738_v60, %v6330_v25  ;;  %5647 = vrsqrt.f32 %v7753_v45 }
 0x4ee   :  { %v4096_v49 = vadd.f32 %v4061_v54, %v7661_v32  ;;  %v7776_v13 = vrot.slane %v3689_v33, %v6334_v30  ;;  %v3747_v28 = vmul.f32 %v5644_v21, %v7655_v29  ;;  %v3967_v7 = vmul.f32 %v7751_v39, %v6317_v46 }
 0x4ef   :  { %v4098_v2 = vadd.f32 %v4063_v26, %v7674_v51  ;;  %v3956_v6 = vmul.f32 %v7597_v52, %v6311_v38  ;;  %v4062_v56 = vmul.f32 %v7772_v47, %v6352_v55  ;;  %v3758_v9 = vand.u32 2147483648, %v7745_v23 }
 0x4f0   :  { %v4161_v32 = vadd.f32 %v7174_v42, %v4096_v49  ;;  %v3906_v33 = vadd.f32 %v3871_v41, %v3808_v34  ;;  %v3749_v51 = vsel %vm3748_vm5, %v7655_v29, %v3747_v28  ;;  %v7791_v54 = vadd.f32 %v3967_v7, %v3904_v18 }
 0x4f1   :  { %v3688_v26 = vsub.f32 %v3590_v0, %v7546_v1  ;;  %v7796_v60 = vadd.f32 %v7174_v42, %v4098_v2  ;;  %v4097_v21 = vadd.f32 %v4062_v56, %v7677_v20  ;;  %v8386_v49 = vand.u32 2147483648, %v7655_v29 }
 0x4f2   :  { %v3969_v41 = vmul.f32 %v7776_v13, %v6317_v46  ;;  %vm3755_vm7 = vcmp.eq.f32.partialorder %v7745_v23, inf  ;;  %v3807_v7 = vadd.f32 %v3590_v0, %v7546_v1  ;;  %v4196_v20 = vmax.f32 %v4161_v32, 0.0 }
 0x4f3   :  { %v3752_v34 = vsel %vm3750_vm6, %v8386_v49, %v3749_v51  ;;  %v3695_v28 = vmul.f32 %v3688_v26, %v3688_v26  ;;  %v7811_v2 = vrot.slane %v3688_v26, %v6330_v25  ;;  %vm3757_vm8 = vcmp.eq.f32.partialorder %v7745_v23, 0.0  ;;  %v8387_v51 = vld [vmem:[#allocation27_spill] sm:$0xff] }
 0x4f4   :  { %v7806_v18 = vrot.slane %v3752_v34, %v6330_v25  ;;  %v4162_v29 = vadd.f32 %v7174_v42, %v4097_v21  ;;  %v3992_v56 = vadd.f32 %v7708_v27, %v3894_v8  ;;  %v4055_v49 = vmul.f32 %v7772_v47, %v8387_v51 }
 0x4f5   :  { %vm3769_vm2 = vcmp.eq.f32.partialorder %v7753_v45, inf  ;;  %v3709_v57 = vrot.slane %v3695_v28, 1  ;;  %v3870_v1 = vmul.f32 %v7811_v2, %v8378_v58  ;;  %v7824_v0 = vrot.slane %v3688_v26, %v6334_v30 }
 0x4f6   :  { %v4064_v34 = vmul.f32 %v7806_v18, %v6352_v55  ;;  %vm3771_vm3 = vcmp.eq.f32.partialorder %v7753_v45, 0.0  ;;  %v4197_v32 = vmax.f32 %v4162_v29, 0.0  ;;  %v4090_v21 = vadd.f32 %v4055_v49, %v3992_v56 }
 0x4f7   :  { %v3994_v8 = vadd.f32 %v7718_v4, %v3896_v36  ;;  %v4057_v27 = vmul.f32 %v7806_v18, %v8387_v51  ;;  %v4004_v44 = vadd.f32 %v3969_v41, %v3906_v33  ;;  %v7833_v17 = vadd.f32 %v3709_v57, %v3695_v28 }
 0x4f8   :  { %v4099_v11 = vadd.f32 %v4064_v34, %v7684_v48  ;;  %v3893_v58 = vadd.f32 %v3858_v19, %v7587_v14  ;;  %v4198_v30 = vmax.f32 %v7796_v60, 0.0  ;;  %5201 = vmatprep.subr.msk.mxu1 %vm1777_vm13, %v4197_v32  ;;  %v4155_v26 = vadd.f32 %v7830_v37, %v4090_v21 }
 0x4f9   :  { %v4092_v29 = vadd.f32 %v4057_v27, %v3994_v8  ;;  %v3860_v4 = vmul.f32 %v7575_v40, %v6463_v35  ;;  %v5646_v36 = vpop.eup %5645  ;;  %5649 = vrsqrt.f32 %v7833_v17  ;;  %v3905_v56 = vadd.f32 %v3870_v1, %v3807_v7  ;;  %5202 = vmatpush1.msk.msra.mxu1 %vm1777_vm13, %v4196_v20 }
 0x4fa   :  { %v3968_v48 = vmul.f32 %v7824_v0, %v6317_v46  ;;  %v4054_v14 = vmul.f32 %v7740_v53, %v8387_v51  ;;  %v3754_v19 = vmul.f32 %v5646_v36, %v7745_v23  ;;  %v3765_v33 = vand.u32 2147483648, %v7833_v17  ;;  %v5648_v41 = vpop.eup %5647  ;;  %v8388_v46 = vld [vmem:[#allocation22_spill] sm:$0xff] }
 0x4fb   :  { %v4164_v57 = vadd.f32 %v7174_v42, %v4099_v11  ;;  %v4190_v60 = vmax.f32 %v4155_v26, 0.0  ;;  %v4157_v28 = vadd.f32 %v7830_v37, %v4092_v29  ;;  %v3991_v49 = vadd.f32 %v3956_v6, %v3893_v58  ;;  %v8389_v26 = vld [vmem:[#allocation10_spill] sm:$0xff] }
 0x4fc   :  { %v3895_v7 = vadd.f32 %v3860_v4, %v7604_v43  ;;  %v3958_v34 = vmul.f32 %v8388_v46, %v6311_v38  ;;  %v3756_v20 = vsel %vm3755_vm7, %v7745_v23, %v3754_v19  ;;  %v3768_v1 = vmul.f32 %v5648_v41, %v7753_v45  ;;  %v8390_v4 = vld [vmem:[#allocation8_spill] sm:$0xff] }
 0x4fd   :  { %v4199_v32 = vmax.f32 %v4164_v57, 0.0  ;;  %4278 = vmatprep.subr.mxu1 %v4190_v60  ;;  %v4056_v11 = vmul.f32 %v7748_v22, %v8387_v51  ;;  %v3759_v21 = vsel %vm3757_vm8, %v3758_v9, %v3756_v20  ;;  %v4192_v6 = vmax.f32 %v4157_v28, 0.0  ;;  %v8392_v57 = vld [vmem:[#allocation37_spill] sm:$0xff] }
 0x4fe   :  { %v4089_v8 = vadd.f32 %v4054_v14, %v3991_v49  ;;  %v3993_v43 = vadd.f32 %v3958_v34, %v3895_v7  ;;  %v7863_v27 = vrot.slane %v3759_v21, %v6330_v25  ;;  %v3770_v58 = vsel %vm3769_vm2, %v7753_v45, %v3768_v1  ;;  %v8393_v49 = vld [vmem:[#allocation26_spill] sm:$0xff] }
 0x4ff   :  { %5206 = vmatprep.subr.msk.mxu0 %vm1777_vm13, %v4199_v32  ;;  %v3852_v29 = vmul.f32 %v7594_v10, %v8389_v26  ;;  %v3950_v36 = vmul.f32 %v7636_v3, %v8390_v4  ;;  %v8391_v23 = vand.u32 2147483648, %v7753_v45  ;;  %v4048_v60 = vmul.f32 %v7772_v47, %v8392_v57 }
 0x500   :  { %5207 = vmatpush1.msk.msra.mxu0 %vm1777_vm13, %v4198_v30  ;;  %v4154_v14 = vadd.f32 %v7830_v37, %v4089_v8  ;;  %v4091_v19 = vadd.f32 %v4056_v11, %v3993_v43  ;;  %v4065_v41 = vmul.f32 %v7863_v27, %v6352_v55  ;;  %vm3762_vm4 = vcmp.eq.f32.partialorder %v7833_v17, inf }
 0x501   :  { %v3773_v9 = vsel %vm3771_vm3, %v8391_v23, %v3770_v58  ;;  %4361 = vmatprep.subr.mxu0 %v4192_v6  ;;  %v3887_v45 = vadd.f32 %v3852_v29, %v8393_v49  ;;  %v3854_v30 = vmul.f32 %v7630_v62, %v8389_v26  ;;  %vm3764_vm12 = vcmp.eq.f32.partialorder %v7833_v17, 0.0  ;;  %v8394_v6 = vld [vmem:[#allocation3_spill] sm:$0xff] }
 0x502   :  { %v7884_v28 = vrot.slane %v3773_v9, %v6330_v25  ;;  %v4189_v7 = vmax.f32 %v4154_v14, 0.0  ;;  %v4156_v34 = vadd.f32 %v7830_v37, %v4091_v19  ;;  %v3952_v20 = vmul.f32 %v7642_v12, %v8390_v4 }
 0x503   :  { %v4050_v1 = vmul.f32 %v7806_v18, %v8392_v57  ;;  %v4100_v32 = vadd.f32 %v4065_v41, %v7791_v54  ;;  %v3985_v21 = vadd.f32 %v3950_v36, %v3887_v45  ;;  %v3889_v8 = vadd.f32 %v3854_v30, %v8394_v6  ;;  %v8395_v36 = vld [vmem:[#allocation32_spill] sm:$0xff]  ;;  %v8398_v6 = vld [vmem:[#allocation21_spill] sm:$0xff] }
 0x504   :  { %v4067_v11 = vmul.f32 %v7884_v28, %v6352_v55  ;;  %v4003_v43 = vadd.f32 %v3968_v48, %v3905_v56  ;;  %4279 = vmatpush1.msra.mxu1 %v4189_v7  ;;  %v4191_v58 = vmax.f32 %v4156_v34, 0.0  ;;  %v3851_v29 = vmul.f32 %v7572_v24, %v8389_v26 }
 0x505   :  { %v3949_v23 = vmul.f32 %v7597_v52, %v8390_v4  ;;  %v4083_v14 = vadd.f32 %v4048_v60, %v3985_v21  ;;  %v3987_v19 = vadd.f32 %v3952_v20, %v3889_v8  ;;  %v4047_v54 = vmul.f32 %v7740_v53, %v8392_v57  ;;  %v8396_v60 = vld [vmem:[#allocation19_spill] sm:$0xff] }
 0x506   :  { %v4102_v9 = vadd.f32 %v4067_v11, %v4004_v44  ;;  %v7907_v41 = vadd.f32 %v7174_v42, %v4100_v32  ;;  %4362 = vmatpush1.msra.mxu0 %v4191_v58  ;;  %v3886_v56 = vadd.f32 %v3851_v29, %v8395_v36  ;;  %v3853_v48 = vmul.f32 %v7575_v40, %v8389_v26  ;;  %v5650_v45 = vpop.eup %5649  ;;  %v8397_v11 = vld [vmem:[#allocation31_spill] sm:$0xff]  ;;  %v8399_v36 = vld [vmem:[#allocation34_spill] sm:$0xff] }
 0x507   :  { %v3951_v49 = vmul.f32 %v8388_v46, %v8390_v4  ;;  %v4148_v30 = vadd.f32 %v8396_v60, %v4083_v14  ;;  %v4085_v7 = vadd.f32 %v4050_v1, %v3987_v19  ;;  %v4049_v34 = vmul.f32 %v7748_v22, %v8392_v57 }
 0x508   :  { %v7915_v44 = vadd.f32 %v7174_v42, %v4102_v9  ;;  %v3761_v20 = vmul.f32 %v5650_v45, %v7833_v17  ;;  %v3984_v32 = vadd.f32 %v3949_v23, %v3886_v56  ;;  %v3888_v21 = vadd.f32 %v3853_v48, %v8397_v11  ;;  %v8400_v23 = vld [vmem:[#allocation36_spill] sm:$0xff]  ;;  %v8401_v11 = vld [vmem:[#allocation11_spill] sm:$0xff] }
 0x509   :  { %v3845_v8 = vmul.f32 %v7594_v10, %v8398_v6  ;;  %v4183_v29 = vmax.f32 %v4148_v30, 0.0  ;;  %v4150_v9 = vadd.f32 %v8396_v60, %v4085_v7  ;;  %v3943_v14 = vmul.f32 %v7636_v3, %v8399_v36 }
 0x50a   :  { %v3763_v1 = vsel %vm3762_vm4, %v7833_v17, %v3761_v20  ;;  %v4082_v19 = vadd.f32 %v4047_v54, %v3984_v32  ;;  %v3986_v45 = vadd.f32 %v3951_v49, %v3888_v21  ;;  %v4041_v7 = vmul.f32 %v7772_v47, %v8401_v11  ;;  %v8402_v32 = vld [vmem:[#allocation33_spill] sm:$0xff] }
 0x50b   :  { %v3880_v56 = vadd.f32 %v3845_v8, %v8400_v23  ;;  %v3766_v48 = vsel %vm3764_vm12, %v3765_v33, %v3763_v1  ;;  %4280 = vmatprep.subr.mxu1 %v4183_v29  ;;  %v4185_v30 = vmax.f32 %v4150_v9, 0.0  ;;  %v3847_v58 = vmul.f32 %v7630_v62, %v8398_v6 }
 0x50c   :  { %v7941_v63 = vrot.slane %v3766_v48, %v6330_v25  ;;  %v4147_v54 = vadd.f32 %v8396_v60, %v4082_v19  ;;  %v4084_v49 = vadd.f32 %v4049_v34, %v3986_v45  ;;  %v3945_v17 = vmul.f32 %v7642_v12, %v8399_v36 }
 0x50d   :  { %v3978_v20 = vadd.f32 %v3943_v14, %v3880_v56  ;;  %4363 = vmatprep.subr.mxu0 %v4185_v30  ;;  %v3882_v21 = vadd.f32 %v3847_v58, %v8402_v32  ;;  %v4043_v33 = vmul.f32 %v7806_v18, %v8401_v11  ;;  %v3844_v8 = vmul.f32 %v7572_v24, %v8398_v6  ;;  %v7954_v14 = vpop.permute.xlu0 %4115  ;;  %v8403_v58 = vld [vmem:[#allocation5_spill] sm:$0xff] }
 0x50e   :  { %v4066_v25 = vmul.f32 %v7941_v63, %v6352_v55  ;;  %v4182_v29 = vmax.f32 %v4147_v54, 0.0  ;;  %v4149_v9 = vadd.f32 %v8396_v60, %v4084_v49  ;;  %v3942_v45 = vmul.f32 %v7597_v52, %v8399_v36 }
 0x50f   :  { %v4076_v34 = vadd.f32 %v4041_v7, %v3978_v20  ;;  %v3980_v1 = vadd.f32 %v3945_v17, %v3882_v21  ;;  %v3879_v19 = vadd.f32 %v3844_v8, %v8403_v58  ;;  %v4040_v23 = vmul.f32 %v7740_v53, %v8401_v11  ;;  %v8404_v21 = vld [vmem:[#allocation28_spill] sm:$0xff] }
 0x510   :  { %v4101_v56 = vadd.f32 %v4066_v25, %v4003_v43  ;;  %4281 = vmatpush1.msra.mxu1 %v4182_v29  ;;  %v4184_v48 = vmax.f32 %v4149_v9, 0.0  ;;  %v3846_v30 = vmul.f32 %v7575_v40, %v8398_v6  ;;  %v3944_v49 = vmul.f32 %v8388_v46, %v8399_v36  ;;  %v8405_v43 = vld [vmem:[#allocation35_spill] sm:$0xff]  ;;  %v8406_v25 = vld [vmem:[#allocation38_spill] sm:$0xff] }
 0x511   :  { %v4141_v55 = vadd.f32 %v7954_v14, %v4076_v34  ;;  %v4078_v7 = vadd.f32 %v4043_v33, %v3980_v1  ;;  %v3977_v54 = vadd.f32 %v3942_v45, %v3879_v19  ;;  %v4042_v20 = vmul.f32 %v7748_v22, %v8401_v11  ;;  %v8407_v34 = vld [vmem:[#allocation18_spill] sm:$0xff]  ;;  %v8408_v45 = vld [vmem:[#allocation13_spill] sm:$0xff] }
 0x512   :  { %4364 = vmatpush1.msra.mxu0 %v4184_v48  ;;  %v3881_v17 = vadd.f32 %v3846_v30, %v8404_v21  ;;  %v3838_v8 = vmul.f32 %v7594_v10, %v8405_v43  ;;  %v3936_v29 = vmul.f32 %v7636_v3, %v8406_v25  ;;  %v4034_v1 = vmul.f32 %v7772_v47, %v8407_v34 }
 0x513   :  { %v4176_v32 = vmax.f32 %v4141_v55, 0.0  ;;  %v4143_v9 = vadd.f32 %v7954_v14, %v4078_v7  ;;  %v4075_v33 = vadd.f32 %v4040_v23, %v3977_v54  ;;  %v3840_v58 = vmul.f32 %v7630_v62, %v8405_v43  ;;  %v8409_v23 = vld [vmem:[#allocation4_spill] sm:$0xff] }
 0x514   :  { %v3979_v19 = vadd.f32 %v3944_v49, %v3881_v17  ;;  %v3873_v48 = vadd.f32 %v3838_v8, %v8408_v45  ;;  %v3938_v55 = vmul.f32 %v7642_v12, %v8406_v25  ;;  %v4036_v10 = vmul.f32 %v7806_v18, %v8407_v34  ;;  %v8410_v18 = vld [vmem:[#allocation7_spill] sm:$0xff] }
 0x515   :  { %4282 = vmatprep.subr.mxu1 %v4176_v32  ;;  %v4178_v3 = vmax.f32 %v4143_v9, 0.0  ;;  %v4140_v30 = vadd.f32 %v7954_v14, %v4075_v33  ;;  %v3875_v7 = vadd.f32 %v3840_v58, %v8409_v23  ;;  %v3837_v47 = vmul.f32 %v7572_v24, %v8405_v43 }
 0x516   :  { %v4077_v54 = vadd.f32 %v4042_v20, %v3979_v19  ;;  %v3971_v62 = vadd.f32 %v3936_v29, %v3873_v48  ;;  %v3935_v49 = vmul.f32 %v7597_v52, %v8406_v25  ;;  %v4033_v32 = vmul.f32 %v7740_v53, %v8407_v34  ;;  %v8411_v29 = vld [vmem:[#allocation12_spill] sm:$0xff] }
 0x517   :  { %4365 = vmatprep.subr.mxu0 %v4178_v3  ;;  %v4175_v12 = vmax.f32 %v4140_v30, 0.0  ;;  %v3973_v21 = vadd.f32 %v3938_v55, %v3875_v7  ;;  %v3872_v17 = vadd.f32 %v3837_v47, %v8410_v18  ;;  %v3839_v8 = vmul.f32 %v7575_v40, %v8405_v43  ;;  %v8412_v48 = vld [vmem:[#allocation16_spill] sm:$0xff] }
 0x518   :  { %v4142_v9 = vadd.f32 %v7954_v14, %v4077_v54  ;;  %v4069_v33 = vadd.f32 %v4034_v1, %v3971_v62  ;;  %v3937_v24 = vmul.f32 %v8388_v46, %v8406_v25  ;;  %v4035_v52 = vmul.f32 %v7748_v22, %v8407_v34 }
 0x519   :  { %4283 = vmatpush1.msra.mxu1 %v4175_v12  ;;  %v4071_v20 = vadd.f32 %v4036_v10, %v3973_v21  ;;  %v3970_v53 = vadd.f32 %v3935_v49, %v3872_v17  ;;  %v3874_v58 = vadd.f32 %v3839_v8, %v8411_v29  ;;  %v4166_v19 = vadd.f32 %v7174_v42, %v4101_v56  ;;  %v8024_v17 = vld [vmem:[%s8241_s6] sm:$0xff] }
 0x51a   :  { %v4177_v45 = vmax.f32 %v4142_v9, 0.0  ;;  %v4134_v55 = vadd.f32 %v8412_v48, %v4069_v33  ;;  %v3864_v40 = vmul.f32 %v7728_v5, %v6463_v35  ;;  %v3962_v1 = vmul.f32 %v7776_v13, %v6311_v38 }
 0x51b   :  { %v4136_v46 = vadd.f32 %v8412_v48, %v4071_v20  ;;  %v4068_v3 = vadd.f32 %v4033_v32, %v3970_v53  ;;  %v3972_v22 = vadd.f32 %v3937_v24, %v3874_v58  ;;  %v4201_v30 = vmax.f32 %v4166_v19, 0.0 }
 0x51c   :  { %4366 = vmatpush1.msra.mxu0 %v4177_v45  ;;  %v4169_v10 = vmax.f32 %v4134_v55, 0.0  ;;  %v3899_v23 = vadd.f32 %v3864_v40, %v7701_v15  ;;  %v4060_v42 = vmul.f32 %v7884_v28, %v8387_v51  ;;  %v3863_v56 = vmul.f32 %v7811_v2, %v6463_v35 }
 0x51d   :  { %v4171_v7 = vmax.f32 %v4136_v46, 0.0  ;;  %v4133_v47 = vadd.f32 %v8412_v48, %v4068_v3  ;;  %v4070_v54 = vadd.f32 %v4035_v52, %v3972_v22  ;;  %v3961_v62 = vmul.f32 %v7824_v0, %v6311_v38 }
 0x51e   :  { %4284 = vmatprep.subr.mxu1 %v4169_v10  ;;  %v3997_v49 = vadd.f32 %v3962_v1, %v3899_v23  ;;  %v3898_v32 = vadd.f32 %v3863_v56, %v7704_v61  ;;  %v4059_v15 = vmul.f32 %v7941_v63, %v8387_v51  ;;  %v3857_v12 = vmul.f32 %v7728_v5, %v8389_v26 }
 0x51f   :  { %4367 = vmatprep.subr.mxu0 %v4171_v7  ;;  %v4168_v21 = vmax.f32 %v4133_v47, 0.0  ;;  %v4135_v18 = vadd.f32 %v8412_v48, %v4070_v54  ;;  %v3955_v8 = vmul.f32 %v7776_v13, %v8390_v4  ;;  %v4053_v61 = vmul.f32 %v7884_v28, %v8392_v57  ;;  %v8078_v7 = vld [vmem:[%s8241_s6 + $0x10] sm:$0x1]  ;;  %v8415_v54 = vld [vmem:[#allocation23_spill] sm:$0xff] }
 0x520   :  { %v4095_v9 = vadd.f32 %v4060_v42, %v3997_v49  ;;  %v3996_v33 = vadd.f32 %v3961_v62, %v3898_v32  ;;  %v3892_v24 = vadd.f32 %v3857_v12, %v7667_v16  ;;  %v3862_v52 = vmul.f32 %v7714_v31, %v6463_v35  ;;  %v8416_v49 = vld [vmem:[#allocation6_spill] sm:$0xff] }
 0x521   :  { %4285 = vmatpush1.msra.mxu1 %v4168_v21  ;;  %v4170_v20 = vmax.f32 %v4135_v18, 0.0  ;;  %v3960_v53 = vmul.f32 %v7751_v39, %v6311_v38  ;;  %v4058_v29 = vmul.f32 %v7863_v27, %v8387_v51  ;;  %v3856_v58 = vmul.f32 %v7811_v2, %v8389_v26  ;;  %v8047_v38 = vld [vmem:[%s8241_s6 + $0x8] sm:$0xff]  ;;  %v8417_v32 = vld [vmem:[#allocation30_spill] sm:$0xff] }
 0x522   :  { %5203 = vmatmul.mubr.msk.f32.vlgmr.msra.gmra.mxu1 %vm1767_vm9, %v8024_v17  ;;  %5211 = vmatprep.subr.msk.mxu1 %vm1777_vm13, %v4201_v30  ;;  %v4160_v16 = vadd.f32 %v7830_v37, %v4095_v9  ;;  %v4094_v19 = vadd.f32 %v4059_v15, %v3996_v33  ;;  %v3990_v35 = vadd.f32 %v3955_v8, %v3892_v24  ;;  %v8413_v45 = vmov 0.0  }
 0x523   :  { %4368 = vmatpush1.msra.mxu0 %v4170_v20  ;;  %4324 = vmatprep.mubr.f32.mxu1 %v8413_v45  ;;  %v3897_v51 = vadd.f32 %v3862_v52, %v7694_v59  ;;  %v3891_v55 = vadd.f32 %v3856_v58, %v7690_v50  ;;  %v3954_v40 = vmul.f32 %v7824_v0, %v8390_v4  ;;  %v8414_v59 = vmax.f32 %v7915_v44, 0.0  ;;  %v8418_v58 = vld [vmem:[#allocation39_spill] sm:$0xff] }
 0x524   :  { %5208 = vmatmul.mubr.msk.f32.vlgmr.msra.gmra.mxu0 %vm1767_vm9, %v8024_v17  ;;  %5547 = vmatprep.subr.mxu0 %v8413_v45  ;;  %v4159_v1 = vadd.f32 %v7830_v37, %v4094_v19  ;;  %v4088_v46 = vadd.f32 %v4053_v61, %v3990_v35  ;;  %v4052_v3 = vmul.f32 %v7941_v63, %v8392_v57  ;;  %v4195_v50 = vmax.f32 %v4160_v16, 0.0 }
 0x525   :  { %4407 = vmatprep.mubr.f32.mxu0 %v8413_v45  ;;  %5548 = vmatpush3.msk.msra.mxu0 %vm1777_vm13, %v8414_v59  ;;  %v3995_v22 = vadd.f32 %v3960_v53, %v3897_v51  ;;  %v3989_v30 = vadd.f32 %v3954_v40, %v3891_v55  ;;  %v3850_v10 = vmul.f32 %v7728_v5, %v8398_v6  ;;  %v4200_v23 = vmax.f32 %v7907_v41, 0.0 }
 0x526   :  { %5204 = vmatmul.mubr.msk.f32.gmra.mxu1 %vm1767_vm9, %v8047_v38  ;;  %5549 = vmatprep.subr.mxu0 %v8413_v45  ;;  %v4153_v42 = vadd.f32 %v8396_v60, %v4088_v46  ;;  %v3948_v44 = vmul.f32 %v7776_v13, %v8399_v36  ;;  %v4046_v56 = vmul.f32 %v7884_v28, %v8401_v11  ;;  %v4194_v12 = vmax.f32 %v4159_v1, 0.0  ;;  %v8419_v46 = vld [vmem:[#allocation29_spill] sm:$0xff] }
 0x527   :  { %4330 = vmatprep.mubr.f32.mxu1 %v8413_v45  ;;  %5550 = vmatpush3.msra.mxu0 %v4195_v50  ;;  %v4093_v41 = vadd.f32 %v4058_v29, %v3995_v22  ;;  %v4087_v47 = vadd.f32 %v4052_v3, %v3989_v30  ;;  %v3885_v62 = vadd.f32 %v3850_v10, %v8415_v54 }
 0x528   :  { %v3792_v15 = vadd.f32 %v8417_v32, %v8416_v49  ;;  %5209 = vmatmul.mubr.msk.f32.gmra.mxu0 %vm1767_vm9, %v8047_v38  ;;  %5212 = vmatpush1.msk.msra.mxu1 %vm1777_vm13, %v4200_v23  ;;  %v3855_v21 = vmul.f32 %v7714_v31, %v8389_v26  ;;  %v3953_v18 = vmul.f32 %v7751_v39, %v8390_v4  ;;  %v4188_v8 = vmax.f32 %v4153_v42, 0.0  ;;  %v8420_v23 = vld [vmem:[#allocation20_spill] sm:$0xff] }
 0x529   :  { %4413 = vmatprep.mubr.f32.mxu0 %v8413_v45  ;;  %5551 = vmatprep.subr.mxu0 %v8413_v45  ;;  %v4158_v61 = vadd.f32 %v7830_v37, %v4093_v41  ;;  %v4152_v9 = vadd.f32 %v8396_v60, %v4087_v47  ;;  %v3983_v33 = vadd.f32 %v3948_v44, %v3885_v62  ;;  %v8421_v44 = vld [vmem:[#allocation25_spill] sm:$0xff]  ;;  %v8422_v62 = vld [vmem:[#allocation24_spill] sm:$0xff] }
 0x52a   :  { %5205 = vmatmul.mubr.msk.f32.gmra.mxu1 %vm1767_vm9, %v8078_v7  ;;  %4444 = vmatprep.subr.mxu1 %v4194_v12  ;;  %v3890_v24 = vadd.f32 %v3855_v21, %v3792_v15  ;;  %v4051_v26 = vmul.f32 %v7863_v27, %v8392_v57  ;;  %v3849_v4 = vmul.f32 %v7811_v2, %v8398_v6 }
 0x52b   :  { %5552 = vmatpush3.msra.mxu0 %v4188_v8  ;;  %v4193_v52 = vmax.f32 %v4158_v61, 0.0  ;;  %v4081_v20 = vadd.f32 %v4046_v56, %v3983_v33  ;;  %v3947_v37 = vmul.f32 %v7824_v0, %v8399_v36  ;;  %v4045_v53 = vmul.f32 %v7941_v63, %v8401_v11  ;;  %4484 = vmatprep.mubr.f32.mxu1 %v8413_v45 }
 0x52c   :  { %5210 = vmatmul.mubr.msk.f32.gmra.mxu0 %vm1767_vm9, %v8078_v7  ;;  %5553 = vmatprep.subr.mxu0 %v8413_v45  ;;  %v4187_v57 = vmax.f32 %v4152_v9, 0.0  ;;  %v3988_v29 = vadd.f32 %v3953_v18, %v3890_v24  ;;  %v3884_v16 = vadd.f32 %v3849_v4, %v8418_v58  ;;  %v3843_v19 = vmul.f32 %v7728_v5, %v8405_v43  ;;  %v8167_v24 = vpop.permute.xlu0 %4221 }
 0x52d   :  { %4445 = vmatpush1.msra.mxu1 %v4193_v52  ;;  %v4146_v35 = vadd.f32 %v7954_v14, %v4081_v20  ;;  %v3941_v51 = vmul.f32 %v7776_v13, %v8406_v25  ;;  %v4039_v55 = vmul.f32 %v7884_v28, %v8407_v34  ;;  %5557 = vmatprep.mubr.msk.f32.mxu0 %vm5680_vm1, %v8413_v45 }
 0x52e   :  { %4446 = vmatprep.subr.mxu1 %v4187_v57  ;;  %v4086_v40 = vadd.f32 %v4051_v26, %v3988_v29  ;;  %v3982_v1 = vadd.f32 %v3947_v37, %v3884_v16  ;;  %v3878_v3 = vadd.f32 %v3843_v19, %v8419_v46  ;;  %v3848_v5 = vmul.f32 %v7714_v31, %v8398_v6  ;;  %v8423_v57 = vld [vmem:[#allocation17_spill] sm:$0xff] }
 0x52f   :  { %v4181_v59 = vmax.f32 %v4146_v35, 0.0  ;;  %v3946_v50 = vmul.f32 %v7751_v39, %v8399_v36  ;;  %v4044_v13 = vmul.f32 %v7863_v27, %v8401_v11  ;;  %v3842_v28 = vmul.f32 %v7811_v2, %v8405_v43 }
 0x530   :  { %v4151_v22 = vadd.f32 %v8396_v60, %v4086_v40  ;;  %v4080_v30 = vadd.f32 %v4045_v53, %v3982_v1  ;;  %v3976_v10 = vadd.f32 %v3941_v51, %v3878_v3  ;;  %v3883_v42 = vadd.f32 %v3848_v5, %v8420_v23  ;;  %v8172_v58 = vpop.permute.xlu0 %4211 }
 0x531   :  { %5554 = vmatpush3.msra.mxu0 %v4181_v59  ;;  %v3877_v56 = vadd.f32 %v3842_v28, %v8421_v44  ;;  %v3940_v6 = vmul.f32 %v7824_v0, %v8406_v25  ;;  %v4038_v36 = vmul.f32 %v7941_v63, %v8407_v34  ;;  %v3841_v11 = vmul.f32 %v7714_v31, %v8405_v43 }
 0x532   :  { %v4186_v41 = vmax.f32 %v4151_v22, 0.0  ;;  %5555 = vmatprep.subr.mxu0 %v8413_v45  ;;  %v4145_v2 = vadd.f32 %v7954_v14, %v4080_v30  ;;  %v4074_v60 = vadd.f32 %v4039_v55, %v3976_v10  ;;  %v3981_v47 = vadd.f32 %v3946_v50, %v3883_v42 }
 0x533   :  { %v3975_v54 = vadd.f32 %v3940_v6, %v3877_v56  ;;  %v3876_v49 = vadd.f32 %v3841_v11, %v8422_v62  ;;  %v3939_v32 = vmul.f32 %v7751_v39, %v8406_v25  ;;  %v4037_v0 = vmul.f32 %v7863_v27, %v8407_v34 }
 0x534   :  { %4447 = vmatpush1.msra.mxu1 %v4186_v41  ;;  %v4180_v63 = vmax.f32 %v4145_v2, 0.0  ;;  %v4139_v31 = vadd.f32 %v8412_v48, %v4074_v60  ;;  %v4079_v43 = vadd.f32 %v4044_v13, %v3981_v47  ;;  %v8185_v13 = vld [vmem:[%s8242_s8] sm:$0x1] }
 0x535   :  { %v4073_v15 = vadd.f32 %v4038_v36, %v3975_v54  ;;  %v3974_v12 = vadd.f32 %v3939_v32, %v3876_v49 }
 0x536   :  { %4448 = vmatprep.subr.mxu1 %v4180_v63  ;;  %v4174_v21 = vmax.f32 %v4139_v31, 0.0  ;;  %v4144_v18 = vadd.f32 %v7954_v14, %v4079_v43 }
 0x537   :  { %v4138_v8 = vadd.f32 %v8412_v48, %v4073_v15  ;;  %v4072_v61 = vadd.f32 %v4037_v0, %v3974_v12 }
 0x538   :  { %5556 = vmatpush3.msra.mxu0 %v4174_v21  ;;  %v4179_v9 = vmax.f32 %v4144_v18, 0.0 }
 0x539   :  { %5558 = vmatmul.mubr.msk.f32.vlgmr.msra.gmra.mxu0 %vm1767_vm9, %v8024_v17  ;;  %v4173_v39 = vmax.f32 %v4138_v8, 0.0  ;;  %v4137_v27 = vadd.f32 %v8412_v48, %v4072_v61 }
 0x53a   :  { %4449 = vmatpush1.msra.mxu1 %v4179_v9  ;;  %5560 = vmatprep.mubr.msk.f32.mxu0 %vm5680_vm1, %v8413_v45 }
 0x53b   :  { %4450 = vmatprep.subr.mxu1 %v4173_v39  ;;  %v4172_v25 = vmax.f32 %v4137_v27, 0.0 }
 0x53d   :  { %4451 = vmatpush1.msra.mxu1 %v4172_v25  ;;  %5561 = vmatmul.mubr.msk.f32.gmra.mxu0 %vm1767_vm9, %v8047_v38 }
 0x53e   :  { %5213 = vmatmul.mubr.msk.f32.vlgmr.msra.gmra.mxu1 %vm1767_vm9, %v8024_v17  ;;  %5563 = vmatprep.mubr.msk.f32.mxu0 %vm5680_vm1, %v8413_v45 }
 0x53f   :  { %4490 = vmatprep.mubr.f32.mxu1 %v8413_v45 }
 0x541   :  { %5564 = vmatmul.mubr.msk.f32.gmra.mxu0 %vm1767_vm9, %v8078_v7 }
 0x542   :  { %5214 = vmatmul.mubr.msk.f32.gmra.mxu1 %vm1767_vm9, %v8047_v38  ;;  %4845 = vmatprep.mubr.f32.mxu0 %v8413_v45 }
 0x543   :  { %4496 = vmatprep.mubr.f32.mxu1 %v8413_v45 }
 0x546   :  { %5215 = vmatmul.mubr.msk.f32.gmra.mxu1 %vm1767_vm9, %v8078_v7 }
 0x547   :  { %4703 = vmatprep.mubr.f32.mxu1 %v8413_v45 }
 0x5e2   :  { %v4320_v14 = vpop.f32.mrf.mxu1 }
 0x5e3   :  { %v4321_v55 = vadd.f32 %v4320_v14, %v8172_v58 }
 0x5e4   :  { %v4403_v34 = vpop.f32.mrf.mxu0  ;;  %v4322_v48 = vpop.f32.mrf.mxu1 }
 0x5e5   :  { %v4323_v35 = vadd.f32 %v4322_v48, %v8172_v58  ;;  %v4583_v28 = vmax.f32 %v4321_v55, 0.0  ;;  %v4404_v23 = vadd.f32 %v4403_v34, %v8172_v58 }
 0x5e6   :  { %v4405_v17 = vpop.f32.mrf.mxu0  ;;  %v4326_v33 = vpop.f32.mrf.mxu1 }
 0x5e7   :  { %v4327_v16 = vadd.f32 %v4326_v33, %v8423_v57  ;;  %v4584_v59 = vmax.f32 %v4323_v35, 0.0  ;;  %v4406_v30 = vadd.f32 %v4405_v17, %v8172_v58  ;;  %v4585_v11 = vmax.f32 %v4404_v23, 0.0 }
 0x5e8   :  { %v4409_v26 = vpop.f32.mrf.mxu0  ;;  %v4328_v4 = vpop.f32.mrf.mxu1 }
 0x5e9   :  { %v4329_v29 = vadd.f32 %v4328_v4, %v8423_v57  ;;  %v4590_v3 = vmax.f32 %v4327_v16, 0.0  ;;  %v4410_v22 = vadd.f32 %v4409_v26, %v8423_v57  ;;  %v4586_v6 = vmax.f32 %v4406_v30, 0.0 }
 0x5ea   :  { %v4411_v52 = vpop.f32.mrf.mxu0  ;;  %v4332_v38 = vpop.f32.mrf.mxu1 }
 0x5eb   :  { %v4333_v20 = vadd.f32 %v4332_v38, %v8167_v24  ;;  %v4591_v1 = vmax.f32 %v4329_v29, 0.0  ;;  %v4412_v50 = vadd.f32 %v4411_v52, %v8423_v57  ;;  %v4592_v56 = vmax.f32 %v4410_v22, 0.0  ;;  %v4609_v38 = vpop.permute.xlu0 %4608 }
 0x5ec   :  { %v4415_v37 = vpop.f32.mrf.mxu0  ;;  %v4334_v53 = vpop.f32.mrf.mxu1 }
 0x5ed   :  { %v4335_v7 = vadd.f32 %v4334_v53, %v8167_v24  ;;  %v4597_v40 = vmax.f32 %v4333_v20, 0.0  ;;  %v4416_v5 = vadd.f32 %v4415_v37, %v8167_v24  ;;  %v4593_v44 = vmax.f32 %v4412_v50, 0.0  ;;  %v8424_v37 = vld [vmem:[#allocation9_spill] sm:$0xff] }
 0x5ee   :  { %v4417_v19 = vpop.f32.mrf.mxu0  ;;  %v8425_v53 = vsub.s32 0, %v8424_v37 }
 0x5ef   :  { %v4598_v51 = vmax.f32 %v4335_v7, 0.0  ;;  %v4418_v46 = vadd.f32 %v4417_v19, %v8167_v24  ;;  %v4599_v42 = vmax.f32 %v4416_v5, 0.0 }
 0x5f1   :  { %5220 = vmatprep.subr.msk.mxu1 %vm2164_vm10, %v4598_v51  ;;  %v4600_v10 = vmax.f32 %v4418_v46, 0.0 }
 0x5f2   :  { %5221 = vmatpush1.msk.msra.mxu1 %vm2164_vm10, %v4597_v40 }
 0x5f3   :  { %4667 = vmatprep.subr.mxu1 %v4591_v1 }
 0x5f4   :  { %4668 = vmatpush1.msra.mxu1 %v4590_v3 }
 0x5f5   :  { %4669 = vmatprep.subr.mxu1 %v4584_v59 }
 0x5f6   :  { %4670 = vmatpush1.msra.mxu1 %v4583_v28 }
 0x5f7   :  { %5222 = vmatmul.mubr.msk.f32.vlgmr.msra.gmra.mxu1 %vm2160_vm11, %v8185_v13  ;;  %5223 = vmatprep.subr.msk.mxu1 %vm2164_vm10, %v4600_v10 }
 0x5f8   :  { %5224 = vmatpush1.msk.msra.mxu1 %vm2164_vm10, %v4599_v42  ;;  %4774 = vmatprep.mubr.f32.mxu1 %v8413_v45 }
 0x5f9   :  { %v4569_v36 = vpop.f32.mrf.mxu0  ;;  %4738 = vmatprep.subr.mxu1 %v4593_v44 }
 0x5fa   :  { %4739 = vmatpush1.msra.mxu1 %v4592_v56  ;;  %v4570_v31 = vadd.f32 %v4569_v36, %v8172_v58 }
 0x5fb   :  { %v5559_v41 = vpop.f32.mrf.mxu0  ;;  %4740 = vmatprep.subr.mxu1 %v4586_v6 }
 0x5fc   :  { %4741 = vmatpush1.msra.mxu1 %v4585_v11  ;;  %v4589_v18 = vmax.f32 %v4570_v31, 0.0 }
 0x5fd   :  { %v4574_v2 = vpop.f32.mrf.mxu0  ;;  %5225 = vmatmul.mubr.msk.f32.vlgmr.msra.gmra.mxu1 %vm2160_vm11, %v8185_v13  ;;  %5566 = vmatprep.subr.mxu1 %v8413_v45 }
 0x5fe   :  { %v4486_v60 = vpop.f32.mrf.mxu1  ;;  %5572 = vmatprep.mubr.msk.f32.mxu1 %vm5680_vm1, %v8413_v45  ;;  %v4575_v49 = vadd.f32 %v4574_v2, %v8423_v57 }
 0x5ff   :  { %v5562_v47 = vpop.f32.mrf.mxu0  ;;  %v4487_v34 = vadd.f32 %v4486_v60, %v8172_v58 }
 0x600   :  { %v4488_v54 = vpop.f32.mrf.mxu1  ;;  %v4596_v12 = vmax.f32 %v4575_v49, 0.0 }
 0x601   :  { %v4579_v62 = vpop.f32.mrf.mxu0  ;;  %v4489_v25 = vadd.f32 %v4488_v54, %v8172_v58 }
 0x602   :  { %v4492_v32 = vpop.f32.mrf.mxu1  ;;  %v4580_v0 = vadd.f32 %v4579_v62, %v8167_v24 }
 0x603   :  { %v5565_v63 = vpop.f32.mrf.mxu0  ;;  %v4493_v27 = vadd.f32 %v4492_v32, %v8423_v57 }
 0x604   :  { %v4603_v43 = vmax.f32 %v4580_v0, 0.0  ;;  %v4494_v15 = vpop.f32.mrf.mxu1 }
 0x605   :  { %v4495_v9 = vadd.f32 %v4494_v15, %v8423_v57  ;;  %v4594_v33 = vmax.f32 %v4493_v27, 0.0  ;;  %v4614_v57 = vrot.slane %v4609_v38, %v8425_v53 }
 0x606   :  { %v4498_v21 = vpop.f32.mrf.mxu1  ;;  %5567 = vmatpush3.msk.msra.mxu1 %vm2164_vm10, %v4603_v43 }
 0x607   :  { %5568 = vmatprep.subr.mxu1 %v8413_v45  ;;  %v4499_v8 = vadd.f32 %v4498_v21, %v8167_v24  ;;  %v4595_v17 = vmax.f32 %v4495_v9, 0.0 }
 0x608   :  { %v4500_v61 = vpop.f32.mrf.mxu1  ;;  %5569 = vmatpush3.msra.mxu1 %v4596_v12  ;;  %v8426_v12 = vld [vmem:[#allocation14_spill] sm:$0xff] }
 0x609   :  { %v4501_v39 = vadd.f32 %v4500_v61, %v8167_v24  ;;  %5570 = vmatprep.subr.mxu1 %v8413_v45  ;;  %v4601_v48 = vmax.f32 %v4499_v8, 0.0  ;;  %v4588_v24 = vmax.f32 %v4489_v25, 0.0  ;;  %v4587_v45 = vmax.f32 %v4487_v34, 0.0 }
 0x60a   :  { %5571 = vmatpush3.msra.mxu1 %v4589_v18 }
 0x60b   :  { %v4602_v14 = vmax.f32 %v4501_v39, 0.0  ;;  %5573 = vmatmul.mubr.msk.f32.vlgmr.msra.gmra.mxu1 %vm2160_vm11, %v8185_v13 }
 0x60d   :  { %5226 = vmatprep.subr.msk.mxu0 %vm2164_vm10, %v4602_v14 }
 0x60e   :  { %5227 = vmatpush1.msk.msra.mxu0 %vm2164_vm10, %v4601_v48 }
 0x60f   :  { %4809 = vmatprep.subr.mxu0 %v4595_v17 }
 0x610   :  { %4810 = vmatpush1.msra.mxu0 %v4594_v33 }
 0x611   :  { %4811 = vmatprep.subr.mxu0 %v4588_v24 }
 0x612   :  { %4812 = vmatpush1.msra.mxu0 %v4587_v45 }
 0x613   :  { %5228 = vmatmul.mubr.msk.f32.vlgmr.msra.gmra.mxu0 %vm2160_vm11, %v8185_v13 }
 0x6b7   :  { %v4705_v26 = vpop.f32.mrf.mxu1 }
 0x6b8   :  { %v4706_v16 = vadd.f32 %v4705_v26, %v4614_v57 }
 0x6b9   :  { %v4707_v4 = vpop.f32.mrf.mxu1 }
 0x6ba   :  { %v4708_v7 = vadd.f32 %v4707_v4, %v4614_v57  ;;  %v5231_v46 = vmul.f32 -1.442695, %v4706_v16 }
 0x6bc   :  { %v5232_v35 = vmul.f32 -1.442695, %v4708_v7 }
 0x6bd   :  { %v4776_v52 = vpop.f32.mrf.mxu1 }
 0x6be   :  { %v4777_v58 = vadd.f32 %v4776_v52, %v4614_v57 }
 0x6bf   :  { %v4778_v20 = vpop.f32.mrf.mxu1 }
 0x6c0   :  { %v4779_v29 = vadd.f32 %v4778_v20, %v4614_v57  ;;  %v5233_v55 = vmul.f32 -1.442695, %v4777_v58 }
 0x6c2   :  { %v5234_v19 = vmul.f32 -1.442695, %v4779_v29 }
 0x6c4   :  { %5651 = vpow2.f32 %v5234_v19 }
 0x6c5   :  { %5653 = vpow2.f32 %v5232_v35 }
 0x6c6   :  { %5655 = vpow2.f32 %v5233_v55 }
 0x6c7   :  { %5657 = vpow2.f32 %v5231_v46 }
 0x6cb   :  { %v4918_v51 = vpop.f32.mrf.mxu1 }
 0x6cc   :  { %v4919_v40 = vadd.f32 %v4918_v51, %v4614_v57 }
 0x6cd   :  { %v5574_v1 = vpop.f32.mrf.mxu1 }
 0x6ce   :  { %v5237_v3 = vmul.f32 -1.442695, %v4919_v40 }
 0x6d0   :  { %5659 = vpow2.f32 %v5237_v3 }
 0x6d1   :  { %v5652_v30 = vpop.eup %5651 }
 0x6d2   :  { %v5654_v10 = vpop.eup %5653  ;;  %v4946_v42 = vadd.f32 1.0, %v5652_v30 }
 0x6d3   :  { %v4847_v5 = vpop.f32.mrf.mxu0  ;;  %v5656_v23 = vpop.eup %5655  ;;  %v4944_v56 = vadd.f32 1.0, %v5654_v10 }
 0x6d4   :  { %v4848_v59 = vadd.f32 %v4847_v5, %v4614_v57  ;;  %v5658_v44 = vpop.eup %5657  ;;  %v4945_v6 = vadd.f32 1.0, %v5656_v23 }
 0x6d5   :  { %v4849_v50 = vpop.f32.mrf.mxu0  ;;  %v4943_v11 = vadd.f32 1.0, %v5658_v44 }
 0x6d6   :  { %v5235_v13 = vmul.f32 -1.442695, %v4848_v59  ;;  %v4850_v28 = vadd.f32 %v4849_v50, %v4614_v57 }
 0x6d8   :  { %5661 = vpow2.f32 %v5235_v13  ;;  %v5236_v22 = vmul.f32 -1.442695, %v4850_v28 }
 0x6da   :  { %5663 = vpow2.f32 %v5236_v22 }
 0x6db   :  { %5665 = vrcp.f32 %v4946_v42 }
 0x6dc   :  { %5667 = vrcp.f32 %v4944_v56 }
 0x6dd   :  { %v5660_v36 = vpop.eup %5659  ;;  %5669 = vrcp.f32 %v4945_v6 }
 0x6de   :  { %v4949_v41 = vadd.f32 1.0, %v5660_v36  ;;  %5671 = vrcp.f32 %v4943_v11 }
 0x6e0   :  { %5673 = vrcp.f32 %v4949_v41 }
 0x6e5   :  { %v5662_v2 = vpop.eup %5661 }
 0x6e6   :  { %v4947_v60 = vadd.f32 1.0, %v5662_v2 }
 0x6e7   :  { %v5664_v47 = vpop.eup %5663 }
 0x6e8   :  { %v4948_v54 = vadd.f32 1.0, %v5664_v47  ;;  %5675 = vrcp.f32 %v4947_v60  ;;  %v5666_v62 = vpop.eup %5665 }
 0x6e9   :  { %v5668_v49 = vpop.eup %5667 }
 0x6ea   :  { %5677 = vrcp.f32 %v4948_v54  ;;  %v5670_v32 = vpop.eup %5669 }
 0x6eb   :  { %v4972_v0 = vcombine.low %v5670_v32, %v5666_v62  ;;  %v5672_v63 = vpop.eup %5671 }
 0x6ec   :  { %v4971_v31 = vcombine.low %v5672_v63, %v5668_v49 }
 0x6ed   :  { %v5674_v43 = vpop.eup %5673  ;;  %v4987_v21 = vrot.slane %v4972_v0, %v8426_v12 }
 0x6ee   :  { %v4980_v8 = vrot.slane %v4971_v31, %v8426_v12  ;;  %v5001_v39 = vrot.slane %v5674_v43, %v8426_v12 }
 0x6f0   :  { %v5002_v9 = vcombine.low %v4980_v8, %v4987_v21 }
 0x6f2   :  { %v5010_v14 = vrot.slane %v5002_v9, %v8426_v12 }
 0x6f5   :  { %v5676_v15 = vpop.eup %5675 }
 0x6f7   :  { %v5678_v18 = vpop.eup %5677 }
 0x6f8   :  { %v4973_v61 = vcombine.low %v5676_v15, %v5678_v18 }
 0x6fa   :  { %v4994_v27 = vrot.slane %v4973_v61, %v8426_v12 }
 0x6fc   :  { %v5003_v25 = vcombine.low %v4994_v27, %v5001_v39 }
 0x6fe   :  { %v5017_v34 = vrot.slane %v5003_v25, %v8426_v12 }
 0x700   :  { %v5018_v48 = vcombine.low %v5010_v14, %v5017_v34 }
 0x702   :  { %5238 = vst.msk [vmem:[%s8243_s12 + $0x1] ss:$2 sm:$0x7f] %vm7337_vm0, %v5018_v48 }

</bundles_post_ra>
